<compile_context>
chip_gen: v5e
topology: v5e:2x2
jax: 0.10.0
libtpu: 0.0.40
codegen_flags: <defaults>
</compile_context>

<pallas_src>
import math

import jax
import jax.numpy as jnp
from jax.experimental import pallas as pl
from jax.experimental.pallas import tpu as pltpu

# ---------------- config (small synthetic shapes) ----------------
NODE_NUM = 16          # N (== node_num; ID embedding indexes arange(N))
EMBED    = 32          # C (embed_size)
HEADS    = 4
HEAD_DIM = EMBED // HEADS
T_LEN    = 8           # T
BATCH    = 2           # B
FWD_EXP  = 4           # forward_expansion
LN_EPS   = 1e-5        # PyTorch nn.LayerNorm default eps
NEG_MASK = -1e30       # finite large-negative (avoids NaN through max/exp)


# ---------------- fused Pallas kernel ----------------
def _make_spaformer_kernel(B, N, T, C, H, D, hidden):
    TN = T * N

    def kernel(x_ref, emb_ref, wqkv_ref, wo_ref, w1_ref, w2_ref, vec_ref, mask_ref,
               o_ref, ctx_ref):
        # vec_ref rows: 0=b_O, 1=ln1_g, 2=ln1_b, 3=ln2_g, 4=ln2_b, 5=ffn_b1, 6=ffn_b2
        # Residual-path activations stay f32.
        x = x_ref[...] + emb_ref[...]                     # X_tildeS slab [B*TN, C] f32
        x_bf = x.astype(jnp.bfloat16)

        # Packed (bias-free) QKV projection; 1/sqrt(D) already folded into W_Q.
        qkv = jnp.dot(x_bf, wqkv_ref[...],
                      preferred_element_type=jnp.float32)                 # [B*TN, 3C] f32

        # Block-diagonal spatial attention: one [TN,TN] score matmul per (batch, head).
        # mask_ref[h] = rel-pos bias on the T diagonal N x N blocks, NEG_MASK elsewhere,
        # so each row's softmax only sees its own t-block.
        for b in range(B):
            r0 = b * TN
            for h in range(H):
                c0 = h * D
                qh = qkv[r0:r0 + TN, c0:c0 + D].astype(jnp.bfloat16)          # [TN, D]
                kh = qkv[r0:r0 + TN, C + c0:C + c0 + D].astype(jnp.bfloat16)  # [TN, D]
                vh = qkv[r0:r0 + TN, 2 * C + c0:2 * C + c0 + D].astype(jnp.bfloat16)
                s = jax.lax.dot_general(qh, kh, (((1,), (1,)), ((), ())),
                                        preferred_element_type=jnp.float32)   # [TN, TN]
                s = s + mask_ref[h]
                m = jnp.max(s, axis=-1, keepdims=True)
                e = jnp.exp(s - m)
                denom = jnp.sum(e, axis=-1, keepdims=True)
                attn = (e * pl.reciprocal(denom, approx=True)).astype(jnp.bfloat16)
                # Write this head/batch context straight into the VMEM accumulator.
                ctx_ref[r0:r0 + TN, c0:c0 + D] = jnp.dot(
                    attn, vh, preferred_element_type=jnp.float32)

        # Output projection (with bias).
        attn_out = jnp.dot(ctx_ref[...].astype(jnp.bfloat16), wo_ref[...],
                           preferred_element_type=jnp.float32) + vec_ref[0:1, :C]

        # Residual + LayerNorm 1 (f32 elementwise math).
        s1 = attn_out + x
        mu1 = jnp.mean(s1, axis=-1, keepdims=True)
        c1 = s1 - mu1
        var1 = jnp.mean(c1 * c1, axis=-1, keepdims=True)
        x_s = c1 * jax.lax.rsqrt(var1 + LN_EPS) * vec_ref[1:2, :C] + vec_ref[2:3, :C]

        # Feed-forward: Linear -> ReLU -> Linear (bf16 MXU operands, f32 accumulation).
        hdd = jnp.dot(x_s.astype(jnp.bfloat16), w1_ref[...],
                      preferred_element_type=jnp.float32) + vec_ref[5:6, :]
        hdd = jnp.maximum(hdd, 0.0)
        fwd = jnp.dot(hdd.astype(jnp.bfloat16), w2_ref[...],
                      preferred_element_type=jnp.float32) + vec_ref[6:7, :C]

        # Residual + LayerNorm 2.
        s2 = fwd + x_s
        mu2 = jnp.mean(s2, axis=-1, keepdims=True)
        c2 = s2 - mu2
        var2 = jnp.mean(c2 * c2, axis=-1, keepdims=True)
        o_ref[...] = (c2 * jax.lax.rsqrt(var2 + LN_EPS) * vec_ref[3:4, :C]
                      + vec_ref[4:5, :C]).astype(o_ref.dtype)

    return kernel


# ---------------- parameters (deterministic synthetic init) ----------------
def init_params(key):
    ks = jax.random.split(key, 13)
    w = lambda k, shape, s=0.1: jax.random.normal(k, shape, jnp.float32) * s
    p = {
        "id_emb":      w(ks[0], (NODE_NUM, EMBED)),
        "in_deg_emb":  w(ks[1], (NODE_NUM, EMBED)),
        "out_deg_emb": w(ks[2], (NODE_NUM, EMBED)),
        "rel_pos_emb": w(ks[3], (4, HEADS)),
        "W_Q": w(ks[4], (EMBED, EMBED)),
        "W_K": w(ks[5], (EMBED, EMBED)),
        "W_V": w(ks[6], (EMBED, EMBED)),
        "W_O": w(ks[7], (EMBED, EMBED)),
        "b_O": w(ks[8], (EMBED,)),
        "ln1_g": jnp.ones((EMBED,), jnp.float32),
        "ln1_b": jnp.zeros((EMBED,), jnp.float32),
        "ln2_g": jnp.ones((EMBED,), jnp.float32),
        "ln2_b": jnp.zeros((EMBED,), jnp.float32),
        "ffn_w1": w(ks[9],  (EMBED, FWD_EXP * EMBED)),
        "ffn_b1": w(ks[10], (FWD_EXP * EMBED,)),
        "ffn_w2": w(ks[11], (FWD_EXP * EMBED, EMBED)),
        "ffn_b2": w(ks[12], (EMBED,)),
    }
    # Note: Label_embedding from __init__ is unused in forward(), so it is omitted.
    return p


# ---------------- forward (single fused Pallas call) ----------------
def spaformer_forward(query, params, adj, g_id, g_od):
    B, N, T, C = query.shape
    H, D = HEADS, HEAD_DIM
    hidden = params["ffn_w1"].shape[1]
    TN = T * N
    BTN = B * TN
    scale = 1.0 / math.sqrt(D)

    # Glue (pure indexing / layout / packing, no heavy compute):
    node_emb = (params["id_emb"]
                + params["in_deg_emb"][g_id]
                + params["out_deg_emb"][g_od])                            # [N, C]
    emb_tiled = jnp.tile(node_emb, (B * T, 1))                            # [B*T*N, C]

    # Block-diagonal rel-pos bias + off-block mask: [H, TN, TN] f32.
    rel_bias = jnp.transpose(params["rel_pos_emb"][adj], (2, 0, 1))       # [H, N, N]
    blk = jnp.kron(jnp.eye(T, dtype=jnp.float32),
                   jnp.ones((N, N), jnp.float32)) > 0.5                   # [TN, TN]
    mask_bias = jnp.where(blk[None], jnp.tile(rel_bias, (1, T, T)),
                          jnp.float32(NEG_MASK))                          # [H, TN, TN]

    # Packed bf16 weights; fold 1/sqrt(D) into W_Q at trace time.
    wqkv = jnp.concatenate([params["W_Q"] * scale, params["W_K"], params["W_V"]],
                           axis=1).astype(jnp.bfloat16)                   # [C, 3C]
    wo = params["W_O"].astype(jnp.bfloat16)
    w1 = params["ffn_w1"].astype(jnp.bfloat16)
    w2 = params["ffn_w2"].astype(jnp.bfloat16)

    # All small vectors packed into one [8, hidden] f32 operand.
    pad = lambda v: jnp.pad(v, (0, hidden - v.shape[0]))
    vecs = jnp.stack([pad(params["b_O"]),
                      pad(params["ln1_g"]), pad(params["ln1_b"]),
                      pad(params["ln2_g"]), pad(params["ln2_b"]),
                      params["ffn_b1"], pad(params["ffn_b2"]),
                      jnp.zeros((hidden,), jnp.float32)])                 # [8, hidden]

    # [B, N, T, C] -> one folded t-major slab [B*T*N, C] (rows ordered b, t, n).
    x = jnp.transpose(query, (0, 2, 1, 3)).reshape(BTN, C)

    kernel = _make_spaformer_kernel(B, N, T, C, H, D, hidden)
    const = lambda shape: pl.BlockSpec(shape, lambda i, _s=shape: (0,) * len(_s))

    out = pl.pallas_call(
        kernel,
        out_shape=jax.ShapeDtypeStruct((BTN, C), query.dtype),
        grid=(1,),
        in_specs=[
            const((BTN, C)),          # x slab (f32)
            const((BTN, C)),          # tiled node embedding (f32)
            const((C, 3 * C)),        # packed W_QKV (bf16, scale folded in)
            const((C, C)),            # W_O (bf16)
            const((C, hidden)),       # ffn W1 (bf16)
            const((hidden, C)),       # ffn W2 (bf16)
            const((8, hidden)),       # packed small vectors (f32)
            const((H, TN, TN)),       # block-diag rel-pos bias + mask (f32)
        ],
        out_specs=const((BTN, C)),
        scratch_shapes=[pltpu.VMEM((BTN, C), jnp.float32)],               # context accumulator
        compiler_params=pltpu.CompilerParams(
            dimension_semantics=("arbitrary",)),
    )(x, emb_tiled, wqkv, wo, w1, w2, vecs, mask_bias)

    # TODO(synk): nn.Dropout is an identity at inference; no dropout applied here.
    return jnp.transpose(out.reshape(B, T, N, C), (0, 2, 1, 3))           # [B, N, T, C]


# ---------------- pure-JAX reference (for correctness check) ----------------
def spaformer_ref(query, params, adj, g_id, g_od):
    B, N, T, C = query.shape
    id_emb  = params["id_emb"][jnp.arange(N)]
    in_deg  = params["in_deg_emb"][g_id]
    out_deg = params["out_deg_emb"][g_od]
    x_tilde = query + (id_emb + in_deg + out_deg)[None, :, None, :]
    rel_bias = jnp.transpose(params["rel_pos_emb"][adj], (2, 0, 1))       # [H, N, N]

    split = lambda x: jnp.transpose(x.reshape(B, N, T, HEADS, HEAD_DIM), (0, 3, 2, 1, 4))
    qh = split(jnp.einsum("bntc,cd->bntd", x_tilde, params["W_Q"]))
    kh = split(jnp.einsum("bntc,cd->bntd", x_tilde, params["W_K"]))
    vh = split(jnp.einsum("bntc,cd->bntd", x_tilde, params["W_V"]))
    scores = jnp.einsum("bhtnd,bhtmd->bhtnm", qh, kh) / math.sqrt(HEAD_DIM)
    scores = scores + rel_bias[None, :, None, :, :]
    attn = jax.nn.softmax(scores, axis=-1)
    ctx = jnp.einsum("bhtnm,bhtmd->bhtnd", attn, vh)
    ctx = jnp.transpose(ctx, (0, 3, 2, 1, 4)).reshape(B, N, T, C)
    attn_out = ctx @ params["W_O"] + params["b_O"]

    def ln(x, g, b):
        mu = jnp.mean(x, -1, keepdims=True)
        var = jnp.mean((x - mu) ** 2, -1, keepdims=True)
        return (x - mu) * jax.lax.rsqrt(var + LN_EPS) * g + b

    x_s = ln(attn_out + x_tilde, params["ln1_g"], params["ln1_b"])
    h = jnp.maximum(x_s @ params["ffn_w1"] + params["ffn_b1"], 0.0)
    fwd = h @ params["ffn_w2"] + params["ffn_b2"]
    return ln(fwd + x_s, params["ln2_g"], params["ln2_b"])


if __name__ == "__main__":
    key = jax.random.PRNGKey(0)
    kq, kadj, kid, kod, kp = jax.random.split(key, 5)
    query = jax.random.normal(kq, (BATCH, NODE_NUM, T_LEN, EMBED), jnp.float32)
    adj  = jax.random.randint(kadj, (NODE_NUM, NODE_NUM), 0, 4)   # D_S relation categories in [0,4)
    g_id = jax.random.randint(kid, (NODE_NUM,), 0, NODE_NUM)      # G_ID (in-degree buckets)
    g_od = jax.random.randint(kod, (NODE_NUM,), 0, NODE_NUM)      # G_OD (out-degree buckets)
    params = init_params(kp)

    out = jax.block_until_ready(spaformer_forward(query, params, adj, g_id, g_od))
    ref = spaformer_ref(query, params, adj, g_id, g_od)

    assert out.shape == (BATCH, NODE_NUM, T_LEN, EMBED)
    max_err = float(jnp.max(jnp.abs(out - ref)))
    if max_err < 5e-2:
        print("KERNEL_OK")
    else:
        print(f"MISMATCH max_abs_err={max_err}")
</pallas_src>

<mosaic_0001>
module attributes {stable_mosaic.version = 11 : i64} {
  func.func @kernel(%arg0: i32, %arg1: memref<256x32xf32, #tpu.memory_space<vmem>>, %arg2: memref<256x32xf32, #tpu.memory_space<vmem>>, %arg3: memref<32x96xbf16, #tpu.memory_space<vmem>>, %arg4: memref<32x32xbf16, #tpu.memory_space<vmem>>, %arg5: memref<32x128xbf16, #tpu.memory_space<vmem>>, %arg6: memref<128x32xbf16, #tpu.memory_space<vmem>>, %arg7: memref<8x128xf32, #tpu.memory_space<vmem>>, %arg8: memref<4x128x128xf32, #tpu.memory_space<vmem>>, %arg9: memref<256x32xf32, #tpu.memory_space<vmem>>, %arg10: memref<256x32xf32, #tpu.memory_space<vmem>>) attributes {dimension_semantics = [#tpu.dimension_semantics<arbitrary>], iteration_bounds = array<i64: 1>, scalar_prefetch = 0 : i64, scratch_operands = 1 : i64, tpu.core_type = #tpu.core_type<tc>, window_params = [{pipeline_mode = #tpu.pipeline_mode<synchronous>, transform_indices = @transform_0, window_bounds = array<i64: 256, 32>}, {pipeline_mode = #tpu.pipeline_mode<synchronous>, transform_indices = @transform_1, window_bounds = array<i64: 256, 32>}, {pipeline_mode = #tpu.pipeline_mode<synchronous>, transform_indices = @transform_2, window_bounds = array<i64: 32, 96>}, {pipeline_mode = #tpu.pipeline_mode<synchronous>, transform_indices = @transform_3, window_bounds = array<i64: 32, 32>}, {pipeline_mode = #tpu.pipeline_mode<synchronous>, transform_indices = @transform_4, window_bounds = array<i64: 32, 128>}, {pipeline_mode = #tpu.pipeline_mode<synchronous>, transform_indices = @transform_5, window_bounds = array<i64: 128, 32>}, {pipeline_mode = #tpu.pipeline_mode<synchronous>, transform_indices = @transform_6, window_bounds = array<i64: 8, 128>}, {pipeline_mode = #tpu.pipeline_mode<synchronous>, transform_indices = @transform_7, window_bounds = array<i64: 4, 128, 128>}, {pipeline_mode = #tpu.pipeline_mode<synchronous>, transform_indices = @transform_8, window_bounds = array<i64: 256, 32>}]} {
    %c0 = arith.constant 0 : index
    %c0_0 = arith.constant 0 : index
    %0 = vector.load %arg1[%c0, %c0_0] : memref<256x32xf32, #tpu.memory_space<vmem>>, vector<256x32xf32>
    %c0_1 = arith.constant 0 : index
    %c0_2 = arith.constant 0 : index
    %1 = vector.load %arg2[%c0_1, %c0_2] : memref<256x32xf32, #tpu.memory_space<vmem>>, vector<256x32xf32>
    %2 = arith.addf %0, %1 : vector<256x32xf32>
    %3 = arith.truncf %2 : vector<256x32xf32> to vector<256x32xbf16>
    %c0_3 = arith.constant 0 : index
    %c0_4 = arith.constant 0 : index
    %4 = vector.load %arg3[%c0_3, %c0_4] : memref<32x96xbf16, #tpu.memory_space<vmem>>, vector<32x96xbf16>
    %cst = arith.constant dense<0.000000e+00> : vector<256x96xf32>
    %5 = tpu.matmul %3, %4, %cst {dimension_numbers = #tpu.dot_dimension_numbers<[1], [0], [0], [1], [0, 0, 1, 1], [], []>} : vector<256x32xbf16>, vector<32x96xbf16>, vector<256x96xf32> -> vector<256x96xf32>
    %6 = vector.extract_strided_slice %5 {offsets = [0, 0], sizes = [128, 8], strides = [1, 1]} : vector<256x96xf32> to vector<128x8xf32>
    %7 = arith.truncf %6 : vector<128x8xf32> to vector<128x8xbf16>
    %8 = vector.extract_strided_slice %5 {offsets = [0, 32], sizes = [128, 8], strides = [1, 1]} : vector<256x96xf32> to vector<128x8xf32>
    %9 = arith.truncf %8 : vector<128x8xf32> to vector<128x8xbf16>
    %10 = vector.extract_strided_slice %5 {offsets = [0, 64], sizes = [128, 8], strides = [1, 1]} : vector<256x96xf32> to vector<128x8xf32>
    %11 = arith.truncf %10 : vector<128x8xf32> to vector<128x8xbf16>
    %cst_5 = arith.constant dense<0.000000e+00> : vector<128x128xf32>
    %12 = tpu.matmul %7, %9, %cst_5 {dimension_numbers = #tpu.dot_dimension_numbers<[1], [1], [0], [0], [0, 0, 1, 0], [], []>} : vector<128x8xbf16>, vector<128x8xbf16>, vector<128x128xf32> -> vector<128x128xf32>
    %c0_6 = arith.constant 0 : index
    %c0_7 = arith.constant 0 : index
    %c0_8 = arith.constant 0 : index
    %13 = vector.load %arg8[%c0_6, %c0_7, %c0_8] : memref<4x128x128xf32, #tpu.memory_space<vmem>>, vector<1x128x128xf32>
    %14 = vector.shape_cast %13 : vector<1x128x128xf32> to vector<128x128xf32>
    %15 = arith.addf %12, %14 : vector<128x128xf32>
    %cst_9 = arith.constant dense<0xFF800000> : vector<128xf32>
    %16 = vector.multi_reduction <maximumf>, %15, %cst_9 [1] : vector<128x128xf32> to vector<128xf32>
    %17 = vector.shape_cast %16 : vector<128xf32> to vector<128x1xf32>
    %18 = vector.broadcast %17 : vector<128x1xf32> to vector<128x128xf32>
    %19 = arith.subf %15, %18 : vector<128x128xf32>
    %20 = math.exp %19 : vector<128x128xf32>
    %cst_10 = arith.constant dense<0.000000e+00> : vector<128xf32>
    %21 = vector.multi_reduction <add>, %20, %cst_10 [1] : vector<128x128xf32> to vector<128xf32>
    %22 = vector.shape_cast %21 : vector<128xf32> to vector<128x1xf32>
    %23 = tpu.reciprocal %22 {approx = true} : vector<128x1xf32> -> vector<128x1xf32>
    %24 = vector.broadcast %23 : vector<128x1xf32> to vector<128x128xf32>
    %25 = arith.mulf %20, %24 : vector<128x128xf32>
    %26 = arith.truncf %25 : vector<128x128xf32> to vector<128x128xbf16>
    %cst_11 = arith.constant dense<0.000000e+00> : vector<128x8xf32>
    %27 = tpu.matmul %26, %11, %cst_11 {dimension_numbers = #tpu.dot_dimension_numbers<[1], [0], [0], [1], [0, 0, 1, 1], [], []>} : vector<128x128xbf16>, vector<128x8xbf16>, vector<128x8xf32> -> vector<128x8xf32>
    %c0_12 = arith.constant 0 : index
    %c0_13 = arith.constant 0 : index
    %28 = vector.load %arg10[%c0_12, %c0_13] : memref<256x32xf32, #tpu.memory_space<vmem>>, vector<128x8xf32>
    tpu.vector_store %arg10[%c0_12, %c0_13], %27 {strides = array<i32>} : memref<256x32xf32, #tpu.memory_space<vmem>>, vector<128x8xf32>,
    %29 = vector.extract_strided_slice %5 {offsets = [0, 8], sizes = [128, 8], strides = [1, 1]} : vector<256x96xf32> to vector<128x8xf32>
    %30 = arith.truncf %29 : vector<128x8xf32> to vector<128x8xbf16>
    %31 = vector.extract_strided_slice %5 {offsets = [0, 40], sizes = [128, 8], strides = [1, 1]} : vector<256x96xf32> to vector<128x8xf32>
    %32 = arith.truncf %31 : vector<128x8xf32> to vector<128x8xbf16>
    %33 = vector.extract_strided_slice %5 {offsets = [0, 72], sizes = [128, 8], strides = [1, 1]} : vector<256x96xf32> to vector<128x8xf32>
    %34 = arith.truncf %33 : vector<128x8xf32> to vector<128x8xbf16>
    %cst_14 = arith.constant dense<0.000000e+00> : vector<128x128xf32>
    %35 = tpu.matmul %30, %32, %cst_14 {dimension_numbers = #tpu.dot_dimension_numbers<[1], [1], [0], [0], [0, 0, 1, 0], [], []>} : vector<128x8xbf16>, vector<128x8xbf16>, vector<128x128xf32> -> vector<128x128xf32>
    %c1 = arith.constant 1 : index
    %c0_15 = arith.constant 0 : index
    %c0_16 = arith.constant 0 : index
    %36 = vector.load %arg8[%c1, %c0_15, %c0_16] : memref<4x128x128xf32, #tpu.memory_space<vmem>>, vector<1x128x128xf32>
    %37 = vector.shape_cast %36 : vector<1x128x128xf32> to vector<128x128xf32>
    %38 = arith.addf %35, %37 : vector<128x128xf32>
    %cst_17 = arith.constant dense<0xFF800000> : vector<128xf32>
    %39 = vector.multi_reduction <maximumf>, %38, %cst_17 [1] : vector<128x128xf32> to vector<128xf32>
    %40 = vector.shape_cast %39 : vector<128xf32> to vector<128x1xf32>
    %41 = vector.broadcast %40 : vector<128x1xf32> to vector<128x128xf32>
    %42 = arith.subf %38, %41 : vector<128x128xf32>
    %43 = math.exp %42 : vector<128x128xf32>
    %cst_18 = arith.constant dense<0.000000e+00> : vector<128xf32>
    %44 = vector.multi_reduction <add>, %43, %cst_18 [1] : vector<128x128xf32> to vector<128xf32>
    %45 = vector.shape_cast %44 : vector<128xf32> to vector<128x1xf32>
    %46 = tpu.reciprocal %45 {approx = true} : vector<128x1xf32> -> vector<128x1xf32>
    %47 = vector.broadcast %46 : vector<128x1xf32> to vector<128x128xf32>
    %48 = arith.mulf %43, %47 : vector<128x128xf32>
    %49 = arith.truncf %48 : vector<128x128xf32> to vector<128x128xbf16>
    %cst_19 = arith.constant dense<0.000000e+00> : vector<128x8xf32>
    %50 = tpu.matmul %49, %34, %cst_19 {dimension_numbers = #tpu.dot_dimension_numbers<[1], [0], [0], [1], [0, 0, 1, 1], [], []>} : vector<128x128xbf16>, vector<128x8xbf16>, vector<128x8xf32> -> vector<128x8xf32>
    %c0_20 = arith.constant 0 : index
    %c8 = arith.constant 8 : index
    %51 = vector.load %arg10[%c0_20, %c8] : memref<256x32xf32, #tpu.memory_space<vmem>>, vector<128x8xf32>
    tpu.vector_store %arg10[%c0_20, %c8], %50 {strides = array<i32>} : memref<256x32xf32, #tpu.memory_space<vmem>>, vector<128x8xf32>,
    %52 = vector.extract_strided_slice %5 {offsets = [0, 16], sizes = [128, 8], strides = [1, 1]} : vector<256x96xf32> to vector<128x8xf32>
    %53 = arith.truncf %52 : vector<128x8xf32> to vector<128x8xbf16>
    %54 = vector.extract_strided_slice %5 {offsets = [0, 48], sizes = [128, 8], strides = [1, 1]} : vector<256x96xf32> to vector<128x8xf32>
    %55 = arith.truncf %54 : vector<128x8xf32> to vector<128x8xbf16>
    %56 = vector.extract_strided_slice %5 {offsets = [0, 80], sizes = [128, 8], strides = [1, 1]} : vector<256x96xf32> to vector<128x8xf32>
    %57 = arith.truncf %56 : vector<128x8xf32> to vector<128x8xbf16>
    %cst_21 = arith.constant dense<0.000000e+00> : vector<128x128xf32>
    %58 = tpu.matmul %53, %55, %cst_21 {dimension_numbers = #tpu.dot_dimension_numbers<[1], [1], [0], [0], [0, 0, 1, 0], [], []>} : vector<128x8xbf16>, vector<128x8xbf16>, vector<128x128xf32> -> vector<128x128xf32>
    %c2 = arith.constant 2 : index
    %c0_22 = arith.constant 0 : index
    %c0_23 = arith.constant 0 : index
    %59 = vector.load %arg8[%c2, %c0_22, %c0_23] : memref<4x128x128xf32, #tpu.memory_space<vmem>>, vector<1x128x128xf32>
    %60 = vector.shape_cast %59 : vector<1x128x128xf32> to vector<128x128xf32>
    %61 = arith.addf %58, %60 : vector<128x128xf32>
    %cst_24 = arith.constant dense<0xFF800000> : vector<128xf32>
    %62 = vector.multi_reduction <maximumf>, %61, %cst_24 [1] : vector<128x128xf32> to vector<128xf32>
    %63 = vector.shape_cast %62 : vector<128xf32> to vector<128x1xf32>
    %64 = vector.broadcast %63 : vector<128x1xf32> to vector<128x128xf32>
    %65 = arith.subf %61, %64 : vector<128x128xf32>
    %66 = math.exp %65 : vector<128x128xf32>
    %cst_25 = arith.constant dense<0.000000e+00> : vector<128xf32>
    %67 = vector.multi_reduction <add>, %66, %cst_25 [1] : vector<128x128xf32> to vector<128xf32>
    %68 = vector.shape_cast %67 : vector<128xf32> to vector<128x1xf32>
    %69 = tpu.reciprocal %68 {approx = true} : vector<128x1xf32> -> vector<128x1xf32>
    %70 = vector.broadcast %69 : vector<128x1xf32> to vector<128x128xf32>
    %71 = arith.mulf %66, %70 : vector<128x128xf32>
    %72 = arith.truncf %71 : vector<128x128xf32> to vector<128x128xbf16>
    %cst_26 = arith.constant dense<0.000000e+00> : vector<128x8xf32>
    %73 = tpu.matmul %72, %57, %cst_26 {dimension_numbers = #tpu.dot_dimension_numbers<[1], [0], [0], [1], [0, 0, 1, 1], [], []>} : vector<128x128xbf16>, vector<128x8xbf16>, vector<128x8xf32> -> vector<128x8xf32>
    %c0_27 = arith.constant 0 : index
    %c16 = arith.constant 16 : index
    %74 = vector.load %arg10[%c0_27, %c16] : memref<256x32xf32, #tpu.memory_space<vmem>>, vector<128x8xf32>
    tpu.vector_store %arg10[%c0_27, %c16], %73 {strides = array<i32>} : memref<256x32xf32, #tpu.memory_space<vmem>>, vector<128x8xf32>,
    %75 = vector.extract_strided_slice %5 {offsets = [0, 24], sizes = [128, 8], strides = [1, 1]} : vector<256x96xf32> to vector<128x8xf32>
    %76 = arith.truncf %75 : vector<128x8xf32> to vector<128x8xbf16>
    %77 = vector.extract_strided_slice %5 {offsets = [0, 56], sizes = [128, 8], strides = [1, 1]} : vector<256x96xf32> to vector<128x8xf32>
    %78 = arith.truncf %77 : vector<128x8xf32> to vector<128x8xbf16>
    %79 = vector.extract_strided_slice %5 {offsets = [0, 88], sizes = [128, 8], strides = [1, 1]} : vector<256x96xf32> to vector<128x8xf32>
    %80 = arith.truncf %79 : vector<128x8xf32> to vector<128x8xbf16>
    %cst_28 = arith.constant dense<0.000000e+00> : vector<128x128xf32>
    %81 = tpu.matmul %76, %78, %cst_28 {dimension_numbers = #tpu.dot_dimension_numbers<[1], [1], [0], [0], [0, 0, 1, 0], [], []>} : vector<128x8xbf16>, vector<128x8xbf16>, vector<128x128xf32> -> vector<128x128xf32>
    %c3 = arith.constant 3 : index
    %c0_29 = arith.constant 0 : index
    %c0_30 = arith.constant 0 : index
    %82 = vector.load %arg8[%c3, %c0_29, %c0_30] : memref<4x128x128xf32, #tpu.memory_space<vmem>>, vector<1x128x128xf32>
    %83 = vector.shape_cast %82 : vector<1x128x128xf32> to vector<128x128xf32>
    %84 = arith.addf %81, %83 : vector<128x128xf32>
    %cst_31 = arith.constant dense<0xFF800000> : vector<128xf32>
    %85 = vector.multi_reduction <maximumf>, %84, %cst_31 [1] : vector<128x128xf32> to vector<128xf32>
    %86 = vector.shape_cast %85 : vector<128xf32> to vector<128x1xf32>
    %87 = vector.broadcast %86 : vector<128x1xf32> to vector<128x128xf32>
    %88 = arith.subf %84, %87 : vector<128x128xf32>
    %89 = math.exp %88 : vector<128x128xf32>
    %cst_32 = arith.constant dense<0.000000e+00> : vector<128xf32>
    %90 = vector.multi_reduction <add>, %89, %cst_32 [1] : vector<128x128xf32> to vector<128xf32>
    %91 = vector.shape_cast %90 : vector<128xf32> to vector<128x1xf32>
    %92 = tpu.reciprocal %91 {approx = true} : vector<128x1xf32> -> vector<128x1xf32>
    %93 = vector.broadcast %92 : vector<128x1xf32> to vector<128x128xf32>
    %94 = arith.mulf %89, %93 : vector<128x128xf32>
    %95 = arith.truncf %94 : vector<128x128xf32> to vector<128x128xbf16>
    %cst_33 = arith.constant dense<0.000000e+00> : vector<128x8xf32>
    %96 = tpu.matmul %95, %80, %cst_33 {dimension_numbers = #tpu.dot_dimension_numbers<[1], [0], [0], [1], [0, 0, 1, 1], [], []>} : vector<128x128xbf16>, vector<128x8xbf16>, vector<128x8xf32> -> vector<128x8xf32>
    %c0_34 = arith.constant 0 : index
    %c24 = arith.constant 24 : index
    %97 = vector.load %arg10[%c0_34, %c24] : memref<256x32xf32, #tpu.memory_space<vmem>>, vector<128x8xf32>
    tpu.vector_store %arg10[%c0_34, %c24], %96 {strides = array<i32>} : memref<256x32xf32, #tpu.memory_space<vmem>>, vector<128x8xf32>,
    %98 = vector.extract_strided_slice %5 {offsets = [128, 0], sizes = [128, 8], strides = [1, 1]} : vector<256x96xf32> to vector<128x8xf32>
    %99 = arith.truncf %98 : vector<128x8xf32> to vector<128x8xbf16>
    %100 = vector.extract_strided_slice %5 {offsets = [128, 32], sizes = [128, 8], strides = [1, 1]} : vector<256x96xf32> to vector<128x8xf32>
    %101 = arith.truncf %100 : vector<128x8xf32> to vector<128x8xbf16>
    %102 = vector.extract_strided_slice %5 {offsets = [128, 64], sizes = [128, 8], strides = [1, 1]} : vector<256x96xf32> to vector<128x8xf32>
    %103 = arith.truncf %102 : vector<128x8xf32> to vector<128x8xbf16>
    %cst_35 = arith.constant dense<0.000000e+00> : vector<128x128xf32>
    %104 = tpu.matmul %99, %101, %cst_35 {dimension_numbers = #tpu.dot_dimension_numbers<[1], [1], [0], [0], [0, 0, 1, 0], [], []>} : vector<128x8xbf16>, vector<128x8xbf16>, vector<128x128xf32> -> vector<128x128xf32>
    %c0_36 = arith.constant 0 : index
    %c0_37 = arith.constant 0 : index
    %c0_38 = arith.constant 0 : index
    %105 = vector.load %arg8[%c0_36, %c0_37, %c0_38] : memref<4x128x128xf32, #tpu.memory_space<vmem>>, vector<1x128x128xf32>
    %106 = vector.shape_cast %105 : vector<1x128x128xf32> to vector<128x128xf32>
    %107 = arith.addf %104, %106 : vector<128x128xf32>
    %cst_39 = arith.constant dense<0xFF800000> : vector<128xf32>
    %108 = vector.multi_reduction <maximumf>, %107, %cst_39 [1] : vector<128x128xf32> to vector<128xf32>
    %109 = vector.shape_cast %108 : vector<128xf32> to vector<128x1xf32>
    %110 = vector.broadcast %109 : vector<128x1xf32> to vector<128x128xf32>
    %111 = arith.subf %107, %110 : vector<128x128xf32>
    %112 = math.exp %111 : vector<128x128xf32>
    %cst_40 = arith.constant dense<0.000000e+00> : vector<128xf32>
    %113 = vector.multi_reduction <add>, %112, %cst_40 [1] : vector<128x128xf32> to vector<128xf32>
    %114 = vector.shape_cast %113 : vector<128xf32> to vector<128x1xf32>
    %115 = tpu.reciprocal %114 {approx = true} : vector<128x1xf32> -> vector<128x1xf32>
    %116 = vector.broadcast %115 : vector<128x1xf32> to vector<128x128xf32>
    %117 = arith.mulf %112, %116 : vector<128x128xf32>
    %118 = arith.truncf %117 : vector<128x128xf32> to vector<128x128xbf16>
    %cst_41 = arith.constant dense<0.000000e+00> : vector<128x8xf32>
    %119 = tpu.matmul %118, %103, %cst_41 {dimension_numbers = #tpu.dot_dimension_numbers<[1], [0], [0], [1], [0, 0, 1, 1], [], []>} : vector<128x128xbf16>, vector<128x8xbf16>, vector<128x8xf32> -> vector<128x8xf32>
    %c128 = arith.constant 128 : index
    %c0_42 = arith.constant 0 : index
    %120 = vector.load %arg10[%c128, %c0_42] : memref<256x32xf32, #tpu.memory_space<vmem>>, vector<128x8xf32>
    tpu.vector_store %arg10[%c128, %c0_42], %119 {strides = array<i32>} : memref<256x32xf32, #tpu.memory_space<vmem>>, vector<128x8xf32>,
    %121 = vector.extract_strided_slice %5 {offsets = [128, 8], sizes = [128, 8], strides = [1, 1]} : vector<256x96xf32> to vector<128x8xf32>
    %122 = arith.truncf %121 : vector<128x8xf32> to vector<128x8xbf16>
    %123 = vector.extract_strided_slice %5 {offsets = [128, 40], sizes = [128, 8], strides = [1, 1]} : vector<256x96xf32> to vector<128x8xf32>
    %124 = arith.truncf %123 : vector<128x8xf32> to vector<128x8xbf16>
    %125 = vector.extract_strided_slice %5 {offsets = [128, 72], sizes = [128, 8], strides = [1, 1]} : vector<256x96xf32> to vector<128x8xf32>
    %126 = arith.truncf %125 : vector<128x8xf32> to vector<128x8xbf16>
    %cst_43 = arith.constant dense<0.000000e+00> : vector<128x128xf32>
    %127 = tpu.matmul %122, %124, %cst_43 {dimension_numbers = #tpu.dot_dimension_numbers<[1], [1], [0], [0], [0, 0, 1, 0], [], []>} : vector<128x8xbf16>, vector<128x8xbf16>, vector<128x128xf32> -> vector<128x128xf32>
    %c1_44 = arith.constant 1 : index
    %c0_45 = arith.constant 0 : index
    %c0_46 = arith.constant 0 : index
    %128 = vector.load %arg8[%c1_44, %c0_45, %c0_46] : memref<4x128x128xf32, #tpu.memory_space<vmem>>, vector<1x128x128xf32>
    %129 = vector.shape_cast %128 : vector<1x128x128xf32> to vector<128x128xf32>
    %130 = arith.addf %127, %129 : vector<128x128xf32>
    %cst_47 = arith.constant dense<0xFF800000> : vector<128xf32>
    %131 = vector.multi_reduction <maximumf>, %130, %cst_47 [1] : vector<128x128xf32> to vector<128xf32>
    %132 = vector.shape_cast %131 : vector<128xf32> to vector<128x1xf32>
    %133 = vector.broadcast %132 : vector<128x1xf32> to vector<128x128xf32>
    %134 = arith.subf %130, %133 : vector<128x128xf32>
    %135 = math.exp %134 : vector<128x128xf32>
    %cst_48 = arith.constant dense<0.000000e+00> : vector<128xf32>
    %136 = vector.multi_reduction <add>, %135, %cst_48 [1] : vector<128x128xf32> to vector<128xf32>
    %137 = vector.shape_cast %136 : vector<128xf32> to vector<128x1xf32>
    %138 = tpu.reciprocal %137 {approx = true} : vector<128x1xf32> -> vector<128x1xf32>
    %139 = vector.broadcast %138 : vector<128x1xf32> to vector<128x128xf32>
    %140 = arith.mulf %135, %139 : vector<128x128xf32>
    %141 = arith.truncf %140 : vector<128x128xf32> to vector<128x128xbf16>
    %cst_49 = arith.constant dense<0.000000e+00> : vector<128x8xf32>
    %142 = tpu.matmul %141, %126, %cst_49 {dimension_numbers = #tpu.dot_dimension_numbers<[1], [0], [0], [1], [0, 0, 1, 1], [], []>} : vector<128x128xbf16>, vector<128x8xbf16>, vector<128x8xf32> -> vector<128x8xf32>
    %c128_50 = arith.constant 128 : index
    %c8_51 = arith.constant 8 : index
    %143 = vector.load %arg10[%c128_50, %c8_51] : memref<256x32xf32, #tpu.memory_space<vmem>>, vector<128x8xf32>
    tpu.vector_store %arg10[%c128_50, %c8_51], %142 {strides = array<i32>} : memref<256x32xf32, #tpu.memory_space<vmem>>, vector<128x8xf32>,
    %144 = vector.extract_strided_slice %5 {offsets = [128, 16], sizes = [128, 8], strides = [1, 1]} : vector<256x96xf32> to vector<128x8xf32>
    %145 = arith.truncf %144 : vector<128x8xf32> to vector<128x8xbf16>
    %146 = vector.extract_strided_slice %5 {offsets = [128, 48], sizes = [128, 8], strides = [1, 1]} : vector<256x96xf32> to vector<128x8xf32>
    %147 = arith.truncf %146 : vector<128x8xf32> to vector<128x8xbf16>
    %148 = vector.extract_strided_slice %5 {offsets = [128, 80], sizes = [128, 8], strides = [1, 1]} : vector<256x96xf32> to vector<128x8xf32>
    %149 = arith.truncf %148 : vector<128x8xf32> to vector<128x8xbf16>
    %cst_52 = arith.constant dense<0.000000e+00> : vector<128x128xf32>
    %150 = tpu.matmul %145, %147, %cst_52 {dimension_numbers = #tpu.dot_dimension_numbers<[1], [1], [0], [0], [0, 0, 1, 0], [], []>} : vector<128x8xbf16>, vector<128x8xbf16>, vector<128x128xf32> -> vector<128x128xf32>
    %c2_53 = arith.constant 2 : index
    %c0_54 = arith.constant 0 : index
    %c0_55 = arith.constant 0 : index
    %151 = vector.load %arg8[%c2_53, %c0_54, %c0_55] : memref<4x128x128xf32, #tpu.memory_space<vmem>>, vector<1x128x128xf32>
    %152 = vector.shape_cast %151 : vector<1x128x128xf32> to vector<128x128xf32>
    %153 = arith.addf %150, %152 : vector<128x128xf32>
    %cst_56 = arith.constant dense<0xFF800000> : vector<128xf32>
    %154 = vector.multi_reduction <maximumf>, %153, %cst_56 [1] : vector<128x128xf32> to vector<128xf32>
    %155 = vector.shape_cast %154 : vector<128xf32> to vector<128x1xf32>
    %156 = vector.broadcast %155 : vector<128x1xf32> to vector<128x128xf32>
    %157 = arith.subf %153, %156 : vector<128x128xf32>
    %158 = math.exp %157 : vector<128x128xf32>
    %cst_57 = arith.constant dense<0.000000e+00> : vector<128xf32>
    %159 = vector.multi_reduction <add>, %158, %cst_57 [1] : vector<128x128xf32> to vector<128xf32>
    %160 = vector.shape_cast %159 : vector<128xf32> to vector<128x1xf32>
    %161 = tpu.reciprocal %160 {approx = true} : vector<128x1xf32> -> vector<128x1xf32>
    %162 = vector.broadcast %161 : vector<128x1xf32> to vector<128x128xf32>
    %163 = arith.mulf %158, %162 : vector<128x128xf32>
    %164 = arith.truncf %163 : vector<128x128xf32> to vector<128x128xbf16>
    %cst_58 = arith.constant dense<0.000000e+00> : vector<128x8xf32>
    %165 = tpu.matmul %164, %149, %cst_58 {dimension_numbers = #tpu.dot_dimension_numbers<[1], [0], [0], [1], [0, 0, 1, 1], [], []>} : vector<128x128xbf16>, vector<128x8xbf16>, vector<128x8xf32> -> vector<128x8xf32>
    %c128_59 = arith.constant 128 : index
    %c16_60 = arith.constant 16 : index
    %166 = vector.load %arg10[%c128_59, %c16_60] : memref<256x32xf32, #tpu.memory_space<vmem>>, vector<128x8xf32>
    tpu.vector_store %arg10[%c128_59, %c16_60], %165 {strides = array<i32>} : memref<256x32xf32, #tpu.memory_space<vmem>>, vector<128x8xf32>,
    %167 = vector.extract_strided_slice %5 {offsets = [128, 24], sizes = [128, 8], strides = [1, 1]} : vector<256x96xf32> to vector<128x8xf32>
    %168 = arith.truncf %167 : vector<128x8xf32> to vector<128x8xbf16>
    %169 = vector.extract_strided_slice %5 {offsets = [128, 56], sizes = [128, 8], strides = [1, 1]} : vector<256x96xf32> to vector<128x8xf32>
    %170 = arith.truncf %169 : vector<128x8xf32> to vector<128x8xbf16>
    %171 = vector.extract_strided_slice %5 {offsets = [128, 88], sizes = [128, 8], strides = [1, 1]} : vector<256x96xf32> to vector<128x8xf32>
    %172 = arith.truncf %171 : vector<128x8xf32> to vector<128x8xbf16>
    %cst_61 = arith.constant dense<0.000000e+00> : vector<128x128xf32>
    %173 = tpu.matmul %168, %170, %cst_61 {dimension_numbers = #tpu.dot_dimension_numbers<[1], [1], [0], [0], [0, 0, 1, 0], [], []>} : vector<128x8xbf16>, vector<128x8xbf16>, vector<128x128xf32> -> vector<128x128xf32>
    %c3_62 = arith.constant 3 : index
    %c0_63 = arith.constant 0 : index
    %c0_64 = arith.constant 0 : index
    %174 = vector.load %arg8[%c3_62, %c0_63, %c0_64] : memref<4x128x128xf32, #tpu.memory_space<vmem>>, vector<1x128x128xf32>
    %175 = vector.shape_cast %174 : vector<1x128x128xf32> to vector<128x128xf32>
    %176 = arith.addf %173, %175 : vector<128x128xf32>
    %cst_65 = arith.constant dense<0xFF800000> : vector<128xf32>
    %177 = vector.multi_reduction <maximumf>, %176, %cst_65 [1] : vector<128x128xf32> to vector<128xf32>
    %178 = vector.shape_cast %177 : vector<128xf32> to vector<128x1xf32>
    %179 = vector.broadcast %178 : vector<128x1xf32> to vector<128x128xf32>
    %180 = arith.subf %176, %179 : vector<128x128xf32>
    %181 = math.exp %180 : vector<128x128xf32>
    %cst_66 = arith.constant dense<0.000000e+00> : vector<128xf32>
    %182 = vector.multi_reduction <add>, %181, %cst_66 [1] : vector<128x128xf32> to vector<128xf32>
    %183 = vector.shape_cast %182 : vector<128xf32> to vector<128x1xf32>
    %184 = tpu.reciprocal %183 {approx = true} : vector<128x1xf32> -> vector<128x1xf32>
    %185 = vector.broadcast %184 : vector<128x1xf32> to vector<128x128xf32>
    %186 = arith.mulf %181, %185 : vector<128x128xf32>
    %187 = arith.truncf %186 : vector<128x128xf32> to vector<128x128xbf16>
    %cst_67 = arith.constant dense<0.000000e+00> : vector<128x8xf32>
    %188 = tpu.matmul %187, %172, %cst_67 {dimension_numbers = #tpu.dot_dimension_numbers<[1], [0], [0], [1], [0, 0, 1, 1], [], []>} : vector<128x128xbf16>, vector<128x8xbf16>, vector<128x8xf32> -> vector<128x8xf32>
    %c128_68 = arith.constant 128 : index
    %c24_69 = arith.constant 24 : index
    %189 = vector.load %arg10[%c128_68, %c24_69] : memref<256x32xf32, #tpu.memory_space<vmem>>, vector<128x8xf32>
    tpu.vector_store %arg10[%c128_68, %c24_69], %188 {strides = array<i32>} : memref<256x32xf32, #tpu.memory_space<vmem>>, vector<128x8xf32>,
    %c0_70 = arith.constant 0 : index
    %c0_71 = arith.constant 0 : index
    %190 = vector.load %arg10[%c0_70, %c0_71] : memref<256x32xf32, #tpu.memory_space<vmem>>, vector<256x32xf32>
    %191 = arith.truncf %190 : vector<256x32xf32> to vector<256x32xbf16>
    %c0_72 = arith.constant 0 : index
    %c0_73 = arith.constant 0 : index
    %192 = vector.load %arg4[%c0_72, %c0_73] : memref<32x32xbf16, #tpu.memory_space<vmem>>, vector<32x32xbf16>
    %cst_74 = arith.constant dense<0.000000e+00> : vector<256x32xf32>
    %193 = tpu.matmul %191, %192, %cst_74 {dimension_numbers = #tpu.dot_dimension_numbers<[1], [0], [0], [1], [0, 0, 1, 1], [], []>} : vector<256x32xbf16>, vector<32x32xbf16>, vector<256x32xf32> -> vector<256x32xf32>
    %c0_75 = arith.constant 0 : index
    %c0_76 = arith.constant 0 : index
    %194 = vector.load %arg7[%c0_75, %c0_76] : memref<8x128xf32, #tpu.memory_space<vmem>>, vector<1x32xf32>
    %195 = vector.broadcast %194 : vector<1x32xf32> to vector<256x32xf32>
    %196 = arith.addf %193, %195 : vector<256x32xf32>
    %197 = arith.addf %196, %2 : vector<256x32xf32>
    %cst_77 = arith.constant dense<0.000000e+00> : vector<256xf32>
    %198 = vector.multi_reduction <add>, %197, %cst_77 [1] : vector<256x32xf32> to vector<256xf32>
    %199 = vector.shape_cast %198 : vector<256xf32> to vector<256x1xf32>
    %cst_78 = arith.constant 3.200000e+01 : f32
    %200 = vector.broadcast %cst_78 : f32 to vector<256x1xf32>
    %201 = arith.divf %199, %200 : vector<256x1xf32>
    %202 = vector.broadcast %201 : vector<256x1xf32> to vector<256x32xf32>
    %203 = arith.subf %197, %202 : vector<256x32xf32>
    %204 = arith.mulf %203, %203 : vector<256x32xf32>
    %cst_79 = arith.constant dense<0.000000e+00> : vector<256xf32>
    %205 = vector.multi_reduction <add>, %204, %cst_79 [1] : vector<256x32xf32> to vector<256xf32>
    %206 = vector.shape_cast %205 : vector<256xf32> to vector<256x1xf32>
    %cst_80 = arith.constant 3.200000e+01 : f32
    %207 = vector.broadcast %cst_80 : f32 to vector<256x1xf32>
    %208 = arith.divf %206, %207 : vector<256x1xf32>
    %cst_81 = arith.constant 9.99999974E-6 : f32
    %209 = vector.broadcast %cst_81 : f32 to vector<256x1xf32>
    %210 = arith.addf %208, %209 : vector<256x1xf32>
    %211 = math.rsqrt %210 : vector<256x1xf32>
    %212 = vector.broadcast %211 : vector<256x1xf32> to vector<256x32xf32>
    %213 = arith.mulf %203, %212 : vector<256x32xf32>
    %c1_82 = arith.constant 1 : index
    %c0_83 = arith.constant 0 : index
    %214 = vector.load %arg7[%c1_82, %c0_83] : memref<8x128xf32, #tpu.memory_space<vmem>>, vector<1x32xf32>
    %215 = vector.broadcast %214 : vector<1x32xf32> to vector<256x32xf32>
    %216 = arith.mulf %213, %215 : vector<256x32xf32>
    %c2_84 = arith.constant 2 : index
    %c0_85 = arith.constant 0 : index
    %217 = vector.load %arg7[%c2_84, %c0_85] : memref<8x128xf32, #tpu.memory_space<vmem>>, vector<1x32xf32>
    %218 = vector.broadcast %217 : vector<1x32xf32> to vector<256x32xf32>
    %219 = arith.addf %216, %218 : vector<256x32xf32>
    %220 = arith.truncf %219 : vector<256x32xf32> to vector<256x32xbf16>
    %c0_86 = arith.constant 0 : index
    %c0_87 = arith.constant 0 : index
    %221 = vector.load %arg5[%c0_86, %c0_87] : memref<32x128xbf16, #tpu.memory_space<vmem>>, vector<32x128xbf16>
    %cst_88 = arith.constant dense<0.000000e+00> : vector<256x128xf32>
    %222 = tpu.matmul %220, %221, %cst_88 {dimension_numbers = #tpu.dot_dimension_numbers<[1], [0], [0], [1], [0, 0, 1, 1], [], []>} : vector<256x32xbf16>, vector<32x128xbf16>, vector<256x128xf32> -> vector<256x128xf32>
    %c5 = arith.constant 5 : index
    %c0_89 = arith.constant 0 : index
    %223 = vector.load %arg7[%c5, %c0_89] : memref<8x128xf32, #tpu.memory_space<vmem>>, vector<1x128xf32>
    %224 = vector.broadcast %223 : vector<1x128xf32> to vector<256x128xf32>
    %225 = arith.addf %222, %224 : vector<256x128xf32>
    %cst_90 = arith.constant 0.000000e+00 : f32
    %226 = vector.broadcast %cst_90 : f32 to vector<256x128xf32>
    %227 = arith.maximumf %225, %226 : vector<256x128xf32>
    %228 = arith.truncf %227 : vector<256x128xf32> to vector<256x128xbf16>
    %c0_91 = arith.constant 0 : index
    %c0_92 = arith.constant 0 : index
    %229 = vector.load %arg6[%c0_91, %c0_92] : memref<128x32xbf16, #tpu.memory_space<vmem>>, vector<128x32xbf16>
    %cst_93 = arith.constant dense<0.000000e+00> : vector<256x32xf32>
    %230 = tpu.matmul %228, %229, %cst_93 {dimension_numbers = #tpu.dot_dimension_numbers<[1], [0], [0], [1], [0, 0, 1, 1], [], []>} : vector<256x128xbf16>, vector<128x32xbf16>, vector<256x32xf32> -> vector<256x32xf32>
    %c6 = arith.constant 6 : index
    %c0_94 = arith.constant 0 : index
    %231 = vector.load %arg7[%c6, %c0_94] : memref<8x128xf32, #tpu.memory_space<vmem>>, vector<1x32xf32>
    %232 = vector.broadcast %231 : vector<1x32xf32> to vector<256x32xf32>
    %233 = arith.addf %230, %232 : vector<256x32xf32>
    %234 = arith.addf %233, %219 : vector<256x32xf32>
    %cst_95 = arith.constant dense<0.000000e+00> : vector<256xf32>
    %235 = vector.multi_reduction <add>, %234, %cst_95 [1] : vector<256x32xf32> to vector<256xf32>
    %236 = vector.shape_cast %235 : vector<256xf32> to vector<256x1xf32>
    %cst_96 = arith.constant 3.200000e+01 : f32
    %237 = vector.broadcast %cst_96 : f32 to vector<256x1xf32>
    %238 = arith.divf %236, %237 : vector<256x1xf32>
    %239 = vector.broadcast %238 : vector<256x1xf32> to vector<256x32xf32>
    %240 = arith.subf %234, %239 : vector<256x32xf32>
    %241 = arith.mulf %240, %240 : vector<256x32xf32>
    %cst_97 = arith.constant dense<0.000000e+00> : vector<256xf32>
    %242 = vector.multi_reduction <add>, %241, %cst_97 [1] : vector<256x32xf32> to vector<256xf32>
    %243 = vector.shape_cast %242 : vector<256xf32> to vector<256x1xf32>
    %cst_98 = arith.constant 3.200000e+01 : f32
    %244 = vector.broadcast %cst_98 : f32 to vector<256x1xf32>
    %245 = arith.divf %243, %244 : vector<256x1xf32>
    %cst_99 = arith.constant 9.99999974E-6 : f32
    %246 = vector.broadcast %cst_99 : f32 to vector<256x1xf32>
    %247 = arith.addf %245, %246 : vector<256x1xf32>
    %248 = math.rsqrt %247 : vector<256x1xf32>
    %249 = vector.broadcast %248 : vector<256x1xf32> to vector<256x32xf32>
    %250 = arith.mulf %240, %249 : vector<256x32xf32>
    %c3_100 = arith.constant 3 : index
    %c0_101 = arith.constant 0 : index
    %251 = vector.load %arg7[%c3_100, %c0_101] : memref<8x128xf32, #tpu.memory_space<vmem>>, vector<1x32xf32>
    %252 = vector.broadcast %251 : vector<1x32xf32> to vector<256x32xf32>
    %253 = arith.mulf %250, %252 : vector<256x32xf32>
    %c4 = arith.constant 4 : index
    %c0_102 = arith.constant 0 : index
    %254 = vector.load %arg7[%c4, %c0_102] : memref<8x128xf32, #tpu.memory_space<vmem>>, vector<1x32xf32>
    %255 = vector.broadcast %254 : vector<1x32xf32> to vector<256x32xf32>
    %256 = arith.addf %253, %255 : vector<256x32xf32>
    %c0_103 = arith.constant 0 : index
    %c0_104 = arith.constant 0 : index
    %257 = vector.load %arg9[%c0_103, %c0_104] : memref<256x32xf32, #tpu.memory_space<vmem>>, vector<256x32xf32>
    tpu.vector_store %arg9[%c0_103, %c0_104], %256 {strides = array<i32>} : memref<256x32xf32, #tpu.memory_space<vmem>>, vector<256x32xf32>,
    return
  }
  func.func @transform_0(%arg0: i32) -> (i32, i32) {
    %c0_i32 = arith.constant 0 : i32
    %c0_i32_0 = arith.constant 0 : i32
    %c0_i32_1 = arith.constant 0 : i32
    return %c0_i32, %c0_i32_0 : i32, i32
  }
  func.func @transform_1(%arg0: i32) -> (i32, i32) {
    %c0_i32 = arith.constant 0 : i32
    %c0_i32_0 = arith.constant 0 : i32
    %c0_i32_1 = arith.constant 0 : i32
    return %c0_i32, %c0_i32_0 : i32, i32
  }
  func.func @transform_2(%arg0: i32) -> (i32, i32) {
    %c0_i32 = arith.constant 0 : i32
    %c0_i32_0 = arith.constant 0 : i32
    %c0_i32_1 = arith.constant 0 : i32
    return %c0_i32, %c0_i32_0 : i32, i32
  }
  func.func @transform_3(%arg0: i32) -> (i32, i32) {
    %c0_i32 = arith.constant 0 : i32
    %c0_i32_0 = arith.constant 0 : i32
    %c0_i32_1 = arith.constant 0 : i32
    return %c0_i32, %c0_i32_0 : i32, i32
  }
  func.func @transform_4(%arg0: i32) -> (i32, i32) {
    %c0_i32 = arith.constant 0 : i32
    %c0_i32_0 = arith.constant 0 : i32
    %c0_i32_1 = arith.constant 0 : i32
    return %c0_i32, %c0_i32_0 : i32, i32
  }
  func.func @transform_5(%arg0: i32) -> (i32, i32) {
    %c0_i32 = arith.constant 0 : i32
    %c0_i32_0 = arith.constant 0 : i32
    %c0_i32_1 = arith.constant 0 : i32
    return %c0_i32, %c0_i32_0 : i32, i32
  }
  func.func @transform_6(%arg0: i32) -> (i32, i32) {
    %c0_i32 = arith.constant 0 : i32
    %c0_i32_0 = arith.constant 0 : i32
    %c0_i32_1 = arith.constant 0 : i32
    return %c0_i32, %c0_i32_0 : i32, i32
  }
  func.func @transform_7(%arg0: i32) -> (i32, i32, i32) {
    %c0_i32 = arith.constant 0 : i32
    %c0_i32_0 = arith.constant 0 : i32
    %c0_i32_1 = arith.constant 0 : i32
    %c0_i32_2 = arith.constant 0 : i32
    return %c0_i32, %c0_i32_0, %c0_i32_1 : i32, i32, i32
  }
  func.func @transform_8(%arg0: i32) -> (i32, i32) {
    %c0_i32 = arith.constant 0 : i32
    %c0_i32_0 = arith.constant 0 : i32
    %c0_i32_1 = arith.constant 0 : i32
    return %c0_i32, %c0_i32_0 : i32, i32
  }
}

</mosaic_0001>

<bundles_post_ra>
// kernel: tpu_custom_call.1
= control target key start
LH: loop header
LB: loop body
LE: loop exit
PB: predicated region body
PF: predicated region fallthrough
CT: control target
= control target key end

     0   :  { %vm158_vm0 = vcmask 261120   ;;  %s7000_s20 = smov 72   ;;  %s7002_s21 = smov 96   ;;  %vm344_vm1 = vcmask 64512   ;;  %vm1118_vm2 = vcmask 130112   ;;  %vm1570_vm3 = vcmask 195712   ;;  %s11927_s2 = inlined_call_operand.vmem [shape: bf16[32,96], index: 2, kind: input, shape index: {}]   ;;  %s11928_s0 = inlined_call_operand.vmem [shape: f32[256,32], index: 0, kind: input, shape index: {}]   ;;  %s11929_s1 = inlined_call_operand.vmem [shape: f32[256,32], index: 1, kind: input, shape index: {}]   ;;  %s11930_s7 = inlined_call_operand.vmem [shape: f32[4,128,128], index: 7, kind: input, shape index: {}]   ;;  %s11931_s3 = inlined_call_operand.vmem [shape: bf16[32,32], index: 3, kind: input, shape index: {}]   ;;  %s11932_s6 = inlined_call_operand.vmem [shape: f32[8,128], index: 6, kind: input, shape index: {}]   ;;  %s11933_s4 = inlined_call_operand.vmem [shape: bf16[32,128], index: 4, kind: input, shape index: {}]   ;;  %s11934_s5 = inlined_call_operand.vmem [shape: bf16[128,32], index: 5, kind: input, shape index: {}]   ;;  %s11935_s8 = inlined_call_operand.vmem [shape: f32[256,32], index: 8, kind: output, shape index: {}]  }
   0x1   :  { %v6268_v0 = vld [vmem:[%s11927_s2 + $0x8] sm:$0xff]  ;;  %v30_v1 = vld [vmem:[%s11928_s0] sm:$0xff]  ;;  %v32_v9 = vld [vmem:[%s11928_s0 + $0x10] sm:$0xff]  ;;  %s7003_s22 = smov 48   ;;  %s7004_s23 = smov 104   ;;  %vm2022_vm4 = vcmask 261312  }
   0x2   :  { %v31_v2 = vld [vmem:[%s11928_s0 + $0x8] sm:$0xff]  ;;  %v62_v3 = vld [vmem:[%s11929_s1] sm:$0xff]  ;;  %213 = vmatpush.bf16.msra.mxu0 %v6268_v0  ;;  %v33_v10 = vld [vmem:[%s11928_s0 + $0x18] sm:$0xff]  ;;  %s7005_s24 = smov 64   ;;  %s7006_s11 = smov 120  }
   0x3   :  { %v63_v4 = vld [vmem:[%s11929_s1 + $0x8] sm:$0xff]  ;;  %v6267_v5 = vld [vmem:[%s11927_s2] sm:$0xff]  ;;  %v7078_v6 = vadd.f32 %v62_v3, %v30_v1  ;;  %v64_v11 = vld [vmem:[%s11929_s1 + $0x10] sm:$0xff]  ;;  %s7001_s2 = smov 112   ;;  %s7007_s12 = smov 88  }
   0x4   :  { %v7080_v7 = vadd.f32 %v63_v4, %v31_v2  ;;  %v65_v12 = vld [vmem:[%s11929_s1 + $0x18] sm:$0xff]  ;;  %v7097_v13 = vadd.f32 %v64_v11, %v32_v9  ;;  %v34_v16 = vld [vmem:[%s11928_s0 + $0x20] sm:$0xff]  ;;  %v35_v17 = vld [vmem:[%s11928_s0 + $0x28] sm:$0xff]  ;;  %s7008_s13 = smov 80   ;;  %s7009_s27 = smov 56  }
   0x5   :  { %12007 = vst [vmem:[#allocation3_spill] sm:$0xff] %v7078_v6  ;;  %v7099_v14 = vadd.f32 %v65_v12, %v33_v10  ;;  %v66_v18 = vld [vmem:[%s11929_s1 + $0x20] sm:$0xff]  ;;  %v67_v19 = vld [vmem:[%s11929_s1 + $0x28] sm:$0xff]  ;;  %v36_v23 = vld [vmem:[%s11928_s0 + $0x30] sm:$0xff]  ;;  %s7011_s15 = smov 16   ;;  %s7012_s16 = smov 8  }
   0x6   :  { %12008 = vst [vmem:[#allocation4_spill] sm:$0xff] %v7080_v7  ;;  %v126_v8 = vpack.c.bf16 %v7080_v7, %v7078_v6  ;;  %214 = vmatpush.bf16.msra.mxu0 %v6267_v5  ;;  %v7116_v20 = vadd.f32 %v66_v18, %v34_v16  ;;  %v7118_v21 = vadd.f32 %v67_v19, %v35_v17  ;;  %v37_v24 = vld [vmem:[%s11928_s0 + $0x38] sm:$0xff]  ;;  %v68_v25 = vld [vmem:[%s11929_s1 + $0x30] sm:$0xff]  ;;  %v38_v30 = vld [vmem:[%s11928_s0 + $0x40] sm:$0xff] }
   0x7   :  { %12009 = vst [vmem:[#allocation5_spill] sm:$0xff] %v7097_v13  ;;  %v127_v15 = vpack.c.bf16 %v7099_v14, %v7097_v13  ;;  %v69_v26 = vld [vmem:[%s11929_s1 + $0x38] sm:$0xff]  ;;  %v7135_v27 = vadd.f32 %v68_v25, %v36_v23  ;;  %v39_v31 = vld [vmem:[%s11928_s0 + $0x48] sm:$0xff]  ;;  %v70_v32 = vld [vmem:[%s11929_s1 + $0x40] sm:$0xff] }
   0x8   :  { %12010 = vst [vmem:[#allocation6_spill] sm:$0xff] %v7099_v14  ;;  %v128_v22 = vpack.c.bf16 %v7118_v21, %v7116_v20  ;;  %v7137_v28 = vadd.f32 %v69_v26, %v37_v24  ;;  %v71_v33 = vld [vmem:[%s11929_s1 + $0x48] sm:$0xff]  ;;  %v7154_v34 = vadd.f32 %v70_v32, %v38_v30  ;;  %v40_v37 = vld [vmem:[%s11928_s0 + $0x50] sm:$0xff]  ;;  %v41_v38 = vld [vmem:[%s11928_s0 + $0x58] sm:$0xff] }
   0x9   :  { %6011 = vmatmul.msk.bf16.vlgmr.msra.gmra.mxu0 %vm158_vm0, %v126_v8  ;;  %12011 = vst [vmem:[#allocation7_spill] sm:$0xff] %v7116_v20  ;;  %v7156_v35 = vadd.f32 %v71_v33, %v39_v31  ;;  %v72_v39 = vld [vmem:[%s11929_s1 + $0x50] sm:$0xff]  ;;  %v73_v40 = vld [vmem:[%s11929_s1 + $0x58] sm:$0xff]  ;;  %v42_v44 = vld [vmem:[%s11928_s0 + $0x60] sm:$0xff] }
   0xa   :  { %12012 = vst [vmem:[#allocation8_spill] sm:$0xff] %v7118_v21  ;;  %v129_v29 = vpack.c.bf16 %v7137_v28, %v7135_v27  ;;  %v7173_v41 = vadd.f32 %v72_v39, %v40_v37  ;;  %v7175_v42 = vadd.f32 %v73_v40, %v41_v38  ;;  %v43_v45 = vld [vmem:[%s11928_s0 + $0x68] sm:$0xff]  ;;  %v74_v46 = vld [vmem:[%s11929_s1 + $0x60] sm:$0xff]  ;;  %v44_v51 = vld [vmem:[%s11928_s0 + $0x70] sm:$0xff] }
   0xb   :  { %12013 = vst [vmem:[#allocation9_spill] sm:$0xff] %v7135_v27  ;;  %v130_v36 = vpack.c.bf16 %v7156_v35, %v7154_v34  ;;  %v75_v47 = vld [vmem:[%s11929_s1 + $0x68] sm:$0xff]  ;;  %v7192_v48 = vadd.f32 %v74_v46, %v42_v44  ;;  %v45_v52 = vld [vmem:[%s11928_s0 + $0x78] sm:$0xff]  ;;  %v76_v53 = vld [vmem:[%s11929_s1 + $0x70] sm:$0xff] }
   0xc   :  { %12014 = vst [vmem:[#allocation10_spill] sm:$0xff] %v7137_v28  ;;  %v131_v43 = vpack.c.bf16 %v7175_v42, %v7173_v41  ;;  %v7194_v49 = vadd.f32 %v75_v47, %v43_v45  ;;  %v77_v54 = vld [vmem:[%s11929_s1 + $0x78] sm:$0xff]  ;;  %v7211_v55 = vadd.f32 %v76_v53, %v44_v51  ;;  %v46_v58 = vld [vmem:[%s11928_s0 + $0x80] sm:$0xff]  ;;  %v47_v59 = vld [vmem:[%s11928_s0 + $0x88] sm:$0xff] }
   0xd   :  { %12015 = vst [vmem:[#allocation11_spill] sm:$0xff] %v7154_v34  ;;  %v7213_v56 = vadd.f32 %v77_v54, %v45_v52  ;;  %v78_v60 = vld [vmem:[%s11929_s1 + $0x80] sm:$0xff]  ;;  %v79_v61 = vld [vmem:[%s11929_s1 + $0x88] sm:$0xff]  ;;  %v48_v3 = vld [vmem:[%s11928_s0 + $0x90] sm:$0xff] }
   0xe   :  { %12016 = vst [vmem:[#allocation12_spill] sm:$0xff] %v7156_v35  ;;  %v132_v50 = vpack.c.bf16 %v7194_v49, %v7192_v48  ;;  %v7230_v62 = vadd.f32 %v78_v60, %v46_v58  ;;  %v7232_v63 = vadd.f32 %v79_v61, %v47_v59  ;;  %v49_v5 = vld [vmem:[%s11928_s0 + $0x98] sm:$0xff]  ;;  %v80_v8 = vld [vmem:[%s11929_s1 + $0x90] sm:$0xff]  ;;  %v50_v17 = vld [vmem:[%s11928_s0 + $0xa0] sm:$0xff] }
   0xf   :  { %12017 = vst [vmem:[#allocation13_spill] sm:$0xff] %v7173_v41  ;;  %v133_v57 = vpack.c.bf16 %v7213_v56, %v7211_v55  ;;  %v81_v9 = vld [vmem:[%s11929_s1 + $0x98] sm:$0xff]  ;;  %v7257_v10 = vadd.f32 %v80_v8, %v48_v3  ;;  %v51_v19 = vld [vmem:[%s11928_s0 + $0xa8] sm:$0xff]  ;;  %v52_v31 = vld [vmem:[%s11928_s0 + $0xb0] sm:$0xff] }
  0x10   :  { %12018 = vst [vmem:[#allocation14_spill] sm:$0xff] %v7175_v42  ;;  %v134_v0 = vpack.c.bf16 %v7232_v63, %v7230_v62  ;;  %v7259_v11 = vadd.f32 %v81_v9, %v49_v5  ;;  %v83_v23 = vld [vmem:[%s11929_s1 + $0xa8] sm:$0xff]  ;;  %v53_v32 = vld [vmem:[%s11928_s0 + $0xb8] sm:$0xff]  ;;  %v84_v33 = vld [vmem:[%s11929_s1 + $0xb0] sm:$0xff] }
  0x11   :  { %12019 = vst [vmem:[#allocation15_spill] sm:$0xff] %v7192_v48  ;;  %v7292_v25 = vadd.f32 %v83_v23, %v51_v19  ;;  %v7321_v37 = vadd.f32 %v84_v33, %v52_v31  ;;  %v54_v45 = vld [vmem:[%s11928_s0 + $0xc0] sm:$0xff]  ;;  %v55_v46 = vld [vmem:[%s11928_s0 + $0xc8] sm:$0xff]  ;;  %v56_v58 = vld [vmem:[%s11928_s0 + $0xd0] sm:$0xff] }
  0x12   :  { %12020 = vst [vmem:[#allocation16_spill] sm:$0xff] %v7194_v49  ;;  %v86_v47 = vld [vmem:[%s11929_s1 + $0xc0] sm:$0xff]  ;;  %v57_v59 = vld [vmem:[%s11928_s0 + $0xd8] sm:$0xff]  ;;  %v88_v60 = vld [vmem:[%s11929_s1 + $0xd0] sm:$0xff] }
  0x13   :  { %12021 = vst [vmem:[#allocation17_spill] sm:$0xff] %v7211_v55  ;;  %v7354_v51 = vadd.f32 %v86_v47, %v54_v45  ;;  %v89_v61 = vld [vmem:[%s11929_s1 + $0xd8] sm:$0xff]  ;;  %v58_v9 = vld [vmem:[%s11928_s0 + $0xe0] sm:$0xff] }
  0x14   :  { %12022 = vst [vmem:[#allocation18_spill] sm:$0xff] %v7213_v56  ;;  %v61_v33 = vld [vmem:[%s11928_s0 + $0xf8] sm:$0xff] }
  0x15   :  { %12023 = vst [vmem:[#allocation19_spill] sm:$0xff] %v7230_v62 }
  0x16   :  { %12024 = vst [vmem:[#allocation20_spill] sm:$0xff] %v7232_v63 }
  0x17   :  { %12025 = vst [vmem:[#allocation21_spill] sm:$0xff] %v7257_v10 }
  0x18   :  { %12026 = vst [vmem:[#allocation22_spill] sm:$0xff] %v7259_v11 }
  0x19   :  { %6012 = vmatmul.msk.bf16.gmra.mxu0 %vm158_vm0, %v127_v15  ;;  %v135_v15 = vpack.c.bf16 %v7259_v11, %v7257_v10  ;;  %12028 = vst [vmem:[#allocation24_spill] sm:$0xff] %v7292_v25 }
  0x1a   :  { %12029 = vst [vmem:[#allocation25_spill] sm:$0xff] %v7321_v37 }
  0x1b   :  { %12031 = vst [vmem:[#allocation27_spill] sm:$0xff] %v7354_v51 }
  0x29   :  { %6013 = vmatmul.msk.bf16.gmra.mxu0 %vm158_vm0, %v128_v22  ;;  %v82_v22 = vld [vmem:[%s11929_s1 + $0xa0] sm:$0xff] }
  0x2a   :  { %v7290_v24 = vadd.f32 %v82_v22, %v50_v17 }
  0x2c   :  { %12027 = vst [vmem:[#allocation23_spill] sm:$0xff] %v7290_v24 }
  0x39   :  { %6014 = vmatmul.msk.bf16.gmra.mxu0 %vm158_vm0, %v129_v29  ;;  %v136_v29 = vpack.c.bf16 %v7292_v25, %v7290_v24 }
  0x49   :  { %6015 = vmatmul.msk.bf16.gmra.mxu0 %vm158_vm0, %v130_v36  ;;  %v85_v36 = vld [vmem:[%s11929_s1 + $0xb8] sm:$0xff] }
  0x4a   :  { %v7323_v38 = vadd.f32 %v85_v36, %v53_v32  ;;  %v60_v32 = vld [vmem:[%s11928_s0 + $0xf0] sm:$0xff] }
  0x4b   :  { %v92_v36 = vld [vmem:[%s11929_s1 + $0xf0] sm:$0xff] }
  0x4c   :  { %12030 = vst [vmem:[#allocation26_spill] sm:$0xff] %v7323_v38  ;;  %v137_v40 = vpack.c.bf16 %v7323_v38, %v7321_v37 }
  0x59   :  { %6016 = vmatmul.msk.bf16.gmra.mxu0 %vm158_vm0, %v131_v43 }
  0x69   :  { %6017 = vmatmul.msk.bf16.gmra.mxu0 %vm158_vm0, %v132_v50  ;;  %v87_v50 = vld [vmem:[%s11929_s1 + $0xc8] sm:$0xff] }
  0x6a   :  { %v7356_v52 = vadd.f32 %v87_v50, %v55_v46 }
  0x6c   :  { %12032 = vst [vmem:[#allocation28_spill] sm:$0xff] %v7356_v52  ;;  %v138_v54 = vpack.c.bf16 %v7356_v52, %v7354_v51 }
  0x79   :  { %6018 = vmatmul.msk.bf16.gmra.mxu0 %vm158_vm0, %v133_v57 }
  0x86   :  { %v216_v1 = vpop.f32.mrf.mxu0 }
  0x89   :  { %6019 = vmatmul.msk.bf16.gmra.mxu0 %vm158_vm0, %v134_v0  ;;  %v7385_v0 = vadd.f32 %v88_v60, %v56_v58 }
  0x8b   :  { %12033 = vst [vmem:[#allocation29_spill] sm:$0xff] %v7385_v0 }
  0x8e   :  { %v218_v2 = vpop.f32.mrf.mxu0 }
  0x8f   :  { %v7240_v4 = vpack.c.bf16 %v218_v2, %v216_v1  ;;  %v7387_v1 = vadd.f32 %v89_v61, %v57_v59 }
  0x91   :  { %1620 = vrot.lane.b32.xlu2 %v7240_v4, %s7000_s20  ;;  %1152 = vrot.lane.b32.xlu1 %v7240_v4, %s7001_s2  ;;  %12034 = vst [vmem:[#allocation30_spill] sm:$0xff] %v7387_v1  ;;  %v139_v3 = vpack.c.bf16 %v7387_v1, %v7385_v0 }
  0x92   :  { %328 = vrot.lane.b32.xlu0 %v7240_v4, %s7002_s21 }
  0x96   :  { %v221_v12 = vpop.f32.mrf.mxu0 }
  0x99   :  { %1433 = vrot.lane.b32.xlu2 %v7240_v4, %s7003_s22  ;;  %1604 = vrot.lane.b32.xlu1 %v7240_v4, %s7004_s23 }
  0x9a   :  { %594 = vrot.lane.b32.xlu0 %v7240_v4, %s7005_s24  ;;  %6020 = vmatmul.msk.bf16.gmra.mxu0 %vm158_vm0, %v135_v15  ;;  %v90_v15 = vld [vmem:[%s11929_s1 + $0xe0] sm:$0xff] }
  0x9b   :  { %v7418_v17 = vadd.f32 %v90_v15, %v58_v9 }
  0x9d   :  { %12035 = vst [vmem:[#allocation31_spill] sm:$0xff] %v7418_v17 }
  0x9e   :  { %v223_v16 = vpop.f32.mrf.mxu0 }
  0x9f   :  { %v7273_v18 = vpack.c.bf16 %v223_v16, %v221_v12  ;;  %v59_v12 = vld [vmem:[%s11928_s0 + $0xe8] sm:$0xff]  ;;  %s7010_s0 = smov 40  }
  0xa0   :  { %v91_v16 = vld [vmem:[%s11929_s1 + $0xe8] sm:$0xff] }
  0xa1   :  { %702 = vrot.lane.b32.xlu2 %v7273_v18, %s7006_s11  ;;  %596 = vrot.lane.b32.xlu1 %v7273_v18, %s7005_s24  ;;  %v7420_v19 = vadd.f32 %v91_v16, %v59_v12 }
  0xa2   :  { %700 = vrot.lane.b32.xlu0 %v7240_v4, %s7006_s11 }
  0xa3   :  { %12036 = vst [vmem:[#allocation32_spill] sm:$0xff] %v7420_v19  ;;  %v140_v23 = vpack.c.bf16 %v7420_v19, %v7418_v17 }
  0xa6   :  { %v226_v26 = vpop.f32.mrf.mxu0 }
  0xa9   :  { %718 = vrot.lane.b32.xlu2 %v7273_v18, %s7007_s12  ;;  %1170 = vrot.lane.b32.xlu1 %v7273_v18, %s7008_s13 }
  0xaa   :  { %716 = vrot.lane.b32.xlu0 %v7240_v4, %s7007_s12  ;;  %6021 = vmatmul.msk.bf16.gmra.mxu0 %vm158_vm0, %v136_v29 }
  0xae   :  { %v228_v30 = vpop.f32.mrf.mxu0 }
  0xaf   :  { %v7334_v43 = vpack.c.bf16 %v228_v30, %v226_v26 }
  0xb1   :  { %983 = vrot.lane.b32.xlu2 %v7273_v18, %s7009_s27  ;;  %1622 = vrot.lane.b32.xlu1 %v7273_v18, %s7000_s20 }
  0xb2   :  { %981 = vrot.lane.b32.xlu0 %v7240_v4, %s7009_s27 }
  0xb6   :  { %v231_v39 = vpop.f32.mrf.mxu0 }
  0xb9   :  { %1154 = vrot.lane.b32.xlu2 %v7273_v18, %s7001_s2  ;;  %1435 = vrot.lane.b32.xlu1 %v7273_v18, %s7003_s22 }
  0xba   :  { %1168 = vrot.lane.b32.xlu0 %v7240_v4, %s7008_s13  ;;  %6022 = vmatmul.msk.bf16.gmra.mxu0 %vm158_vm0, %v137_v40  ;;  %v7455_v40 = vadd.f32 %v92_v36, %v60_v32 }
  0xbc   :  { %12039 = vst [vmem:[#allocation35_spill] sm:$0xff] %v7455_v40 }
  0xbe   :  { %v233_v44 = vpop.f32.mrf.mxu0 }
  0xbf   :  { %v7391_v5 = vpack.c.bf16 %v233_v44, %v231_v39  ;;  %v93_v39 = vld [vmem:[%s11929_s1 + $0xf8] sm:$0xff] }
  0xc0   :  { %v7457_v44 = vadd.f32 %v93_v39, %v61_v33 }
  0xc1   :  { %1606 = vrot.lane.b32.xlu1 %v7273_v18, %s7004_s23  ;;  %598 = vrot.lane.b32.xlu2 %v7334_v43, %s7005_s24 }
  0xc2   :  { %330 = vrot.lane.b32.xlu0 %v7273_v18, %s7002_s21  ;;  %12040 = vst [vmem:[#allocation36_spill] sm:$0xff] %v7457_v44  ;;  %v141_v47 = vpack.c.bf16 %v7457_v44, %v7455_v40 }
  0xc6   :  { %v236_v53 = vpop.f32.mrf.mxu0 }
  0xc9   :  { %1172 = vrot.lane.b32.xlu2 %v7334_v43, %s7008_s13  ;;  %332 = vrot.lane.b32.xlu1 %v7334_v43, %s7002_s21 }
  0xca   :  { %720 = vrot.lane.b32.xlu0 %v7334_v43, %s7007_s12  ;;  %6023 = vmatmul.msk.bf16.gmra.mxu0 %vm158_vm0, %v138_v54 }
  0xce   :  { %v238_v57 = vpop.f32.mrf.mxu0 }
  0xcf   :  { %v7424_v26 = vpack.c.bf16 %v238_v57, %v236_v53 }
  0xd1   :  { %1624 = vrot.lane.b32.xlu2 %v7334_v43, %s7000_s20  ;;  %704 = vrot.lane.b32.xlu1 %v7334_v43, %s7006_s11 }
  0xd2   :  { %1156 = vrot.lane.b32.xlu0 %v7334_v43, %s7001_s2 }
  0xd6   :  { %v241_v2 = vpop.f32.mrf.mxu0 }
  0xd9   :  { %1437 = vrot.lane.b32.xlu2 %v7334_v43, %s7003_s22  ;;  %985 = vrot.lane.b32.xlu1 %v7334_v43, %s7009_s27 }
  0xda   :  { %600 = vrot.lane.b32.xlu0 %v7391_v5, %s7005_s24  ;;  %6024 = vmatmul.msk.bf16.gmra.mxu0 %vm158_vm0, %v139_v3 }
  0xde   :  { %v243_v8 = vpop.f32.mrf.mxu0 }
  0xdf   :  { %v7435_v30 = vpack.c.bf16 %v243_v8, %v241_v2 }
  0xe1   :  { %706 = vrot.lane.b32.xlu2 %v7391_v5, %s7006_s11  ;;  %334 = vrot.lane.b32.xlu1 %v7391_v5, %s7002_s21  ;;  %12038 = vst [vmem:[#allocation34_spill] sm:$0xff] %v7435_v30 }
  0xe2   :  { %987 = vrot.lane.b32.xlu0 %v7391_v5, %s7009_s27 }
  0xe6   :  { %v246_v22 = vpop.f32.mrf.mxu0 }
  0xe9   :  { %722 = vrot.lane.b32.xlu1 %v7391_v5, %s7007_s12  ;;  %336 = vrot.lane.b32.xlu2 %v7424_v26, %s7002_s21 }
  0xea   :  { %1174 = vrot.lane.b32.xlu0 %v7391_v5, %s7008_s13  ;;  %6025 = vmatmul.msk.bf16.gmra.mxu0 %vm158_vm0, %v140_v23 }
  0xeb   :  { %v7433_v29 = vpop.permute.xlu2 %1620 }
  0xec   :  { %12037 = vst [vmem:[#allocation33_spill] sm:$0xff] %v7433_v29 }
  0xee   :  { %v248_v31 = vpop.f32.mrf.mxu0 }
  0xef   :  { %v7498_v3 = vpack.c.bf16 %v248_v31, %v246_v22 }
  0xf1   :  { %1158 = vrot.lane.b32.xlu1 %v7391_v5, %s7001_s2  ;;  %989 = vrot.lane.b32.xlu2 %v7424_v26, %s7009_s27  ;;  %12043 = vst [vmem:[#allocation39_spill] sm:$0xff] %v7498_v3 }
  0xf2   :  { %604 = vrot.lane.b32.xlu0 %v7435_v30, %s7005_s24 }
  0xf3   :  { %v7459_v45 = vpop.permute.xlu2 %1433 }
  0xf6   :  { %v251_v46 = vpop.f32.mrf.mxu0 }
  0xf9   :  { %1626 = vrot.lane.b32.xlu1 %v7391_v5, %s7000_s20  ;;  %1160 = vrot.lane.b32.xlu2 %v7424_v26, %s7001_s2 }
  0xfa   :  { %991 = vrot.lane.b32.xlu0 %v7435_v30, %s7009_s27  ;;  %6026 = vmatmul.msk.bf16.gmra.mxu0 %vm158_vm0, %v141_v47 }
  0xfb   :  { %v7470_v50 = vpop.permute.xlu2 %702 }
  0xfe   :  { %v253_v53 = vpop.f32.mrf.mxu0 }
  0xff   :  { %v7568_v51 = vpack.c.bf16 %v253_v53, %v251_v46 }
 0x101   :  { %1439 = vrot.lane.b32.xlu1 %v7391_v5, %s7003_s22  ;;  %1628 = vrot.lane.b32.xlu2 %v7424_v26, %s7000_s20  ;;  %12051 = vst [vmem:[#allocation47_spill] sm:$0xff] %v7568_v51 }
 0x102   :  { %1162 = vrot.lane.b32.xlu0 %v7435_v30, %s7001_s2 }
 0x103   :  { %v7478_v54 = vpop.permute.xlu1 %1152  ;;  %v7480_v57 = vpop.permute.xlu2 %718 }
 0x104   :  { %12041 = vst [vmem:[#allocation37_spill] sm:$0xff] %v7478_v54  ;;  %v7482_v58 = vpop.permute.xlu0 %328 }
 0x106   :  { %v7484_v59 = vpop.f32.mrf.mxu0 }
 0x109   :  { %602 = vrot.lane.b32.xlu1 %v7424_v26, %s7005_s24  ;;  %1441 = vrot.lane.b32.xlu2 %v7424_v26, %s7003_s22 }
 0x10a   :  { %1630 = vrot.lane.b32.xlu0 %v7435_v30, %s7000_s20 }
 0x10b   :  { %v7492_v60 = vpop.permute.xlu1 %1604  ;;  %v7494_v61 = vpop.permute.xlu2 %983 }
 0x10c   :  { %12042 = vst [vmem:[#allocation38_spill] sm:$0xff] %v7492_v60  ;;  %v7496_v2 = vpop.permute.xlu0 %594 }
 0x10e   :  { %v7500_v8 = vpop.f32.mrf.mxu0 }
 0x10f   :  { %v7620_v42 = vpack.c.bf16 %v7500_v8, %v7484_v59 }
 0x111   :  { %708 = vrot.lane.b32.xlu1 %v7424_v26, %s7006_s11  ;;  %338 = vrot.lane.b32.xlu2 %v7435_v30, %s7002_s21  ;;  %12054 = vst [vmem:[#allocation50_spill] sm:$0xff] %v7620_v42 }
 0x112   :  { %340 = vrot.lane.b32.xlu0 %v7498_v3, %s7002_s21 }
 0x113   :  { %v7508_v9 = vpop.permute.xlu2 %1154  ;;  %v7510_v12 = vpop.permute.xlu1 %596 }
 0x114   :  { %12044 = vst [vmem:[#allocation40_spill] sm:$0xff] %v7508_v9  ;;  %v7512_v15 = vpop.permute.xlu0 %700 }
 0x117   :  { %v7514_v16 = vpop.f32.mrf.mxu0 }
 0x119   :  { %724 = vrot.lane.b32.xlu1 %v7424_v26, %s7007_s12  ;;  %710 = vrot.lane.b32.xlu2 %v7435_v30, %s7006_s11 }
 0x11a   :  { %728 = vrot.lane.b32.xlu0 %v7498_v3, %s7007_s12 }
 0x11b   :  { %v7522_v22 = vpop.permute.xlu1 %1170  ;;  %v7524_v23 = vpop.permute.xlu2 %598 }
 0x11c   :  { %12045 = vst [vmem:[#allocation41_spill] sm:$0xff] %v7522_v22  ;;  %v7526_v31 = vpop.permute.xlu0 %716 }
 0x11f   :  { %v7528_v32 = vpop.f32.mrf.mxu0 }
 0x120   :  { %v7650_v13 = vpack.c.bf16 %v7528_v32, %v7514_v16 }
 0x121   :  { %1176 = vrot.lane.b32.xlu1 %v7424_v26, %s7008_s13  ;;  %1178 = vrot.lane.b32.xlu2 %v7435_v30, %s7008_s13 }
 0x122   :  { %712 = vrot.lane.b32.xlu0 %v7498_v3, %s7006_s11  ;;  %12057 = vst [vmem:[#allocation53_spill] sm:$0xff] %v7650_v13 }
 0x123   :  { %v7536_v33 = vpop.permute.xlu1 %1622  ;;  %v7538_v36 = vpop.permute.xlu2 %1172 }
 0x124   :  { %12046 = vst [vmem:[#allocation42_spill] sm:$0xff] %v7536_v33  ;;  %v7540_v39 = vpop.permute.xlu0 %981 }
 0x125   :  { %12047 = vst [vmem:[#allocation43_spill] sm:$0xff] %v7538_v36 }
 0x127   :  { %v7542_v47 = vpop.f32.mrf.mxu0 }
 0x129   :  { %726 = vrot.lane.b32.xlu1 %v7435_v30, %s7007_s12  ;;  %1443 = vrot.lane.b32.xlu2 %v7435_v30, %s7003_s22 }
 0x12a   :  { %1180 = vrot.lane.b32.xlu0 %v7498_v3, %s7008_s13 }
 0x12b   :  { %v7550_v44 = vpop.permute.xlu1 %1435  ;;  %v7552_v40 = vpop.permute.xlu2 %1624 }
 0x12c   :  { %12048 = vst [vmem:[#allocation44_spill] sm:$0xff] %v7552_v40  ;;  %v7554_v19 = vpop.permute.xlu0 %1168 }
 0x12d   :  { %12049 = vst [vmem:[#allocation45_spill] sm:$0xff] %v7554_v19 }
 0x12f   :  { %v268_v0 = vpop.f32.mrf.mxu0 }
 0x130   :  { %v7665_v29 = vpack.c.bf16 %v268_v0, %v7542_v47 }
 0x131   :  { %993 = vrot.lane.b32.xlu1 %v7498_v3, %s7009_s27  ;;  %606 = vrot.lane.b32.xlu2 %v7498_v3, %s7005_s24 }
 0x132   :  { %1445 = vrot.lane.b32.xlu0 %v7498_v3, %s7003_s22  ;;  %12059 = vst [vmem:[#allocation55_spill] sm:$0xff] %v7665_v29 }
 0x133   :  { %v7562_v52 = vpop.permute.xlu1 %1606  ;;  %v7564_v17 = vpop.permute.xlu2 %1437 }
 0x134   :  { %12050 = vst [vmem:[#allocation46_spill] sm:$0xff] %v7562_v52  ;;  %v7566_v1 = vpop.permute.xlu0 %330 }
 0x137   :  { %v271_v38 = vpop.f32.mrf.mxu0 }
 0x139   :  { %1164 = vrot.lane.b32.xlu1 %v7498_v3, %s7001_s2  ;;  %714 = vrot.lane.b32.xlu2 %v7568_v51, %s7006_s11 }
 0x13a   :  { %730 = vrot.lane.b32.xlu0 %v7568_v51, %s7007_s12 }
 0x13b   :  { %v7576_v37 = vpop.permute.xlu1 %332  ;;  %v7578_v25 = vpop.permute.xlu2 %706 }
 0x13c   :  { %v7580_v10 = vpop.permute.xlu0 %720 }
 0x13f   :  { %v273_v63 = vpop.f32.mrf.mxu0 }
 0x140   :  { %v7679_v40 = vpack.c.bf16 %v273_v63, %v271_v38 }
 0x141   :  { %1632 = vrot.lane.b32.xlu1 %v7498_v3, %s7000_s20  ;;  %995 = vrot.lane.b32.xlu2 %v7568_v51, %s7009_s27 }
 0x142   :  { %1610 = vrot.lane.b32.xlu0 %v7391_v5, %s7004_s23  ;;  %12062 = vst [vmem:[#allocation58_spill] sm:$0xff] %v7679_v40 }
 0x143   :  { %v7588_v46 = vpop.permute.xlu1 %704  ;;  %v7590_v53 = vpop.permute.xlu2 %336 }
 0x144   :  { %v7592_v24 = vpop.permute.xlu0 %1156 }
 0x145   :  { %12052 = vst [vmem:[#allocation48_spill] sm:$0xff] %v7592_v24 }
 0x147   :  { %v276_v11 = vpop.f32.mrf.mxu0 }
 0x149   :  { %1166 = vrot.lane.b32.xlu2 %v7568_v51, %s7001_s2  ;;  %342 = vrot.lane.b32.xlu1 %v7568_v51, %s7002_s21 }
 0x14a   :  { %1612 = vrot.lane.b32.xlu0 %v7424_v26, %s7004_s23 }
 0x14b   :  { %v7600_v62 = vpop.permute.xlu1 %985  ;;  %v7602_v56 = vpop.permute.xlu2 %989 }
 0x14c   :  { %v7604_v55 = vpop.permute.xlu0 %600 }
 0x14f   :  { %v278_v49 = vpop.f32.mrf.mxu0 }
 0x151   :  { %1634 = vrot.lane.b32.xlu2 %v7568_v51, %s7000_s20  ;;  %608 = vrot.lane.b32.xlu1 %v7568_v51, %s7005_s24 }
 0x152   :  { %1614 = vrot.lane.b32.xlu0 %v7435_v30, %s7004_s23 }
 0x153   :  { %v7612_v41 = vpop.permute.xlu1 %334  ;;  %v7614_v35 = vpop.permute.xlu2 %1160 }
 0x154   :  { %12053 = vst [vmem:[#allocation49_spill] sm:$0xff] %v7614_v35  ;;  %v7616_v48 = vpop.permute.xlu0 %987  ;;  %v7693_v35 = vpack.c.bf16 %v278_v49, %v276_v11 }
 0x156   :  { %12064 = vst [vmem:[#allocation60_spill] sm:$0xff] %v7693_v35 }
 0x157   :  { %v7622_v34 = vpop.f32.mrf.mxu0 }
 0x159   :  { %1616 = vrot.lane.b32.xlu2 %v7498_v3, %s7004_s23  ;;  %1182 = vrot.lane.b32.xlu1 %v7568_v51, %s7008_s13 }
 0x15a   :  { %2457 = vrot.lane.b32.xlu0 %v7620_v42, %s7007_s12 }
 0x15b   :  { %v7630_v27 = vpop.permute.xlu1 %722  ;;  %v7632_v28 = vpop.permute.xlu2 %1628 }
 0x15c   :  { %12055 = vst [vmem:[#allocation51_spill] sm:$0xff] %v7632_v28  ;;  %v7634_v20 = vpop.permute.xlu0 %1174 }
 0x15f   :  { %v283_v59 = vpop.f32.mrf.mxu0 }
 0x161   :  { %1618 = vrot.lane.b32.xlu2 %v7568_v51, %s7004_s23  ;;  %1447 = vrot.lane.b32.xlu1 %v7568_v51, %s7003_s22 }
 0x162   :  { %1895 = vrot.lane.b32.xlu0 %v7435_v30, %s7010_s0  ;;  %v7738_v30 = vpack.c.bf16 %v283_v59, %v7622_v34 }
 0x163   :  { %v7642_v8 = vpop.permute.xlu1 %1158  ;;  %v7644_v21 = vpop.permute.xlu2 %1441 }
 0x164   :  { %12056 = vst [vmem:[#allocation52_spill] sm:$0xff] %v7642_v8  ;;  %v7646_v14 = vpop.permute.xlu0 %604 }
 0x165   :  { %12070 = vst [vmem:[#allocation66_spill] sm:$0xff] %v7738_v30 }
 0x167   :  { %v286_v60 = vpop.f32.mrf.mxu0 }
 0x169   :  { %1608 = vrot.lane.b32.xlu1 %v7334_v43, %s7004_s23  ;;  %2071 = vrot.lane.b32.xlu2 %v7620_v42, %s7002_s21 }
 0x16a   :  { %2073 = vrot.lane.b32.xlu0 %v7650_v13, %s7002_s21 }
 0x16b   :  { %v7658_v6 = vpop.permute.xlu1 %1626  ;;  %v7660_v7 = vpop.permute.xlu2 %338 }
 0x16c   :  { %12058 = vst [vmem:[#allocation54_spill] sm:$0xff] %v7658_v6  ;;  %v7662_v52 = vpop.permute.xlu0 %991 }
 0x16f   :  { %v288_v6 = vpop.f32.mrf.mxu0 }
 0x170   :  { %v7705_v24 = vpack.c.bf16 %v288_v6, %v286_v60 }
 0x171   :  { %2441 = vrot.lane.b32.xlu2 %v7620_v42, %s7006_s11  ;;  %2459 = vrot.lane.b32.xlu1 %v7650_v13, %s7007_s12 }
 0x172   :  { %2075 = vrot.lane.b32.xlu0 %v7665_v29, %s7002_s21  ;;  %12066 = vst [vmem:[#allocation62_spill] sm:$0xff] %v7705_v24 }
 0x173   :  { %v7673_v16 = vpop.permute.xlu1 %1439  ;;  %v7675_v32 = vpop.permute.xlu2 %710 }
 0x174   :  { %12060 = vst [vmem:[#allocation56_spill] sm:$0xff] %v7675_v32  ;;  %v7677_v33 = vpop.permute.xlu0 %1162 }
 0x175   :  { %12061 = vst [vmem:[#allocation57_spill] sm:$0xff] %v7677_v33 }
 0x177   :  { %v291_v63 = vpop.f32.mrf.mxu0 }
 0x179   :  { %1899 = vrot.lane.b32.xlu2 %v7568_v51, %s7010_s0  ;;  %2443 = vrot.lane.b32.xlu1 %v7650_v13, %s7006_s11 }
 0x17a   :  { %2077 = vrot.lane.b32.xlu0 %v7679_v40, %s7002_s21 }
 0x17b   :  { %v7687_v0 = vpop.permute.xlu1 %602  ;;  %v7689_v47 = vpop.permute.xlu2 %1178 }
 0x17c   :  { %v7691_v28 = vpop.permute.xlu0 %1630 }
 0x17d   :  { %12063 = vst [vmem:[#allocation59_spill] sm:$0xff] %v7691_v28 }
 0x17f   :  { %v293_v49 = vpop.f32.mrf.mxu0 }
 0x180   :  { %v7713_v54 = vpack.c.bf16 %v293_v49, %v291_v63 }
 0x181   :  { %1897 = vrot.lane.b32.xlu2 %v7498_v3, %s7010_s0  ;;  %2461 = vrot.lane.b32.xlu1 %v7665_v29, %s7007_s12 }
 0x182   :  { %2079 = vrot.lane.b32.xlu0 %v7693_v35, %s7002_s21  ;;  %12067 = vst [vmem:[#allocation63_spill] sm:$0xff] %v7713_v54 }
 0x183   :  { %v7701_v38 = vpop.permute.xlu1 %708  ;;  %v7703_v33 = vpop.permute.xlu2 %1443 }
 0x184   :  { %12065 = vst [vmem:[#allocation61_spill] sm:$0xff] %v7701_v38  ;;  %v341_v8 = vpop.permute.xlu0 %340 }
 0x189   :  { %2445 = vrot.lane.b32.xlu2 %v7665_v29, %s7006_s11  ;;  %2463 = vrot.lane.b32.xlu1 %v7679_v40, %s7007_s12 }
 0x18a   :  { %2919 = vrot.lane.b32.xlu0 %v7705_v24, %s7008_s13 }
 0x18b   :  { %v725_v11 = vpop.permute.xlu1 %724  ;;  %v607_v28 = vpop.permute.xlu2 %606 }
 0x18c   :  { %v729_v9 = vpop.permute.xlu0 %728 }
 0x18d   :  { %v775_v36 = vsel %vm344_vm1, %v729_v9, 0 }
 0x191   :  { %2447 = vrot.lane.b32.xlu2 %v7679_v40, %s7006_s11  ;;  %2465 = vrot.lane.b32.xlu1 %v7693_v35, %s7007_s12 }
 0x192   :  { %2921 = vrot.lane.b32.xlu0 %v7713_v54, %s7008_s13 }
 0x193   :  { %v7721_v6 = vpop.permute.xlu1 %1176  ;;  %v7723_v60 = vpop.permute.xlu2 %714 }
 0x194   :  { %12068 = vst [vmem:[#allocation64_spill] sm:$0xff] %v7723_v60  ;;  %v7725_v51 = vpop.permute.xlu0 %712 }
 0x195   :  { %12069 = vst [vmem:[#allocation65_spill] sm:$0xff] %v7725_v51 }
 0x199   :  { %2915 = vrot.lane.b32.xlu2 %v7693_v35, %s7008_s13  ;;  %2449 = vrot.lane.b32.xlu1 %v7693_v35, %s7006_s11 }
 0x19a   :  { %2911 = vrot.lane.b32.xlu0 %v7665_v29, %s7008_s13 }
 0x19b   :  { %v727_v63 = vpop.permute.xlu1 %726  ;;  %v7733_v49 = vpop.permute.xlu2 %995 }
 0x19c   :  { %v7735_v3 = vpop.permute.xlu0 %1180 }
 0x1a1   :  { %2467 = vrot.lane.b32.xlu2 %v7738_v30, %s7007_s12  ;;  %2081 = vrot.lane.b32.xlu1 %v7738_v30, %s7002_s21 }
 0x1a2   :  { %2907 = vrot.lane.b32.xlu0 %v7620_v42, %s7008_s13 }
 0x1a3   :  { %v7746_v60 = vpop.permute.xlu1 %993  ;;  %v7748_v51 = vpop.permute.xlu2 %1166 }
 0x1a4   :  { %12071 = vst [vmem:[#allocation67_spill] sm:$0xff] %v7748_v51  ;;  %v7750_v32 = vpop.permute.xlu0 %1445 }
 0x1a9   :  { %2917 = vrot.lane.b32.xlu2 %v7738_v30, %s7008_s13  ;;  %2083 = vrot.lane.b32.xlu1 %v7705_v24, %s7002_s21 }
 0x1aa   :  { %2893 = vrot.lane.b32.xlu0 %v7650_v13, %s7001_s2 }
 0x1ab   :  { %v7758_v34 = vpop.permute.xlu1 %1164  ;;  %v7760_v59 = vpop.permute.xlu2 %1634 }
 0x1ac   :  { %12072 = vst [vmem:[#allocation68_spill] sm:$0xff] %v7758_v34  ;;  %v731_v19 = vpop.permute.xlu0 %730  ;;  %v772_v34 = vsel %vm344_vm1, %v727_v63, 0 }
 0x1ad   :  { %12073 = vst [vmem:[#allocation69_spill] sm:$0xff] %v7760_v59  ;;  %v778_v38 = vsel %vm344_vm1, %v731_v19, 0 }
 0x1ae   :  { %780 = vmatpush.bf16.xpose.msra.mxu3 %v778_v38 }
 0x1b1   :  { %2451 = vrot.lane.b32.xlu2 %v7738_v30, %s7006_s11  ;;  %3369 = vrot.lane.b32.xlu1 %v7705_v24, %s7000_s20 }
 0x1b3   :  { %v7767_v51 = vpop.permute.xlu1 %1632  ;;  %v7769_v22 = vpop.permute.xlu2 %1616 }
 0x1b4   :  { %12074 = vst [vmem:[#allocation70_spill] sm:$0xff] %v7769_v22  ;;  %v388_v22 = vsel %vm344_vm1, %v341_v8, 0 }
 0x1b6   :  { %781 = vmatpush.bf16.xpose.msra.mxu3 %v775_v36 }
 0x1b9   :  { %3367 = vrot.lane.b32.xlu2 %v7738_v30, %s7000_s20  ;;  %2085 = vrot.lane.b32.xlu1 %v7713_v54, %s7002_s21 }
 0x1bb   :  { %v7776_v19 = vpop.permute.xlu2 %1618  ;;  %v343_v38 = vpop.permute.xlu1 %342 }
 0x1bc   :  { %12075 = vst [vmem:[#allocation71_spill] sm:$0xff] %v7776_v19  ;;  %v391_v59 = vsel %vm344_vm1, %v343_v38, 0  ;;  %v769_v19 = vsel %vm344_vm1, %v725_v11, 0  ;;  %v12081_v38 = vld [vmem:[#allocation41_spill] sm:$0xff] }
 0x1bd   :  { %393 = vmatpush.bf16.xpose.msra.mxu1 %v391_v59  ;;  %v385_v59 = vsel %vm344_vm1, %v7660_v7, 0  ;;  %v382_v7 = vsel %vm344_vm1, %v7590_v53, 0 }
 0x1be   :  { %782 = vmatpush.bf16.xpose.msra.mxu3 %v772_v34 }
 0x1c1   :  { %2469 = vrot.lane.b32.xlu2 %v7705_v24, %s7007_s12  ;;  %3365 = vrot.lane.b32.xlu1 %v7693_v35, %s7000_s20 }
 0x1c3   :  { %v609_v9 = vpop.permute.xlu1 %608  ;;  %v7784_v36 = vpop.permute.xlu2 %2071 }
 0x1c4   :  { %618 = vmatpush.bf16.msra.mxu2 %v609_v9  ;;  %v1212_v9 = vsel %vm344_vm1, %v12081_v38, 0 }
 0x1c5   :  { %394 = vmatpush.bf16.xpose.msra.mxu1 %v388_v22  ;;  %v766_v22 = vsel %vm344_vm1, %v7630_v27, 0 }
 0x1c6   :  { %783 = vmatpush.bf16.xpose.msra.mxu3 %v769_v19 }
 0x1c8   :  { %619 = vmatpush.bf16.msra.mxu2 %v607_v28 }
 0x1c9   :  { %2471 = vrot.lane.b32.xlu2 %v7713_v54, %s7007_s12  ;;  %1891 = vrot.lane.b32.xlu1 %v7391_v5, %s7010_s0 }
 0x1cb   :  { %v1183_v63 = vpop.permute.xlu1 %1182  ;;  %v7792_v34 = vpop.permute.xlu2 %2441 }
 0x1cc   :  { %620 = vmatpush.bf16.msra.mxu2 %v7646_v14  ;;  %v763_v14 = vsel %vm344_vm1, %v7580_v10, 0  ;;  %v760_v10 = vsel %vm344_vm1, %v7480_v57, 0  ;;  %v757_v57 = vsel %vm344_vm1, %v7526_v31, 0  ;;  %v373_v31 = vsel %vm344_vm1, %v7566_v1, 0 }
 0x1cd   :  { %395 = vmatpush.bf16.xpose.msra.mxu1 %v385_v59 }
 0x1ce   :  { %784 = vmatpush.bf16.xpose.msra.mxu3 %v766_v22  ;;  %v12083_v22 = vld [vmem:[#allocation45_spill] sm:$0xff] }
 0x1d0   :  { %621 = vmatpush.bf16.msra.mxu2 %v7687_v0 }
 0x1d1   :  { %3371 = vrot.lane.b32.xlu2 %v7713_v54, %s7000_s20  ;;  %2913 = vrot.lane.b32.xlu1 %v7679_v40, %s7008_s13 }
 0x1d3   :  { %v1448_v28 = vpop.permute.xlu1 %1447  ;;  %v7804_v8 = vpop.permute.xlu2 %1899 }
 0x1d4   :  { %622 = vmatpush.bf16.msra.mxu2 %v7604_v55  ;;  %v379_v55 = vsel %vm344_vm1, %v7612_v41, 0  ;;  %v376_v41 = vsel %vm344_vm1, %v7576_v37, 0 }
 0x1d5   :  { %396 = vmatpush.bf16.xpose.msra.mxu1 %v382_v7 }
 0x1d6   :  { %785 = vmatpush.bf16.xpose.msra.mxu3 %v763_v14 }
 0x1d8   :  { %623 = vmatpush.bf16.msra.mxu2 %v7524_v23 }
 0x1d9   :  { %1893 = vrot.lane.b32.xlu2 %v7424_v26, %s7010_s0  ;;  %2453 = vrot.lane.b32.xlu1 %v7705_v24, %s7006_s11 }
 0x1db   :  { %v7816_v27 = vpop.permute.xlu1 %1608  ;;  %v7818_v0 = vpop.permute.xlu2 %1897 }
 0x1dc   :  { %12076 = vst [vmem:[#allocation72_spill] sm:$0xff] %v7816_v27  ;;  %624 = vmatpush.bf16.msra.mxu2 %v7510_v12  ;;  %v6061_v27 = vld [vmem:[%s11930_s7 + $0x110] sm:$0xff] }
 0x1dd   :  { %397 = vmatpush.bf16.xpose.msra.mxu1 %v379_v55 }
 0x1de   :  { %786 = vmatpush.bf16.xpose.msra.mxu3 %v760_v10 }
 0x1e0   :  { %625 = vmatpush.bf16.msra.mxu2 %v7496_v2 }
 0x1e1   :  { %1887 = vrot.lane.b32.xlu2 %v7273_v18, %s7010_s0  ;;  %3363 = vrot.lane.b32.xlu1 %v7679_v40, %s7000_s20 }
 0x1e3   :  { %v7831_v23 = vpop.permute.xlu1 %2459  ;;  %v7833_v12 = vpop.permute.xlu2 %2445 }
 0x1e4   :  { %1005 = vmatpush.bf16.msrb.mxu2 %v7733_v49 }
 0x1e5   :  { %398 = vmatpush.bf16.xpose.msra.mxu1 %v376_v41 }
 0x1e6   :  { %787 = vmatpush.bf16.xpose.msra.mxu3 %v757_v57  ;;  %v12084_v57 = vld [vmem:[#allocation56_spill] sm:$0xff] }
 0x1e8   :  { %1006 = vmatpush.bf16.msrb.mxu2 %v7746_v60 }
 0x1e9   :  { %2909 = vrot.lane.b32.xlu2 %v7650_v13, %s7008_s13  ;;  %1889 = vrot.lane.b32.xlu1 %v7334_v43, %s7010_s0 }
 0x1eb   :  { %v7846_v2 = vpop.permute.xlu1 %2443  ;;  %v7848_v37 = vpop.permute.xlu2 %2447 }
 0x1ec   :  { %1007 = vmatpush.bf16.msrb.mxu2 %v7662_v52  ;;  %v7858_v52 = vpop.permute.xlu0 %1610 }
 0x1ed   :  { %6051 = vmatmul.msk.bf16.vlgmr.msra.gmra.mxu3 %vm344_vm1, %v7512_v15  ;;  %399 = vmatpush.bf16.xpose.msra.mxu1 %v373_v31  ;;  %12077 = vst [vmem:[#allocation73_spill] sm:$0xff] %v7858_v52 }
 0x1ee   :  { %1457 = vmatpush.bf16.msrb.mxu3 %v1448_v28  ;;  %v1209_v28 = vsel %vm344_vm1, %v12083_v22, 0  ;;  %v6036_v22 = vld [vmem:[%s11930_s7 + $0x88] sm:$0xff] }
 0x1f0   :  { %1008 = vmatpush.bf16.msrb.mxu2 %v7602_v56  ;;  %v370_v56 = vsel %vm344_vm1, %v7482_v58, 0 }
 0x1f1   :  { %2455 = vrot.lane.b32.xlu2 %v7713_v54, %s7006_s11  ;;  %3361 = vrot.lane.b32.xlu1 %v7665_v29, %s7000_s20 }
 0x1f2   :  { %1458 = vmatpush.bf16.msrb.mxu3 %v7750_v32  ;;  %v1218_v32 = vsel %vm344_vm1, %v7634_v20, 0 }
 0x1f3   :  { %v7864_v1 = vpop.permute.xlu1 %2461  ;;  %v7866_v15 = vpop.permute.xlu2 %2915 }
 0x1f4   :  { %1009 = vmatpush.bf16.msrb.mxu2 %v7616_v48  ;;  %v7881_v58 = vpop.permute.xlu0 %1612 }
 0x1f5   :  { %400 = vmatpush.bf16.xpose.msra.mxu1 %v370_v56  ;;  %12078 = vst [vmem:[#allocation74_spill] sm:$0xff] %v7881_v58 }
 0x1f6   :  { %1459 = vmatpush.bf16.msrb.mxu3 %v7703_v33  ;;  %v1230_v33 = vsel %vm344_vm1, %v1183_v63, 0 }
 0x1f8   :  { %1010 = vmatpush.bf16.msrb.mxu2 %v7600_v62  ;;  %v1227_v62 = vsel %vm344_vm1, %v7735_v3, 0 }
 0x1f9   :  { %3359 = vrot.lane.b32.xlu2 %v7650_v13, %s7000_s20  ;;  %1885 = vrot.lane.b32.xlu1 %v7240_v4, %s7010_s0 }
 0x1fa   :  { %1460 = vmatpush.bf16.msrb.mxu3 %v7644_v21 }
 0x1fb   :  { %v7879_v21 = vpop.permute.xlu1 %2463  ;;  %v2468_v48 = vpop.permute.xlu2 %2467 }
 0x1fc   :  { %1011 = vmatpush.bf16.msrb.mxu2 %v7494_v61  ;;  %6027 = vmatmul.msk.bf16.vlgmr.msra.gmra.mxu1 %vm344_vm1, %v7240_v4  ;;  %v7900_v61 = vpop.permute.xlu0 %1614  ;;  %v2513_v14 = vsel %vm344_vm1, %v2468_v48, 0 }
 0x1fd   :  { %1232 = vmatpush.bf16.xpose.msrb.mxu1 %v1230_v33  ;;  %6052 = vmatmul.msk.bf16.gmra.mxu3 %vm344_vm1, %v7470_v50  ;;  %v1224_v50 = vsel %vm344_vm1, %v7689_v47, 0  ;;  %12079 = vst [vmem:[#allocation75_spill] sm:$0xff] %v7900_v61  ;;  %v2507_v33 = vsel %vm344_vm1, %v7879_v21, 0  ;;  %v2501_v21 = vsel %vm344_vm1, %v7831_v23, 0 }
 0x1fe   :  { %1461 = vmatpush.bf16.msrb.mxu3 %v7673_v16 }
 0x200   :  { %1012 = vmatpush.bf16.msrb.mxu2 %v7540_v39 }
 0x201   :  { %3341 = vrot.lane.b32.xlu2 %v7620_v42, %s7004_s23  ;;  %3357 = vrot.lane.b32.xlu1 %v7620_v42, %s7000_s20 }
 0x202   :  { %1462 = vmatpush.bf16.msrb.mxu3 %v7564_v17 }
 0x203   :  { %v2466_v4 = vpop.permute.xlu1 %2465  ;;  %v7896_v17 = vpop.permute.xlu2 %2917 }
 0x204   :  { %v2458_v39 = vpop.permute.xlu0 %2457  ;;  %v2510_v41 = vsel %vm344_vm1, %v2466_v4, 0  ;;  %v12086_v4 = vld [vmem:[#allocation34_spill] sm:$0xff] }
 0x205   :  { %1233 = vmatpush.bf16.xpose.msrb.mxu1 %v1227_v62 }
 0x206   :  { %1463 = vmatpush.bf16.msrb.mxu3 %v7550_v44 }
 0x209   :  { %2891 = vrot.lane.b32.xlu1 %v7620_v42, %s7001_s2 }
 0x20a   :  { %1464 = vmatpush.bf16.msrb.mxu3 %v7459_v45  ;;  %v1221_v45 = vsel %vm344_vm1, %v7721_v6, 0 }
 0x20b   :  { %v7904_v44 = vpop.permute.xlu1 %2449  ;;  %v7906_v3 = vpop.permute.xlu2 %2451 }
 0x20c   :  { %6028 = vmatmul.msk.bf16.gmra.mxu1 %vm344_vm1, %v7273_v18  ;;  %v7918_v47 = vpop.permute.xlu0 %1895  ;;  %v12080_v18 = vld [vmem:[#allocation43_spill] sm:$0xff] }
 0x20d   :  { %1234 = vmatpush.bf16.xpose.msrb.mxu1 %v1224_v50  ;;  %6053 = vmatmul.msk.bf16.gmra.mxu3 %vm344_vm1, %v7588_v46  ;;  %v1215_v46 = vsel %vm344_vm1, %v12080_v18, 0  ;;  %v12087_v50 = vld [vmem:[#allocation65_spill] sm:$0xff]  ;;  %v2498_v18 = vsel %vm344_vm1, %v2458_v39, 0  ;;  %v2112_v39 = vsel %vm344_vm1, %v7784_v36, 0 }
 0x213   :  { %v7914_v53 = vpop.permute.xlu2 %3367  ;;  %v2082_v16 = vpop.permute.xlu1 %2081 }
 0x214   :  { %v2074_v20 = vpop.permute.xlu0 %2073 }
 0x215   :  { %1235 = vmatpush.bf16.xpose.msrb.mxu1 %v1221_v45  ;;  %v2115_v23 = vsel %vm344_vm1, %v2074_v20, 0  ;;  %v3413_v20 = vsel %vm344_vm1, %v7914_v53, 0  ;;  %v304_v53 = vld [vmem:[%s11930_s7] sm:$0xff] }
 0x21b   :  { %v2470_v11 = vpop.permute.xlu2 %2469  ;;  %v2084_v60 = vpop.permute.xlu1 %2083 }
 0x21c   :  { %6029 = vmatmul.msk.bf16.gmra.mxu1 %vm344_vm1, %v7334_v43  ;;  %v2516_v63 = vsel %vm344_vm1, %v2470_v11, 0  ;;  %v2076_v7 = vpop.permute.xlu0 %2075  ;;  %v2130_v55 = vsel %vm344_vm1, %v2084_v60, 0 }
 0x21d   :  { %1236 = vmatpush.bf16.xpose.msrb.mxu1 %v1218_v32  ;;  %6054 = vmatmul.msk.bf16.gmra.mxu3 %vm344_vm1, %v7578_v25  ;;  %v12082_v25 = vld [vmem:[#allocation61_spill] sm:$0xff]  ;;  %v2118_v32 = vsel %vm344_vm1, %v2076_v7, 0 }
 0x223   :  { %v3370_v6 = vpop.permute.xlu1 %3369  ;;  %v2472_v49 = vpop.permute.xlu2 %2471 }
 0x224   :  { %v2519_v19 = vsel %vm344_vm1, %v2472_v49, 0  ;;  %v2078_v10 = vpop.permute.xlu0 %2077  ;;  %v3416_v38 = vsel %vm344_vm1, %v3370_v6, 0 }
 0x225   :  { %1237 = vmatpush.bf16.xpose.msrb.mxu1 %v1215_v46  ;;  %2521 = vmatpush.bf16.xpose.msrb.mxu0 %v2519_v19  ;;  %v2121_v45 = vsel %vm344_vm1, %v2078_v10, 0  ;;  %v12089_v46 = vld [vmem:[#allocation64_spill] sm:$0xff] }
 0x22b   :  { %v2086_v43 = vpop.permute.xlu1 %2085  ;;  %v3372_v11 = vpop.permute.xlu2 %3371 }
 0x22c   :  { %v2133_v59 = vsel %vm344_vm1, %v2086_v43, 0  ;;  %6030 = vmatmul.msk.bf16.gmra.mxu1 %vm344_vm1, %v7391_v5  ;;  %v2127_v5 = vsel %vm344_vm1, %v2082_v16, 0  ;;  %v2080_v56 = vpop.permute.xlu0 %2079  ;;  %v3419_v60 = vsel %vm344_vm1, %v3372_v11, 0  ;;  %v12091_v43 = vld [vmem:[#allocation47_spill] sm:$0xff]  ;;  %v306_v11 = vld [vmem:[%s11930_s7 + $0x10] sm:$0xff] }
 0x22d   :  { %1238 = vmatpush.bf16.xpose.msrb.mxu1 %v1212_v9  ;;  %6055 = vmatmul.msk.bf16.gmra.mxu3 %vm344_vm1, %v12082_v25  ;;  %v2124_v48 = vsel %vm344_vm1, %v2080_v56, 0  ;;  %v305_v56 = vld [vmem:[%s11930_s7 + $0x8] sm:$0xff] }
 0x22e   :  { %2522 = vmatpush.bf16.xpose.msrb.mxu0 %v2516_v63 }
 0x233   :  { %v3366_v31 = vpop.permute.xlu1 %3365  ;;  %v7971_v19 = vpop.permute.xlu2 %1893 }
 0x234   :  { %v2920_v6 = vpop.permute.xlu0 %2919  ;;  %v3410_v36 = vsel %vm344_vm1, %v3366_v31, 0  ;;  %v6035_v31 = vld [vmem:[%s11930_s7 + $0x80] sm:$0xff] }
 0x235   :  { %1239 = vmatpush.bf16.xpose.msrb.mxu1 %v1209_v28 }
 0x236   :  { %2523 = vmatpush.bf16.xpose.msrb.mxu0 %v2513_v14 }
 0x23b   :  { %v7948_v62 = vpop.permute.xlu1 %1891  ;;  %v7978_v63 = vpop.permute.xlu2 %1887 }
 0x23c   :  { %6031 = vmatmul.msk.bf16.gmra.mxu1 %vm344_vm1, %v7424_v26  ;;  %12085 = vst [vmem:[#allocation43_spill] sm:$0xff] %v7948_v62  ;;  %v2504_v26 = vsel %vm344_vm1, %v7864_v1, 0  ;;  %v12088_v1 = vld [vmem:[#allocation39_spill] sm:$0xff] }
 0x23d   :  { %2135 = vmatpush.bf16.xpose.msra.mxu1 %v2133_v59  ;;  %6056 = vmatmul.msk.bf16.gmra.mxu3 %vm344_vm1, %v12084_v57  ;;  %12090 = vst [vmem:[#allocation41_spill] sm:$0xff] %v7978_v63 }
 0x23e   :  { %2524 = vmatpush.bf16.xpose.msrb.mxu0 %v2510_v41  ;;  %v12093_v41 = vld [vmem:[#allocation37_spill] sm:$0xff] }
 0x243   :  { %v7959_v16 = vpop.permute.xlu1 %2913 }
 0x245   :  { %2136 = vmatpush.bf16.xpose.msra.mxu1 %v2130_v55 }
 0x246   :  { %2525 = vmatpush.bf16.xpose.msrb.mxu0 %v2507_v33 }
 0x24b   :  { %v7969_v49 = vpop.permute.xlu1 %2453 }
 0x24c   :  { %6032 = vmatmul.msk.bf16.gmra.mxu1 %vm344_vm1, %v12086_v4 }
 0x24d   :  { %2137 = vmatpush.bf16.xpose.msra.mxu1 %v2127_v5  ;;  %6057 = vmatmul.msk.bf16.gmra.mxu3 %vm344_vm1, %v12087_v50 }
 0x24e   :  { %2526 = vmatpush.bf16.xpose.msrb.mxu0 %v2504_v26 }
 0x253   :  { %v3364_v9 = vpop.permute.xlu1 %3363 }
 0x254   :  { %v3407_v5 = vsel %vm344_vm1, %v3364_v9, 0 }
 0x255   :  { %2138 = vmatpush.bf16.xpose.msra.mxu1 %v2124_v48 }
 0x256   :  { %2527 = vmatpush.bf16.xpose.msrb.mxu0 %v2501_v21 }
 0x25b   :  { %v7984_v25 = vpop.permute.xlu1 %1889 }
 0x25c   :  { %6033 = vmatmul.msk.bf16.gmra.mxu1 %vm344_vm1, %v12088_v1  ;;  %12092 = vst [vmem:[#allocation61_spill] sm:$0xff] %v7984_v25 }
 0x25d   :  { %2139 = vmatpush.bf16.xpose.msra.mxu1 %v2121_v45  ;;  %6058 = vmatmul.msk.bf16.gmra.mxu3 %vm344_vm1, %v12089_v46  ;;  %v2966_v45 = vsel %vm344_vm1, %v2920_v6, 0 }
 0x25e   :  { %2528 = vmatpush.bf16.xpose.msrb.mxu0 %v2498_v18 }
 0x263   :  { %v3362_v57 = vpop.permute.xlu1 %3361 }
 0x264   :  { %v3404_v21 = vsel %vm344_vm1, %v3362_v57, 0 }
 0x265   :  { %2140 = vmatpush.bf16.xpose.msra.mxu1 %v2118_v32  ;;  %6131 = vmatmul.msk.bf16.vlgmr.msrb.gmra.mxu0 %vm344_vm1, %v7792_v34  ;;  %v7989_v34 = vpop.permute.xlu2 %2909  ;;  %v6037_v32 = vld [vmem:[%s11930_s7 + $0x90] sm:$0xff] }
 0x266   :  { %3421 = vmatpush.bf16.xpose.msra.mxu0 %v3419_v60 }
 0x26b   :  { %v8031_v60 = vpop.permute.xlu1 %1885 }
 0x26c   :  { %6034 = vmatmul.msk.bf16.gmra.mxu1 %vm344_vm1, %v12091_v43  ;;  %12094 = vst [vmem:[#allocation45_spill] sm:$0xff] %v8031_v60  ;;  %v307_v43 = vld [vmem:[%s11930_s7 + $0x18] sm:$0xff] }
 0x26d   :  { %2141 = vmatpush.bf16.xpose.msra.mxu1 %v2115_v23  ;;  %v8013_v33 = vpop.permute.xlu2 %2455 }
 0x26e   :  { %3422 = vmatpush.bf16.xpose.msra.mxu0 %v3416_v38  ;;  %v12095_v38 = vld [vmem:[#allocation40_spill] sm:$0xff] }
 0x270   :  { %v789_v59 = vpop.f32.mrf.mxu3 }
 0x271   :  { %v8015_v26 = vadd.f32 %v6035_v31, %v789_v59 }
 0x273   :  { %v3358_v6 = vpop.permute.xlu1 %3357 }
 0x275   :  { %2142 = vmatpush.bf16.xpose.msra.mxu1 %v2112_v39  ;;  %6132 = vmatmul.msk.bf16.gmra.mxu0 %vm344_vm1, %v7846_v2  ;;  %v2922_v2 = vpop.permute.xlu0 %2921  ;;  %v3360_v46 = vpop.permute.xlu2 %3359  ;;  %v2963_v39 = vsel %vm344_vm1, %v7896_v17, 0  ;;  %v2960_v17 = vsel %vm344_vm1, %v7866_v15, 0  ;;  %v308_v15 = vld [vmem:[%s11930_s7 + $0x20] sm:$0xff] }
 0x276   :  { %3423 = vmatpush.bf16.xpose.msra.mxu0 %v3413_v20  ;;  %v2969_v10 = vsel %vm344_vm1, %v2922_v2, 0  ;;  %v3401_v9 = vsel %vm344_vm1, %v3360_v46, 0  ;;  %v311_v46 = vld [vmem:[%s11930_s7 + $0x38] sm:$0xff] }
 0x278   :  { %v791_v28 = vpop.f32.mrf.mxu3 }
 0x279   :  { %v402_v7 = vpop.f32.mrf.mxu1  ;;  %v7997_v14 = vadd.f32 %v6036_v22, %v791_v28  ;;  %v3398_v22 = vsel %vm344_vm1, %v3358_v6, 0  ;;  %v6044_v6 = vld [vmem:[%s11930_s7 + $0xc8] sm:$0xff] }
 0x27a   :  { %v7999_v55 = vadd.f32 %v402_v7, %v304_v53  ;;  %v6038_v53 = vld [vmem:[%s11930_s7 + $0x98] sm:$0xff] }
 0x27b   :  { %831 = vmax.xlane.f32.xlu1 %v7997_v14 }
 0x27c   :  { %6075 = vmatmul.msk.bf16.vlgmr.msrb.gmra.mxu1 %vm344_vm1, %v12093_v41  ;;  %442 = vmax.xlane.f32.xlu2 %v7999_v55  ;;  %v309_v41 = vld [vmem:[%s11930_s7 + $0x28] sm:$0xff] }
 0x27d   :  { %2971 = vmatpush.bf16.xpose.msrb.mxu1 %v2969_v10  ;;  %v12096_v10 = vld [vmem:[#allocation48_spill] sm:$0xff] }
 0x27e   :  { %3424 = vmatpush.bf16.xpose.msra.mxu0 %v3410_v36 }
 0x280   :  { %v794_v48 = vpop.f32.mrf.mxu3 }
 0x281   :  { %v404_v4 = vpop.f32.mrf.mxu1  ;;  %v8033_v23 = vadd.f32 %v6037_v32, %v794_v48  ;;  %v2912_v48 = vpop.permute.xlu0 %2911 }
 0x282   :  { %v8017_v50 = vadd.f32 %v404_v4, %v305_v56  ;;  %v6040_v4 = vld [vmem:[%s11930_s7 + $0xa8] sm:$0xff] }
 0x284   :  { %444 = vmax.xlane.f32.xlu0 %v8017_v50  ;;  %829 = vmax.xlane.f32.xlu2 %v8015_v26 }
 0x285   :  { %6133 = vmatmul.msk.bf16.gmra.mxu0 %vm344_vm1, %v7833_v12  ;;  %2972 = vmatpush.bf16.xpose.msrb.mxu1 %v2966_v45  ;;  %v6041_v45 = vld [vmem:[%s11930_s7 + $0xb0] sm:$0xff] }
 0x286   :  { %3425 = vmatpush.bf16.xpose.msra.mxu0 %v3407_v5 }
 0x288   :  { %v796_v1 = vpop.f32.mrf.mxu3 }
 0x289   :  { %v407_v18 = vpop.f32.mrf.mxu1  ;;  %v8060_v2 = vadd.f32 %v6038_v53, %v796_v1 }
 0x28a   :  { %v8035_v12 = vadd.f32 %v407_v18, %v306_v11  ;;  %v12097_v18 = vld [vmem:[#allocation52_spill] sm:$0xff] }
 0x28c   :  { %6076 = vmatmul.msk.bf16.gmra.mxu1 %vm344_vm1, %v12095_v38  ;;  %833 = vmax.xlane.f32.xlu0 %v8033_v23 }
 0x28d   :  { %446 = vmax.xlane.f32.xlu1 %v8035_v12  ;;  %2973 = vmatpush.bf16.xpose.msrb.mxu1 %v2963_v39 }
 0x28e   :  { %3426 = vmatpush.bf16.xpose.msra.mxu0 %v3404_v21 }
 0x290   :  { %v8047_v20 = vpop.f32.mrf.mxu3 }
 0x291   :  { %v409_v59 = vpop.f32.mrf.mxu1 }
 0x292   :  { %v8049_v36 = vadd.f32 %v409_v59, %v307_v43 }
 0x294   :  { %448 = vmax.xlane.f32.xlu2 %v8049_v36 }
 0x295   :  { %6134 = vmatmul.msk.bf16.gmra.mxu0 %vm344_vm1, %v7848_v37  ;;  %2974 = vmatpush.bf16.xpose.msrb.mxu1 %v2960_v17  ;;  %v2957_v37 = vsel %vm344_vm1, %v7959_v16, 0  ;;  %v2954_v16 = vsel %vm344_vm1, %v2912_v48, 0 }
 0x296   :  { %3427 = vmatpush.bf16.xpose.msra.mxu0 %v3401_v9  ;;  %v2908_v9 = vpop.permute.xlu0 %2907 }
 0x297   :  { %v2948_v59 = vsel %vm344_vm1, %v2908_v9, 0 }
 0x298   :  { %v801_v28 = vpop.f32.mrf.mxu3 }
 0x299   :  { %v412_v7 = vpop.f32.mrf.mxu1  ;;  %v8090_v11 = vadd.f32 %v6040_v4, %v801_v28  ;;  %v12099_v4 = vld [vmem:[#allocation57_spill] sm:$0xff] }
 0x29a   :  { %v8073_v31 = vadd.f32 %v412_v7, %v308_v15  ;;  %v12098_v7 = vld [vmem:[#allocation49_spill] sm:$0xff] }
 0x29c   :  { %6077 = vmatmul.msk.bf16.gmra.mxu1 %vm344_vm1, %v12096_v10  ;;  %835 = vmax.xlane.f32.xlu2 %v8060_v2 }
 0x29d   :  { %2975 = vmatpush.bf16.xpose.msrb.mxu1 %v2957_v37 }
 0x29e   :  { %3428 = vmatpush.bf16.xpose.msra.mxu0 %v3398_v22 }
 0x2a0   :  { %v804_v5 = vpop.f32.mrf.mxu3 }
 0x2a1   :  { %v414_v57 = vpop.f32.mrf.mxu1  ;;  %v8092_v1 = vadd.f32 %v6041_v45, %v804_v5 }
 0x2a2   :  { %v8075_v56 = vadd.f32 %v414_v57, %v309_v41  ;;  %v314_v41 = vld [vmem:[%s11930_s7 + $0x50] sm:$0xff] }
 0x2a4   :  { %452 = vmax.xlane.f32.xlu0 %v8075_v56  ;;  %450 = vmax.xlane.f32.xlu2 %v8073_v31 }
 0x2a5   :  { %6135 = vmatmul.msk.bf16.gmra.mxu0 %vm344_vm1, %v7904_v44  ;;  %2976 = vmatpush.bf16.xpose.msrb.mxu1 %v2954_v16  ;;  %v2951_v44 = vsel %vm344_vm1, %v7989_v34, 0  ;;  %v312_v34 = vld [vmem:[%s11930_s7 + $0x40] sm:$0xff] }
 0x2a6   :  { %3343 = vrot.lane.b32.xlu1 %v7650_v13, %s7004_s23  ;;  %v6039_v16 = vld [vmem:[%s11930_s7 + $0xa0] sm:$0xff] }
 0x2a7   :  { %v8143_v45 = vadd.f32 %v6039_v16, %v8047_v20  ;;  %v310_v20 = vld [vmem:[%s11930_s7 + $0x30] sm:$0xff]  ;;  %v3342_v16 = vpop.permute.xlu2 %3341 }
 0x2a8   :  { %v806_v21 = vpop.f32.mrf.mxu3 }
 0x2a9   :  { %v417_v32 = vpop.f32.mrf.mxu1 }
 0x2aa   :  { %v8163_v9 = vadd.f32 %v417_v32, %v310_v20  ;;  %v317_v32 = vld [vmem:[%s11930_s7 + $0x68] sm:$0xff]  ;;  %v6045_v20 = vld [vmem:[%s11930_s7 + $0xd0] sm:$0xff] }
 0x2ac   :  { %6078 = vmatmul.msk.bf16.gmra.mxu1 %vm344_vm1, %v12097_v18  ;;  %839 = vmax.xlane.f32.xlu0 %v8090_v11  ;;  %v315_v18 = vld [vmem:[%s11930_s7 + $0x58] sm:$0xff] }
 0x2ad   :  { %841 = vmax.xlane.f32.xlu2 %v8092_v1  ;;  %2977 = vmatpush.bf16.xpose.msrb.mxu1 %v2951_v44 }
 0x2b0   :  { %v809_v38 = vpop.f32.mrf.mxu3 }
 0x2b1   :  { %v419_v39 = vpop.f32.mrf.mxu1 }
 0x2b2   :  { %v8103_v43 = vadd.f32 %v419_v39, %v311_v46 }
 0x2b5   :  { %456 = vmax.xlane.f32.xlu2 %v8103_v43  ;;  %6136 = vmatmul.msk.bf16.gmra.mxu0 %vm344_vm1, %v7906_v3  ;;  %v6043_v3 = vld [vmem:[%s11930_s7 + $0xc0] sm:$0xff] }
 0x2b6   :  { %2978 = vmatpush.bf16.xpose.msrb.mxu1 %v2948_v59  ;;  %v8126_v15 = vadd.f32 %v6043_v3, %v809_v38  ;;  %v6046_v59 = vld [vmem:[%s11930_s7 + $0xd8] sm:$0xff] }
 0x2b8   :  { %v811_v17 = vpop.f32.mrf.mxu3 }
 0x2b9   :  { %v422_v22 = vpop.f32.mrf.mxu1  ;;  %v8117_v28 = vadd.f32 %v6044_v6, %v811_v17 }
 0x2ba   :  { %v8115_v53 = vadd.f32 %v422_v22, %v312_v34  ;;  %v6042_v22 = vld [vmem:[%s11930_s7 + $0xb8] sm:$0xff] }
 0x2bc   :  { %6079 = vmatmul.msk.bf16.gmra.mxu1 %vm344_vm1, %v12098_v7  ;;  %458 = vmax.xlane.f32.xlu0 %v8115_v53  ;;  %v12100_v7 = vld [vmem:[#allocation68_spill] sm:$0xff] }
 0x2bd   :  { %847 = vmax.xlane.f32.xlu2 %v8117_v28 }
 0x2c0   :  { %v814_v10 = vpop.f32.mrf.mxu3 }
 0x2c1   :  { %v424_v37 = vpop.f32.mrf.mxu1 }
 0x2c4   :  { %845 = vmax.xlane.f32.xlu0 %v8126_v15 }
 0x2c5   :  { %6137 = vmatmul.msk.bf16.gmra.mxu0 %vm344_vm1, %v7969_v49  ;;  %v6047_v49 = vld [vmem:[%s11930_s7 + $0xe0] sm:$0xff] }
 0x2c8   :  { %v816_v5 = vpop.f32.mrf.mxu3 }
 0x2c9   :  { %v427_v57 = vpop.f32.mrf.mxu1  ;;  %v8169_v17 = vadd.f32 %v6046_v59, %v816_v5  ;;  %v12101_v59 = vld [vmem:[#allocation67_spill] sm:$0xff] }
 0x2ca   :  { %v8134_v48 = vadd.f32 %v427_v57, %v314_v41  ;;  %v313_v57 = vld [vmem:[%s11930_s7 + $0x48] sm:$0xff] }
 0x2cc   :  { %6080 = vmatmul.msk.bf16.gmra.mxu1 %vm344_vm1, %v12099_v4  ;;  %462 = vmax.xlane.f32.xlu2 %v8134_v48  ;;  %v318_v4 = vld [vmem:[%s11930_s7 + $0x70] sm:$0xff] }
 0x2d0   :  { %v819_v44 = vpop.f32.mrf.mxu3  ;;  %837 = vmax.xlane.f32.xlu1 %v8143_v45 }
 0x2d1   :  { %v429_v46 = vpop.f32.mrf.mxu1  ;;  %v8152_v38 = vadd.f32 %v6047_v49, %v819_v44  ;;  %v6050_v49 = vld [vmem:[%s11930_s7 + $0xf8] sm:$0xff] }
 0x2d2   :  { %v8154_v39 = vadd.f32 %v429_v46, %v315_v18 }
 0x2d4   :  { %464 = vmax.xlane.f32.xlu0 %v8154_v39  ;;  %853 = vmax.xlane.f32.xlu2 %v8152_v38 }
 0x2d5   :  { %6138 = vmatmul.msk.bf16.gmra.mxu0 %vm344_vm1, %v8013_v33  ;;  %v8177_v33 = vadd.f32 %v6042_v22, %v806_v21  ;;  %v8190_v21 = vadd.f32 %v424_v37, %v313_v57  ;;  %v8210_v22 = vadd.f32 %v6045_v20, %v814_v10  ;;  %v316_v10 = vld [vmem:[%s11930_s7 + $0x60] sm:$0xff] }
 0x2d8   :  { %v821_v34 = vpop.f32.mrf.mxu3  ;;  %454 = vmax.xlane.f32.xlu1 %v8163_v9 }
 0x2d9   :  { %v432_v6 = vpop.f32.mrf.mxu1 }
 0x2dc   :  { %6081 = vmatmul.msk.bf16.gmra.mxu1 %vm344_vm1, %v12100_v7  ;;  %851 = vmax.xlane.f32.xlu0 %v8169_v17  ;;  %v8212_v7 = vpop.permute.xlu0 %2893 }
 0x2e0   :  { %v824_v3 = vpop.f32.mrf.mxu3  ;;  %843 = vmax.xlane.f32.xlu1 %v8177_v33 }
 0x2e1   :  { %v434_v41 = vpop.f32.mrf.mxu1 }
 0x2e2   :  { %v8183_v5 = vadd.f32 %v434_v41, %v317_v32  ;;  %v6049_v32 = vld [vmem:[%s11930_s7 + $0xf0] sm:$0xff] }
 0x2e4   :  { %468 = vmax.xlane.f32.xlu2 %v8183_v5 }
 0x2e5   :  { %6179 = vmatmul.msk.bf16.vlgmr.msra.gmra.mxu0 %vm344_vm1, %v3342_v16 }
 0x2e8   :  { %v826_v18 = vpop.f32.mrf.mxu3  ;;  %460 = vmax.xlane.f32.xlu1 %v8190_v21 }
 0x2e9   :  { %v437_v44 = vpop.f32.mrf.mxu1  ;;  %v8204_v37 = vadd.f32 %v6050_v49, %v826_v18  ;;  %v8225_v18 = vpop.permute.xlu1 %2891 }
 0x2ea   :  { %v8199_v46 = vadd.f32 %v437_v44, %v318_v4  ;;  %v8219_v4 = vadd.f32 %v6049_v32, %v824_v3  ;;  %v8227_v44 = vadd.f32 %v432_v6, %v316_v10 }
 0x2ec   :  { %6082 = vmatmul.msk.bf16.gmra.mxu1 %vm344_vm1, %v12101_v59  ;;  %470 = vmax.xlane.f32.xlu0 %v8199_v46 }
 0x2ed   :  { %859 = vmax.xlane.f32.xlu2 %v8204_v37 }
 0x2ef   :  { %v443_v41 = vpop.xlane.xlu2 %442 }
 0x2f0   :  { %v474_v57 = vsub.f32 %v7999_v55, %v443_v41  ;;  %849 = vmax.xlane.f32.xlu1 %v8210_v22  ;;  %v6048_v41 = vld [vmem:[%s11930_s7 + $0xe8] sm:$0xff] }
 0x2f1   :  { %v439_v16 = vpop.f32.mrf.mxu1  ;;  %v8239_v6 = vadd.f32 %v6048_v41, %v821_v34 }
 0x2f2   :  { %v490_v49 = vmul.f32 1.442695, %v474_v57  ;;  %v832_v57 = vpop.xlane.xlu1 %831 }
 0x2f3   :  { %v862_v41 = vsub.f32 %v7997_v14, %v832_v57 }
 0x2f4   :  { %6303 = vpow2.f32 %v490_v49  ;;  %857 = vmax.xlane.f32.xlu0 %v8219_v4  ;;  %v6059_v49 = vld [vmem:[%s11930_s7 + $0x100] sm:$0xff] }
 0x2f7   :  { %v445_v20 = vpop.xlane.xlu0 %444 }
 0x2f8   :  { %v475_v55 = vsub.f32 %v8017_v50, %v445_v20  ;;  %466 = vmax.xlane.f32.xlu1 %v8227_v44  ;;  %v830_v50 = vpop.xlane.xlu2 %829 }
 0x2f9   :  { %v1241_v59 = vpop.f32.mrf.mxu1 }
 0x2fa   :  { %v8231_v3 = vpop.eup %6303  ;;  %v492_v32 = vmul.f32 1.442695, %v475_v55  ;;  %v861_v55 = vsub.f32 %v8015_v26, %v830_v50  ;;  %v8247_v61 = vadd.f32 %v6059_v49, %v1241_v59  ;;  %v6060_v59 = vld [vmem:[%s11930_s7 + $0x108] sm:$0xff]  ;;  %v879_v50 = vmul.f32 1.442695, %v862_v41 }
 0x2fb   :  { %522 = vadd.xlane.f32.xlu2 %v8231_v3 }
 0x2fc   :  { %6305 = vpow2.f32 %v492_v32  ;;  %6107 = vmatmul.msk.bf16.vlgmr.msra.gmra.mxu1 %vm344_vm1, %v7620_v42  ;;  %v319_v42 = vld [vmem:[%s11930_s7 + $0x78] sm:$0xff] }
 0x2ff   :  { %v834_v10 = vpop.xlane.xlu0 %833 }
 0x300   :  { %v863_v20 = vsub.f32 %v8033_v23, %v834_v10  ;;  %855 = vmax.xlane.f32.xlu1 %v8239_v6  ;;  %v877_v23 = vmul.f32 1.442695, %v861_v55  ;;  %v8257_v10 = vadd.f32 %v439_v16, %v319_v42  ;;  %v447_v26 = vpop.xlane.xlu1 %446 }
 0x301   :  { %v1243_v32 = vpop.f32.mrf.mxu1  ;;  %v476_v57 = vsub.f32 %v8035_v12, %v447_v26 }
 0x302   :  { %v8249_v58 = vpop.eup %6305  ;;  %v881_v34 = vmul.f32 1.442695, %v863_v20  ;;  %v8265_v52 = vadd.f32 %v6060_v59, %v1243_v32 }
 0x303   :  { %524 = vadd.xlane.f32.xlu0 %v8249_v58  ;;  %1281 = vmax.xlane.f32.xlu2 %v8247_v61 }
 0x304   :  { %6307 = vpow2.f32 %v881_v34 }
 0x305   :  { %6309 = vpow2.f32 %v877_v23  ;;  %v6062_v23 = vld [vmem:[%s11930_s7 + $0x118] sm:$0xff] }
 0x306   :  { %6311 = vpow2.f32 %v879_v50 }
 0x307   :  { %v449_v49 = vpop.xlane.xlu2 %448 }
 0x308   :  { %v477_v14 = vsub.f32 %v8049_v36, %v449_v49  ;;  %472 = vmax.xlane.f32.xlu1 %v8257_v10  ;;  %v494_v36 = vmul.f32 1.442695, %v476_v57 }
 0x309   :  { %v1246_v20 = vpop.f32.mrf.mxu1 }
 0x30a   :  { %v8267_v55 = vpop.eup %6307  ;;  %v496_v42 = vmul.f32 1.442695, %v477_v14 }
 0x30b   :  { %1283 = vmax.xlane.f32.xlu0 %v8265_v52  ;;  %913 = vadd.xlane.f32.xlu2 %v8267_v55  ;;  %v8273_v16 = vpop.eup %6309 }
 0x30c   :  { %6313 = vpow2.f32 %v496_v42  ;;  %6108 = vmatmul.msk.bf16.gmra.mxu1 %vm344_vm1, %v7650_v13  ;;  %v8276_v12 = vpop.eup %6311 }
 0x30d   :  { %6315 = vpow2.f32 %v494_v36 }
 0x30f   :  { %v836_v34 = vpop.xlane.xlu2 %835 }
 0x310   :  { %909 = vadd.xlane.f32.xlu1 %v8273_v16  ;;  %v864_v57 = vsub.f32 %v8060_v2, %v836_v34 }
 0x311   :  { %v1248_v32 = vpop.f32.mrf.mxu1 }
 0x312   :  { %v8278_v41 = vpop.eup %6313  ;;  %v8290_v42 = vadd.f32 %v6062_v23, %v1248_v32 }
 0x313   :  { %528 = vadd.xlane.f32.xlu2 %v8278_v41  ;;  %911 = vadd.xlane.f32.xlu0 %v8276_v12  ;;  %v8285_v26 = vpop.eup %6315 }
 0x317   :  { %v453_v59 = vpop.xlane.xlu0 %452  ;;  %v451_v50 = vpop.xlane.xlu2 %450 }
 0x318   :  { %v478_v49 = vsub.f32 %v8073_v31, %v451_v50  ;;  %526 = vadd.xlane.f32.xlu1 %v8285_v26  ;;  %v3344_v14 = vpop.permute.xlu1 %3343  ;;  %v883_v31 = vmul.f32 1.442695, %v864_v57  ;;  %v8299_v50 = vadd.f32 %v6061_v27, %v1246_v20  ;;  %v479_v32 = vsub.f32 %v8075_v56, %v453_v59 }
 0x319   :  { %6180 = vmatmul.msk.bf16.gmra.mxu0 %vm344_vm1, %v3344_v14  ;;  %v1251_v36 = vpop.f32.mrf.mxu1 }
 0x31a   :  { %v498_v13 = vmul.f32 1.442695, %v478_v49  ;;  %v500_v60 = vmul.f32 1.442695, %v479_v32 }
 0x31b   :  { %1287 = vmax.xlane.f32.xlu2 %v8290_v42 }
 0x31c   :  { %6109 = vmatmul.msk.bf16.gmra.mxu1 %vm344_vm1, %v7665_v29  ;;  %6317 = vpow2.f32 %v498_v13  ;;  %v6063_v13 = vld [vmem:[%s11930_s7 + $0x120] sm:$0xff] }
 0x31d   :  { %6319 = vpow2.f32 %v883_v31  ;;  %v8315_v56 = vadd.f32 %v6063_v13, %v1251_v36  ;;  %v6064_v36 = vld [vmem:[%s11930_s7 + $0x128] sm:$0xff] }
 0x31f   :  { %v840_v2 = vpop.xlane.xlu0 %839 }
 0x320   :  { %v866_v34 = vsub.f32 %v8090_v11, %v840_v2  ;;  %1285 = vmax.xlane.f32.xlu1 %v8299_v50  ;;  %v842_v20 = vpop.xlane.xlu2 %841 }
 0x321   :  { %v1253_v23 = vpop.f32.mrf.mxu1 }
 0x322   :  { %v887_v49 = vmul.f32 1.442695, %v866_v34  ;;  %v8304_v14 = vpop.eup %6317  ;;  %v8332_v34 = vadd.f32 %v6064_v36, %v1253_v23 }
 0x323   :  { %530 = vadd.xlane.f32.xlu0 %v8304_v14  ;;  %v8307_v57 = vpop.eup %6319 }
 0x324   :  { %6321 = vpow2.f32 %v887_v49 }
 0x325   :  { %6323 = vpow2.f32 %v500_v60  ;;  %v867_v60 = vsub.f32 %v8092_v1, %v842_v20 }
 0x327   :  { %v889_v31 = vmul.f32 1.442695, %v867_v60 }
 0x328   :  { %915 = vadd.xlane.f32.xlu1 %v8307_v57  ;;  %v457_v49 = vpop.xlane.xlu2 %456 }
 0x329   :  { %v8317_v11 = vpop.f32.mrf.mxu1  ;;  %6325 = vpow2.f32 %v889_v31 }
 0x32a   :  { %v8313_v27 = vpop.eup %6321 }
 0x32b   :  { %12102 = vst [vmem:[#allocation56_spill] sm:$0xff] %v8313_v27  ;;  %919 = vadd.xlane.f32.xlu2 %v8313_v27  ;;  %1289 = vmax.xlane.f32.xlu0 %v8315_v56  ;;  %v8323_v59 = vpop.eup %6323 }
 0x32c   :  { %6110 = vmatmul.msk.bf16.gmra.mxu1 %vm344_vm1, %v7679_v40 }
 0x32f   :  { %v459_v32 = vpop.xlane.xlu0 %458  ;;  %v8338_v20 = vpop.eup %6325 }
 0x330   :  { %532 = vadd.xlane.f32.xlu1 %v8323_v59  ;;  %v482_v13 = vsub.f32 %v8115_v53, %v459_v32  ;;  %12103 = vst [vmem:[#allocation34_spill] sm:$0xff] %v8338_v20  ;;  %v848_v60 = vpop.xlane.xlu2 %847  ;;  %v481_v53 = vsub.f32 %v8103_v43, %v457_v49 }
 0x331   :  { %v8330_v2 = vpop.f32.mrf.mxu1  ;;  %v870_v31 = vsub.f32 %v8117_v28, %v848_v60 }
 0x332   :  { %v506_v1 = vmul.f32 1.442695, %v482_v13 }
 0x333   :  { %v895_v43 = vmul.f32 1.442695, %v870_v31 }
 0x334   :  { %6327 = vpow2.f32 %v506_v1  ;;  %v6067_v1 = vld [vmem:[%s11930_s7 + $0x140] sm:$0xff] }
 0x337   :  { %v846_v63 = vpop.xlane.xlu0 %845 }
 0x338   :  { %1291 = vmax.xlane.f32.xlu1 %v8332_v34 }
 0x339   :  { %v1261_v27 = vpop.f32.mrf.mxu1 }
 0x33a   :  { %v8342_v62 = vpop.eup %6327  ;;  %v8357_v49 = vadd.f32 %v6067_v1, %v1261_v27 }
 0x33c   :  { %6111 = vmatmul.msk.bf16.gmra.mxu1 %vm344_vm1, %v7693_v35 }
 0x33f   :  { %v463_v13 = vpop.xlane.xlu2 %462 }
 0x340   :  { %921 = vadd.xlane.f32.xlu1 %v8338_v20  ;;  %v504_v20 = vmul.f32 1.442695, %v481_v53 }
 0x341   :  { %v8347_v32 = vpop.f32.mrf.mxu1 }
 0x343   :  { %v838_v23 = vpop.xlane.xlu1 %837 }
 0x344   :  { %v865_v36 = vsub.f32 %v8143_v45, %v838_v23 }
 0x346   :  { %v885_v25 = vmul.f32 1.442695, %v865_v36 }
 0x347   :  { %v465_v28 = vpop.xlane.xlu0 %464 }
 0x348   :  { %6329 = vpow2.f32 %v885_v25  ;;  %538 = vadd.xlane.f32.xlu1 %v8342_v62  ;;  %v485_v36 = vsub.f32 %v8154_v39, %v465_v28  ;;  %v6065_v39 = vld [vmem:[%s11930_s7 + $0x130] sm:$0xff] }
 0x349   :  { %6331 = vpow2.f32 %v504_v20  ;;  %v869_v20 = vsub.f32 %v8126_v15, %v846_v63 }
 0x34b   :  { %v455_v45 = vpop.xlane.xlu1 %454  ;;  %v893_v28 = vmul.f32 1.442695, %v869_v20  ;;  %v484_v20 = vsub.f32 %v8134_v48, %v463_v13 }
 0x34c   :  { %v480_v23 = vsub.f32 %v8163_v9, %v455_v45  ;;  %6112 = vmatmul.msk.bf16.gmra.mxu1 %vm344_vm1, %v7738_v30  ;;  %v8362_v9 = vpop.f32.mrf.mxu1  ;;  %v854_v45 = vpop.xlane.xlu2 %853  ;;  %v512_v30 = vmul.f32 1.442695, %v485_v36 }
 0x34e   :  { %v8355_v25 = vpop.eup %6329  ;;  %v502_v60 = vmul.f32 1.442695, %v480_v23 }
 0x34f   :  { %12104 = vst [vmem:[#allocation65_spill] sm:$0xff] %v8355_v25  ;;  %917 = vadd.xlane.f32.xlu0 %v8355_v25  ;;  %v8364_v31 = vpop.eup %6331  ;;  %v852_v63 = vpop.xlane.xlu0 %851 }
 0x350   :  { %6333 = vpow2.f32 %v502_v60  ;;  %1297 = vmax.xlane.f32.xlu1 %v8357_v49 }
 0x351   :  { %6335 = vpow2.f32 %v895_v43  ;;  %v6066_v43 = vld [vmem:[%s11930_s7 + $0x138] sm:$0xff] }
 0x352   :  { %6337 = vpow2.f32 %v512_v30  ;;  %v8389_v30 = vadd.f32 %v6066_v43, %v8330_v2  ;;  %v6070_v2 = vld [vmem:[%s11930_s7 + $0x158] sm:$0xff] }
 0x353   :  { %v844_v53 = vpop.xlane.xlu1 %843  ;;  %6339 = vpow2.f32 %v893_v28 }
 0x354   :  { %v868_v23 = vsub.f32 %v8177_v33, %v844_v53  ;;  %v8386_v33 = vadd.f32 %v6065_v39, %v8317_v11  ;;  %v1268_v53 = vpop.f32.mrf.mxu1  ;;  %v873_v11 = vsub.f32 %v8152_v38, %v854_v45  ;;  %v510_v39 = vmul.f32 1.442695, %v484_v20 }
 0x356   :  { %v8366_v27 = vpop.eup %6333  ;;  %v891_v15 = vmul.f32 1.442695, %v868_v23  ;;  %v901_v13 = vmul.f32 1.442695, %v873_v11  ;;  %v872_v11 = vsub.f32 %v8169_v17, %v852_v63  ;;  %v6068_v17 = vld [vmem:[%s11930_s7 + $0x148] sm:$0xff]  ;;  %v6069_v63 = vld [vmem:[%s11930_s7 + $0x150] sm:$0xff] }
 0x357   :  { %v8368_v1 = vpop.eup %6335  ;;  %536 = vadd.xlane.f32.xlu0 %v8364_v31  ;;  %534 = vadd.xlane.f32.xlu2 %v8366_v27  ;;  %v8381_v36 = vpop.xlane.xlu2 %468 }
 0x358   :  { %12105 = vst [vmem:[#allocation39_spill] sm:$0xff] %v8368_v1  ;;  %927 = vadd.xlane.f32.xlu1 %v8368_v1  ;;  %v8391_v1 = vpop.eup %6337  ;;  %6341 = vpow2.f32 %v891_v15  ;;  %v8406_v15 = vadd.f32 %v6070_v2, %v1268_v53 }
 0x359   :  { %v8402_v48 = vpop.eup %6339  ;;  %6343 = vpow2.f32 %v510_v39 }
 0x35a   :  { %12106 = vst [vmem:[#allocation64_spill] sm:$0xff] %v8402_v48 }
 0x35b   :  { %v461_v60 = vpop.xlane.xlu1 %460 }
 0x35c   :  { %6113 = vmatmul.msk.bf16.gmra.mxu1 %vm344_vm1, %v7705_v24  ;;  %v483_v23 = vsub.f32 %v8190_v21, %v461_v60  ;;  %v8408_v60 = vpop.f32.mrf.mxu1 }
 0x35e   :  { %v508_v28 = vmul.f32 1.442695, %v483_v23  ;;  %v8404_v25 = vpop.eup %6341 }
 0x35f   :  { %1295 = vmax.xlane.f32.xlu0 %v8389_v30  ;;  %1293 = vmax.xlane.f32.xlu2 %v8386_v33  ;;  %v471_v24 = vpop.xlane.xlu0 %470  ;;  %12107 = vst [vmem:[#allocation47_spill] sm:$0xff] %v8404_v25  ;;  %v8416_v53 = vpop.eup %6343 }
 0x360   :  { %544 = vadd.xlane.f32.xlu1 %v8391_v1  ;;  %v860_v21 = vpop.xlane.xlu2 %859  ;;  %6345 = vpow2.f32 %v508_v28  ;;  %v488_v38 = vsub.f32 %v8199_v46, %v471_v24 }
 0x361   :  { %6347 = vpow2.f32 %v901_v13  ;;  %v899_v13 = vmul.f32 1.442695, %v872_v11 }
 0x362   :  { %v518_v20 = vmul.f32 1.442695, %v488_v38 }
 0x363   :  { %v850_v43 = vpop.xlane.xlu1 %849 }
 0x364   :  { %v871_v24 = vsub.f32 %v8210_v22, %v850_v43  ;;  %6349 = vpow2.f32 %v518_v20  ;;  %v8429_v46 = vpop.f32.mrf.mxu1  ;;  %v8443_v22 = vadd.f32 %v6069_v63, %v8362_v9  ;;  %v876_v9 = vsub.f32 %v8204_v37, %v860_v21 }
 0x366   :  { %v8418_v23 = vpop.eup %6345 }
 0x367   :  { %925 = vadd.xlane.f32.xlu2 %v8402_v48  ;;  %923 = vadd.xlane.f32.xlu0 %v8404_v25  ;;  %v8421_v39 = vpop.xlane.xlu0 %857  ;;  %v8423_v28 = vpop.eup %6347  ;;  %v897_v48 = vmul.f32 1.442695, %v871_v24  ;;  %v8440_v25 = vadd.f32 %v6068_v17, %v8347_v32  ;;  %v6073_v24 = vld [vmem:[%s11930_s7 + $0x170] sm:$0xff] }
 0x368   :  { %1303 = vmax.xlane.f32.xlu1 %v8406_v15  ;;  %12108 = vst [vmem:[#allocation37_spill] sm:$0xff] %v8423_v28 }
 0x36b   :  { %v467_v45 = vpop.xlane.xlu1 %466 }
 0x36c   :  { %6114 = vmatmul.msk.bf16.gmra.mxu1 %vm344_vm1, %v7713_v54  ;;  %v487_v54 = vsub.f32 %v8183_v5, %v8381_v36  ;;  %v486_v32 = vsub.f32 %v8227_v44, %v467_v45  ;;  %v1276_v17 = vpop.f32.mrf.mxu1 }
 0x36d   :  { %v8467_v37 = vadd.f32 %v6073_v24, %v1276_v17 }
 0x36e   :  { %v523_v2 = vpop.xlane.xlu2 %522  ;;  %v514_v63 = vmul.f32 1.442695, %v486_v32 }
 0x36f   :  { %542 = vadd.xlane.f32.xlu0 %v8416_v53  ;;  %540 = vadd.xlane.f32.xlu2 %v8418_v23  ;;  %6351 = vrcp.f32 %v523_v2  ;;  %v516_v2 = vmul.f32 1.442695, %v487_v54  ;;  %12109 = vst [vmem:[#allocation40_spill] sm:$0xff] %v8467_v37 }
 0x370   :  { %933 = vadd.xlane.f32.xlu1 %v8423_v28  ;;  %6353 = vpow2.f32 %v899_v13  ;;  %v8447_v28 = vpop.eup %6349 }
 0x373   :  { %v8437_v38 = vpop.xlane.xlu1 %855 }
 0x375   :  { %v6352_v11 = vpop.eup %6351 }
 0x376   :  { %v525_v43 = vpop.xlane.xlu0 %524  ;;  %v8445_v20 = vpop.xlane.xlu2 %1281  ;;  %v570_v13 = vmul.f32 %v6352_v11, %v8231_v3 }
 0x377   :  { %6355 = vrcp.f32 %v525_v43  ;;  %1301 = vmax.xlane.f32.xlu0 %v8443_v22  ;;  %1299 = vmax.xlane.f32.xlu2 %v8440_v25  ;;  %v8461_v36 = vpop.eup %6353 }
 0x378   :  { %6357 = vpow2.f32 %v897_v48  ;;  %550 = vadd.xlane.f32.xlu1 %v8447_v28  ;;  %v907_v48 = vmul.f32 1.442695, %v876_v9  ;;  %v12110_v9 = vld [vmem:[#allocation69_spill] sm:$0xff] }
 0x379   :  { %6359 = vpow2.f32 %v516_v2  ;;  %v1682_v24 = vsel %vm344_vm1, %v12110_v9, 0 }
 0x37a   :  { %6361 = vpow2.f32 %v514_v63  ;;  %v875_v63 = vsub.f32 %v8219_v4, %v8421_v39  ;;  %v1679_v4 = vsel %vm344_vm1, %v7767_v51, 0  ;;  %v1313_v51 = vsub.f32 %v8247_v61, %v8445_v20 }
 0x37b   :  { %v8459_v5 = vpop.xlane.xlu1 %472  ;;  %6363 = vpow2.f32 %v907_v48  ;;  %v6071_v48 = vld [vmem:[%s11930_s7 + $0x160] sm:$0xff] }
 0x37c   :  { %6155 = vmatmul.msk.bf16.vlgmr.msrb.gmra.mxu1 %vm344_vm1, %v8225_v18  ;;  %v905_v39 = vmul.f32 1.442695, %v875_v63 }
 0x37d   :  { %v6356_v44 = vpop.eup %6355 }
 0x37e   :  { %v8465_v45 = vpop.eup %6357  ;;  %v1284_v54 = vpop.xlane.xlu0 %1283  ;;  %v571_v43 = vmul.f32 %v6356_v44, %v8249_v58 }
 0x37f   :  { %v8469_v21 = vpop.xlane.xlu2 %913  ;;  %931 = vadd.xlane.f32.xlu2 %v8461_v36  ;;  %929 = vadd.xlane.f32.xlu0 %v8465_v45  ;;  %v1314_v32 = vsub.f32 %v8265_v52, %v1284_v54  ;;  %v8481_v58 = vpop.eup %6359  ;;  %v874_v52 = vsub.f32 %v8239_v6, %v8437_v38  ;;  %v6072_v54 = vld [vmem:[%s11930_s7 + $0x168] sm:$0xff]  ;;  %v8505_v6 = vadd.f32 %v6071_v48, %v8408_v60 }
 0x380   :  { %1309 = vmax.xlane.f32.xlu1 %v8467_v37  ;;  %v586_v18 = vpack.c.bf16 %v571_v43, %v570_v13  ;;  %v8483_v2 = vpop.eup %6361  ;;  %v8508_v38 = vadd.f32 %v6072_v54, %v8429_v46  ;;  %v12112_v46 = vld [vmem:[#allocation59_spill] sm:$0xff] }
 0x381   :  { %v1331_v11 = vmul.f32 1.442695, %v1314_v32  ;;  %v8485_v17 = vpop.eup %6363  ;;  %v903_v43 = vmul.f32 1.442695, %v874_v52 }
 0x382   :  { %626 = vmatmul.bf16.vlgmr.msra.gmra.mxu2 %v586_v18  ;;  %12111 = vst [vmem:[#allocation48_spill] sm:$0xff] %v8485_v17 }
 0x383   :  { %1684 = vmatpush.bf16.xpose.msra.mxu2 %v1682_v24  ;;  %v8479_v3 = vpop.xlane.xlu1 %909  ;;  %6365 = vpow2.f32 %v1331_v11  ;;  %v1676_v24 = vsel %vm344_vm1, %v12112_v46, 0  ;;  %v1329_v11 = vmul.f32 1.442695, %v1313_v51 }
 0x386   :  { %v8514_v32 = vpop.xlane.xlu0 %911 }
 0x387   :  { %v529_v44 = vpop.xlane.xlu2 %528  ;;  %548 = vadd.xlane.f32.xlu0 %v8481_v58  ;;  %546 = vadd.xlane.f32.xlu2 %v8483_v2 }
 0x388   :  { %939 = vadd.xlane.f32.xlu1 %v8485_v17  ;;  %6367 = vrcp.f32 %v529_v44 }
 0x389   :  { %v8510_v18 = vpop.eup %6365 }
 0x38b   :  { %1685 = vmatpush.bf16.xpose.msra.mxu2 %v1679_v4  ;;  %v527_v13 = vpop.xlane.xlu1 %526 }
 0x38c   :  { %6369 = vrcp.f32 %v527_v13  ;;  %6156 = vmatmul.msk.bf16.gmra.mxu1 %vm344_vm1, %v8212_v7  ;;  %v489_v7 = vsub.f32 %v8257_v10, %v8459_v5 }
 0x38d   :  { %6371 = vpow2.f32 %v905_v39 }
 0x38e   :  { %v6368_v9 = vpop.eup %6367  ;;  %6373 = vpow2.f32 %v903_v43  ;;  %v520_v44 = vmul.f32 1.442695, %v489_v7  ;;  %v6074_v7 = vld [vmem:[%s11930_s7 + $0x178] sm:$0xff] }
 0x38f   :  { %1307 = vmax.xlane.f32.xlu0 %v8508_v38  ;;  %1305 = vmax.xlane.f32.xlu2 %v8505_v6  ;;  %v573_v63 = vmul.f32 %v6368_v9, %v8278_v41  ;;  %v1288_v48 = vpop.xlane.xlu2 %1287  ;;  %6375 = vpow2.f32 %v1329_v11 }
 0x390   :  { %1363 = vadd.xlane.f32.xlu1 %v8510_v18  ;;  %6377 = vpow2.f32 %v520_v44  ;;  %v1316_v4 = vsub.f32 %v8290_v42, %v1288_v48 }
 0x392   :  { %v6370_v60 = vpop.eup %6369  ;;  %v1335_v13 = vmul.f32 1.442695, %v1316_v4 }
 0x393   :  { %1686 = vmatpush.bf16.xpose.msra.mxu2 %v1676_v24  ;;  %v8523_v61 = vpop.xlane.xlu1 %1285  ;;  %v572_v20 = vmul.f32 %v6370_v60, %v8285_v26  ;;  %v8527_v52 = vpop.eup %6371  ;;  %v12114_v26 = vld [vmem:[#allocation51_spill] sm:$0xff]  ;;  %v12115_v24 = vld [vmem:[#allocation54_spill] sm:$0xff] }
 0x394   :  { %12113 = vst [vmem:[#allocation52_spill] sm:$0xff] %v8527_v52  ;;  %v8529_v10 = vpop.eup %6373  ;;  %v1673_v41 = vsel %vm344_vm1, %v12114_v26, 0  ;;  %6379 = vpow2.f32 %v1335_v13  ;;  %v1278_v60 = vpop.f32.mrf.mxu1  ;;  %v1670_v11 = vsel %vm344_vm1, %v12115_v24, 0 }
 0x395   :  { %v587_v54 = vpack.c.bf16 %v573_v63, %v572_v20  ;;  %v8538_v43 = vpop.eup %6375  ;;  %v8550_v63 = vadd.f32 %v6074_v7, %v1278_v60 }
 0x396   :  { %v531_v5 = vpop.xlane.xlu0 %530  ;;  %v8540_v51 = vpop.eup %6377 }
 0x397   :  { %937 = vadd.xlane.f32.xlu2 %v8527_v52  ;;  %935 = vadd.xlane.f32.xlu0 %v8529_v10  ;;  %6381 = vrcp.f32 %v531_v5  ;;  %12116 = vst [vmem:[#allocation49_spill] sm:$0xff] %v8550_v63 }
 0x398   :  { %631 = vmatmul.bf16.gmra.mxu2 %v587_v54  ;;  %v12117_v54 = vld [vmem:[#allocation44_spill] sm:$0xff] }
 0x399   :  { %v1667_v4 = vsel %vm344_vm1, %v12117_v54, 0 }
 0x39a   :  { %v8552_v44 = vpop.eup %6379 }
 0x39b   :  { %1687 = vmatpush.bf16.xpose.msra.mxu2 %v1673_v41  ;;  %v8536_v39 = vpop.xlane.xlu1 %915 }
 0x39e   :  { %v1290_v9 = vpop.xlane.xlu0 %1289 }
 0x39f   :  { %1361 = vadd.xlane.f32.xlu0 %v8538_v43  ;;  %552 = vadd.xlane.f32.xlu2 %v8540_v51  ;;  %v1317_v42 = vsub.f32 %v8315_v56, %v1290_v9  ;;  %v6382_v56 = vpop.eup %6381 }
 0x3a0   :  { %v574_v41 = vmul.f32 %v6382_v56, %v8304_v14 }
 0x3a1   :  { %v1337_v46 = vmul.f32 1.442695, %v1317_v42  ;;  %v12118_v42 = vld [vmem:[#allocation42_spill] sm:$0xff] }
 0x3a2   :  { %v1664_v7 = vsel %vm344_vm1, %v12118_v42, 0 }
 0x3a3   :  { %1688 = vmatpush.bf16.xpose.msra.mxu2 %v1670_v11  ;;  %v533_v20 = vpop.xlane.xlu1 %532  ;;  %6383 = vpow2.f32 %v1337_v46  ;;  %v12119_v46 = vld [vmem:[#allocation33_spill] sm:$0xff] }
 0x3a4   :  { %6385 = vrcp.f32 %v533_v20  ;;  %v1661_v24 = vsel %vm344_vm1, %v12119_v46, 0  ;;  %v8573_v20 = vpop.xlane.xlu2 %919 }
 0x3a7   :  { %1367 = vadd.xlane.f32.xlu0 %v8552_v44  ;;  %1311 = vmax.xlane.f32.xlu2 %v8550_v63 }
 0x3a9   :  { %v8556_v48 = vpop.eup %6383 }
 0x3aa   :  { %v6386_v26 = vpop.eup %6385  ;;  %1369 = vadd.xlane.f32.xlu1 %v8556_v48 }
 0x3ab   :  { %1689 = vmatpush.bf16.xpose.msra.mxu2 %v1667_v4  ;;  %v8561_v5 = vpop.xlane.xlu1 %1291  ;;  %v575_v13 = vmul.f32 %v6386_v26, %v8323_v59 }
 0x3ad   :  { %v588_v9 = vpack.c.bf16 %v575_v13, %v574_v41 }
 0x3af   :  { %636 = vmatmul.bf16.gmra.mxu2 %v588_v9 }
 0x3b3   :  { %1690 = vmatpush.bf16.xpose.msra.mxu2 %v1664_v7  ;;  %v8567_v60 = vpop.xlane.xlu1 %921 }
 0x3bb   :  { %1691 = vmatpush.bf16.xpose.msra.mxu2 %v1661_v24  ;;  %v539_v11 = vpop.xlane.xlu1 %538 }
 0x3bf   :  { %2895 = vrot.lane.b32.xlu2 %v7665_v29, %s7001_s2 }
 0x3c2   :  { %v8575_v14 = vpop.xlane.xlu0 %917 }
 0x3c3   :  { %v8577_v59 = vpop.xlane.xlu1 %1297 }
 0x3c7   :  { %3345 = vrot.lane.b32.xlu2 %v7665_v29, %s7004_s23 }
 0x3ca   :  { %v537_v56 = vpop.xlane.xlu0 %536  ;;  %v535_v54 = vpop.xlane.xlu2 %534 }
 0x3cb   :  { %6387 = vrcp.f32 %v537_v56  ;;  %v8581_v4 = vpop.xlane.xlu1 %927  ;;  %v8587_v56 = vpop.f32.mrf.mxu1 }
 0x3cc   :  { %6389 = vrcp.f32 %v535_v54 }
 0x3d1   :  { %v6388_v26 = vpop.eup %6387 }
 0x3d2   :  { %v6390_v41 = vpop.eup %6389  ;;  %v1296_v13 = vpop.xlane.xlu0 %1295  ;;  %v577_v42 = vmul.f32 %v6388_v26, %v8364_v31  ;;  %v6945_v26 = vld [vmem:[%s11930_s7 + $0x80] sm:$0xff] }
 0x3d3   :  { %v1294_v9 = vpop.xlane.xlu2 %1293  ;;  %v1320_v7 = vsub.f32 %v8389_v30, %v1296_v13  ;;  %v545_v24 = vpop.xlane.xlu1 %544  ;;  %v576_v63 = vmul.f32 %v6390_v41, %v8366_v27  ;;  %v6946_v13 = vld [vmem:[%s11930_s7 + $0x8] sm:$0xff] }
 0x3d4   :  { %v1319_v46 = vsub.f32 %v8386_v33, %v1294_v9  ;;  %v2530_v27 = vpop.f32.mrf.mxu0 }
 0x3d5   :  { %v1343_v29 = vmul.f32 1.442695, %v1320_v7  ;;  %v589_v17 = vpack.c.bf16 %v577_v42, %v576_v63  ;;  %v2146_v63 = vpop.f32.mrf.mxu1  ;;  %v8606_v41 = vadd.f32 %v6945_v26, %v2530_v27  ;;  %v6947_v26 = vld [vmem:[%s11930_s7 + $0x88] sm:$0xff] }
 0x3d6   :  { %v1341_v37 = vmul.f32 1.442695, %v1319_v46  ;;  %v8611_v9 = vadd.f32 %v6946_v13, %v2146_v63 }
 0x3d7   :  { %6391 = vpow2.f32 %v1343_v29  ;;  %641 = vmatmul.bf16.gmra.mxu2 %v589_v17  ;;  %v1315_v29 = vsub.f32 %v8299_v50, %v8523_v61  ;;  %12120 = vst [vmem:[#allocation57_spill] sm:$0xff] %v8606_v41 }
 0x3d8   :  { %6393 = vpow2.f32 %v1341_v37  ;;  %12121 = vst [vmem:[#allocation68_spill] sm:$0xff] %v8611_v9 }
 0x3d9   :  { %6395 = vrcp.f32 %v539_v11  ;;  %v1333_v42 = vmul.f32 1.442695, %v1315_v29  ;;  %v1318_v11 = vsub.f32 %v8332_v34, %v8561_v5 }
 0x3da   :  { %v8591_v52 = vpop.xlane.xlu0 %923 }
 0x3db   :  { %v8589_v54 = vpop.xlane.xlu2 %925  ;;  %v8593_v31 = vpop.xlane.xlu1 %1303 }
 0x3dc   :  { %v2532_v61 = vpop.f32.mrf.mxu0 }
 0x3dd   :  { %v8595_v30 = vpop.eup %6391  ;;  %v8628_v13 = vadd.f32 %v6947_v26, %v2532_v61 }
 0x3de   :  { %v8597_v33 = vpop.eup %6393  ;;  %1375 = vadd.xlane.f32.xlu1 %v8595_v30 }
 0x3df   :  { %1373 = vadd.xlane.f32.xlu0 %v8597_v33  ;;  %v6396_v50 = vpop.eup %6395  ;;  %12122 = vst [vmem:[#allocation67_spill] sm:$0xff] %v8628_v13 }
 0x3e0   :  { %v578_v63 = vmul.f32 %v6396_v50, %v8342_v62  ;;  %v1321_v62 = vsub.f32 %v8357_v49, %v8577_v59 }
 0x3e2   :  { %v543_v37 = vpop.xlane.xlu0 %542  ;;  %v1345_v50 = vmul.f32 1.442695, %v1321_v62 }
 0x3e3   :  { %v541_v17 = vpop.xlane.xlu2 %540  ;;  %v8613_v7 = vpop.xlane.xlu1 %933 }
 0x3e4   :  { %6397 = vrcp.f32 %v541_v17 }
 0x3e5   :  { %6399 = vpow2.f32 %v1333_v42 }
 0x3e6   :  { %2570 = vmax.xlane.f32.xlu1 %v8606_v41  ;;  %v1339_v41 = vmul.f32 1.442695, %v1318_v11  ;;  %6401 = vrcp.f32 %v543_v37 }
 0x3e7   :  { %2186 = vmax.xlane.f32.xlu0 %v8611_v9 }
 0x3e8   :  { %6403 = vpow2.f32 %v1339_v41 }
 0x3e9   :  { %6405 = vrcp.f32 %v545_v24 }
 0x3ea   :  { %v6398_v46 = vpop.eup %6397  ;;  %v8619_v27 = vpop.xlane.xlu0 %1301  ;;  %6407 = vpow2.f32 %v1345_v50 }
 0x3eb   :  { %v8621_v17 = vpop.xlane.xlu2 %1299  ;;  %v579_v29 = vmul.f32 %v6398_v46, %v8418_v23  ;;  %v8630_v9 = vpop.eup %6399 }
 0x3ec   :  { %v551_v34 = vpop.xlane.xlu1 %550  ;;  %v6402_v61 = vpop.eup %6401 }
 0x3ed   :  { %v590_v42 = vpack.c.bf16 %v579_v29, %v578_v63  ;;  %v580_v41 = vmul.f32 %v6402_v61, %v8416_v53  ;;  %v6948_v61 = vld [vmem:[%s11930_s7] sm:$0xff] }
 0x3ee   :  { %v8640_v11 = vpop.eup %6403 }
 0x3ef   :  { %2572 = vmax.xlane.f32.xlu0 %v8628_v13  ;;  %646 = vmatmul.bf16.gmra.mxu2 %v590_v42  ;;  %v6406_v46 = vpop.eup %6405  ;;  %v2149_v13 = vpop.f32.mrf.mxu1 }
 0x3f0   :  { %1365 = vadd.xlane.f32.xlu2 %v8630_v9  ;;  %v581_v49 = vmul.f32 %v6406_v46, %v8391_v1  ;;  %v8647_v24 = vpop.eup %6407  ;;  %v8664_v46 = vadd.f32 %v6948_v61, %v8587_v56 }
 0x3f2   :  { %v8638_v5 = vpop.xlane.xlu0 %929  ;;  %v591_v59 = vpack.c.bf16 %v581_v49, %v580_v41  ;;  %v1324_v41 = vsub.f32 %v8406_v15, %v8593_v31 }
 0x3f3   :  { %v8636_v23 = vpop.xlane.xlu2 %931 }
 0x3f4   :  { %v8643_v37 = vpop.xlane.xlu1 %1309 }
 0x3f5   :  { %12123 = vst [vmem:[#allocation69_spill] sm:$0xff] %v8643_v37 }
 0x3f8   :  { %1371 = vadd.xlane.f32.xlu2 %v8640_v11 }
 0x3fa   :  { %v549_v63 = vpop.xlane.xlu0 %548 }
 0x3fb   :  { %v547_v29 = vpop.xlane.xlu2 %546  ;;  %6409 = vrcp.f32 %v549_v63 }
 0x3fc   :  { %6411 = vrcp.f32 %v547_v29  ;;  %v8658_v53 = vpop.xlane.xlu1 %939 }
 0x3ff   :  { %651 = vmatmul.bf16.gmra.mxu2 %v591_v59  ;;  %2897 = vrot.lane.b32.xlu1 %v7679_v40, %s7001_s2 }
 0x400   :  { %1377 = vadd.xlane.f32.xlu2 %v8647_v24 }
 0x401   :  { %v6410_v1 = vpop.eup %6409 }
 0x402   :  { %v8652_v26 = vpop.xlane.xlu0 %1307  ;;  %v6412_v50 = vpop.eup %6411  ;;  %v583_v29 = vmul.f32 %v6410_v1, %v8481_v58 }
 0x403   :  { %v8654_v42 = vpop.xlane.xlu2 %1305  ;;  %3347 = vrot.lane.b32.xlu0 %v7679_v40, %s7004_s23  ;;  %v582_v63 = vmul.f32 %v6412_v50, %v8483_v2  ;;  %v1351_v40 = vmul.f32 1.442695, %v1324_v41 }
 0x404   :  { %v1364_v15 = vpop.xlane.xlu1 %1363 }
 0x405   :  { %v627_v62 = vpop.f32.mrf.mxu2  ;;  %v592_v56 = vpack.c.bf16 %v583_v29, %v582_v63  ;;  %6413 = vpow2.f32 %v1351_v40  ;;  %v2151_v29 = vpop.f32.mrf.mxu1 }
 0x406   :  { %667 = vst.msk [vmem:[#allocation2] sm:$0xff] %vm344_vm1, %v627_v62  ;;  %v6949_v62 = vld [vmem:[%s11930_s7 + $0x10] sm:$0xff]  ;;  %6415 = vrcp.f32 %v1364_v15 }
 0x407   :  { %v8679_v61 = vadd.f32 %v6949_v62, %v2149_v13  ;;  %6417 = vrcp.f32 %v551_v34 }
 0x408   :  { %2184 = vmax.xlane.f32.xlu2 %v8664_v46 }
 0x409   :  { %12124 = vst [vmem:[#allocation59_spill] sm:$0xff] %v8679_v61 }
 0x40a   :  { %v8674_v59 = vpop.xlane.xlu0 %935 }
 0x40b   :  { %v8672_v49 = vpop.xlane.xlu2 %937  ;;  %v8683_v31 = vpop.eup %6413 }
 0x40c   :  { %v6416_v1 = vpop.eup %6415 }
 0x40d   :  { %v629_v37 = vpop.f32.mrf.mxu2  ;;  %v6418_v50 = vpop.eup %6417  ;;  %v1410_v34 = vmul.f32 %v6416_v1, %v8510_v18  ;;  %v1322_v18 = vsub.f32 %v8440_v25, %v8621_v17  ;;  %v6951_v25 = vld [vmem:[%s11930_s7 + $0x90] sm:$0xff] }
 0x40e   :  { %668 = vst.msk [vmem:[#allocation2 + $0x8] sm:$0xff] %vm344_vm1, %v629_v37  ;;  %v1323_v37 = vsub.f32 %v8443_v22, %v8619_v27  ;;  %v584_v62 = vmul.f32 %v6418_v50, %v8447_v28  ;;  %v6950_v22 = vld [vmem:[%s11930_s7 + $0x18] sm:$0xff]  ;;  %v2535_v28 = vpop.f32.mrf.mxu0 }
 0x40f   :  { %656 = vmatmul.bf16.gmra.mxu2 %v592_v56  ;;  %v8698_v27 = vadd.f32 %v6950_v22, %v2151_v29  ;;  %v8710_v17 = vadd.f32 %v6951_v25, %v2535_v28  ;;  %v6952_v29 = vld [vmem:[%s11930_s7 + $0x98] sm:$0xff]  ;;  %v12130_v22 = vld [vmem:[#allocation56_spill] sm:$0xff]  ;;  %v12131_v28 = vld [vmem:[#allocation45_spill] sm:$0xff] }
 0x410   :  { %2188 = vmax.xlane.f32.xlu2 %v8679_v61  ;;  %v1349_v61 = vmul.f32 1.442695, %v1323_v37 }
 0x412   :  { %v1362_v58 = vpop.xlane.xlu0 %1361 }
 0x413   :  { %v553_v2 = vpop.xlane.xlu2 %552  ;;  %6419 = vrcp.f32 %v1362_v58 }
 0x414   :  { %6421 = vrcp.f32 %v553_v2 }
 0x415   :  { %6423 = vrcp.f32 %v8514_v32 }
 0x416   :  { %6425 = vrcp.f32 %v8479_v3 }
 0x417   :  { %6427 = vpow2.f32 %v1349_v61 }
 0x418   :  { %1383 = vadd.xlane.f32.xlu2 %v8683_v31 }
 0x419   :  { %v6420_v13 = vpop.eup %6419 }
 0x41a   :  { %v6422_v41 = vpop.eup %6421  ;;  %v1409_v63 = vmul.f32 %v6420_v13, %v8538_v43  ;;  %v1347_v43 = vmul.f32 1.442695, %v1322_v18 }
 0x41b   :  { %v8688_v40 = vpop.xlane.xlu2 %1311  ;;  %v632_v56 = vpop.f32.mrf.mxu2  ;;  %v585_v15 = vmul.f32 %v6422_v41, %v8540_v51 }
 0x41c   :  { %669 = vst.msk [vmem:[#allocation2 + $0x10] sm:$0xff] %vm344_vm1, %v632_v56  ;;  %v1425_v58 = vpack.c.bf16 %v1410_v34, %v1409_v63  ;;  %v6424_v50 = vpop.eup %6423  ;;  %6429 = vpow2.f32 %v1347_v43  ;;  %v2537_v41 = vpop.f32.mrf.mxu0 }
 0x41d   :  { %v593_v2 = vpack.c.bf16 %v585_v15, %v584_v62  ;;  %v6426_v32 = vpop.eup %6425  ;;  %v958_v3 = vmul.f32 %v6424_v50, %v8276_v12  ;;  %v8725_v56 = vadd.f32 %v6952_v29, %v2537_v41  ;;  %6431 = vrcp.f32 %v8536_v39  ;;  %v12133_v41 = vld [vmem:[#allocation34_spill] sm:$0xff] }
 0x41e   :  { %1465 = vmatmul.bf16.vlgmr.msrb.gmra.mxu3 %v1425_v58  ;;  %v8712_v13 = vpop.eup %6427  ;;  %v957_v37 = vmul.f32 %v6426_v32, %v8273_v16  ;;  %6433 = vrcp.f32 %v8469_v21  ;;  %v12125_v21 = vld [vmem:[#allocation43_spill] sm:$0xff]  ;;  %v1326_v29 = vsub.f32 %v8508_v38, %v8652_v26 }
 0x41f   :  { %661 = vmatmul.bf16.gmra.mxu2 %v593_v2  ;;  %6435 = vrcp.f32 %v8575_v14  ;;  %v12128_v2 = vld [vmem:[#allocation41_spill] sm:$0xff]  ;;  %v12132_v32 = vld [vmem:[#allocation47_spill] sm:$0xff] }
 0x420   :  { %2190 = vmax.xlane.f32.xlu2 %v8698_v27  ;;  %v973_v34 = vpack.c.bf16 %v958_v3, %v957_v37  ;;  %6437 = vrcp.f32 %v8573_v20  ;;  %v1368_v20 = vpop.xlane.xlu0 %1367 }
 0x421   :  { %6439 = vrcp.f32 %v8591_v52 }
 0x422   :  { %v8719_v63 = vpop.eup %6429  ;;  %6441 = vrcp.f32 %v8567_v60  ;;  %v1355_v60 = vmul.f32 1.442695, %v1326_v29 }
 0x423   :  { %v2896_v51 = vpop.permute.xlu2 %2895  ;;  %v634_v1 = vpop.f32.mrf.mxu2  ;;  %6443 = vrcp.f32 %v8589_v54 }
 0x424   :  { %6157 = vmatmul.msk.bf16.gmra.mxu1 %vm344_vm1, %v2896_v51  ;;  %670 = vst.msk [vmem:[#allocation2 + $0x18] sm:$0xff] %vm344_vm1, %v634_v1  ;;  %v6432_v12 = vpop.eup %6431  ;;  %v1370_v1 = vpop.xlane.xlu1 %1369  ;;  %6445 = vrcp.f32 %v8581_v4  ;;  %v6953_v4 = vld [vmem:[%s11930_s7 + $0x28] sm:$0xff] }
 0x425   :  { %v6434_v62 = vpop.eup %6433  ;;  %v960_v15 = vmul.f32 %v6432_v12, %v8307_v57  ;;  %6447 = vrcp.f32 %v1368_v20 }
 0x426   :  { %v959_v39 = vmul.f32 %v6434_v62, %v8267_v55  ;;  %v6436_v55 = vpop.eup %6435 }
 0x427   :  { %v6438_v57 = vpop.eup %6437 }
 0x428   :  { %2574 = vmax.xlane.f32.xlu2 %v8710_v17  ;;  %v962_v18 = vmul.f32 %v6438_v57, %v12130_v22  ;;  %v6440_v51 = vpop.eup %6439 }
 0x429   :  { %1381 = vadd.xlane.f32.xlu1 %v8712_v13  ;;  %v6442_v50 = vpop.eup %6441  ;;  %v964_v3 = vmul.f32 %v6440_v51, %v12132_v32 }
 0x42a   :  { %v963_v37 = vmul.f32 %v6442_v50, %v12133_v41  ;;  %v6444_v38 = vpop.eup %6443  ;;  %v6954_v50 = vld [vmem:[%s11930_s7 + $0x20] sm:$0xff] }
 0x42b   :  { %v3346_v61 = vpop.permute.xlu2 %3345 }
 0x42c   :  { %6181 = vmatmul.msk.bf16.gmra.mxu0 %vm344_vm1, %v3346_v61  ;;  %v976_v52 = vpack.c.bf16 %v964_v3, %v963_v37 }
 0x42d   :  { %1379 = vadd.xlane.f32.xlu0 %v8719_v63 }
 0x42f   :  { %1013 = vmatmul.bf16.vlgmr.msrb.gmra.mxu2 %v973_v34  ;;  %v2154_v34 = vpop.f32.mrf.mxu1 }
 0x430   :  { %1909 = vmatpush.bf16.msrb.mxu2 %v7804_v8  ;;  %2576 = vmax.xlane.f32.xlu2 %v8725_v56  ;;  %v974_v8 = vpack.c.bf16 %v960_v15, %v959_v39  ;;  %v6446_v39 = vpop.eup %6445  ;;  %v8791_v32 = vadd.f32 %v6954_v50, %v2154_v34 }
 0x432   :  { %v637_v16 = vpop.f32.mrf.mxu2 }
 0x433   :  { %671 = vst.msk [vmem:[#allocation2 + $0x20] sm:$0xff] %vm344_vm1, %v637_v16 }
 0x434   :  { %1910 = vmatpush.bf16.msrb.mxu2 %v7818_v0  ;;  %v12126_v0 = vld [vmem:[#allocation63_spill] sm:$0xff] }
 0x437   :  { %v2156_v26 = vpop.f32.mrf.mxu1 }
 0x438   :  { %1911 = vmatpush.bf16.msrb.mxu2 %v7918_v47  ;;  %v12127_v47 = vld [vmem:[#allocation61_spill] sm:$0xff] }
 0x43a   :  { %v639_v58 = vpop.f32.mrf.mxu2 }
 0x43b   :  { %672 = vst.msk [vmem:[#allocation2 + $0x28] sm:$0xff] %vm344_vm1, %v639_v58  ;;  %v1325_v58 = vsub.f32 %v8505_v6, %v8654_v42 }
 0x43c   :  { %1912 = vmatpush.bf16.msrb.mxu2 %v7971_v19  ;;  %v12129_v19 = vld [vmem:[#allocation65_spill] sm:$0xff] }
 0x43d   :  { %v961_v14 = vmul.f32 %v6436_v55, %v12129_v19  ;;  %v1353_v54 = vmul.f32 1.442695, %v1325_v58  ;;  %v12134_v55 = vld [vmem:[#allocation64_spill] sm:$0xff]  ;;  %v2540_v19 = vpop.f32.mrf.mxu0 }
 0x43e   :  { %v965_v57 = vmul.f32 %v6444_v38, %v12134_v55 }
 0x43f   :  { %1018 = vmatmul.bf16.gmra.mxu2 %v974_v8  ;;  %v975_v43 = vpack.c.bf16 %v962_v18, %v961_v14  ;;  %v6448_v8 = vpop.eup %6447  ;;  %v12135_v14 = vld [vmem:[#allocation39_spill] sm:$0xff] }
 0x440   :  { %1913 = vmatpush.bf16.msrb.mxu2 %v12125_v21  ;;  %v8773_v21 = vadd.f32 %v6953_v4, %v2156_v26  ;;  %v966_v22 = vmul.f32 %v6446_v39, %v12135_v14  ;;  %v12137_v14 = vld [vmem:[#allocation62_spill] sm:$0xff] }
 0x441   :  { %3349 = vrot.lane.b32.xlu0 %v7693_v35, %s7004_s23 }
 0x442   :  { %2350 = vrot.lane.b32.xlu1 %v12126_v0, %s7005_s24  ;;  %v977_v20 = vpack.c.bf16 %v966_v22, %v965_v57 }
 0x444   :  { %1914 = vmatpush.bf16.msrb.mxu2 %v12127_v47 }
 0x445   :  { %v2542_v37 = vpop.f32.mrf.mxu0 }
 0x448   :  { %1915 = vmatpush.bf16.msrb.mxu2 %v12128_v2  ;;  %2899 = vrot.lane.b32.xlu2 %v7693_v35, %s7001_s2 }
 0x44c   :  { %1916 = vmatpush.bf16.msrb.mxu2 %v12131_v28  ;;  %v1412_v28 = vmul.f32 %v6448_v8, %v8552_v44 }
 0x44f   :  { %1023 = vmatmul.bf16.gmra.mxu2 %v975_v43 }
 0x451   :  { %v8761_v16 = vpop.xlane.xlu1 %1375 }
 0x452   :  { %v8754_v25 = vpop.xlane.xlu0 %1373 }
 0x459   :  { %v8775_v47 = vpop.xlane.xlu1 %2570 }
 0x45a   :  { %v642_v61 = vpop.f32.mrf.mxu2  ;;  %v8765_v62 = vpop.xlane.xlu0 %2186 }
 0x45b   :  { %673 = vst.msk [vmem:[#allocation2 + $0x30] sm:$0xff] %vm344_vm1, %v642_v61 }
 0x45f   :  { %1028 = vmatmul.bf16.gmra.mxu2 %v976_v52 }
 0x462   :  { %v644_v12 = vpop.f32.mrf.mxu2  ;;  %v8785_v43 = vpop.xlane.xlu0 %2572 }
 0x463   :  { %674 = vst.msk [vmem:[#allocation2 + $0x38] sm:$0xff] %vm344_vm1, %v644_v12  ;;  %v1366_v15 = vpop.xlane.xlu2 %1365 }
 0x464   :  { %6449 = vrcp.f32 %v1366_v15 }
 0x465   :  { %6451 = vpow2.f32 %v1355_v60 }
 0x466   :  { %6453 = vpow2.f32 %v1353_v54 }
 0x467   :  { %6455 = vrcp.f32 %v8636_v23  ;;  %v6955_v23 = vld [vmem:[%s11930_s7 + $0xa0] sm:$0xff] }
 0x468   :  { %6457 = vrcp.f32 %v8638_v5  ;;  %v8800_v3 = vadd.f32 %v6955_v23, %v2540_v19  ;;  %v12136_v19 = vld [vmem:[#allocation37_spill] sm:$0xff] }
 0x46a   :  { %v6450_v2 = vpop.eup %6449 }
 0x46b   :  { %v8778_v6 = vpop.eup %6451  ;;  %2194 = vmax.xlane.f32.xlu0 %v8773_v21  ;;  %v1372_v42 = vpop.xlane.xlu2 %1371  ;;  %v1411_v18 = vmul.f32 %v6450_v2, %v8630_v9 }
 0x46c   :  { %1387 = vadd.xlane.f32.xlu1 %v8778_v6  ;;  %6459 = vrcp.f32 %v1372_v42  ;;  %v8795_v9 = vpop.eup %6453 }
 0x46d   :  { %v1426_v51 = vpack.c.bf16 %v1412_v28, %v1411_v18  ;;  %6461 = vrcp.f32 %v1370_v1  ;;  %v6456_v41 = vpop.eup %6455  ;;  %v6956_v1 = vld [vmem:[%s11930_s7 + $0xa8] sm:$0xff]  ;;  %v12138_v28 = vld [vmem:[#allocation66_spill] sm:$0xff] }
 0x46e   :  { %v6458_v34 = vpop.eup %6457  ;;  %v8812_v60 = vadd.f32 %v6956_v1, %v2542_v37  ;;  %v968_v58 = vmul.f32 %v6456_v41, %v8461_v36  ;;  %6463 = vrcp.f32 %v8674_v59 }
 0x46f   :  { %1033 = vmatmul.bf16.gmra.mxu2 %v977_v20  ;;  %1470 = vmatmul.bf16.gmra.mxu3 %v1426_v51  ;;  %v967_v15 = vmul.f32 %v6458_v34, %v8465_v45  ;;  %6465 = vrcp.f32 %v8761_v16 }
 0x470   :  { %6467 = vrcp.f32 %v8754_v25 }
 0x471   :  { %2192 = vmax.xlane.f32.xlu2 %v8791_v32  ;;  %v2898_v44 = vpop.permute.xlu1 %2897  ;;  %v978_v54 = vpack.c.bf16 %v968_v58, %v967_v15  ;;  %6469 = vrcp.f32 %v8613_v7  ;;  %v12142_v15 = vld [vmem:[#allocation40_spill] sm:$0xff] }
 0x472   :  { %v647_v61 = vpop.f32.mrf.mxu2  ;;  %6158 = vmatmul.msk.bf16.gmra.mxu1 %vm344_vm1, %v2898_v44  ;;  %v6460_v52 = vpop.eup %6459  ;;  %6471 = vrcp.f32 %v8672_v49  ;;  %v12139_v49 = vld [vmem:[#allocation52_spill] sm:$0xff] }
 0x473   :  { %675 = vst.msk [vmem:[#allocation2 + $0x40] sm:$0xff] %vm344_vm1, %v647_v61  ;;  %1385 = vadd.xlane.f32.xlu0 %v8795_v9  ;;  %v8805_v5 = vpop.xlane.xlu2 %1377  ;;  %v6462_v12 = vpop.eup %6461  ;;  %v1414_v38 = vmul.f32 %v6460_v52, %v8640_v11  ;;  %6473 = vrcp.f32 %v8658_v53  ;;  %v12140_v53 = vld [vmem:[#allocation48_spill] sm:$0xff] }
 0x474   :  { %2578 = vmax.xlane.f32.xlu1 %v8800_v3  ;;  %v1413_v8 = vmul.f32 %v6462_v12, %v8556_v48  ;;  %v6464_v11 = vpop.eup %6463  ;;  %6475 = vrcp.f32 %v8805_v5  ;;  %v12141_v5 = vld [vmem:[#allocation69_spill] sm:$0xff] }
 0x475   :  { %v3348_v29 = vpop.permute.xlu0 %3347  ;;  %v6466_v55 = vpop.eup %6465  ;;  %v970_v57 = vmul.f32 %v6464_v11, %v8529_v10  ;;  %v1327_v58 = vsub.f32 %v12142_v15, %v12141_v5 }
 0x476   :  { %6182 = vmatmul.msk.bf16.gmra.mxu0 %vm344_vm1, %v3348_v29  ;;  %v1427_v4 = vpack.c.bf16 %v1414_v38, %v1413_v8  ;;  %v6468_v48 = vpop.eup %6467  ;;  %v1416_v25 = vmul.f32 %v6466_v55, %v8595_v30 }
 0x477   :  { %v6470_v59 = vpop.eup %6469  ;;  %v1415_v16 = vmul.f32 %v6468_v48, %v8597_v33 }
 0x478   :  { %v969_v42 = vmul.f32 %v6470_v59, %v12136_v19  ;;  %v6472_v33 = vpop.eup %6471 }
 0x479   :  { %2580 = vmax.xlane.f32.xlu2 %v8812_v60  ;;  %v1428_v18 = vpack.c.bf16 %v1416_v25, %v1415_v16  ;;  %v6474_v20 = vpop.eup %6473  ;;  %v971_v51 = vmul.f32 %v6472_v33, %v12139_v49  ;;  %v12147_v49 = vld [vmem:[#allocation73_spill] sm:$0xff] }
 0x47a   :  { %v649_v26 = vpop.f32.mrf.mxu2  ;;  %v979_v22 = vpack.c.bf16 %v970_v57, %v969_v42  ;;  %v972_v23 = vmul.f32 %v6474_v20, %v12140_v53  ;;  %v6476_v29 = vpop.eup %6475 }
 0x47b   :  { %676 = vst.msk [vmem:[#allocation2 + $0x48] sm:$0xff] %vm344_vm1, %v649_v26  ;;  %v8819_v39 = vpop.xlane.xlu2 %2184  ;;  %v1417_v1 = vmul.f32 %v6476_v29, %v8647_v24  ;;  %v12143_v24 = vld [vmem:[#allocation38_spill] sm:$0xff] }
 0x47c   :  { %v980_v61 = vpack.c.bf16 %v972_v23, %v971_v51 }
 0x47f   :  { %1038 = vmatmul.bf16.gmra.mxu2 %v978_v54  ;;  %1475 = vmatmul.bf16.gmra.mxu3 %v1427_v4  ;;  %v1357_v4 = vmul.f32 1.442695, %v1327_v58 }
 0x482   :  { %v652_v36 = vpop.f32.mrf.mxu2 }
 0x483   :  { %677 = vst.msk [vmem:[#allocation2 + $0x50] sm:$0xff] %vm344_vm1, %v652_v36  ;;  %v8827_v45 = vpop.xlane.xlu2 %2188 }
 0x487   :  { %2736 = vrot.lane.b32.xlu0 %v12126_v0, %s7009_s27 }
 0x48a   :  { %v654_v2 = vpop.f32.mrf.mxu2 }
 0x48b   :  { %678 = vst.msk [vmem:[#allocation2 + $0x58] sm:$0xff] %vm344_vm1, %v654_v2  ;;  %v1384_v7 = vpop.xlane.xlu2 %1383 }
 0x48d   :  { %2734 = vrot.lane.b32.xlu1 %v12137_v14, %s7009_s27 }
 0x48f   :  { %3351 = vrot.lane.b32.xlu0 %v12138_v28, %s7004_s23  ;;  %1043 = vmatmul.bf16.gmra.mxu2 %v979_v22  ;;  %v12145_v22 = vld [vmem:[#allocation46_spill] sm:$0xff] }
 0x490   :  { %1480 = vmatmul.bf16.gmra.mxu3 %v1428_v18 }
 0x491   :  { %2901 = vrot.lane.b32.xlu2 %v12138_v28, %s7001_s2 }
 0x492   :  { %v657_v10 = vpop.f32.mrf.mxu2 }
 0x493   :  { %679 = vst.msk [vmem:[#allocation2 + $0x60] sm:$0xff] %vm344_vm1, %v657_v10  ;;  %v8845_v30 = vpop.xlane.xlu2 %2190  ;;  %v12146_v10 = vld [vmem:[#allocation72_spill] sm:$0xff] }
 0x495   :  { %2730 = vrot.lane.b32.xlu1 %v7693_v35, %s7009_s27 }
 0x499   :  { %2348 = vrot.lane.b32.xlu2 %v12137_v14, %s7005_s24 }
 0x49a   :  { %v659_v50 = vpop.f32.mrf.mxu2 }
 0x49b   :  { %680 = vst.msk [vmem:[#allocation2 + $0x68] sm:$0xff] %vm344_vm1, %v659_v50  ;;  %v8853_v44 = vpop.xlane.xlu2 %2574 }
 0x49c   :  { %v1382_v38 = vpop.xlane.xlu1 %1381 }
 0x49f   :  { %1048 = vmatmul.bf16.gmra.mxu2 %v980_v61 }
 0x4a0   :  { %v1380_v41 = vpop.xlane.xlu0 %1379 }
 0x4a1   :  { %6477 = vrcp.f32 %v1380_v41  ;;  %2346 = vrot.lane.b32.xlu2 %v12138_v28, %s7005_s24  ;;  %v1466_v16 = vpop.f32.mrf.mxu3 }
 0x4a2   :  { %v662_v37 = vpop.f32.mrf.mxu2  ;;  %6479 = vrcp.f32 %v1382_v38 }
 0x4a3   :  { %681 = vst.msk [vmem:[#allocation2 + $0x70] sm:$0xff] %vm344_vm1, %v662_v37  ;;  %v8860_v34 = vpop.xlane.xlu2 %2576  ;;  %6481 = vrcp.f32 %v1384_v7 }
 0x4a4   :  { %6483 = vpow2.f32 %v1357_v4 }
 0x4a7   :  { %v6478_v52 = vpop.eup %6477 }
 0x4a8   :  { %v1418_v12 = vmul.f32 %v6478_v52, %v8719_v63  ;;  %v12144_v63 = vld [vmem:[#allocation49_spill] sm:$0xff]  ;;  %v6480_v55 = vpop.eup %6479 }
 0x4a9   :  { %2732 = vrot.lane.b32.xlu2 %v12138_v28, %s7009_s27  ;;  %v1328_v36 = vsub.f32 %v12144_v63, %v8688_v40  ;;  %v6482_v57 = vpop.eup %6481  ;;  %v1419_v25 = vmul.f32 %v6480_v55, %v8712_v13  ;;  %v1468_v18 = vpop.f32.mrf.mxu3 }
 0x4aa   :  { %v664_v26 = vpop.f32.mrf.mxu2  ;;  %v1429_v8 = vpack.c.bf16 %v1418_v12, %v1417_v1  ;;  %v8878_v7 = vpop.eup %6483  ;;  %v1420_v19 = vmul.f32 %v6482_v57, %v8683_v31  ;;  %v12148_v1 = vld [vmem:[#allocation74_spill] sm:$0xff] }
 0x4ab   :  { %682 = vst.msk [vmem:[#allocation2 + $0x78] sm:$0xff] %vm344_vm1, %v664_v26  ;;  %v2900_v54 = vpop.permute.xlu2 %2899  ;;  %v1359_v2 = vmul.f32 1.442695, %v1328_v36 }
 0x4ac   :  { %1485 = vmatmul.bf16.gmra.mxu3 %v1429_v8  ;;  %6159 = vmatmul.msk.bf16.gmra.mxu1 %vm344_vm1, %v2900_v54  ;;  %v1430_v42 = vpack.c.bf16 %v1420_v19, %v1419_v25  ;;  %v12149_v54 = vld [vmem:[#allocation75_spill] sm:$0xff] }
 0x4ad   :  { %6485 = vpow2.f32 %v1359_v2 }
 0x4af   :  { %6099 = vmatmul.msk.bf16.vlgmr.msra.gmra.mxu2 %vm344_vm1, %v12143_v24 }
 0x4b1   :  { %2344 = vrot.lane.b32.xlu2 %v7693_v35, %s7005_s24 }
 0x4b2   :  { %v1014_v11 = vpop.f32.mrf.mxu2 }
 0x4b3   :  { %v3350_v48 = vpop.permute.xlu0 %3349  ;;  %v8886_v13 = vpop.eup %6485 }
 0x4b4   :  { %6183 = vmatmul.msk.bf16.gmra.mxu0 %vm344_vm1, %v3350_v48  ;;  %v2351_v59 = vpop.permute.xlu1 %2350 }
 0x4b5   :  { %2360 = vmatpush.bf16.msra.mxu3 %v2351_v59  ;;  %v12150_v59 = vld [vmem:[#allocation70_spill] sm:$0xff] }
 0x4b9   :  { %1389 = vadd.xlane.f32.xlu0 %v8878_v7  ;;  %1522 = vrot.lane.b32.xlu2 %v1466_v16, %s7011_s15 }
 0x4ba   :  { %v1016_v40 = vpop.f32.mrf.mxu2 }
 0x4bb   :  { %1072 = vrot.lane.b32.xlu1 %v1016_v40, %s7012_s16 }
 0x4bc   :  { %1490 = vmatmul.bf16.gmra.mxu3 %v1430_v42 }
 0x4bf   :  { %6100 = vmatmul.msk.bf16.gmra.mxu2 %vm344_vm1, %v12145_v22  ;;  %v12151_v22 = vld [vmem:[#allocation71_spill] sm:$0xff] }
 0x4c1   :  { %1391 = vadd.xlane.f32.xlu0 %v8886_v13  ;;  %1524 = vrot.lane.b32.xlu2 %v1468_v18, %s7011_s15 }
 0x4c2   :  { %v1019_v31 = vpop.f32.mrf.mxu2 }
 0x4c9   :  { %1074 = vrot.lane.b32.xlu2 %v1019_v31, %s7012_s16 }
 0x4ca   :  { %v1021_v33 = vpop.f32.mrf.mxu2 }
 0x4cf   :  { %6101 = vmatmul.msk.bf16.gmra.mxu2 %vm344_vm1, %v12146_v10 }
 0x4d2   :  { %v1024_v23 = vpop.f32.mrf.mxu2 }
 0x4d5   :  { %1070 = vrot.lane.b32.xlu0 %v1014_v11, %s7012_s16 }
 0x4da   :  { %v1026_v5 = vpop.f32.mrf.mxu2 }
 0x4de   :  { %v8894_v20 = vpop.xlane.xlu0 %2194 }
 0x4df   :  { %6102 = vmatmul.msk.bf16.gmra.mxu2 %vm344_vm1, %v12147_v49  ;;  %v1388_v51 = vpop.xlane.xlu1 %1387 }
 0x4e0   :  { %6487 = vrcp.f32 %v1388_v51 }
 0x4e4   :  { %v8898_v50 = vpop.xlane.xlu2 %2192 }
 0x4e6   :  { %v1386_v53 = vpop.xlane.xlu0 %1385  ;;  %v6488_v61 = vpop.eup %6487 }
 0x4e7   :  { %6489 = vrcp.f32 %v1386_v53  ;;  %v1422_v52 = vmul.f32 %v6488_v61, %v8778_v6  ;;  %v8908_v38 = vpop.xlane.xlu1 %2578  ;;  %v1029_v6 = vpop.f32.mrf.mxu2 }
 0x4ec   :  { %v8900_v41 = vpop.xlane.xlu2 %2580 }
 0x4ed   :  { %v6490_v37 = vpop.eup %6489 }
 0x4ee   :  { %v1421_v29 = vmul.f32 %v6490_v37, %v8795_v9 }
 0x4ef   :  { %6103 = vmatmul.msk.bf16.gmra.mxu2 %vm344_vm1, %v12148_v1  ;;  %v1031_v11 = vpop.f32.mrf.mxu2 }
 0x4f0   :  { %v1431_v12 = vpack.c.bf16 %v1422_v52, %v1421_v29 }
 0x4f2   :  { %1495 = vmatmul.bf16.gmra.mxu3 %v1431_v12  ;;  %v1471_v15 = vpop.f32.mrf.mxu3 }
 0x4f3   :  { %1526 = vrot.lane.b32.xlu0 %v1471_v15, %s7011_s15 }
 0x4f4   :  { %v2902_v58 = vpop.permute.xlu2 %2901 }
 0x4f5   :  { %6160 = vmatmul.msk.bf16.gmra.mxu1 %vm344_vm1, %v2902_v58 }
 0x4f7   :  { %v1034_v57 = vpop.f32.mrf.mxu2 }
 0x4f9   :  { %v2737_v26 = vpop.permute.xlu0 %2736 }
 0x4fa   :  { %2746 = vmatpush.bf16.msra.mxu2 %v2737_v26  ;;  %v1473_v8 = vpop.f32.mrf.mxu3 }
 0x4fb   :  { %1076 = vrot.lane.b32.xlu0 %v1021_v33, %s7012_s16  ;;  %1528 = vrot.lane.b32.xlu1 %v1473_v8, %s7011_s15 }
 0x4fc   :  { %v2349_v9 = vpop.permute.xlu2 %2348 }
 0x4fd   :  { %2361 = vmatpush.bf16.msra.mxu3 %v2349_v9 }
 0x4ff   :  { %6104 = vmatmul.msk.bf16.gmra.mxu2 %vm344_vm1, %v12149_v54  ;;  %v2735_v4 = vpop.permute.xlu1 %2734  ;;  %v1036_v19 = vpop.f32.mrf.mxu2 }
 0x500   :  { %2747 = vmatpush.bf16.msra.mxu2 %v2735_v4 }
 0x501   :  { %v3352_v24 = vpop.permute.xlu0 %3351 }
 0x502   :  { %6184 = vmatmul.msk.bf16.gmra.mxu0 %vm344_vm1, %v3352_v24  ;;  %v1476_v63 = vpop.f32.mrf.mxu3 }
 0x503   :  { %1082 = vrot.lane.b32.xlu0 %v1029_v6, %s7012_s16  ;;  %1078 = vrot.lane.b32.xlu1 %v1024_v23, %s7012_s16 }
 0x504   :  { %1530 = vrot.lane.b32.xlu2 %v1476_v63, %s7011_s15  ;;  %v2347_v36 = vpop.permute.xlu2 %2346 }
 0x505   :  { %2362 = vmatpush.bf16.msra.mxu3 %v2347_v36 }
 0x507   :  { %v2731_v2 = vpop.permute.xlu1 %2730  ;;  %v1039_v18 = vpop.f32.mrf.mxu2 }
 0x50a   :  { %v1478_v55 = vpop.f32.mrf.mxu3 }
 0x50b   :  { %1532 = vrot.lane.b32.xlu1 %v1478_v55, %s7011_s15 }
 0x50c   :  { %1080 = vrot.lane.b32.xlu2 %v1026_v5, %s7012_s16  ;;  %v2733_v48 = vpop.permute.xlu2 %2732 }
 0x50d   :  { %2748 = vmatpush.bf16.msra.mxu2 %v2733_v48 }
 0x50f   :  { %6105 = vmatmul.msk.bf16.gmra.mxu2 %vm344_vm1, %v12150_v59  ;;  %v1041_v51 = vpop.f32.mrf.mxu2 }
 0x511   :  { %2749 = vmatpush.bf16.msra.mxu2 %v2731_v2 }
 0x513   :  { %v1481_v16 = vpop.f32.mrf.mxu3  ;;  %1084 = vrot.lane.b32.xlu1 %v1031_v11, %s7012_s16 }
 0x514   :  { %1534 = vrot.lane.b32.xlu2 %v1481_v16, %s7011_s15  ;;  %v2345_v25 = vpop.permute.xlu2 %2344 }
 0x515   :  { %2363 = vmatpush.bf16.msra.mxu3 %v2345_v25 }
 0x517   :  { %v1044_v37 = vpop.f32.mrf.mxu2 }
 0x51b   :  { %v1483_v40 = vpop.f32.mrf.mxu3 }
 0x51c   :  { %1086 = vrot.lane.b32.xlu2 %v1034_v57, %s7012_s16  ;;  %1536 = vrot.lane.b32.xlu0 %v1483_v40, %s7011_s15  ;;  %v1523_v42 = vpop.permute.xlu2 %1522 }
 0x51f   :  { %6106 = vmatmul.msk.bf16.gmra.mxu2 %vm344_vm1, %v12151_v22  ;;  %v1046_v58 = vpop.f32.mrf.mxu2 }
 0x524   :  { %1088 = vrot.lane.b32.xlu0 %v1036_v19, %s7012_s16  ;;  %v1525_v31 = vpop.permute.xlu2 %1524 }
 0x52c   :  { %v1390_v10 = vpop.xlane.xlu0 %1389  ;;  %v1075_v33 = vpop.permute.xlu2 %1074 }
 0x52d   :  { %1121 = vst.msk [vmem:[#allocation2 + $0x10] sm:$0xff] %vm1118_vm2, %v1075_v33  ;;  %v1073_v49 = vpop.permute.xlu1 %1072  ;;  %6491 = vrcp.f32 %v1390_v10 }
 0x52e   :  { %1120 = vst.msk [vmem:[#allocation2 + $0x8] sm:$0xff] %vm1118_vm2, %v1073_v49 }
 0x52f   :  { %v1486_v53 = vpop.f32.mrf.mxu3  ;;  %1572 = vst.msk [vmem:[#allocation2 + $0x8] sm:$0xff] %vm1570_vm3, %v1525_v31 }
 0x530   :  { %1538 = vrot.lane.b32.xlu1 %v1486_v53, %s7011_s15 }
 0x533   :  { %v6492_v29 = vpop.eup %6491 }
 0x534   :  { %v1392_v23 = vpop.xlane.xlu0 %1391  ;;  %v1423_v1 = vmul.f32 %v6492_v29, %v8878_v7  ;;  %v1049_v7 = vpop.f32.mrf.mxu2 }
 0x535   :  { %6493 = vrcp.f32 %v1392_v23 }
 0x537   :  { %v1488_v61 = vpop.f32.mrf.mxu3 }
 0x538   :  { %1090 = vrot.lane.b32.xlu1 %v1039_v18, %s7012_s16  ;;  %1540 = vrot.lane.b32.xlu2 %v1488_v61, %s7011_s15 }
 0x53b   :  { %v6494_v52 = vpop.eup %6493 }
 0x53c   :  { %v1424_v12 = vmul.f32 %v6494_v52, %v8886_v13  ;;  %v1051_v13 = vpop.f32.mrf.mxu2 }
 0x53e   :  { %v1432_v5 = vpack.c.bf16 %v1424_v12, %v1423_v1 }
 0x53f   :  { %v1491_v15 = vpop.f32.mrf.mxu3 }
 0x540   :  { %1092 = vrot.lane.b32.xlu2 %v1041_v51, %s7012_s16  ;;  %1542 = vrot.lane.b32.xlu0 %v1491_v15, %s7011_s15 }
 0x541   :  { %1500 = vmatmul.bf16.gmra.mxu3 %v1432_v5  ;;  %v6086_v5 = vld [vmem:[%s11930_s7 + $0x198] sm:$0xff] }
 0x544   :  { %v1693_v9 = vpop.f32.mrf.mxu2 }
 0x547   :  { %v1071_v26 = vpop.permute.xlu0 %1070  ;;  %v1493_v8 = vpop.f32.mrf.mxu3 }
 0x548   :  { %1119 = vst.msk [vmem:[#allocation2] sm:$0xff] %vm1118_vm2, %v1071_v26  ;;  %1094 = vrot.lane.b32.xlu0 %v1044_v37, %s7012_s16  ;;  %1544 = vrot.lane.b32.xlu2 %v1493_v8, %s7011_s15  ;;  %v6083_v37 = vld [vmem:[%s11930_s7 + $0x180] sm:$0xff] }
 0x549   :  { %1571 = vst.msk [vmem:[#allocation2] sm:$0xff] %vm1570_vm3, %v1523_v42  ;;  %v8976_v52 = vadd.f32 %v6083_v37, %v1693_v9  ;;  %v6167_v8 = vld [vmem:[%s11930_s7 + $0x1a0] sm:$0xff]  ;;  %v6170_v37 = vld [vmem:[%s11930_s7 + $0x1b8] sm:$0xff] }
 0x54c   :  { %v8946_v24 = vpop.f32.mrf.mxu2 }
 0x550   :  { %1098 = vrot.lane.b32.xlu2 %v1049_v7, %s7012_s16 }
 0x554   :  { %v8950_v55 = vpop.f32.mrf.mxu2 }
 0x55c   :  { %v1700_v19 = vpop.f32.mrf.mxu2 }
 0x55d   :  { %v8983_v15 = vadd.f32 %v6086_v5, %v1700_v19  ;;  %v6097_v5 = vld [vmem:[%s11930_s7 + $0x1f0] sm:$0xff] }
 0x55e   :  { %v1531_v6 = vpop.permute.xlu2 %1530 }
 0x564   :  { %v1703_v42 = vpop.f32.mrf.mxu2 }
 0x565   :  { %v1527_v54 = vpop.permute.xlu0 %1526  ;;  %v8990_v7 = vadd.f32 %v6167_v8, %v1703_v42 }
 0x566   :  { %1573 = vst.msk [vmem:[#allocation2 + $0x10] sm:$0xff] %vm1570_vm3, %v1527_v54  ;;  %v1081_v4 = vpop.permute.xlu2 %1080 }
 0x567   :  { %1124 = vst.msk [vmem:[#allocation2 + $0x28] sm:$0xff] %vm1118_vm2, %v1081_v4 }
 0x56c   :  { %v8964_v31 = vpop.f32.mrf.mxu2 }
 0x56d   :  { %v1077_v63 = vpop.permute.xlu0 %1076  ;;  %v1529_v36 = vpop.permute.xlu1 %1528 }
 0x56e   :  { %1122 = vst.msk [vmem:[#allocation2 + $0x18] sm:$0xff] %vm1118_vm2, %v1077_v63  ;;  %v1535_v11 = vpop.permute.xlu2 %1534  ;;  %v6172_v63 = vld [vmem:[%s11930_s7 + $0x1c8] sm:$0xff] }
 0x56f   :  { %1574 = vst.msk [vmem:[#allocation2 + $0x18] sm:$0xff] %vm1570_vm3, %v1529_v36 }
 0x574   :  { %v1708_v49 = vpop.f32.mrf.mxu2 }
 0x575   :  { %v1496_v48 = vpop.f32.mrf.mxu3  ;;  %v1083_v59 = vpop.permute.xlu0 %1082 }
 0x576   :  { %1125 = vst.msk [vmem:[#allocation2 + $0x30] sm:$0xff] %vm1118_vm2, %v1083_v59  ;;  %v1087_v57 = vpop.permute.xlu2 %1086  ;;  %1546 = vrot.lane.b32.xlu1 %v1496_v48, %s7011_s15  ;;  %v1079_v2 = vpop.permute.xlu1 %1078  ;;  %v6173_v48 = vld [vmem:[%s11930_s7 + $0x1d0] sm:$0xff] }
 0x577   :  { %1577 = vst.msk [vmem:[#allocation2 + $0x30] sm:$0xff] %vm1570_vm3, %v1535_v11 }
 0x578   :  { %1127 = vst.msk [vmem:[#allocation2 + $0x40] sm:$0xff] %vm1118_vm2, %v1087_v57 }
 0x579   :  { %1123 = vst.msk [vmem:[#allocation2 + $0x20] sm:$0xff] %vm1118_vm2, %v1079_v2  ;;  %v6095_v2 = vld [vmem:[%s11930_s7 + $0x1e0] sm:$0xff] }
 0x57a   :  { %1575 = vst.msk [vmem:[#allocation2 + $0x20] sm:$0xff] %vm1570_vm3, %v1531_v6  ;;  %v6169_v6 = vld [vmem:[%s11930_s7 + $0x1b0] sm:$0xff] }
 0x57b   :  { %v8997_v54 = vadd.f32 %v6169_v6, %v1708_v49  ;;  %v6085_v49 = vld [vmem:[%s11930_s7 + $0x190] sm:$0xff] }
 0x57c   :  { %v1710_v23 = vpop.f32.mrf.mxu2 }
 0x57d   :  { %v1498_v16 = vpop.f32.mrf.mxu3 }
 0x57e   :  { %1096 = vrot.lane.b32.xlu1 %v1046_v58, %s7012_s16  ;;  %1548 = vrot.lane.b32.xlu0 %v1498_v16, %s7011_s15  ;;  %v1533_v25 = vpop.permute.xlu1 %1532 }
 0x57f   :  { %1576 = vst.msk [vmem:[#allocation2 + $0x28] sm:$0xff] %vm1570_vm3, %v1533_v25  ;;  %v6096_v25 = vld [vmem:[%s11930_s7 + $0x1e8] sm:$0xff] }
 0x584   :  { %v1713_v1 = vpop.f32.mrf.mxu2 }
 0x586   :  { %1100 = vrot.lane.b32.xlu0 %v1051_v13, %s7012_s16  ;;  %v1085_v40 = vpop.permute.xlu1 %1084 }
 0x587   :  { %1126 = vst.msk [vmem:[#allocation2 + $0x38] sm:$0xff] %vm1118_vm2, %v1085_v40 }
 0x58c   :  { %v1715_v26 = vpop.f32.mrf.mxu2 }
 0x58d   :  { %v9004_v36 = vadd.f32 %v6172_v63, %v1715_v26 }
 0x58e   :  { %v1537_v22 = vpop.permute.xlu0 %1536 }
 0x58f   :  { %1578 = vst.msk [vmem:[#allocation2 + $0x38] sm:$0xff] %vm1570_vm3, %v1537_v22  ;;  %v6084_v22 = vld [vmem:[%s11930_s7 + $0x188] sm:$0xff] }
 0x592   :  { %v1541_v18 = vpop.permute.xlu2 %1540 }
 0x594   :  { %v1718_v9 = vpop.f32.mrf.mxu2 }
 0x595   :  { %v9010_v59 = vadd.f32 %v6173_v48, %v1718_v9 }
 0x596   :  { %v1089_v10 = vpop.permute.xlu0 %1088 }
 0x597   :  { %1128 = vst.msk [vmem:[#allocation2 + $0x48] sm:$0xff] %vm1118_vm2, %v1089_v10 }
 0x598   :  { %1580 = vst.msk [vmem:[#allocation2 + $0x48] sm:$0xff] %vm1570_vm3, %v1541_v18  ;;  %v1696_v18 = vadd.f32 %v6084_v22, %v8946_v24 }
 0x59a   :  { %v1093_v33 = vpop.permute.xlu2 %1092 }
 0x59b   :  { %1130 = vst.msk [vmem:[#allocation2 + $0x58] sm:$0xff] %vm1118_vm2, %v1093_v33 }
 0x59c   :  { %v1720_v11 = vpop.f32.mrf.mxu2 }
 0x5a2   :  { %v1545_v51 = vpop.permute.xlu2 %1544  ;;  %v1539_v53 = vpop.permute.xlu1 %1538 }
 0x5a3   :  { %1582 = vst.msk [vmem:[#allocation2 + $0x58] sm:$0xff] %vm1570_vm3, %v1545_v51  ;;  %v6168_v51 = vld [vmem:[%s11930_s7 + $0x1a8] sm:$0xff] }
 0x5a4   :  { %1579 = vst.msk [vmem:[#allocation2 + $0x40] sm:$0xff] %vm1570_vm3, %v1539_v53  ;;  %v1723_v57 = vpop.f32.mrf.mxu2  ;;  %v1699_v53 = vadd.f32 %v6085_v49, %v8950_v55  ;;  %v6957_v49 = vld [vmem:[%s11930_s7 + $0x38] sm:$0xff] }
 0x5a5   :  { %v9016_v16 = vadd.f32 %v6095_v2, %v1723_v57 }
 0x5aa   :  { %v1099_v61 = vpop.permute.xlu2 %1098  ;;  %v1091_v29 = vpop.permute.xlu1 %1090 }
 0x5ab   :  { %1133 = vst.msk [vmem:[#allocation2 + $0x70] sm:$0xff] %vm1118_vm2, %v1099_v61  ;;  %v9040_v61 = vadd.f32 %v6168_v51, %v8964_v31  ;;  %v12152_v51 = vld [vmem:[#allocation58_spill] sm:$0xff] }
 0x5ac   :  { %1129 = vst.msk [vmem:[#allocation2 + $0x50] sm:$0xff] %vm1118_vm2, %v1091_v29  ;;  %v1725_v19 = vpop.f32.mrf.mxu2  ;;  %v6171_v29 = vld [vmem:[%s11930_s7 + $0x1c0] sm:$0xff] }
 0x5ad   :  { %v9022_v40 = vadd.f32 %v6096_v25, %v1725_v19  ;;  %v9052_v55 = vadd.f32 %v6171_v29, %v1713_v1 }
 0x5b0   :  { %1733 = vmax.xlane.f32.xlu0 %v8976_v52 }
 0x5b2   :  { %v1543_v12 = vpop.permute.xlu0 %1542 }
 0x5b3   :  { %1581 = vst.msk [vmem:[#allocation2 + $0x50] sm:$0xff] %vm1570_vm3, %v1543_v12  ;;  %v9050_v12 = vadd.f32 %v6170_v37, %v1710_v23  ;;  %v6098_v23 = vld [vmem:[%s11930_s7 + $0x1f8] sm:$0xff] }
 0x5b4   :  { %v1728_v31 = vpop.f32.mrf.mxu2 }
 0x5b5   :  { %v9064_v8 = vadd.f32 %v6097_v5, %v1728_v31 }
 0x5b8   :  { %1739 = vmax.xlane.f32.xlu0 %v8983_v15 }
 0x5ba   :  { %v1095_v58 = vpop.permute.xlu0 %1094 }
 0x5bb   :  { %1131 = vst.msk [vmem:[#allocation2 + $0x60] sm:$0xff] %vm1118_vm2, %v1095_v58  ;;  %v6174_v58 = vld [vmem:[%s11930_s7 + $0x1d8] sm:$0xff] }
 0x5bc   :  { %v9062_v26 = vadd.f32 %v6174_v58, %v1720_v11  ;;  %v1730_v1 = vpop.f32.mrf.mxu2 }
 0x5c0   :  { %1741 = vmax.xlane.f32.xlu0 %v8990_v7 }
 0x5c4   :  { %v1501_v13 = vpop.f32.mrf.mxu3 }
 0x5c5   :  { %1550 = vrot.lane.b32.xlu1 %v1501_v13, %s7011_s15  ;;  %v9071_v13 = vadd.f32 %v6098_v23, %v1730_v1 }
 0x5c8   :  { %1745 = vmax.xlane.f32.xlu0 %v8997_v54 }
 0x5cc   :  { %v1503_v4 = vpop.f32.mrf.mxu3 }
 0x5cd   :  { %1552 = vrot.lane.b32.xlu2 %v1503_v4, %s7011_s15 }
 0x5d0   :  { %1751 = vmax.xlane.f32.xlu0 %v9004_v36 }
 0x5d8   :  { %1753 = vmax.xlane.f32.xlu0 %v9010_v59 }
 0x5e0   :  { %1757 = vmax.xlane.f32.xlu0 %v9016_v16 }
 0x5e8   :  { %1759 = vmax.xlane.f32.xlu0 %v9022_v40  ;;  %v1547_v42 = vpop.permute.xlu1 %1546 }
 0x5e9   :  { %1583 = vst.msk [vmem:[#allocation2 + $0x60] sm:$0xff] %vm1570_vm3, %v1547_v42 }
 0x5ef   :  { %1735 = vmax.xlane.f32.xlu1 %v1696_v18 }
 0x5f0   :  { %v1549_v10 = vpop.permute.xlu0 %1548  ;;  %v1097_v33 = vpop.permute.xlu1 %1096 }
 0x5f1   :  { %1132 = vst.msk [vmem:[#allocation2 + $0x68] sm:$0xff] %vm1118_vm2, %v1097_v33 }
 0x5f2   :  { %1584 = vst.msk [vmem:[#allocation2 + $0x68] sm:$0xff] %vm1570_vm3, %v1549_v10  ;;  %v2159_v10 = vpop.f32.mrf.mxu1 }
 0x5f6   :  { %1737 = vmax.xlane.f32.xlu2 %v1699_v53 }
 0x5f7   :  { %1743 = vmax.xlane.f32.xlu1 %v9040_v61 }
 0x5f8   :  { %v1101_v24 = vpop.permute.xlu0 %1100 }
 0x5f9   :  { %1134 = vst.msk [vmem:[#allocation2 + $0x78] sm:$0xff] %vm1118_vm2, %v1101_v24 }
 0x5fa   :  { %v2161_v33 = vpop.f32.mrf.mxu1 }
 0x5fe   :  { %1747 = vmax.xlane.f32.xlu2 %v9050_v12 }
 0x5ff   :  { %1749 = vmax.xlane.f32.xlu1 %v9052_v55 }
 0x606   :  { %1755 = vmax.xlane.f32.xlu2 %v9062_v26 }
 0x607   :  { %1761 = vmax.xlane.f32.xlu1 %v9064_v8 }
 0x60e   :  { %1763 = vmax.xlane.f32.xlu2 %v9071_v13 }
 0x623   :  { %v1734_v6 = vpop.xlane.xlu0 %1733 }
 0x624   :  { %v1765_v9 = vsub.f32 %v8976_v52, %v1734_v6 }
 0x626   :  { %v1781_v4 = vmul.f32 1.442695, %v1765_v9 }
 0x627   :  { %v1553_v63 = vpop.permute.xlu2 %1552 }
 0x628   :  { %6495 = vpow2.f32 %v1781_v4  ;;  %1586 = vst.msk [vmem:[#allocation2 + $0x78] sm:$0xff] %vm1570_vm3, %v1553_v63 }
 0x62b   :  { %v1740_v11 = vpop.xlane.xlu0 %1739 }
 0x62c   :  { %v1768_v48 = vsub.f32 %v8983_v15, %v1740_v11 }
 0x62e   :  { %v9077_v57 = vpop.eup %6495  ;;  %v1787_v2 = vmul.f32 1.442695, %v1768_v48 }
 0x62f   :  { %1813 = vadd.xlane.f32.xlu2 %v9077_v57 }
 0x630   :  { %6497 = vpow2.f32 %v1787_v2 }
 0x633   :  { %v1742_v25 = vpop.xlane.xlu0 %1741 }
 0x634   :  { %v1769_v19 = vsub.f32 %v8990_v7, %v1742_v25  ;;  %v9091_v7 = vadd.f32 %v6957_v49, %v2161_v33  ;;  %v2545_v49 = vpop.f32.mrf.mxu0 }
 0x636   :  { %v9081_v42 = vpop.eup %6497  ;;  %v1789_v52 = vmul.f32 1.442695, %v1769_v19 }
 0x637   :  { %v1551_v22 = vpop.permute.xlu1 %1550  ;;  %1819 = vadd.xlane.f32.xlu1 %v9081_v42 }
 0x638   :  { %6499 = vpow2.f32 %v1789_v52  ;;  %1585 = vst.msk [vmem:[#allocation2 + $0x70] sm:$0xff] %vm1570_vm3, %v1551_v22  ;;  %v6958_v22 = vld [vmem:[%s11930_s7 + $0x30] sm:$0xff] }
 0x639   :  { %v9117_v33 = vadd.f32 %v6958_v22, %v2159_v10 }
 0x63b   :  { %v9096_v31 = vpop.xlane.xlu0 %1745 }
 0x63e   :  { %v9085_v15 = vpop.eup %6499 }
 0x63f   :  { %1821 = vadd.xlane.f32.xlu1 %v9085_v15 }
 0x643   :  { %v1752_v4 = vpop.xlane.xlu0 %1751 }
 0x644   :  { %v1774_v48 = vsub.f32 %v9004_v36, %v1752_v4 }
 0x646   :  { %v1799_v25 = vmul.f32 1.442695, %v1774_v48 }
 0x647   :  { %2198 = vmax.xlane.f32.xlu1 %v9091_v7 }
 0x64b   :  { %v9108_v2 = vpop.xlane.xlu0 %1753 }
 0x660   :  { %2728 = vrot.lane.b32.xlu1 %v12152_v51, %s7009_s27 }
 0x662   :  { %v1736_v24 = vpop.xlane.xlu1 %1735 }
 0x663   :  { %v1766_v37 = vsub.f32 %v1696_v18, %v1736_v24  ;;  %v1758_v24 = vpop.xlane.xlu0 %1757 }
 0x665   :  { %v1783_v29 = vmul.f32 1.442695, %v1766_v37 }
 0x667   :  { %6501 = vpow2.f32 %v1783_v29  ;;  %v1777_v29 = vsub.f32 %v9016_v16, %v1758_v24 }
 0x669   :  { %v1738_v5 = vpop.xlane.xlu2 %1737 }
 0x66a   :  { %v1767_v58 = vsub.f32 %v1699_v53, %v1738_v5  ;;  %v1744_v23 = vpop.xlane.xlu1 %1743 }
 0x66b   :  { %v1770_v9 = vsub.f32 %v9040_v61, %v1744_v23  ;;  %v1760_v23 = vpop.xlane.xlu0 %1759 }
 0x66c   :  { %v1785_v1 = vmul.f32 1.442695, %v1767_v58  ;;  %v1805_v58 = vmul.f32 1.442695, %v1777_v29  ;;  %v1778_v16 = vsub.f32 %v9022_v40, %v1760_v23  ;;  %v1771_v40 = vsub.f32 %v8997_v54, %v9096_v31  ;;  %v12153_v29 = vld [vmem:[#allocation67_spill] sm:$0xff] }
 0x66d   :  { %v9098_v6 = vpop.eup %6501  ;;  %v1791_v63 = vmul.f32 1.442695, %v1770_v9  ;;  %v6959_v9 = vld [vmem:[%s11930_s7 + $0xb8] sm:$0xff] }
 0x66e   :  { %6503 = vpow2.f32 %v1785_v1  ;;  %1815 = vadd.xlane.f32.xlu0 %v9098_v6  ;;  %v1793_v24 = vmul.f32 1.442695, %v1771_v40 }
 0x66f   :  { %6505 = vpow2.f32 %v1791_v63  ;;  %v1807_v63 = vmul.f32 1.442695, %v1778_v16 }
 0x670   :  { %6507 = vpow2.f32 %v1799_v25 }
 0x671   :  { %v1748_v18 = vpop.xlane.xlu2 %1747 }
 0x672   :  { %v1772_v61 = vsub.f32 %v9050_v12, %v1748_v18  ;;  %v1750_v10 = vpop.xlane.xlu1 %1749 }
 0x673   :  { %v1773_v40 = vsub.f32 %v9052_v55, %v1750_v10 }
 0x674   :  { %v9102_v11 = vpop.eup %6503  ;;  %v1795_v52 = vmul.f32 1.442695, %v1772_v61 }
 0x675   :  { %1817 = vadd.xlane.f32.xlu2 %v9102_v11  ;;  %v9106_v53 = vpop.eup %6505 }
 0x676   :  { %6509 = vpow2.f32 %v1795_v52  ;;  %v9121_v37 = vpop.eup %6507  ;;  %v2216_v52 = vsub.f32 %v8664_v46, %v8819_v39 }
 0x678   :  { %v2232_v22 = vmul.f32 1.442695, %v2216_v52 }
 0x679   :  { %v1756_v19 = vpop.xlane.xlu2 %1755 }
 0x67a   :  { %v1776_v36 = vsub.f32 %v9062_v26, %v1756_v19  ;;  %v2547_v26 = vpop.f32.mrf.mxu0  ;;  %v1762_v18 = vpop.xlane.xlu1 %1761 }
 0x67b   :  { %v9134_v4 = vadd.f32 %v6959_v9, %v2547_v26  ;;  %v1779_v61 = vsub.f32 %v9064_v8, %v1762_v18  ;;  %v6960_v8 = vld [vmem:[%s11930_s7 + $0xb0] sm:$0xff]  ;;  %v12154_v26 = vld [vmem:[#allocation68_spill] sm:$0xff] }
 0x67c   :  { %v1803_v12 = vmul.f32 1.442695, %v1776_v36  ;;  %v9125_v5 = vpop.eup %6509  ;;  %v2217_v23 = vsub.f32 %v12154_v26, %v8765_v62  ;;  %v12155_v18 = vld [vmem:[#allocation53_spill] sm:$0xff]  ;;  %v1775_v26 = vsub.f32 %v9010_v59, %v9108_v2 }
 0x67d   :  { %1823 = vadd.xlane.f32.xlu2 %v9106_v53  ;;  %v1809_v25 = vmul.f32 1.442695, %v1779_v61 }
 0x67e   :  { %6511 = vpow2.f32 %v1803_v12  ;;  %v9154_v12 = vadd.f32 %v6960_v8, %v2545_v49  ;;  %v2234_v16 = vmul.f32 1.442695, %v2217_v23 }
 0x67f   :  { %6513 = vpow2.f32 %v1805_v58  ;;  %v2603_v58 = vsub.f32 %v12153_v29, %v8785_v43 }
 0x680   :  { %6515 = vpow2.f32 %v1807_v63 }
 0x681   :  { %6517 = vpow2.f32 %v1809_v25  ;;  %v2620_v46 = vmul.f32 1.442695, %v2603_v58  ;;  %v9181_v25 = vpop.xlane.xlu2 %1763 }
 0x682   :  { %2342 = vrot.lane.b32.xlu0 %v12152_v51, %s7005_s24  ;;  %6519 = vpow2.f32 %v2232_v22  ;;  %v9194_v59 = vpop.f32.mrf.mxu0 }
 0x683   :  { %6521 = vpow2.f32 %v1793_v24  ;;  %v1797_v24 = vmul.f32 1.442695, %v1773_v40 }
 0x684   :  { %v9128_v1 = vpop.eup %6511  ;;  %6523 = vpow2.f32 %v2620_v46 }
 0x685   :  { %2196 = vmax.xlane.f32.xlu2 %v9117_v33  ;;  %v9138_v48 = vpop.eup %6513  ;;  %6525 = vpow2.f32 %v2234_v16  ;;  %v12156_v16 = vld [vmem:[#allocation55_spill] sm:$0xff] }
 0x686   :  { %v9142_v19 = vpop.eup %6515 }
 0x687   :  { %v9149_v36 = vpop.eup %6517 }
 0x688   :  { %v9162_v39 = vpop.eup %6519 }
 0x689   :  { %v9165_v54 = vpop.eup %6521 }
 0x68a   :  { %1831 = vadd.xlane.f32.xlu1 %v9121_v37  ;;  %v9168_v49 = vpop.eup %6523 }
 0x68b   :  { %v9179_v61 = vpop.eup %6525 }
 0x68d   :  { %1827 = vadd.xlane.f32.xlu2 %v9125_v5 }
 0x692   :  { %1835 = vadd.xlane.f32.xlu1 %v9128_v1 }
 0x695   :  { %2584 = vmax.xlane.f32.xlu2 %v9134_v4 }
 0x69a   :  { %1837 = vadd.xlane.f32.xlu1 %v9138_v48 }
 0x6a2   :  { %1839 = vadd.xlane.f32.xlu1 %v9142_v19  ;;  %v1814_v52 = vpop.xlane.xlu2 %1813 }
 0x6a3   :  { %6527 = vrcp.f32 %v1814_v52 }
 0x6a9   :  { %v6528_v22 = vpop.eup %6527 }
 0x6aa   :  { %1841 = vadd.xlane.f32.xlu1 %v9149_v36  ;;  %v1820_v31 = vpop.xlane.xlu1 %1819  ;;  %v1861_v58 = vmul.f32 %v6528_v22, %v9077_v57 }
 0x6ac   :  { %2582 = vmax.xlane.f32.xlu0 %v9154_v12 }
 0x6ad   :  { %2903 = vrot.lane.b32.xlu2 %v12137_v14, %s7001_s2 }
 0x6b2   :  { %2264 = vadd.xlane.f32.xlu1 %v9162_v39  ;;  %v1822_v43 = vpop.xlane.xlu1 %1821 }
 0x6b4   :  { %1825 = vadd.xlane.f32.xlu0 %v9165_v54 }
 0x6ba   :  { %2652 = vadd.xlane.f32.xlu1 %v9168_v49  ;;  %v9175_v9 = vpop.xlane.xlu1 %2198 }
 0x6c8   :  { %3353 = vrot.lane.b32.xlu0 %v12137_v14, %s7004_s23 }
 0x6d2   :  { %v2729_v63 = vpop.permute.xlu1 %2728 }
 0x6d3   :  { %2338 = vrot.lane.b32.xlu1 %v12155_v18, %s7005_s24  ;;  %2750 = vmatpush.bf16.msra.mxu2 %v2729_v63  ;;  %v1801_v63 = vmul.f32 1.442695, %v1775_v26 }
 0x6d6   :  { %2266 = vadd.xlane.f32.xlu2 %v9179_v61 }
 0x6e1   :  { %v1816_v62 = vpop.xlane.xlu0 %1815 }
 0x6e2   :  { %6529 = vrcp.f32 %v1816_v62  ;;  %v2164_v62 = vpop.f32.mrf.mxu1 }
 0x6e3   :  { %6531 = vpow2.f32 %v1797_v24  ;;  %v6961_v24 = vld [vmem:[%s11930_s7 + $0x40] sm:$0xff] }
 0x6e8   :  { %v6530_v8 = vpop.eup %6529  ;;  %v1818_v29 = vpop.xlane.xlu2 %1817 }
 0x6e9   :  { %v1862_v46 = vmul.f32 %v6530_v8, %v9098_v6  ;;  %6533 = vrcp.f32 %v1818_v29  ;;  %v9191_v10 = vpop.eup %6531  ;;  %v9208_v8 = vadd.f32 %v6961_v24, %v2164_v62  ;;  %v1780_v24 = vsub.f32 %v9071_v13, %v9181_v25 }
 0x6ea   :  { %6535 = vrcp.f32 %v1820_v31  ;;  %v2166_v62 = vpop.f32.mrf.mxu1 }
 0x6eb   :  { %v1877_v23 = vpack.c.bf16 %v1862_v46, %v1861_v58  ;;  %6537 = vpow2.f32 %v1801_v63  ;;  %v2552_v58 = vpop.f32.mrf.mxu0 }
 0x6ed   :  { %1917 = vmatmul.bf16.vlgmr.msrb.gmra.mxu2 %v1877_v23 }
 0x6ee   :  { %2726 = vrot.lane.b32.xlu2 %v12156_v16, %s7009_s27 }
 0x6ef   :  { %v6534_v57 = vpop.eup %6533 }
 0x6f0   :  { %v1824_v55 = vpop.xlane.xlu2 %1823  ;;  %v6536_v52 = vpop.eup %6535  ;;  %v1863_v2 = vmul.f32 %v6534_v57, %v9102_v11  ;;  %v12157_v11 = vld [vmem:[#allocation50_spill] sm:$0xff] }
 0x6f1   :  { %v9201_v31 = vpop.eup %6537  ;;  %v1864_v22 = vmul.f32 %v6536_v52, %v9081_v42  ;;  %6539 = vrcp.f32 %v1824_v55  ;;  %v6962_v42 = vld [vmem:[%s11930_s7 + $0xc8] sm:$0xff] }
 0x6f2   :  { %1829 = vadd.xlane.f32.xlu0 %v9191_v10  ;;  %6541 = vrcp.f32 %v1822_v43  ;;  %v9216_v26 = vadd.f32 %v6962_v42, %v2552_v58  ;;  %v1811_v58 = vmul.f32 1.442695, %v1780_v24 }
 0x6f3   :  { %v1878_v29 = vpack.c.bf16 %v1864_v22, %v1863_v2  ;;  %v9245_v13 = vpop.f32.mrf.mxu0 }
 0x6f4   :  { %v2343_v6 = vpop.permute.xlu0 %2342 }
 0x6f5   :  { %2364 = vmatpush.bf16.msra.mxu3 %v2343_v6 }
 0x6f6   :  { %2724 = vrot.lane.b32.xlu2 %v12155_v18, %s7009_s27 }
 0x6f7   :  { %v6540_v23 = vpop.eup %6539 }
 0x6f8   :  { %v9199_v40 = vpop.xlane.xlu2 %2196  ;;  %v6542_v63 = vpop.eup %6541  ;;  %v1866_v57 = vmul.f32 %v6540_v23, %v9106_v53  ;;  %v6963_v53 = vld [vmem:[%s11930_s7 + $0x48] sm:$0xff] }
 0x6f9   :  { %v1865_v55 = vmul.f32 %v6542_v63, %v9085_v15  ;;  %v9233_v22 = vadd.f32 %v6963_v53, %v2166_v62  ;;  %v2169_v53 = vpop.f32.mrf.mxu1 }
 0x6fa   :  { %1833 = vadd.xlane.f32.xlu0 %v9201_v31 }
 0x6fb   :  { %v1879_v52 = vpack.c.bf16 %v1866_v57, %v1865_v55  ;;  %v12158_v57 = vld [vmem:[#allocation57_spill] sm:$0xff] }
 0x6fc   :  { %v2602_v55 = vsub.f32 %v12158_v57, %v8775_v47  ;;  %v2607_v47 = vsub.f32 %v8812_v60, %v8900_v41 }
 0x6fd   :  { %1922 = vmatmul.bf16.gmra.mxu2 %v1878_v29  ;;  %2200 = vmax.xlane.f32.xlu1 %v9208_v8 }
 0x6fe   :  { %2722 = vrot.lane.b32.xlu2 %v12157_v11, %s7009_s27 }
 0x700   :  { %v1828_v46 = vpop.xlane.xlu2 %1827 }
 0x701   :  { %6543 = vrcp.f32 %v1828_v46  ;;  %v1832_v46 = vpop.xlane.xlu1 %1831  ;;  %v9259_v24 = vpop.f32.mrf.mxu1 }
 0x705   :  { %2588 = vmax.xlane.f32.xlu1 %v9216_v26 }
 0x707   :  { %v6544_v29 = vpop.eup %6543 }
 0x708   :  { %v9220_v6 = vpop.xlane.xlu2 %2584  ;;  %v1868_v63 = vmul.f32 %v6544_v29, %v9125_v5  ;;  %v2628_v29 = vmul.f32 1.442695, %v2607_v47 }
 0x709   :  { %v9248_v5 = vpop.xlane.xlu1 %1835  ;;  %v9273_v41 = vpop.f32.mrf.mxu1 }
 0x70d   :  { %1927 = vmatmul.bf16.gmra.mxu2 %v1879_v52 }
 0x70e   :  { %2340 = vrot.lane.b32.xlu0 %v12156_v16, %s7005_s24 }
 0x710   :  { %v2904_v43 = vpop.permute.xlu2 %2903 }
 0x711   :  { %6161 = vmatmul.msk.bf16.gmra.mxu1 %vm344_vm1, %v2904_v43  ;;  %v2618_v43 = vmul.f32 1.442695, %v2602_v55 }
 0x71e   :  { %3355 = vrot.lane.b32.xlu1 %v12126_v0, %s7004_s23 }
 0x71f   :  { %v9228_v2 = vpop.xlane.xlu0 %2582 }
 0x727   :  { %v1826_v15 = vpop.xlane.xlu0 %1825  ;;  %2202 = vmax.xlane.f32.xlu2 %v9233_v22 }
 0x728   :  { %6545 = vrcp.f32 %v1826_v15  ;;  %v9257_v15 = vpop.f32.mrf.mxu0 }
 0x729   :  { %6547 = vpow2.f32 %v1811_v58  ;;  %v6964_v58 = vld [vmem:[%s11930_s7 + $0x50] sm:$0xff] }
 0x72a   :  { %6549 = vpow2.f32 %v2618_v43 }
 0x72b   :  { %6551 = vpow2.f32 %v2628_v29 }
 0x72e   :  { %v6546_v42 = vpop.eup %6545 }
 0x72f   :  { %v1867_v23 = vmul.f32 %v6546_v42, %v9165_v54  ;;  %v9242_v62 = vpop.eup %6547  ;;  %v9264_v42 = vadd.f32 %v6964_v58, %v2169_v53  ;;  %v6965_v53 = vld [vmem:[%s11930_s7 + $0xe0] sm:$0xff]  ;;  %v2176_v58 = vpop.f32.mrf.mxu1 }
 0x730   :  { %v9250_v54 = vpop.eup %6549  ;;  %v2560_v57 = vpop.f32.mrf.mxu0 }
 0x731   :  { %v1880_v52 = vpack.c.bf16 %v1868_v63, %v1867_v23  ;;  %v9266_v23 = vpop.xlane.xlu1 %1837  ;;  %v9271_v60 = vpop.eup %6551  ;;  %v9285_v47 = vadd.f32 %v6965_v53, %v2560_v57  ;;  %v2606_v53 = vsub.f32 %v8800_v3, %v8908_v38 }
 0x733   :  { %1932 = vmatmul.bf16.gmra.mxu2 %v1880_v52  ;;  %v2223_v52 = vsub.f32 %v9091_v7, %v9175_v9  ;;  %v2605_v7 = vsub.f32 %v8725_v56, %v8860_v34  ;;  %v2626_v34 = vmul.f32 1.442695, %v2606_v53 }
 0x737   :  { %v2179_v16 = vpop.f32.mrf.mxu1 }
 0x738   :  { %1843 = vadd.xlane.f32.xlu0 %v9242_v62  ;;  %v9287_v29 = vpop.f32.mrf.mxu0 }
 0x739   :  { %v9275_v55 = vpop.xlane.xlu1 %1839 }
 0x73a   :  { %v3354_v25 = vpop.permute.xlu0 %3353 }
 0x73b   :  { %6185 = vmatmul.msk.bf16.gmra.mxu0 %vm344_vm1, %v3354_v25  ;;  %v2246_v25 = vmul.f32 1.442695, %v2223_v52  ;;  %v2624_v52 = vmul.f32 1.442695, %v2605_v7  ;;  %v6966_v7 = vld [vmem:[%s11930_s7 + $0x70] sm:$0xff] }
 0x73d   :  { %6553 = vpow2.f32 %v2246_v25 }
 0x73e   :  { %6555 = vpow2.f32 %v2624_v52 }
 0x73f   :  { %2905 = vrot.lane.b32.xlu2 %v12126_v0, %s7001_s2  ;;  %6557 = vrcp.f32 %v1832_v46 }
 0x740   :  { %2650 = vadd.xlane.f32.xlu0 %v9250_v54  ;;  %v9297_v57 = vpop.f32.mrf.mxu0 }
 0x748   :  { %2204 = vmax.xlane.f32.xlu1 %v9264_v42  ;;  %v2567_v38 = vpop.f32.mrf.mxu0 }
 0x749   :  { %v9269_v63 = vpop.xlane.xlu2 %2266 }
 0x750   :  { %2660 = vadd.xlane.f32.xlu1 %v9271_v60 }
 0x751   :  { %v2727_v43 = vpop.permute.xlu2 %2726 }
 0x752   :  { %2751 = vmatpush.bf16.msra.mxu2 %v2727_v43  ;;  %v9292_v43 = vpop.xlane.xlu1 %1841 }
 0x754   :  { %2336 = vrot.lane.b32.xlu0 %v12157_v11, %s7005_s24  ;;  %v9294_v11 = vpop.eup %6553 }
 0x755   :  { %v9308_v51 = vpop.eup %6555 }
 0x756   :  { %v6558_v3 = vpop.eup %6557 }
 0x757   :  { %v1870_v52 = vmul.f32 %v6558_v3, %v9121_v37 }
 0x758   :  { %2594 = vmax.xlane.f32.xlu1 %v9285_v47 }
 0x759   :  { %v2725_v9 = vpop.permute.xlu2 %2724 }
 0x75a   :  { %2752 = vmatpush.bf16.msra.mxu2 %v2725_v9  ;;  %v9301_v56 = vpop.xlane.xlu1 %2264  ;;  %v9306_v9 = vadd.f32 %v6966_v7, %v2179_v16  ;;  %v6967_v16 = vld [vmem:[%s11930_s7 + $0xf8] sm:$0xff] }
 0x75b   :  { %v9317_v53 = vadd.f32 %v6967_v16, %v2567_v38 }
 0x760   :  { %2278 = vadd.xlane.f32.xlu1 %v9294_v11 }
 0x761   :  { %v2723_v18 = vpop.permute.xlu2 %2722 }
 0x762   :  { %2753 = vmatpush.bf16.msra.mxu2 %v2723_v18 }
 0x765   :  { %v1830_v25 = vpop.xlane.xlu0 %1829 }
 0x766   :  { %6559 = vrcp.f32 %v1830_v25  ;;  %v9319_v25 = vpop.xlane.xlu1 %2652 }
 0x767   :  { %6561 = vpow2.f32 %v2626_v34  ;;  %v6968_v34 = vld [vmem:[%s11930_s7 + $0x68] sm:$0xff] }
 0x768   :  { %2656 = vadd.xlane.f32.xlu2 %v9308_v51  ;;  %2212 = vmax.xlane.f32.xlu1 %v9306_v9  ;;  %v9331_v3 = vadd.f32 %v6968_v34, %v2176_v58 }
 0x76c   :  { %v6560_v18 = vpop.eup %6559 }
 0x76d   :  { %v1869_v46 = vmul.f32 %v6560_v18, %v9191_v10  ;;  %v9321_v7 = vpop.eup %6561  ;;  %v1834_v35 = vpop.xlane.xlu0 %1833  ;;  %v2222_v10 = vsub.f32 %v9117_v33, %v9199_v40  ;;  %v12159_v18 = vld [vmem:[#allocation59_spill] sm:$0xff] }
 0x76e   :  { %6563 = vrcp.f32 %v1834_v35  ;;  %v2339_v38 = vpop.permute.xlu1 %2338  ;;  %v2609_v35 = vsub.f32 %v9134_v4, %v9220_v6  ;;  %v2219_v4 = vsub.f32 %v8698_v27, %v8845_v30  ;;  %v2604_v27 = vsub.f32 %v8710_v17, %v8853_v44 }
 0x76f   :  { %v1881_v28 = vpack.c.bf16 %v1870_v52, %v1869_v46  ;;  %6565 = vrcp.f32 %v9248_v5  ;;  %v2244_v37 = vmul.f32 1.442695, %v2222_v10  ;;  %v2218_v46 = vsub.f32 %v12159_v18, %v8827_v45  ;;  %v6969_v5 = vld [vmem:[%s11930_s7 + $0xc0] sm:$0xff] }
 0x770   :  { %2658 = vadd.xlane.f32.xlu2 %v9321_v7  ;;  %2600 = vmax.xlane.f32.xlu1 %v9317_v53  ;;  %v9343_v58 = vadd.f32 %v6969_v5, %v9194_v59  ;;  %v2632_v16 = vmul.f32 1.442695, %v2609_v35  ;;  %v6970_v35 = vld [vmem:[%s11930_s7 + $0xf0] sm:$0xff] }
 0x771   :  { %1937 = vmatmul.bf16.gmra.mxu2 %v1881_v28  ;;  %6567 = vpow2.f32 %v2244_v37  ;;  %v2236_v33 = vmul.f32 1.442695, %v2218_v46  ;;  %v2622_v46 = vmul.f32 1.442695, %v2604_v27 }
 0x773   :  { %6569 = vpow2.f32 %v2236_v33 }
 0x774   :  { %v6564_v52 = vpop.eup %6563  ;;  %6571 = vpow2.f32 %v2632_v16  ;;  %v9390_v16 = vpop.f32.mrf.mxu1 }
 0x775   :  { %v6566_v28 = vpop.eup %6565  ;;  %v1871_v40 = vmul.f32 %v6564_v52, %v9201_v31  ;;  %6573 = vrcp.f32 %v9275_v55 }
 0x776   :  { %v1872_v45 = vmul.f32 %v6566_v28, %v9128_v1  ;;  %v9346_v10 = vpop.xlane.xlu1 %2200  ;;  %v2238_v1 = vmul.f32 1.442695, %v2219_v4  ;;  %6575 = vrcp.f32 %v9266_v23  ;;  %v9374_v28 = vadd.f32 %v6970_v35, %v9297_v57  ;;  %v6971_v57 = vld [vmem:[%s11930_s7 + $0x58] sm:$0xff] }
 0x777   :  { %v9349_v37 = vpop.eup %6567 }
 0x778   :  { %2210 = vmax.xlane.f32.xlu2 %v9331_v3  ;;  %v1882_v31 = vpack.c.bf16 %v1872_v45, %v1871_v40  ;;  %6577 = vpow2.f32 %v2238_v1  ;;  %v9387_v40 = vadd.f32 %v6971_v57, %v9259_v24  ;;  %v9403_v24 = vpop.f32.mrf.mxu0 }
 0x779   :  { %v9356_v59 = vpop.eup %6569  ;;  %6579 = vpow2.f32 %v2622_v46  ;;  %v6974_v46 = vld [vmem:[%s11930_s7 + $0x100] sm:$0xff] }
 0x77a   :  { %v9359_v34 = vpop.eup %6571 }
 0x77b   :  { %v6574_v30 = vpop.eup %6573 }
 0x77c   :  { %v6576_v55 = vpop.eup %6575  ;;  %v1874_v23 = vmul.f32 %v6574_v30, %v9142_v19  ;;  %v2980_v1 = vpop.f32.mrf.mxu1 }
 0x77e   :  { %2586 = vmax.xlane.f32.xlu0 %v9343_v58  ;;  %v9363_v18 = vpop.xlane.xlu1 %2588  ;;  %v9367_v52 = vpop.eup %6577 }
 0x77f   :  { %v9379_v19 = vpop.eup %6579 }
 0x780   :  { %2276 = vadd.xlane.f32.xlu2 %v9349_v37  ;;  %v2341_v6 = vpop.permute.xlu0 %2340 }
 0x781   :  { %1942 = vmatmul.bf16.gmra.mxu2 %v1882_v31  ;;  %2365 = vmatpush.bf16.msra.mxu3 %v2341_v6  ;;  %v2220_v6 = vsub.f32 %v8791_v32, %v8898_v50  ;;  %v2221_v32 = vsub.f32 %v8773_v21, %v8894_v20 }
 0x783   :  { %v2240_v27 = vmul.f32 1.442695, %v2220_v6  ;;  %v2242_v35 = vmul.f32 1.442695, %v2221_v32 }
 0x785   :  { %2366 = vmatpush.bf16.msra.mxu3 %v2339_v38  ;;  %v1873_v38 = vmul.f32 %v6576_v55, %v9138_v48 }
 0x786   :  { %2268 = vadd.xlane.f32.xlu0 %v9356_v59 }
 0x787   :  { %v1883_v17 = vpack.c.bf16 %v1874_v23, %v1873_v38  ;;  %v9417_v23 = vadd.f32 %v6974_v46, %v2980_v1  ;;  %v6977_v46 = vld [vmem:[%s11930_s7 + $0x78] sm:$0xff] }
 0x788   :  { %2664 = vadd.xlane.f32.xlu2 %v9359_v34  ;;  %v9469_v32 = vadd.f32 %v6977_v46, %v9390_v16 }
 0x78e   :  { %2270 = vadd.xlane.f32.xlu0 %v9367_v52 }
 0x790   :  { %2598 = vmax.xlane.f32.xlu2 %v9374_v28  ;;  %v3356_v44 = vpop.permute.xlu1 %3355 }
 0x791   :  { %1947 = vmatmul.bf16.gmra.mxu2 %v1883_v17  ;;  %6186 = vmatmul.msk.bf16.gmra.mxu0 %vm344_vm1, %v3356_v44 }
 0x796   :  { %2654 = vadd.xlane.f32.xlu0 %v9379_v19 }
 0x79a   :  { %v2203_v48 = vpop.xlane.xlu2 %2202 }
 0x79b   :  { %v2225_v33 = vsub.f32 %v9233_v22, %v2203_v48  ;;  %v6972_v22 = vld [vmem:[%s11930_s7 + $0xd0] sm:$0xff] }
 0x79c   :  { %v9397_v4 = vadd.f32 %v6972_v22, %v9245_v13  ;;  %v6973_v13 = vld [vmem:[%s11930_s7 + $0xd8] sm:$0xff] }
 0x79d   :  { %v2250_v5 = vmul.f32 1.442695, %v2225_v33  ;;  %v9412_v55 = vadd.f32 %v6973_v13, %v9257_v15  ;;  %v6164_v15 = vld [vmem:[%s11930_s7 + $0x188] sm:$0xff] }
 0x79e   :  { %2206 = vmax.xlane.f32.xlu0 %v9387_v40 }
 0x79f   :  { %6581 = vpow2.f32 %v2250_v5 }
 0x7a0   :  { %6583 = vrcp.f32 %v9292_v43  ;;  %v3432_v43 = vpop.f32.mrf.mxu0 }
 0x7a1   :  { %v9428_v48 = vadd.f32 %v6164_v15, %v3432_v43 }
 0x7a2   :  { %v2906_v45 = vpop.permute.xlu2 %2905 }
 0x7a3   :  { %6162 = vmatmul.msk.bf16.gmra.mxu1 %vm344_vm1, %v2906_v45 }
 0x7a5   :  { %v9399_v31 = vpop.eup %6581 }
 0x7a6   :  { %2282 = vadd.xlane.f32.xlu2 %v9399_v31  ;;  %2590 = vmax.xlane.f32.xlu0 %v9397_v4  ;;  %v6584_v50 = vpop.eup %6583 }
 0x7a7   :  { %v1875_v17 = vmul.f32 %v6584_v50, %v9149_v36 }
 0x7ab   :  { %v1844_v30 = vpop.xlane.xlu0 %1843 }
 0x7ac   :  { %6585 = vrcp.f32 %v1844_v30 }
 0x7ad   :  { %6587 = vpow2.f32 %v2240_v27 }
 0x7ae   :  { %3020 = vmax.xlane.f32.xlu2 %v9417_v23  ;;  %2592 = vmax.xlane.f32.xlu0 %v9412_v55  ;;  %6589 = vpow2.f32 %v2242_v35 }
 0x7b2   :  { %v6586_v38 = vpop.eup %6585 }
 0x7b3   :  { %v1876_v44 = vmul.f32 %v6586_v38, %v9242_v62  ;;  %v9430_v33 = vpop.eup %6587  ;;  %v2651_v57 = vpop.xlane.xlu0 %2650 }
 0x7b4   :  { %6591 = vrcp.f32 %v2651_v57  ;;  %v9436_v21 = vpop.eup %6589  ;;  %v2982_v57 = vpop.f32.mrf.mxu1 }
 0x7b5   :  { %v1884_v5 = vpack.c.bf16 %v1876_v44, %v1875_v17  ;;  %6593 = vrcp.f32 %v9319_v25  ;;  %v6975_v25 = vld [vmem:[%s11930_s7 + $0x60] sm:$0xff] }
 0x7b6   :  { %3472 = vmax.xlane.f32.xlu2 %v9428_v48  ;;  %2272 = vadd.xlane.f32.xlu0 %v9430_v33  ;;  %6595 = vrcp.f32 %v9269_v63  ;;  %v9446_v63 = vadd.f32 %v6975_v25, %v9273_v41  ;;  %v6976_v41 = vld [vmem:[%s11930_s7 + $0xe8] sm:$0xff] }
 0x7b7   :  { %1952 = vmatmul.bf16.gmra.mxu2 %v1884_v5  ;;  %6597 = vrcp.f32 %v9301_v56 }
 0x7ba   :  { %v6592_v20 = vpop.eup %6591 }
 0x7bb   :  { %v6594_v36 = vpop.eup %6593  ;;  %v2698_v45 = vmul.f32 %v6592_v20, %v9250_v54  ;;  %v2608_v54 = vsub.f32 %v9154_v12, %v9228_v2  ;;  %v2224_v12 = vsub.f32 %v9208_v8, %v9346_v10  ;;  %v6163_v10 = vld [vmem:[%s11930_s7 + $0x180] sm:$0xff]  ;;  %v2205_v35 = vpop.xlane.xlu1 %2204 }
 0x7bc   :  { %v6596_v62 = vpop.eup %6595  ;;  %v2699_v6 = vmul.f32 %v6594_v36, %v9168_v49  ;;  %v9485_v38 = vadd.f32 %v6163_v10, %v9403_v24  ;;  %v2226_v44 = vsub.f32 %v9264_v42, %v2205_v35 }
 0x7bd   :  { %v6598_v22 = vpop.eup %6597  ;;  %v2313_v1 = vmul.f32 %v6596_v62, %v9179_v61  ;;  %v2630_v13 = vmul.f32 1.442695, %v2608_v54  ;;  %v9457_v61 = vadd.f32 %v6976_v41, %v9287_v29  ;;  %v2248_v2 = vmul.f32 1.442695, %v2224_v12 }
 0x7be   :  { %2274 = vadd.xlane.f32.xlu0 %v9436_v21  ;;  %v2714_v56 = vpack.c.bf16 %v2699_v6, %v2698_v45  ;;  %v2312_v27 = vmul.f32 %v6598_v22, %v9162_v39  ;;  %v2611_v29 = vsub.f32 %v9216_v26, %v9363_v18  ;;  %v2252_v20 = vmul.f32 1.442695, %v2226_v44 }
 0x7bf   :  { %6599 = vpow2.f32 %v2630_v13 }
 0x7c0   :  { %v2328_v49 = vpack.c.bf16 %v2313_v1, %v2312_v27  ;;  %6601 = vpow2.f32 %v2248_v2  ;;  %v2636_v50 = vmul.f32 1.442695, %v2611_v29 }
 0x7c2   :  { %6603 = vpow2.f32 %v2636_v50  ;;  %v2985_v50 = vpop.f32.mrf.mxu1 }
 0x7c5   :  { %v9460_v39 = vpop.eup %6599 }
 0x7c6   :  { %2208 = vmax.xlane.f32.xlu0 %v9446_v63  ;;  %v2337_v30 = vpop.permute.xlu0 %2336  ;;  %v9474_v15 = vpop.eup %6601 }
 0x7c7   :  { %2367 = vmatpush.bf16.msra.mxu3 %v2337_v30  ;;  %2754 = vmatmul.bf16.vlgmr.msra.gmra.mxu2 %v2714_v56 }
 0x7c8   :  { %v9477_v8 = vpop.eup %6603 }
 0x7ca   :  { %2368 = vmatmul.bf16.vlgmr.msra.gmra.mxu3 %v2328_v49 }
 0x7ce   :  { %2596 = vmax.xlane.f32.xlu0 %v9457_v61 }
 0x7d6   :  { %2662 = vadd.xlane.f32.xlu0 %v9460_v39 }
 0x7db   :  { %v2657_v36 = vpop.xlane.xlu2 %2656 }
 0x7de   :  { %2214 = vmax.xlane.f32.xlu0 %v9469_v32 }
 0x7e6   :  { %2280 = vadd.xlane.f32.xlu0 %v9474_v15 }
 0x7ee   :  { %2668 = vadd.xlane.f32.xlu0 %v9477_v8 }
 0x7f1   :  { %v2587_v16 = vpop.xlane.xlu0 %2586 }
 0x7f2   :  { %v2610_v43 = vsub.f32 %v9343_v58, %v2587_v16  ;;  %v6978_v58 = vld [vmem:[%s11930_s7 + $0x108] sm:$0xff] }
 0x7f3   :  { %v9495_v24 = vadd.f32 %v6978_v58, %v2982_v57 }
 0x7f4   :  { %v2634_v26 = vmul.f32 1.442695, %v2610_v43 }
 0x7f6   :  { %6605 = vpow2.f32 %v2634_v26  ;;  %3470 = vmax.xlane.f32.xlu0 %v9485_v38 }
 0x7f9   :  { %v2269_v18 = vpop.xlane.xlu0 %2268 }
 0x7fa   :  { %6607 = vrcp.f32 %v2269_v18 }
 0x7fc   :  { %v9488_v17 = vpop.eup %6605 }
 0x7fd   :  { %2666 = vadd.xlane.f32.xlu1 %v9488_v17 }
 0x800   :  { %v6608_v62 = vpop.eup %6607 }
 0x801   :  { %v2271_v5 = vpop.xlane.xlu0 %2270  ;;  %v2314_v42 = vmul.f32 %v6608_v62, %v9356_v59  ;;  %v2659_v59 = vpop.xlane.xlu2 %2658 }
 0x802   :  { %6609 = vrcp.f32 %v2271_v5 }
 0x803   :  { %6611 = vpow2.f32 %v2252_v20 }
 0x804   :  { %6613 = vrcp.f32 %v2657_v36 }
 0x805   :  { %3022 = vmax.xlane.f32.xlu1 %v9495_v24 }
 0x808   :  { %v6610_v45 = vpop.eup %6609 }
 0x809   :  { %v2655_v22 = vpop.xlane.xlu0 %2654  ;;  %v2315_v6 = vmul.f32 %v6610_v45, %v9367_v52  ;;  %v9500_v1 = vpop.eup %6611 }
 0x80a   :  { %6615 = vrcp.f32 %v2655_v22  ;;  %v6614_v56 = vpop.eup %6613  ;;  %v2661_v52 = vpop.xlane.xlu1 %2660  ;;  %v6980_v22 = vld [vmem:[%s11930_s7 + $0x118] sm:$0xff] }
 0x80b   :  { %v2329_v25 = vpack.c.bf16 %v2315_v6, %v2314_v42  ;;  %v2701_v49 = vmul.f32 %v6614_v56, %v9308_v51  ;;  %v3435_v51 = vpop.f32.mrf.mxu0  ;;  %v2211_v6 = vpop.xlane.xlu2 %2210 }
 0x80c   :  { %v2229_v56 = vsub.f32 %v9331_v3, %v2211_v6 }
 0x80d   :  { %2373 = vmatmul.bf16.gmra.mxu3 %v2329_v25  ;;  %2284 = vadd.xlane.f32.xlu1 %v9500_v1 }
 0x810   :  { %v6616_v27 = vpop.eup %6615 }
 0x811   :  { %v2207_v30 = vpop.xlane.xlu0 %2206  ;;  %v2700_v54 = vmul.f32 %v6616_v27, %v9379_v19  ;;  %v6165_v27 = vld [vmem:[%s11930_s7 + $0x190] sm:$0xff] }
 0x812   :  { %v2227_v13 = vsub.f32 %v9387_v40, %v2207_v30  ;;  %v2595_v44 = vpop.xlane.xlu1 %2594 }
 0x813   :  { %v2715_v41 = vpack.c.bf16 %v2701_v49, %v2700_v54  ;;  %v3437_v58 = vpop.f32.mrf.mxu0  ;;  %v2258_v49 = vmul.f32 1.442695, %v2229_v56 }
 0x814   :  { %v2254_v12 = vmul.f32 1.442695, %v2227_v13 }
 0x815   :  { %2759 = vmatmul.bf16.gmra.mxu2 %v2715_v41  ;;  %v9544_v41 = vadd.f32 %v6165_v27, %v3435_v51  ;;  %v6982_v27 = vld [vmem:[%s11930_s7 + $0x1a0] sm:$0xff] }
 0x816   :  { %6617 = vpow2.f32 %v2254_v12 }
 0x817   :  { %6619 = vrcp.f32 %v2659_v59 }
 0x818   :  { %6621 = vrcp.f32 %v2661_v52  ;;  %v6144_v52 = vld [vmem:[%s11930_s7 + $0x128] sm:$0xff] }
 0x819   :  { %v2591_v2 = vpop.xlane.xlu0 %2590 }
 0x81a   :  { %v2612_v46 = vsub.f32 %v9397_v4, %v2591_v2  ;;  %v6979_v4 = vld [vmem:[%s11930_s7 + $0x110] sm:$0xff]  ;;  %v2279_v54 = vpop.xlane.xlu1 %2278 }
 0x81b   :  { %v9516_v35 = vadd.f32 %v6979_v4, %v2985_v50  ;;  %v3440_v12 = vpop.f32.mrf.mxu0 }
 0x81c   :  { %v9507_v29 = vpop.eup %6617  ;;  %v2638_v10 = vmul.f32 1.442695, %v2612_v46  ;;  %v2277_v46 = vpop.xlane.xlu2 %2276 }
 0x81d   :  { %v6620_v19 = vpop.eup %6619  ;;  %2286 = vadd.xlane.f32.xlu0 %v9507_v29 }
 0x81e   :  { %6623 = vpow2.f32 %v2638_v10  ;;  %v6622_v40 = vpop.eup %6621  ;;  %v2702_v16 = vmul.f32 %v6620_v19, %v9321_v7  ;;  %v2987_v7 = vpop.f32.mrf.mxu1 }
 0x81f   :  { %v2703_v18 = vmul.f32 %v6622_v40, %v9271_v60  ;;  %v6166_v60 = vld [vmem:[%s11930_s7 + $0x198] sm:$0xff]  ;;  %v9531_v42 = vadd.f32 %v6980_v22, %v2987_v7 }
 0x820   :  { %v9526_v45 = vadd.f32 %v6166_v60, %v3437_v58 }
 0x821   :  { %v2593_v43 = vpop.xlane.xlu0 %2592  ;;  %v2716_v20 = vpack.c.bf16 %v2703_v18, %v2702_v16 }
 0x822   :  { %v2613_v26 = vsub.f32 %v9412_v55, %v2593_v43  ;;  %v2614_v55 = vsub.f32 %v9285_v47, %v2595_v44  ;;  %v2213_v43 = vpop.xlane.xlu1 %2212 }
 0x823   :  { %v3442_v4 = vpop.f32.mrf.mxu0 }
 0x824   :  { %v9518_v57 = vpop.eup %6623  ;;  %v2640_v5 = vmul.f32 1.442695, %v2613_v26  ;;  %v2642_v62 = vmul.f32 1.442695, %v2614_v55  ;;  %v2665_v60 = vpop.xlane.xlu2 %2664 }
 0x825   :  { %2670 = vadd.xlane.f32.xlu2 %v9518_v57  ;;  %3024 = vmax.xlane.f32.xlu0 %v9516_v35 }
 0x826   :  { %2764 = vmatmul.bf16.gmra.mxu2 %v2716_v20  ;;  %6625 = vpow2.f32 %v2640_v5  ;;  %v2990_v47 = vpop.f32.mrf.mxu1  ;;  %v6981_v20 = vld [vmem:[%s11930_s7 + $0x1a8] sm:$0xff] }
 0x827   :  { %6627 = vpow2.f32 %v2642_v62  ;;  %v9568_v7 = vadd.f32 %v6981_v20, %v3442_v4  ;;  %v12160_v20 = vld [vmem:[#allocation66_spill] sm:$0xff] }
 0x829   :  { %v2273_v36 = vpop.xlane.xlu0 %2272 }
 0x82a   :  { %6629 = vrcp.f32 %v2273_v36 }
 0x82c   :  { %v9533_v25 = vpop.eup %6625 }
 0x82d   :  { %3026 = vmax.xlane.f32.xlu2 %v9531_v42  ;;  %3476 = vmax.xlane.f32.xlu0 %v9526_v45  ;;  %v9542_v13 = vpop.eup %6627 }
 0x82e   :  { %2672 = vadd.xlane.f32.xlu1 %v9533_v25  ;;  %v2992_v2 = vpop.f32.mrf.mxu1 }
 0x82f   :  { %v9554_v40 = vadd.f32 %v6144_v52, %v2992_v2 }
 0x830   :  { %v6630_v59 = vpop.eup %6629 }
 0x831   :  { %v2275_v30 = vpop.xlane.xlu0 %2274  ;;  %v2316_v10 = vmul.f32 %v6630_v59, %v9430_v33  ;;  %v2230_v33 = vsub.f32 %v9306_v9, %v2213_v43 }
 0x832   :  { %6631 = vrcp.f32 %v2275_v30  ;;  %v9584_v30 = vadd.f32 %v6982_v27, %v3440_v12 }
 0x833   :  { %6633 = vpow2.f32 %v2258_v49  ;;  %v2260_v55 = vmul.f32 1.442695, %v2230_v33  ;;  %v2599_v49 = vpop.xlane.xlu2 %2598 }
 0x834   :  { %6635 = vrcp.f32 %v2277_v46 }
 0x835   :  { %2674 = vadd.xlane.f32.xlu0 %v9542_v13 }
 0x836   :  { %3474 = vmax.xlane.f32.xlu1 %v9544_v41 }
 0x838   :  { %v6632_v3 = vpop.eup %6631 }
 0x839   :  { %v2209_v50 = vpop.xlane.xlu0 %2208  ;;  %v2317_v19 = vmul.f32 %v6632_v3, %v9436_v21  ;;  %v9556_v18 = vpop.eup %6633  ;;  %v6143_v21 = vld [vmem:[%s11930_s7 + $0x120] sm:$0xff] }
 0x83a   :  { %v2228_v51 = vsub.f32 %v9446_v63, %v2209_v50  ;;  %v6636_v5 = vpop.eup %6635  ;;  %v9572_v9 = vadd.f32 %v6143_v21, %v2990_v47  ;;  %v2601_v50 = vpop.xlane.xlu1 %2600 }
 0x83b   :  { %v2330_v16 = vpack.c.bf16 %v2317_v19, %v2316_v10  ;;  %v2283_v19 = vpop.xlane.xlu2 %2282 }
 0x83c   :  { %v2256_v26 = vmul.f32 1.442695, %v2228_v51 }
 0x83d   :  { %2378 = vmatmul.bf16.gmra.mxu3 %v2330_v16  ;;  %3030 = vmax.xlane.f32.xlu0 %v9554_v40  ;;  %v2617_v16 = vsub.f32 %v9317_v53, %v2601_v50 }
 0x83e   :  { %6637 = vpow2.f32 %v2256_v26  ;;  %2290 = vadd.xlane.f32.xlu1 %v9556_v18 }
 0x83f   :  { %6639 = vrcp.f32 %v2279_v54  ;;  %v2648_v26 = vmul.f32 1.442695, %v2617_v16  ;;  %v6983_v16 = vld [vmem:[%s11930_s7 + $0x1b0] sm:$0xff] }
 0x841   :  { %v2597_v63 = vpop.xlane.xlu0 %2596 }
 0x842   :  { %v2615_v44 = vsub.f32 %v9457_v61, %v2597_v63  ;;  %v2318_v61 = vmul.f32 %v6636_v5, %v9349_v37 }
 0x844   :  { %v9570_v58 = vpop.eup %6637  ;;  %v2644_v36 = vmul.f32 1.442695, %v2615_v44 }
 0x845   :  { %2288 = vadd.xlane.f32.xlu2 %v9570_v58  ;;  %3480 = vmax.xlane.f32.xlu0 %v9568_v7  ;;  %v6640_v62 = vpop.eup %6639 }
 0x846   :  { %6641 = vpow2.f32 %v2644_v36  ;;  %3028 = vmax.xlane.f32.xlu1 %v9572_v9  ;;  %v2319_v6 = vmul.f32 %v6640_v62, %v9294_v11  ;;  %v2616_v62 = vsub.f32 %v9374_v28, %v2599_v49  ;;  %v12162_v28 = vld [vmem:[#allocation58_spill] sm:$0xff] }
 0x847   :  { %6643 = vpow2.f32 %v2260_v55 }
 0x848   :  { %6645 = vrcp.f32 %v2665_v60  ;;  %v2331_v56 = vpack.c.bf16 %v2319_v6, %v2318_v61  ;;  %v2646_v6 = vmul.f32 1.442695, %v2616_v62 }
 0x849   :  { %v2663_v22 = vpop.xlane.xlu0 %2662 }
 0x84a   :  { %6647 = vrcp.f32 %v2663_v22  ;;  %v12161_v22 = vld [vmem:[#allocation60_spill] sm:$0xff] }
 0x84c   :  { %v9579_v47 = vpop.eup %6641 }
 0x84d   :  { %v9586_v54 = vpop.eup %6643  ;;  %2676 = vadd.xlane.f32.xlu2 %v9579_v47  ;;  %v2369_v37 = vpop.f32.mrf.mxu3  ;;  %2383 = vmatmul.bf16.gmra.mxu3 %v2331_v56 }
 0x84e   :  { %v6646_v59 = vpop.eup %6645  ;;  %2409 = vst.msk [vmem:[#allocation2 + $0x80] sm:$0xff] %vm344_vm1, %v2369_v37  ;;  %3478 = vmax.xlane.f32.xlu1 %v9584_v30  ;;  %2292 = vadd.xlane.f32.xlu0 %v9586_v54  ;;  %v6145_v37 = vld [vmem:[%s11930_s7 + $0x130] sm:$0xff] }
 0x84f   :  { %v2705_v12 = vmul.f32 %v6646_v59, %v9359_v34  ;;  %v2995_v59 = vpop.f32.mrf.mxu1 }
 0x850   :  { %v6648_v11 = vpop.eup %6647 }
 0x851   :  { %v2215_v3 = vpop.xlane.xlu0 %2214  ;;  %v2704_v52 = vmul.f32 %v6648_v11, %v9460_v39  ;;  %v9639_v11 = vadd.f32 %v6145_v37, %v2995_v59 }
 0x852   :  { %v2231_v2 = vsub.f32 %v9469_v32, %v2215_v3 }
 0x853   :  { %v2717_v46 = vpack.c.bf16 %v2705_v12, %v2704_v52 }
 0x854   :  { %v2262_v10 = vmul.f32 1.442695, %v2231_v2 }
 0x855   :  { %v2371_v51 = vpop.f32.mrf.mxu3  ;;  %2769 = vmatmul.bf16.gmra.mxu2 %v2717_v46 }
 0x856   :  { %6649 = vpow2.f32 %v2262_v10  ;;  %2410 = vst.msk [vmem:[#allocation2 + $0x88] sm:$0xff] %vm344_vm1, %v2371_v51  ;;  %v3445_v10 = vpop.f32.mrf.mxu0 }
 0x857   :  { %6651 = vrcp.f32 %v2283_v19 }
 0x859   :  { %v2281_v43 = vpop.xlane.xlu0 %2280 }
 0x85a   :  { %6653 = vrcp.f32 %v2281_v43  ;;  %v9650_v43 = vadd.f32 %v6983_v16, %v3445_v10 }
 0x85b   :  { %6655 = vpow2.f32 %v2648_v26 }
 0x85c   :  { %v9597_v39 = vpop.eup %6649 }
 0x85d   :  { %2294 = vadd.xlane.f32.xlu0 %v9597_v39  ;;  %v6652_v34 = vpop.eup %6651 }
 0x85e   :  { %v2321_v4 = vmul.f32 %v6652_v34, %v9399_v31  ;;  %v9611_v31 = vpop.f32.mrf.mxu2 }
 0x860   :  { %v6654_v32 = vpop.eup %6653 }
 0x861   :  { %v2320_v33 = vmul.f32 %v6654_v32, %v9474_v15  ;;  %v9602_v63 = vpop.eup %6655  ;;  %v2669_v53 = vpop.xlane.xlu0 %2668 }
 0x862   :  { %6657 = vrcp.f32 %v2669_v53 }
 0x863   :  { %v2332_v21 = vpack.c.bf16 %v2321_v4, %v2320_v33  ;;  %v6146_v4 = vld [vmem:[%s11930_s7 + $0x138] sm:$0xff] }
 0x865   :  { %3186 = vrot.lane.b32.xlu2 %v12126_v0, %s7003_s22  ;;  %2388 = vmatmul.bf16.gmra.mxu3 %v2332_v21  ;;  %v2997_v21 = vpop.f32.mrf.mxu1 }
 0x866   :  { %2680 = vadd.xlane.f32.xlu0 %v9602_v63  ;;  %v9619_v36 = vpop.f32.mrf.mxu2 }
 0x867   :  { %3636 = vrot.lane.b32.xlu1 %v12126_v0, %s7010_s0 }
 0x868   :  { %v6658_v44 = vpop.eup %6657 }
 0x869   :  { %v2707_v60 = vmul.f32 %v6658_v44, %v9477_v8  ;;  %v3471_v8 = vpop.xlane.xlu0 %3470 }
 0x86e   :  { %v9655_v34 = vpop.f32.mrf.mxu2 }
 0x86f   :  { %3184 = vrot.lane.b32.xlu1 %v12137_v14, %s7003_s22 }
 0x870   :  { %v2667_v15 = vpop.xlane.xlu1 %2666 }
 0x871   :  { %6659 = vrcp.f32 %v2667_v15 }
 0x872   :  { %6661 = vpow2.f32 %v2646_v6 }
 0x877   :  { %v6660_v5 = vpop.eup %6659  ;;  %3182 = vrot.lane.b32.xlu1 %v12160_v20, %s7003_s22 }
 0x878   :  { %v2706_v55 = vmul.f32 %v6660_v5, %v9488_v17  ;;  %v3023_v61 = vpop.xlane.xlu1 %3022  ;;  %v9630_v56 = vpop.eup %6661  ;;  %v9661_v5 = vadd.f32 %v6146_v4, %v2997_v21 }
 0x879   :  { %v3053_v32 = vsub.f32 %v9495_v24, %v3023_v61  ;;  %v3502_v61 = vsub.f32 %v9485_v38, %v3471_v8 }
 0x87a   :  { %3634 = vrot.lane.b32.xlu0 %v12137_v14, %s7010_s0  ;;  %v2718_v0 = vpack.c.bf16 %v2707_v60, %v2706_v55  ;;  %v9628_v14 = vpop.xlane.xlu2 %3020 }
 0x87b   :  { %v3070_v15 = vmul.f32 1.442695, %v3053_v32 }
 0x87c   :  { %2774 = vmatmul.bf16.gmra.mxu2 %v2718_v0  ;;  %v9668_v0 = vpop.f32.mrf.mxu2 }
 0x87f   :  { %3632 = vrot.lane.b32.xlu1 %v12160_v20, %s7010_s0 }
 0x880   :  { %v2285_v17 = vpop.xlane.xlu1 %2284 }
 0x881   :  { %6663 = vrcp.f32 %v2285_v17  ;;  %v3447_v17 = vpop.f32.mrf.mxu0 }
 0x882   :  { %3180 = vrot.lane.b32.xlu0 %v12161_v22, %s7003_s22  ;;  %v3473_v52 = vpop.xlane.xlu2 %3472 }
 0x883   :  { %v3503_v8 = vsub.f32 %v9428_v48, %v3473_v52 }
 0x884   :  { %v9695_v48 = vpop.f32.mrf.mxu2 }
 0x887   :  { %3630 = vrot.lane.b32.xlu1 %v12161_v22, %s7010_s0  ;;  %v6664_v3 = vpop.eup %6663 }
 0x888   :  { %v2322_v46 = vmul.f32 %v6664_v3, %v9500_v1  ;;  %v3520_v3 = vmul.f32 1.442695, %v3503_v8  ;;  %v12165_v8 = vld [vmem:[#allocation50_spill] sm:$0xff] }
 0x88e   :  { %2678 = vadd.xlane.f32.xlu2 %v9630_v56 }
 0x88f   :  { %3178 = vrot.lane.b32.xlu1 %v12162_v28, %s7003_s22 }
 0x890   :  { %v2374_v27 = vpop.f32.mrf.mxu3  ;;  %v2287_v49 = vpop.xlane.xlu0 %2286 }
 0x891   :  { %2411 = vst.msk [vmem:[#allocation2 + $0x90] sm:$0xff] %vm344_vm1, %v2374_v27  ;;  %6665 = vrcp.f32 %v2287_v49 }
 0x896   :  { %3032 = vmax.xlane.f32.xlu2 %v9639_v11 }
 0x897   :  { %v6666_v12 = vpop.eup %6665 }
 0x898   :  { %v2376_v2 = vpop.f32.mrf.mxu3  ;;  %v2323_v50 = vmul.f32 %v6666_v12, %v9507_v29  ;;  %v9645_v19 = vpop.xlane.xlu0 %3024 }
 0x899   :  { %2412 = vst.msk [vmem:[#allocation2 + $0x98] sm:$0xff] %vm344_vm1, %v2376_v2  ;;  %v2671_v26 = vpop.xlane.xlu2 %2670 }
 0x89a   :  { %v2333_v51 = vpack.c.bf16 %v2323_v50, %v2322_v46  ;;  %6667 = vrcp.f32 %v2671_v26 }
 0x89c   :  { %2393 = vmatmul.bf16.gmra.mxu3 %v2333_v51 }
 0x89e   :  { %3482 = vmax.xlane.f32.xlu2 %v9650_v43 }
 0x8a0   :  { %v9653_v1 = vpop.xlane.xlu0 %3476  ;;  %v6668_v33 = vpop.eup %6667 }
 0x8a1   :  { %v2673_v29 = vpop.xlane.xlu1 %2672  ;;  %v2708_v55 = vmul.f32 %v6668_v33, %v9518_v57  ;;  %v9670_v62 = vpop.xlane.xlu2 %3026  ;;  %v3518_v57 = vmul.f32 1.442695, %v3502_v61 }
 0x8a2   :  { %6669 = vrcp.f32 %v2673_v29 }
 0x8a3   :  { %6671 = vpow2.f32 %v3070_v15  ;;  %v9707_v15 = vpop.f32.mrf.mxu2 }
 0x8a8   :  { %v6670_v53 = vpop.eup %6669  ;;  %v2675_v44 = vpop.xlane.xlu0 %2674 }
 0x8a9   :  { %v9663_v20 = vpop.xlane.xlu1 %3474  ;;  %v2709_v60 = vmul.f32 %v6670_v53, %v9533_v25  ;;  %v9673_v22 = vpop.eup %6671  ;;  %v6984_v25 = vld [vmem:[%s11930_s7 + $0x1b8] sm:$0xff] }
 0x8aa   :  { %v9683_v49 = vadd.f32 %v6984_v25, %v3447_v17 }
 0x8ab   :  { %v2719_v24 = vpack.c.bf16 %v2709_v60, %v2708_v55  ;;  %v12164_v55 = vld [vmem:[#allocation53_spill] sm:$0xff] }
 0x8ac   :  { %3034 = vmax.xlane.f32.xlu0 %v9661_v5 }
 0x8ad   :  { %2779 = vmatmul.bf16.gmra.mxu2 %v2719_v24 }
 0x8b0   :  { %v9675_v6 = vpop.xlane.xlu0 %3030 }
 0x8b1   :  { %v2291_v27 = vpop.xlane.xlu1 %2290 }
 0x8b2   :  { %6673 = vrcp.f32 %v2291_v27 }
 0x8b4   :  { %3102 = vadd.xlane.f32.xlu0 %v9673_v22 }
 0x8b6   :  { %3628 = vrot.lane.b32.xlu2 %v12162_v28, %s7010_s0 }
 0x8b8   :  { %v2289_v38 = vpop.xlane.xlu2 %2288  ;;  %v6674_v37 = vpop.eup %6673 }
 0x8b9   :  { %6675 = vrcp.f32 %v2289_v38  ;;  %3484 = vmax.xlane.f32.xlu1 %v9683_v49  ;;  %v9687_v59 = vpop.xlane.xlu0 %3480  ;;  %v2325_v10 = vmul.f32 %v6674_v37, %v9556_v18  ;;  %v9697_v26 = vpop.xlane.xlu1 %3028 }
 0x8ba   :  { %6677 = vpow2.f32 %v3518_v57 }
 0x8bb   :  { %6679 = vrcp.f32 %v2675_v44  ;;  %v3052_v44 = vsub.f32 %v9417_v23, %v9628_v14 }
 0x8bf   :  { %v6676_v12 = vpop.eup %6675 }
 0x8c0   :  { %v9689_v28 = vpop.eup %6677  ;;  %v2677_v2 = vpop.xlane.xlu2 %2676  ;;  %v2324_v50 = vmul.f32 %v6676_v12, %v9570_v58  ;;  %v12163_v58 = vld [vmem:[#allocation55_spill] sm:$0xff] }
 0x8c1   :  { %v2379_v46 = vpop.f32.mrf.mxu3  ;;  %6681 = vrcp.f32 %v2677_v2  ;;  %3550 = vadd.xlane.f32.xlu1 %v9689_v28  ;;  %v6680_v51 = vpop.eup %6679 }
 0x8c2   :  { %2413 = vst.msk [vmem:[#allocation2 + $0xa0] sm:$0xff] %vm344_vm1, %v2379_v46  ;;  %6683 = vpow2.f32 %v3520_v3  ;;  %v2334_v52 = vpack.c.bf16 %v2325_v10, %v2324_v50  ;;  %v2293_v29 = vpop.xlane.xlu0 %2292  ;;  %v2710_v4 = vmul.f32 %v6680_v51, %v9542_v13  ;;  %v9713_v24 = vpop.xlane.xlu1 %3478 }
 0x8c3   :  { %6685 = vrcp.f32 %v2293_v29  ;;  %v9732_v29 = vpop.f32.mrf.mxu2 }
 0x8c4   :  { %2398 = vmatmul.bf16.gmra.mxu3 %v2334_v52  ;;  %v3000_v52 = vpop.f32.mrf.mxu1 }
 0x8c7   :  { %v6682_v16 = vpop.eup %6681 }
 0x8c8   :  { %v9699_v32 = vpop.eup %6683  ;;  %3176 = vrot.lane.b32.xlu0 %v12163_v58, %s7003_s22  ;;  %v3187_v18 = vpop.permute.xlu2 %3186  ;;  %v2711_v21 = vmul.f32 %v6682_v16, %v9579_v47  ;;  %v3068_v47 = vmul.f32 1.442695, %v3052_v44 }
 0x8c9   :  { %v2381_v33 = vpop.f32.mrf.mxu3  ;;  %3552 = vadd.xlane.f32.xlu1 %v9699_v32  ;;  %3196 = vmatpush.bf16.msrb.mxu3 %v3187_v18  ;;  %v6686_v61 = vpop.eup %6685 }
 0x8ca   :  { %2414 = vst.msk [vmem:[#allocation2 + $0xa8] sm:$0xff] %vm344_vm1, %v2381_v33  ;;  %v2720_v53 = vpack.c.bf16 %v2711_v21, %v2710_v4  ;;  %v2326_v23 = vmul.f32 %v6686_v61, %v9586_v54  ;;  %v3450_v18 = vpop.f32.mrf.mxu0  ;;  %v6148_v33 = vld [vmem:[%s11930_s7 + $0x148] sm:$0xff]  ;;  %v3504_v61 = vsub.f32 %v9544_v41, %v9663_v20 }
 0x8cb   :  { %v6985_v41 = vld [vmem:[%s11930_s7 + $0x1c8] sm:$0xff] }
 0x8cc   :  { %2784 = vmatmul.bf16.gmra.mxu2 %v2720_v53  ;;  %v3002_v4 = vpop.f32.mrf.mxu1  ;;  %v6147_v53 = vld [vmem:[%s11930_s7 + $0x140] sm:$0xff] }
 0x8d0   :  { %3174 = vrot.lane.b32.xlu0 %v12164_v55, %s7003_s22  ;;  %v2295_v13 = vpop.xlane.xlu0 %2294 }
 0x8d1   :  { %v2384_v60 = vpop.f32.mrf.mxu3  ;;  %6687 = vrcp.f32 %v2295_v13 }
 0x8d2   :  { %2415 = vst.msk [vmem:[#allocation2 + $0xb0] sm:$0xff] %vm344_vm1, %v2384_v60  ;;  %6689 = vpow2.f32 %v3068_v47  ;;  %v9742_v60 = vadd.f32 %v6148_v33, %v3002_v4 }
 0x8d7   :  { %v6688_v17 = vpop.eup %6687 }
 0x8d8   :  { %3624 = vrot.lane.b32.xlu0 %v12164_v55, %s7010_s0  ;;  %v2327_v14 = vmul.f32 %v6688_v17, %v9597_v39  ;;  %v9721_v38 = vpop.eup %6689 }
 0x8d9   :  { %v2386_v27 = vpop.f32.mrf.mxu3  ;;  %v3637_v57 = vpop.permute.xlu1 %3636 }
 0x8da   :  { %2416 = vst.msk [vmem:[#allocation2 + $0xb8] sm:$0xff] %vm344_vm1, %v2386_v27  ;;  %3646 = vmatpush.bf16.msrb.mxu2 %v3637_v57  ;;  %v2335_v25 = vpack.c.bf16 %v2327_v14, %v2326_v23  ;;  %v2681_v54 = vpop.xlane.xlu0 %2680  ;;  %v9754_v27 = vpop.f32.mrf.mxu2  ;;  %v3055_v23 = vsub.f32 %v9531_v42, %v9670_v62  ;;  %v3522_v14 = vmul.f32 1.442695, %v3504_v61  ;;  %v3505_v62 = vsub.f32 %v9526_v45, %v9653_v1  ;;  %v6986_v45 = vld [vmem:[%s11930_s7 + $0x1c0] sm:$0xff] }
 0x8db   :  { %6691 = vrcp.f32 %v2681_v54  ;;  %v9785_v1 = vadd.f32 %v6986_v45, %v3450_v18 }
 0x8dc   :  { %2403 = vmatmul.bf16.gmra.mxu3 %v2335_v25  ;;  %v3074_v57 = vmul.f32 1.442695, %v3055_v23 }
 0x8df   :  { %3100 = vadd.xlane.f32.xlu2 %v9721_v38 }
 0x8e0   :  { %3622 = vrot.lane.b32.xlu0 %v12165_v8, %s7010_s0 }
 0x8e1   :  { %v3185_v37 = vpop.permute.xlu1 %3184  ;;  %v6692_v21 = vpop.eup %6691 }
 0x8e2   :  { %3626 = vrot.lane.b32.xlu1 %v12163_v58, %s7010_s0  ;;  %3197 = vmatpush.bf16.msrb.mxu3 %v3185_v37  ;;  %v3054_v58 = vsub.f32 %v9516_v35, %v9645_v19  ;;  %v2713_v35 = vmul.f32 %v6692_v21, %v9602_v63  ;;  %v9748_v19 = vadd.f32 %v6147_v53, %v3000_v52 }
 0x8e4   :  { %v3072_v44 = vmul.f32 1.442695, %v3054_v58 }
 0x8e8   :  { %v2389_v39 = vpop.f32.mrf.mxu3 }
 0x8e9   :  { %2417 = vst.msk [vmem:[#allocation2 + $0xc0] sm:$0xff] %vm344_vm1, %v2389_v39  ;;  %v3183_v3 = vpop.permute.xlu1 %3182  ;;  %v3056_v39 = vsub.f32 %v9572_v9, %v9697_v26 }
 0x8ea   :  { %3198 = vmatpush.bf16.msrb.mxu3 %v3183_v3  ;;  %v6150_v3 = vld [vmem:[%s11930_s7 + $0x158] sm:$0xff] }
 0x8eb   :  { %v3076_v9 = vmul.f32 1.442695, %v3056_v39 }
 0x8ec   :  { %v3635_v12 = vpop.permute.xlu0 %3634 }
 0x8ed   :  { %3647 = vmatpush.bf16.msrb.mxu2 %v3635_v12 }
 0x8f0   :  { %v2391_v2 = vpop.f32.mrf.mxu3 }
 0x8f1   :  { %2418 = vst.msk [vmem:[#allocation2 + $0xc8] sm:$0xff] %vm344_vm1, %v2391_v2  ;;  %v3633_v46 = vpop.permute.xlu1 %3632 }
 0x8f2   :  { %3648 = vmatpush.bf16.msrb.mxu2 %v3633_v46  ;;  %v3524_v46 = vmul.f32 1.442695, %v3505_v62  ;;  %v6989_v62 = vld [vmem:[%s11930_s7 + $0x1e0] sm:$0xff] }
 0x8f4   :  { %v3181_v50 = vpop.permute.xlu0 %3180 }
 0x8f5   :  { %3199 = vmatpush.bf16.msrb.mxu3 %v3181_v50  ;;  %v6149_v50 = vld [vmem:[%s11930_s7 + $0x150] sm:$0xff] }
 0x8f7   :  { %3172 = vrot.lane.b32.xlu2 %v12165_v8, %s7003_s22  ;;  %v3005_v8 = vpop.f32.mrf.mxu1 }
 0x8f8   :  { %v9794_v52 = vadd.f32 %v6149_v50, %v3005_v8 }
 0x8f9   :  { %v3631_v10 = vpop.permute.xlu1 %3630 }
 0x8fa   :  { %3649 = vmatpush.bf16.msrb.mxu2 %v3631_v10 }
 0x8ff   :  { %v3007_v12 = vpop.f32.mrf.mxu1 }
 0x900   :  { %v9790_v10 = vadd.f32 %v6150_v3, %v3007_v12 }
 0x901   :  { %v3179_v51 = vpop.permute.xlu1 %3178  ;;  %v2679_v16 = vpop.xlane.xlu2 %2678 }
 0x902   :  { %6693 = vrcp.f32 %v2679_v16  ;;  %3200 = vmatpush.bf16.msrb.mxu3 %v3179_v51  ;;  %v3507_v51 = vsub.f32 %v9568_v7, %v9687_v59  ;;  %v3506_v16 = vsub.f32 %v9584_v30, %v9713_v24  ;;  %v3057_v7 = vsub.f32 %v9554_v40, %v9675_v6  ;;  %v6987_v30 = vld [vmem:[%s11930_s7 + $0x1d8] sm:$0xff] }
 0x903   :  { %6695 = vpow2.f32 %v3072_v44 }
 0x904   :  { %6697 = vpow2.f32 %v3522_v14  ;;  %v3528_v33 = vmul.f32 1.442695, %v3507_v51  ;;  %v3526_v59 = vmul.f32 1.442695, %v3506_v16 }
 0x905   :  { %6699 = vpow2.f32 %v3074_v57  ;;  %v6152_v57 = vld [vmem:[%s11930_s7 + $0x168] sm:$0xff] }
 0x906   :  { %6701 = vpow2.f32 %v3524_v46 }
 0x907   :  { %6703 = vpow2.f32 %v3076_v9  ;;  %v3010_v44 = vpop.f32.mrf.mxu1 }
 0x908   :  { %v6694_v55 = vpop.eup %6693  ;;  %6705 = vpow2.f32 %v3528_v33 }
 0x909   :  { %v9744_v13 = vpop.xlane.xlu2 %3032  ;;  %v2712_v47 = vmul.f32 %v6694_v55, %v9630_v56  ;;  %v3452_v56 = vpop.f32.mrf.mxu0  ;;  %v3078_v55 = vmul.f32 1.442695, %v3057_v7  ;;  %6707 = vpow2.f32 %v3526_v59 }
 0x90a   :  { %3038 = vmax.xlane.f32.xlu0 %v9742_v60  ;;  %v9758_v63 = vpop.eup %6695  ;;  %v9765_v20 = vadd.f32 %v6985_v41, %v3452_v56  ;;  %v3058_v56 = vsub.f32 %v9639_v11, %v9744_v13  ;;  %v6151_v13 = vld [vmem:[%s11930_s7 + $0x160] sm:$0xff] }
 0x90b   :  { %v2721_v17 = vpack.c.bf16 %v2713_v35, %v2712_v47  ;;  %v9769_v42 = vpop.eup %6697  ;;  %v6988_v47 = vld [vmem:[%s11930_s7 + $0x1d0] sm:$0xff]  ;;  %6709 = vpow2.f32 %v3078_v55  ;;  %v9853_v45 = vadd.f32 %v6151_v13, %v3010_v44 }
 0x90c   :  { %3036 = vmax.xlane.f32.xlu1 %v9748_v19  ;;  %v9774_v54 = vpop.eup %6699  ;;  %v3080_v39 = vmul.f32 1.442695, %v3058_v56 }
 0x90d   :  { %2789 = vmatmul.bf16.gmra.mxu2 %v2721_v17  ;;  %v9802_v58 = vpop.eup %6701 }
 0x90e   :  { %v9806_v53 = vpop.eup %6703 }
 0x90f   :  { %v9823_v6 = vpop.eup %6705  ;;  %v3012_v41 = vpop.f32.mrf.mxu1 }
 0x910   :  { %v9826_v17 = vpop.eup %6707  ;;  %v9843_v3 = vadd.f32 %v6152_v57, %v3012_v41  ;;  %v6991_v57 = vld [vmem:[%s11930_s7 + $0x1f8] sm:$0xff] }
 0x911   :  { %v9760_v25 = vpop.xlane.xlu2 %3482  ;;  %v3455_v2 = vpop.f32.mrf.mxu0 }
 0x912   :  { %3104 = vadd.xlane.f32.xlu0 %v9758_v63  ;;  %v9820_v40 = vadd.f32 %v6988_v47, %v3455_v2  ;;  %v9832_v14 = vpop.eup %6709  ;;  %v9849_v2 = vpop.f32.mrf.mxu2  ;;  %v3508_v9 = vsub.f32 %v9650_v43, %v9760_v25  ;;  %v6990_v43 = vld [vmem:[%s11930_s7 + $0x1e8] sm:$0xff] }
 0x914   :  { %3488 = vmax.xlane.f32.xlu1 %v9765_v20 }
 0x919   :  { %v3629_v37 = vpop.permute.xlu2 %3628  ;;  %v3457_v18 = vpop.f32.mrf.mxu0 }
 0x91a   :  { %3554 = vadd.xlane.f32.xlu0 %v9769_v42  ;;  %3650 = vmatpush.bf16.msrb.mxu2 %v3629_v37  ;;  %v9813_v24 = vadd.f32 %v6987_v30, %v3457_v18  ;;  %v9872_v7 = vpop.f32.mrf.mxu2 }
 0x91c   :  { %3106 = vadd.xlane.f32.xlu1 %v9774_v54 }
 0x91f   :  { %v2394_v26 = vpop.f32.mrf.mxu3  ;;  %v3035_v21 = vpop.xlane.xlu0 %3034 }
 0x920   :  { %2419 = vst.msk [vmem:[#allocation2 + $0xd0] sm:$0xff] %vm344_vm1, %v2394_v26  ;;  %3486 = vmax.xlane.f32.xlu2 %v9785_v1  ;;  %v3059_v23 = vsub.f32 %v9661_v5, %v3035_v21  ;;  %v3530_v21 = vmul.f32 1.442695, %v3508_v9 }
 0x921   :  { %v3460_v35 = vpop.f32.mrf.mxu0 }
 0x922   :  { %3042 = vmax.xlane.f32.xlu0 %v9790_v10  ;;  %v3082_v8 = vmul.f32 1.442695, %v3059_v23  ;;  %v9840_v37 = vadd.f32 %v6989_v62, %v3460_v35  ;;  %v9884_v56 = vpop.f32.mrf.mxu2 }
 0x924   :  { %3040 = vmax.xlane.f32.xlu1 %v9794_v52  ;;  %6711 = vpow2.f32 %v3082_v8  ;;  %v6992_v8 = vld [vmem:[%s11930_s7 + $0x1f0] sm:$0xff] }
 0x925   :  { %6713 = vpow2.f32 %v3080_v39 }
 0x927   :  { %v2396_v4 = vpop.f32.mrf.mxu3  ;;  %v3103_v61 = vpop.xlane.xlu0 %3102 }
 0x928   :  { %2420 = vst.msk [vmem:[#allocation2 + $0xd8] sm:$0xff] %vm344_vm1, %v2396_v4  ;;  %3556 = vadd.xlane.f32.xlu2 %v9802_v58  ;;  %v3015_v4 = vpop.f32.mrf.mxu1 }
 0x929   :  { %v3462_v12 = vpop.f32.mrf.mxu0 }
 0x92a   :  { %3108 = vadd.xlane.f32.xlu0 %v9806_v53  ;;  %v9856_v50 = vpop.eup %6711  ;;  %v9870_v25 = vadd.f32 %v6990_v43, %v3462_v12 }
 0x92b   :  { %v9861_v18 = vpop.eup %6713 }
 0x92c   :  { %3492 = vmax.xlane.f32.xlu1 %v9813_v24  ;;  %v3485_v5 = vpop.xlane.xlu1 %3484 }
 0x92d   :  { %v3509_v46 = vsub.f32 %v9683_v49, %v3485_v5  ;;  %v6153_v49 = vld [vmem:[%s11930_s7 + $0x170] sm:$0xff] }
 0x92e   :  { %v9874_v30 = vadd.f32 %v6153_v49, %v3015_v4 }
 0x92f   :  { %v3532_v26 = vmul.f32 1.442695, %v3509_v46 }
 0x930   :  { %3490 = vmax.xlane.f32.xlu2 %v9820_v40 }
 0x931   :  { %v3465_v33 = vpop.f32.mrf.mxu0  ;;  %6715 = vpow2.f32 %v3532_v26 }
 0x932   :  { %3560 = vadd.xlane.f32.xlu0 %v9823_v6  ;;  %6717 = vpow2.f32 %v3530_v21  ;;  %v9896_v62 = vadd.f32 %v6992_v8, %v3465_v33 }
 0x933   :  { %6719 = vrcp.f32 %v3103_v61  ;;  %v6154_v61 = vld [vmem:[%s11930_s7 + $0x178] sm:$0xff]  ;;  %s7013_s7 = smov 24  }
 0x934   :  { %3558 = vadd.xlane.f32.xlu1 %v9826_v17  ;;  %v3551_v51 = vpop.xlane.xlu1 %3550 }
 0x937   :  { %v9879_v44 = vpop.eup %6715 }
 0x938   :  { %3110 = vadd.xlane.f32.xlu2 %v9832_v14  ;;  %v9882_v35 = vpop.eup %6717 }
 0x939   :  { %v3467_v47 = vpop.f32.mrf.mxu0  ;;  %v6720_v12 = vpop.eup %6719 }
 0x93a   :  { %v3177_v11 = vpop.permute.xlu0 %3176  ;;  %3494 = vmax.xlane.f32.xlu0 %v9840_v37  ;;  %v9889_v41 = vadd.f32 %v6991_v57, %v3467_v47  ;;  %v3149_v33 = vmul.f32 %v6720_v12, %v9673_v22 }
 0x93b   :  { %3201 = vmatpush.bf16.msrb.mxu3 %v3177_v11  ;;  %v3017_v11 = vpop.f32.mrf.mxu1 }
 0x93c   :  { %3046 = vmax.xlane.f32.xlu1 %v9843_v3  ;;  %v3553_v55 = vpop.xlane.xlu1 %3552  ;;  %v9903_v46 = vadd.f32 %v6154_v61, %v3017_v11 }
 0x93d   :  { %6721 = vrcp.f32 %v3553_v55 }
 0x93e   :  { %6723 = vrcp.f32 %v3551_v51 }
 0x940   :  { %3044 = vmax.xlane.f32.xlu2 %v9853_v45 }
 0x942   :  { %v3175_v16 = vpop.permute.xlu0 %3174  ;;  %3114 = vadd.xlane.f32.xlu0 %v9856_v50 }
 0x943   :  { %3202 = vmatpush.bf16.msrb.mxu3 %v3175_v16  ;;  %v6722_v9 = vpop.eup %6721  ;;  %v9906_v16 = vpop.f32.mrf.mxu2 }
 0x944   :  { %3112 = vadd.xlane.f32.xlu1 %v9861_v18  ;;  %v6724_v26 = vpop.eup %6723  ;;  %v3599_v49 = vmul.f32 %v6722_v9, %v9699_v32 }
 0x945   :  { %v3598_v43 = vmul.f32 %v6724_v26, %v9689_v28 }
 0x947   :  { %v2399_v59 = vpop.f32.mrf.mxu3  ;;  %v3614_v47 = vpack.c.bf16 %v3599_v49, %v3598_v43 }
 0x948   :  { %2421 = vst.msk [vmem:[#allocation2 + $0xe0] sm:$0xff] %vm344_vm1, %v2399_v59  ;;  %3496 = vmax.xlane.f32.xlu2 %v9870_v25 }
 0x94a   :  { %3048 = vmax.xlane.f32.xlu0 %v9874_v30  ;;  %v3625_v5 = vpop.permute.xlu0 %3624 }
 0x94b   :  { %v9913_v57 = vpop.f32.mrf.mxu2 }
 0x94c   :  { %3564 = vadd.xlane.f32.xlu1 %v9879_v44 }
 0x94f   :  { %v2401_v23 = vpop.f32.mrf.mxu3 }
 0x950   :  { %2422 = vst.msk [vmem:[#allocation2 + $0xe8] sm:$0xff] %vm344_vm1, %v2401_v23  ;;  %3562 = vadd.xlane.f32.xlu2 %v9882_v35 }
 0x952   :  { %3500 = vmax.xlane.f32.xlu0 %v9889_v41  ;;  %v3101_v39 = vpop.xlane.xlu2 %3100  ;;  %v3623_v59 = vpop.permute.xlu0 %3622 }
 0x953   :  { %6725 = vrcp.f32 %v3101_v39  ;;  %v9918_v32 = vpop.f32.mrf.mxu2 }
 0x954   :  { %3498 = vmax.xlane.f32.xlu1 %v9896_v62  ;;  %v3627_v13 = vpop.permute.xlu1 %3626 }
 0x955   :  { %3651 = vmatpush.bf16.msrb.mxu2 %v3627_v13 }
 0x958   :  { %3050 = vmax.xlane.f32.xlu2 %v9903_v46 }
 0x959   :  { %v6726_v51 = vpop.eup %6725  ;;  %3652 = vmatpush.bf16.msrb.mxu2 %v3625_v5 }
 0x95a   :  { %v3148_v4 = vmul.f32 %v6726_v51, %v9721_v38  ;;  %v3173_v21 = vpop.permute.xlu2 %3172 }
 0x95b   :  { %3203 = vmatpush.bf16.msrb.mxu3 %v3173_v21  ;;  %v9924_v28 = vpop.f32.mrf.mxu2 }
 0x95c   :  { %v3164_v55 = vpack.c.bf16 %v3149_v33, %v3148_v4 }
 0x95d   :  { %3653 = vmatpush.bf16.msrb.mxu2 %v3623_v59 }
 0x95e   :  { %3204 = vmatmul.bf16.vlgmr.msrb.gmra.mxu3 %v3164_v55 }
 0x95f   :  { %v2404_v23 = vpop.f32.mrf.mxu3 }
 0x960   :  { %2423 = vst.msk [vmem:[#allocation2 + $0xf0] sm:$0xff] %vm344_vm1, %v2404_v23  ;;  %3654 = vmatmul.bf16.vlgmr.msrb.gmra.mxu2 %v3614_v47 }
 0x963   :  { %v9926_v5 = vpop.f32.mrf.mxu2 }
 0x967   :  { %v2406_v22 = vpop.f32.mrf.mxu3 }
 0x968   :  { %2424 = vst.msk [vmem:[#allocation2 + $0xf8] sm:$0xff] %vm344_vm1, %v2406_v22 }
 0x96d   :  { %1976 = vrot.lane.b32.xlu1 %v9619_v36, %s7013_s7 }
 0x970   :  { %1974 = vrot.lane.b32.xlu2 %v9611_v31, %s7013_s7  ;;  %v9932_v31 = vpop.f32.mrf.mxu2 }
 0x975   :  { %1980 = vrot.lane.b32.xlu1 %v9668_v0, %s7013_s7 }
 0x978   :  { %v9939_v4 = vpop.f32.mrf.mxu2 }
 0x97d   :  { %v3039_v38 = vpop.xlane.xlu0 %3038 }
 0x97e   :  { %v3061_v11 = vsub.f32 %v9742_v60, %v3039_v38 }
 0x97f   :  { %v3037_v8 = vpop.xlane.xlu1 %3036 }
 0x980   :  { %v3060_v39 = vsub.f32 %v9748_v19, %v3037_v8  ;;  %v3086_v12 = vmul.f32 1.442695, %v3061_v11 }
 0x982   :  { %v3084_v61 = vmul.f32 1.442695, %v3060_v39 }
 0x984   :  { %6727 = vpow2.f32 %v3084_v61 }
 0x985   :  { %v3105_v36 = vpop.xlane.xlu0 %3104  ;;  %6729 = vpow2.f32 %v3086_v12 }
 0x986   :  { %6731 = vrcp.f32 %v3105_v36 }
 0x987   :  { %v3489_v13 = vpop.xlane.xlu1 %3488 }
 0x988   :  { %v3511_v0 = vsub.f32 %v9765_v20, %v3489_v13 }
 0x98a   :  { %v9930_v9 = vpop.eup %6727  ;;  %v3536_v51 = vmul.f32 1.442695, %v3511_v0 }
 0x98b   :  { %3116 = vadd.xlane.f32.xlu0 %v9930_v9  ;;  %v9936_v33 = vpop.eup %6729 }
 0x98c   :  { %v6732_v49 = vpop.eup %6731 }
 0x98d   :  { %v3555_v26 = vpop.xlane.xlu0 %3554  ;;  %v3150_v47 = vmul.f32 %v6732_v49, %v9758_v63  ;;  %v9953_v63 = vpop.f32.mrf.mxu2 }
 0x98f   :  { %v3107_v19 = vpop.xlane.xlu1 %3106 }
 0x990   :  { %6733 = vrcp.f32 %v3107_v19 }
 0x991   :  { %6735 = vpow2.f32 %v3536_v51 }
 0x993   :  { %3118 = vadd.xlane.f32.xlu0 %v9936_v33  ;;  %v3487_v60 = vpop.xlane.xlu2 %3486 }
 0x994   :  { %v3510_v21 = vsub.f32 %v9785_v1, %v3487_v60  ;;  %v6270_v1 = vld [vmem:[%s11931_s3 + $0x8] sm:$0xff] }
 0x995   :  { %v9942_v20 = vpop.xlane.xlu0 %3042  ;;  %3895 = vmatpush.bf16.msra.mxu1 %v6270_v1  ;;  %v9964_v49 = vpop.f32.mrf.mxu2 }
 0x996   :  { %v6734_v43 = vpop.eup %6733  ;;  %v3534_v59 = vmul.f32 1.442695, %v3510_v21 }
 0x997   :  { %v3041_v55 = vpop.xlane.xlu1 %3040  ;;  %v3151_v23 = vmul.f32 %v6734_v43, %v9774_v54  ;;  %v9946_v22 = vpop.eup %6735 }
 0x998   :  { %6737 = vpow2.f32 %v3534_v59  ;;  %v3062_v38 = vsub.f32 %v9794_v52, %v3041_v55 }
 0x999   :  { %3568 = vadd.xlane.f32.xlu2 %v9946_v22  ;;  %v3165_v8 = vpack.c.bf16 %v3151_v23, %v3150_v47  ;;  %6739 = vrcp.f32 %v3555_v26 }
 0x99a   :  { %v3088_v39 = vmul.f32 1.442695, %v3062_v38 }
 0x99b   :  { %3209 = vmatmul.bf16.gmra.mxu3 %v3165_v8  ;;  %v3557_v61 = vpop.xlane.xlu2 %3556 }
 0x99c   :  { %6741 = vpow2.f32 %v3088_v39 }
 0x99d   :  { %6743 = vrcp.f32 %v3557_v61  ;;  %v3109_v54 = vpop.xlane.xlu0 %3108  ;;  %v9974_v1 = vpop.f32.mrf.mxu2 }
 0x99e   :  { %v9955_v11 = vpop.eup %6737 }
 0x99f   :  { %v3493_v52 = vpop.xlane.xlu1 %3492  ;;  %3566 = vadd.xlane.f32.xlu0 %v9955_v11  ;;  %v6740_v36 = vpop.eup %6739 }
 0x9a0   :  { %v3600_v51 = vmul.f32 %v6740_v36, %v9769_v42  ;;  %v3513_v55 = vsub.f32 %v9813_v24, %v3493_v52 }
 0x9a2   :  { %v9958_v13 = vpop.eup %6741  ;;  %v3540_v23 = vmul.f32 1.442695, %v3513_v55 }
 0x9a3   :  { %v6744_v12 = vpop.eup %6743  ;;  %3120 = vadd.xlane.f32.xlu1 %v9958_v13  ;;  %v3491_v0 = vpop.xlane.xlu2 %3490 }
 0x9a4   :  { %v3512_v26 = vsub.f32 %v9820_v40, %v3491_v0  ;;  %v3601_v19 = vmul.f32 %v6744_v12, %v9802_v58 }
 0x9a5   :  { %v3561_v60 = vpop.xlane.xlu0 %3560 }
 0x9a6   :  { %v3538_v21 = vmul.f32 1.442695, %v3512_v26  ;;  %v3615_v43 = vpack.c.bf16 %v3601_v19, %v3600_v51 }
 0x9a7   :  { %v3559_v59 = vpop.xlane.xlu1 %3558 }
 0x9a8   :  { %6745 = vpow2.f32 %v3538_v21  ;;  %3659 = vmatmul.bf16.gmra.mxu2 %v3615_v43 }
 0x9a9   :  { %6747 = vrcp.f32 %v3559_v59 }
 0x9aa   :  { %6749 = vrcp.f32 %v3109_v54 }
 0x9ab   :  { %6751 = vrcp.f32 %v3561_v60  ;;  %v3111_v47 = vpop.xlane.xlu2 %3110 }
 0x9ac   :  { %6753 = vrcp.f32 %v3111_v47 }
 0x9ad   :  { %v9967_v40 = vpop.xlane.xlu0 %3494  ;;  %6755 = vpow2.f32 %v3540_v23  ;;  %v6269_v23 = vld [vmem:[%s11931_s3] sm:$0xff] }
 0x9ae   :  { %v9969_v42 = vpop.eup %6745  ;;  %3896 = vmatpush.bf16.msra.mxu1 %v6269_v23 }
 0x9af   :  { %v6748_v58 = vpop.eup %6747  ;;  %v9971_v38 = vpop.xlane.xlu1 %3046  ;;  %3570 = vadd.xlane.f32.xlu2 %v9969_v42 }
 0x9b0   :  { %v6750_v8 = vpop.eup %6749  ;;  %v3602_v61 = vmul.f32 %v6748_v58, %v9826_v17  ;;  %v9985_v17 = vpop.f32.mrf.mxu2 }
 0x9b1   :  { %v6752_v24 = vpop.eup %6751  ;;  %v3152_v52 = vmul.f32 %v6750_v8, %v9806_v53 }
 0x9b2   :  { %v6754_v39 = vpop.eup %6753  ;;  %v3603_v12 = vmul.f32 %v6752_v24, %v9823_v6 }
 0x9b3   :  { %v3045_v54 = vpop.xlane.xlu2 %3044  ;;  %1978 = vrot.lane.b32.xlu0 %v9655_v34, %s7013_s7  ;;  %v3153_v36 = vmul.f32 %v6754_v39, %v9832_v14  ;;  %v9982_v26 = vpop.eup %6755 }
 0x9b4   :  { %v3616_v51 = vpack.c.bf16 %v3603_v12, %v3602_v61 }
 0x9b5   :  { %v3166_v0 = vpack.c.bf16 %v3153_v36, %v3152_v52  ;;  %v3115_v19 = vpop.xlane.xlu0 %3114 }
 0x9b7   :  { %v3113_v60 = vpop.xlane.xlu1 %3112  ;;  %3214 = vmatmul.bf16.gmra.mxu3 %v3166_v0  ;;  %3572 = vadd.xlane.f32.xlu2 %v9982_v26 }
 0x9b8   :  { %3664 = vmatmul.bf16.gmra.mxu2 %v3616_v51  ;;  %6757 = vrcp.f32 %v3113_v60  ;;  %v9990_v43 = vpop.f32.mrf.mxu2 }
 0x9b9   :  { %6759 = vrcp.f32 %v3115_v19 }
 0x9bb   :  { %v3497_v34 = vpop.xlane.xlu2 %3496 }
 0x9bc   :  { %1984 = vrot.lane.b32.xlu1 %v9707_v15, %s7013_s7 }
 0x9be   :  { %v6758_v53 = vpop.eup %6757 }
 0x9bf   :  { %v3565_v6 = vpop.xlane.xlu1 %3564  ;;  %v6760_v14 = vpop.eup %6759  ;;  %v3154_v21 = vmul.f32 %v6758_v53, %v9861_v18 }
 0x9c0   :  { %6761 = vrcp.f32 %v3565_v6  ;;  %v3155_v55 = vmul.f32 %v6760_v14, %v9856_v50  ;;  %v9998_v39 = vpop.f32.mrf.mxu2  ;;  %v3063_v50 = vsub.f32 %v9790_v10, %v9942_v20  ;;  %v3065_v20 = vsub.f32 %v9843_v3, %v9971_v38 }
 0x9c2   :  { %v3167_v47 = vpack.c.bf16 %v3155_v55, %v3154_v21  ;;  %v3090_v52 = vmul.f32 1.442695, %v3063_v50  ;;  %v3514_v21 = vsub.f32 %v9840_v37, %v9967_v40  ;;  %v3049_v55 = vpop.xlane.xlu0 %3048 }
 0x9c3   :  { %v3563_v59 = vpop.xlane.xlu2 %3562 }
 0x9c4   :  { %6763 = vrcp.f32 %v3563_v59  ;;  %v3542_v23 = vmul.f32 1.442695, %v3514_v21 }
 0x9c5   :  { %6765 = vpow2.f32 %v3090_v52 }
 0x9c6   :  { %v6762_v58 = vpop.eup %6761 }
 0x9c7   :  { %3219 = vmatmul.bf16.gmra.mxu3 %v3167_v47  ;;  %v3605_v18 = vmul.f32 %v6762_v58, %v9879_v44  ;;  %v3064_v44 = vsub.f32 %v9853_v45, %v3045_v54  ;;  %v3499_v0 = vpop.xlane.xlu1 %3498  ;;  %v3094_v45 = vmul.f32 1.442695, %v3065_v20 }
 0x9c8   :  { %v10004_v12 = vpop.f32.mrf.mxu2  ;;  %v3516_v60 = vsub.f32 %v9896_v62, %v3499_v0 }
 0x9c9   :  { %v3092_v51 = vmul.f32 1.442695, %v3064_v44 }
 0x9ca   :  { %v6764_v15 = vpop.eup %6763 }
 0x9cb   :  { %v3051_v8 = vpop.xlane.xlu2 %3050  ;;  %v3604_v24 = vmul.f32 %v6764_v15, %v9882_v35  ;;  %v3515_v35 = vsub.f32 %v9870_v25, %v3497_v34  ;;  %v10009_v10 = vpop.eup %6765  ;;  %6767 = vpow2.f32 %v3092_v51  ;;  %v3546_v25 = vmul.f32 1.442695, %v3516_v60 }
 0x9cc   :  { %v3067_v15 = vsub.f32 %v9903_v46, %v3051_v8 }
 0x9cd   :  { %v3617_v61 = vpack.c.bf16 %v3605_v18, %v3604_v24  ;;  %v3544_v19 = vmul.f32 1.442695, %v3515_v35  ;;  %v3501_v18 = vpop.xlane.xlu0 %3500 }
 0x9ce   :  { %v3098_v24 = vmul.f32 1.442695, %v3067_v15 }
 0x9cf   :  { %1982 = vrot.lane.b32.xlu2 %v9695_v48, %s7013_s7  ;;  %3669 = vmatmul.bf16.gmra.mxu2 %v3617_v61  ;;  %6769 = vpow2.f32 %v3544_v19  ;;  %v3517_v61 = vsub.f32 %v9889_v41, %v3501_v18 }
 0x9d0   :  { %v10012_v48 = vpop.f32.mrf.mxu2  ;;  %6771 = vpow2.f32 %v3094_v45 }
 0x9d1   :  { %v10018_v54 = vpop.eup %6767  ;;  %6773 = vpow2.f32 %v3546_v25  ;;  %v3548_v50 = vmul.f32 1.442695, %v3517_v61 }
 0x9d2   :  { %6775 = vpow2.f32 %v3542_v23 }
 0x9d3   :  { %v1975_v36 = vpop.permute.xlu2 %1974  ;;  %6777 = vpow2.f32 %v3098_v24 }
 0x9d4   :  { %2023 = vst.msk [vmem:[#allocation2] sm:$0xff] %vm2022_vm4, %v1975_v36  ;;  %6779 = vpow2.f32 %v3548_v50 }
 0x9d5   :  { %v10020_v34 = vpop.eup %6769 }
 0x9d6   :  { %v10030_v59 = vpop.eup %6771 }
 0x9d7   :  { %v10032_v47 = vpop.eup %6773 }
 0x9d8   :  { %v10023_v6 = vpop.f32.mrf.mxu2  ;;  %v10039_v37 = vpop.eup %6775 }
 0x9d9   :  { %v10045_v36 = vpop.eup %6777 }
 0x9da   :  { %v10052_v44 = vpop.eup %6779 }
 0x9db   :  { %v3775_v3 = vld [vmem:[#allocation2] sm:$0xff] }
 0x9dd   :  { %3122 = vadd.xlane.f32.xlu0 %v10009_v10 }
 0x9df   :  { %v1977_v53 = vpop.permute.xlu1 %1976 }
 0x9e0   :  { %2024 = vst.msk [vmem:[#allocation2 + $0x8] sm:$0xff] %vm2022_vm4, %v1977_v53  ;;  %v10036_v58 = vpop.f32.mrf.mxu2 }
 0x9e5   :  { %3124 = vadd.xlane.f32.xlu0 %v10018_v54 }
 0x9e6   :  { %3576 = vadd.xlane.f32.xlu1 %v10020_v34 }
 0x9e7   :  { %v1981_v38 = vpop.permute.xlu1 %1980  ;;  %v3776_v62 = vld [vmem:[#allocation2 + $0x8] sm:$0xff] }
 0x9e8   :  { %2026 = vst.msk [vmem:[#allocation2 + $0x18] sm:$0xff] %vm2022_vm4, %v1981_v38  ;;  %v3807_v14 = vpack.c.bf16 %v3776_v62, %v3775_v3  ;;  %v10041_v40 = vpop.f32.mrf.mxu2  ;;  %v3205_v3 = vpop.f32.mrf.mxu3  ;;  %v3066_v38 = vsub.f32 %v9874_v30, %v3049_v55 }
 0x9ea   :  { %6195 = vmatmul.msk.bf16.vlgmr.msra.gmra.mxu1 %vm158_vm0, %v3807_v14 }
 0x9ed   :  { %3126 = vadd.xlane.f32.xlu0 %v10030_v59 }
 0x9ee   :  { %3578 = vadd.xlane.f32.xlu1 %v10032_v47 }
 0x9ef   :  { %v3778_v21 = vld [vmem:[#allocation2 + $0x18] sm:$0xff] }
 0x9f0   :  { %v10050_v46 = vpop.f32.mrf.mxu2 }
 0x9f8   :  { %3574 = vadd.xlane.f32.xlu2 %v10039_v37  ;;  %v10059_v41 = vpop.f32.mrf.mxu2 }
 0x9fe   :  { %v3117_v52 = vpop.xlane.xlu0 %3116 }
 0x9ff   :  { %6781 = vrcp.f32 %v3117_v52 }
 0xa00   :  { %3130 = vadd.xlane.f32.xlu2 %v10045_v36  ;;  %v10065_v60 = vpop.f32.mrf.mxu2 }
 0xa01   :  { %1986 = vrot.lane.b32.xlu0 %v9732_v29, %s7013_s7 }
 0xa05   :  { %v6782_v35 = vpop.eup %6781 }
 0xa06   :  { %v3119_v8 = vpop.xlane.xlu0 %3118  ;;  %v3156_v51 = vmul.f32 %v6782_v35, %v9930_v9 }
 0xa07   :  { %6783 = vrcp.f32 %v3119_v8  ;;  %1990 = vrot.lane.b32.xlu1 %v9849_v2, %s7013_s7 }
 0xa08   :  { %3580 = vadd.xlane.f32.xlu2 %v10052_v44 }
 0xa09   :  { %1988 = vrot.lane.b32.xlu0 %v9754_v27, %s7013_s7 }
 0xa0c   :  { %v3569_v29 = vpop.xlane.xlu2 %3568 }
 0xa0d   :  { %v6784_v0 = vpop.eup %6783  ;;  %6785 = vrcp.f32 %v3569_v29 }
 0xa0e   :  { %v3157_v19 = vmul.f32 %v6784_v0, %v9936_v33  ;;  %v3655_v33 = vpop.f32.mrf.mxu2 }
 0xa0f   :  { %1996 = vrot.lane.b32.xlu1 %v9906_v16, %s7013_s7 }
 0xa10   :  { %v3168_v20 = vpack.c.bf16 %v3157_v19, %v3156_v51 }
 0xa12   :  { %3224 = vmatmul.bf16.gmra.mxu3 %v3168_v20  ;;  %v3567_v2 = vpop.xlane.xlu0 %3566 }
 0xa13   :  { %6787 = vrcp.f32 %v3567_v2  ;;  %v6786_v27 = vpop.eup %6785 }
 0xa14   :  { %v3607_v9 = vmul.f32 %v6786_v27, %v9946_v22  ;;  %v3096_v22 = vmul.f32 1.442695, %v3066_v38 }
 0xa16   :  { %v3121_v14 = vpop.xlane.xlu1 %3120 }
 0xa17   :  { %2000 = vrot.lane.b32.xlu1 %v9918_v32, %s7013_s7  ;;  %v3657_v32 = vpop.f32.mrf.mxu2 }
 0xa19   :  { %v6788_v53 = vpop.eup %6787 }
 0xa1a   :  { %v3606_v45 = vmul.f32 %v6788_v53, %v9955_v11  ;;  %v3207_v11 = vpop.f32.mrf.mxu3 }
 0xa1c   :  { %v3618_v25 = vpack.c.bf16 %v3607_v9, %v3606_v45 }
 0xa1e   :  { %3674 = vmatmul.bf16.gmra.mxu2 %v3618_v25 }
 0xa1f   :  { %2004 = vrot.lane.b32.xlu1 %v9926_v5, %s7013_s7 }
 0xa20   :  { %1992 = vrot.lane.b32.xlu2 %v9872_v7, %s7013_s7 }
 0xa22   :  { %v3571_v16 = vpop.xlane.xlu2 %3570  ;;  %v3210_v24 = vpop.f32.mrf.mxu3 }
 0xa23   :  { %6789 = vrcp.f32 %v3571_v16 }
 0xa25   :  { %v1979_v62 = vpop.permute.xlu0 %1978 }
 0xa26   :  { %2025 = vst.msk [vmem:[#allocation2 + $0x10] sm:$0xff] %vm2022_vm4, %v1979_v62 }
 0xa27   :  { %3261 = vrot.lane.b32.xlu1 %v3205_v3, %s7011_s15 }
 0xa28   :  { %1998 = vrot.lane.b32.xlu2 %v9913_v57, %s7013_s7 }
 0xa29   :  { %v6790_v15 = vpop.eup %6789 }
 0xa2a   :  { %v3573_v5 = vpop.xlane.xlu2 %3572  ;;  %v3608_v50 = vmul.f32 %v6790_v15, %v9969_v42 }
 0xa2b   :  { %6791 = vrcp.f32 %v3573_v5  ;;  %v3660_v23 = vpop.f32.mrf.mxu2 }
 0xa2c   :  { %6793 = vpow2.f32 %v3096_v22 }
 0xa2d   :  { %v3777_v7 = vld [vmem:[#allocation2 + $0x10] sm:$0xff]  ;;  %6795 = vrcp.f32 %v3121_v14 }
 0xa2e   :  { %v1985_v30 = vpop.permute.xlu1 %1984  ;;  %v3808_v55 = vpack.c.bf16 %v3778_v21, %v3777_v7 }
 0xa2f   :  { %2028 = vst.msk [vmem:[#allocation2 + $0x28] sm:$0xff] %vm2022_vm4, %v1985_v30  ;;  %3713 = vrot.lane.b32.xlu1 %v3657_v32, %s7013_s7 }
 0xa30   :  { %2002 = vrot.lane.b32.xlu2 %v9924_v28, %s7013_s7  ;;  %6196 = vmatmul.msk.bf16.gmra.mxu1 %vm158_vm0, %v3808_v55  ;;  %v3212_v28 = vpop.f32.mrf.mxu3 }
 0xa31   :  { %v6792_v57 = vpop.eup %6791 }
 0xa32   :  { %v10085_v18 = vpop.eup %6793  ;;  %v1983_v61 = vpop.permute.xlu2 %1982  ;;  %v3609_v52 = vmul.f32 %v6792_v57, %v9982_v26 }
 0xa33   :  { %2027 = vst.msk [vmem:[#allocation2 + $0x20] sm:$0xff] %vm2022_vm4, %v1983_v61  ;;  %3128 = vadd.xlane.f32.xlu0 %v10085_v18  ;;  %v3662_v35 = vpop.f32.mrf.mxu2  ;;  %v6796_v27 = vpop.eup %6795 }
 0xa34   :  { %v3619_v8 = vpack.c.bf16 %v3609_v52, %v3608_v50 }
 0xa36   :  { %3679 = vmatmul.bf16.gmra.mxu2 %v3619_v8  ;;  %v3780_v29 = vld [vmem:[#allocation2 + $0x28] sm:$0xff] }
 0xa37   :  { %3265 = vrot.lane.b32.xlu1 %v3210_v24, %s7011_s15 }
 0xa38   :  { %2813 = vrot.lane.b32.xlu2 %v9939_v4, %s7012_s16 }
 0xa3a   :  { %v3779_v0 = vld [vmem:[#allocation2 + $0x20] sm:$0xff]  ;;  %v3215_v42 = vpop.f32.mrf.mxu3 }
 0xa3b   :  { %v3809_v51 = vpack.c.bf16 %v3780_v29, %v3779_v0  ;;  %v3665_v26 = vpop.f32.mrf.mxu2 }
 0xa3f   :  { %3717 = vrot.lane.b32.xlu1 %v3662_v35, %s7013_s7 }
 0xa40   :  { %3711 = vrot.lane.b32.xlu2 %v3655_v33, %s7013_s7  ;;  %6197 = vmatmul.msk.bf16.gmra.mxu1 %vm158_vm0, %v3809_v51  ;;  %v12166_v51 = vld [vmem:[#allocation4_spill] sm:$0xff] }
 0xa42   :  { %v3217_v4 = vpop.f32.mrf.mxu3 }
 0xa43   :  { %v3667_v19 = vpop.f32.mrf.mxu2 }
 0xa47   :  { %3269 = vrot.lane.b32.xlu1 %v3215_v42, %s7011_s15  ;;  %1994 = vrot.lane.b32.xlu0 %v9884_v56, %s7013_s7 }
 0xa48   :  { %2817 = vrot.lane.b32.xlu2 %v9964_v49, %s7012_s16  ;;  %v3158_v49 = vmul.f32 %v6796_v27, %v9958_v13 }
 0xa4a   :  { %v3220_v53 = vpop.f32.mrf.mxu3 }
 0xa4f   :  { %3721 = vrot.lane.b32.xlu1 %v3667_v19, %s7013_s7  ;;  %2811 = vrot.lane.b32.xlu0 %v9932_v31, %s7012_s16 }
 0xa50   :  { %v3123_v20 = vpop.xlane.xlu0 %3122  ;;  %3715 = vrot.lane.b32.xlu2 %v3660_v23, %s7013_s7 }
 0xa51   :  { %6797 = vrcp.f32 %v3123_v20 }
 0xa52   :  { %v3670_v2 = vpop.f32.mrf.mxu2  ;;  %v3222_v61 = vpop.f32.mrf.mxu3 }
 0xa57   :  { %v6798_v45 = vpop.eup %6797  ;;  %3273 = vrot.lane.b32.xlu1 %v3220_v53, %s7011_s15  ;;  %3263 = vrot.lane.b32.xlu0 %v3207_v11, %s7011_s15 }
 0xa58   :  { %v3125_v56 = vpop.xlane.xlu0 %3124  ;;  %2821 = vrot.lane.b32.xlu2 %v9985_v17, %s7012_s16  ;;  %v3159_v31 = vmul.f32 %v6798_v45, %v10009_v10 }
 0xa59   :  { %6799 = vrcp.f32 %v3125_v56  ;;  %v3577_v17 = vpop.xlane.xlu1 %3576 }
 0xa5a   :  { %v3169_v9 = vpack.c.bf16 %v3159_v31, %v3158_v49  ;;  %v3672_v33 = vpop.f32.mrf.mxu2 }
 0xa5c   :  { %3229 = vmatmul.bf16.gmra.mxu3 %v3169_v9 }
 0xa5f   :  { %3725 = vrot.lane.b32.xlu1 %v3672_v33, %s7013_s7  ;;  %2815 = vrot.lane.b32.xlu0 %v9953_v63, %s7012_s16  ;;  %v6800_v3 = vpop.eup %6799 }
 0xa60   :  { %3719 = vrot.lane.b32.xlu2 %v3665_v26, %s7013_s7  ;;  %v3127_v25 = vpop.xlane.xlu0 %3126  ;;  %v3160_v13 = vmul.f32 %v6800_v3, %v10018_v54 }
 0xa61   :  { %6801 = vrcp.f32 %v3127_v25  ;;  %v3579_v62 = vpop.xlane.xlu1 %3578  ;;  %v12167_v25 = vld [vmem:[#allocation3_spill] sm:$0xff] }
 0xa62   :  { %6803 = vrcp.f32 %v3577_v17 }
 0xa67   :  { %v6802_v16 = vpop.eup %6801  ;;  %2827 = vrot.lane.b32.xlu1 %v10004_v12, %s7012_s16  ;;  %3267 = vrot.lane.b32.xlu0 %v3212_v28, %s7011_s15  ;;  %v3898_v7 = vpop.f32.mrf.mxu1 }
 0xa68   :  { %2825 = vrot.lane.b32.xlu2 %v9998_v39, %s7012_s16  ;;  %v3161_v10 = vmul.f32 %v6802_v16, %v10030_v59  ;;  %v6804_v12 = vpop.eup %6803 }
 0xa69   :  { %v3611_v14 = vmul.f32 %v6804_v12, %v10020_v34 }
 0xa6a   :  { %v3170_v63 = vpack.c.bf16 %v3161_v10, %v3160_v13 }
 0xa6b   :  { %v3575_v38 = vpop.xlane.xlu2 %3574 }
 0xa6c   :  { %6805 = vrcp.f32 %v3575_v38  ;;  %3234 = vmatmul.bf16.gmra.mxu3 %v3170_v63  ;;  %v12168_v38 = vld [vmem:[#allocation5_spill] sm:$0xff] }
 0xa6d   :  { %6807 = vrcp.f32 %v3579_v62 }
 0xa6f   :  { %2829 = vrot.lane.b32.xlu1 %v10012_v48, %s7012_s16  ;;  %2819 = vrot.lane.b32.xlu0 %v9974_v1, %s7012_s16  ;;  %v3900_v52 = vpop.f32.mrf.mxu1 }
 0xa70   :  { %3723 = vrot.lane.b32.xlu2 %v3670_v2, %s7013_s7 }
 0xa72   :  { %v6806_v39 = vpop.eup %6805 }
 0xa73   :  { %v3131_v32 = vpop.xlane.xlu2 %3130  ;;  %v1987_v54 = vpop.permute.xlu0 %1986  ;;  %v3610_v59 = vmul.f32 %v6806_v39, %v10039_v37 }
 0xa74   :  { %2029 = vst.msk [vmem:[#allocation2 + $0x30] sm:$0xff] %vm2022_vm4, %v1987_v54  ;;  %v6808_v37 = vpop.eup %6807 }
 0xa75   :  { %v3620_v22 = vpack.c.bf16 %v3611_v14, %v3610_v59  ;;  %v3612_v55 = vmul.f32 %v6808_v37, %v10032_v47  ;;  %v10147_v47 = vld [vmem:[%s11932_s6] ss:$0 sm:$0xff] }
 0xa76   :  { %v3899_v49 = vadd.f32 %v10147_v47, %v3898_v7 }
 0xa77   :  { %3271 = vrot.lane.b32.xlu0 %v3217_v4, %s7011_s15  ;;  %3684 = vmatmul.bf16.gmra.mxu2 %v3620_v22 }
 0xa78   :  { %v10164_v3 = vadd.f32 %v3899_v49, %v12167_v25  ;;  %v7014_v25 = vmov 32.0  }
 0xa79   :  { %v1991_v48 = vpop.permute.xlu1 %1990 }
 0xa7a   :  { %2031 = vst.msk [vmem:[#allocation2 + $0x40] sm:$0xff] %vm2022_vm4, %v1991_v48  ;;  %v4010_v62 = vsel %vm158_vm0, %v10164_v3, 0.0 }
 0xa7b   :  { %v3581_v1 = vpop.xlane.xlu2 %3580  ;;  %v1989_v11 = vpop.permute.xlu0 %1988  ;;  %v3781_v23 = vld [vmem:[#allocation2 + $0x30] sm:$0xff] }
 0xa7c   :  { %6809 = vrcp.f32 %v3581_v1  ;;  %2030 = vst.msk [vmem:[#allocation2 + $0x38] sm:$0xff] %vm2022_vm4, %v1989_v11 }
 0xa7d   :  { %6811 = vrcp.f32 %v3131_v32 }
 0xa7f   :  { %2823 = vrot.lane.b32.xlu0 %v9990_v43, %s7012_s16 }
 0xa81   :  { %v1997_v34 = vpop.permute.xlu1 %1996  ;;  %v3783_v0 = vld [vmem:[#allocation2 + $0x40] sm:$0xff] }
 0xa82   :  { %v6810_v5 = vpop.eup %6809  ;;  %2034 = vst.msk [vmem:[#allocation2 + $0x58] sm:$0xff] %vm2022_vm4, %v1997_v34 }
 0xa83   :  { %v1993_v21 = vpop.permute.xlu2 %1992  ;;  %v3782_v30 = vld [vmem:[#allocation2 + $0x38] sm:$0xff]  ;;  %v3613_v15 = vmul.f32 %v6810_v5, %v10052_v44  ;;  %v3901_v44 = vadd.f32 %v10147_v47, %v3900_v52  ;;  %v6812_v9 = vpop.eup %6811 }
 0xa84   :  { %2032 = vst.msk [vmem:[#allocation2 + $0x48] sm:$0xff] %vm2022_vm4, %v1993_v21  ;;  %v3810_v24 = vpack.c.bf16 %v3782_v30, %v3781_v23  ;;  %v3163_v63 = vmul.f32 %v6812_v9, %v10045_v36 }
 0xa85   :  { %v3621_v57 = vpack.c.bf16 %v3613_v15, %v3612_v55  ;;  %v10153_v42 = vadd.f32 %v3901_v44, %v12166_v51 }
 0xa86   :  { %6198 = vmatmul.msk.bf16.gmra.mxu1 %vm158_vm0, %v3810_v24  ;;  %v12169_v24 = vld [vmem:[#allocation6_spill] sm:$0xff] }
 0xa87   :  { %3275 = vrot.lane.b32.xlu0 %v3222_v61, %s7011_s15  ;;  %3689 = vmatmul.bf16.gmra.mxu2 %v3621_v57  ;;  %v4013_v4 = vsel %vm158_vm0, %v10153_v42, 0.0 }
 0xa89   :  { %v2001_v43 = vpop.permute.xlu1 %2000  ;;  %v3786_v37 = vld [vmem:[#allocation2 + $0x58] sm:$0xff] }
 0xa8a   :  { %2036 = vst.msk [vmem:[#allocation2 + $0x68] sm:$0xff] %vm2022_vm4, %v2001_v43 }
 0xa8b   :  { %v1999_v50 = vpop.permute.xlu2 %1998  ;;  %v3784_v35 = vld [vmem:[#allocation2 + $0x48] sm:$0xff] }
 0xa8c   :  { %2035 = vst.msk [vmem:[#allocation2 + $0x60] sm:$0xff] %vm2022_vm4, %v1999_v50  ;;  %v3811_v29 = vpack.c.bf16 %v3784_v35, %v3783_v0 }
 0xa91   :  { %v2005_v8 = vpop.permute.xlu1 %2004  ;;  %v3788_v35 = vld [vmem:[#allocation2 + $0x68] sm:$0xff] }
 0xa92   :  { %2038 = vst.msk [vmem:[#allocation2 + $0x78] sm:$0xff] %vm2022_vm4, %v2005_v8 }
 0xa93   :  { %v2003_v28 = vpop.permute.xlu2 %2002  ;;  %v3787_v52 = vld [vmem:[#allocation2 + $0x60] sm:$0xff] }
 0xa94   :  { %2037 = vst.msk [vmem:[#allocation2 + $0x70] sm:$0xff] %vm2022_vm4, %v2003_v28  ;;  %v12170_v28 = vld [vmem:[#allocation8_spill] sm:$0xff] }
 0xa95   :  { %v3225_v26 = vpop.f32.mrf.mxu3 }
 0xa96   :  { %3277 = vrot.lane.b32.xlu1 %v3225_v26, %s7011_s15  ;;  %6199 = vmatmul.msk.bf16.gmra.mxu1 %vm158_vm0, %v3811_v29 }
 0xa99   :  { %v3262_v19 = vpop.permute.xlu1 %3261  ;;  %4014 = vadd.xlane.f32.xlu2 %v4013_v4 }
 0xa9b   :  { %v2814_v20 = vpop.permute.xlu2 %2813  ;;  %v3789_v4 = vld [vmem:[#allocation2 + $0x70] sm:$0xff] }
 0xa9c   :  { %2860 = vst.msk [vmem:[#allocation2 + $0x88] sm:$0xff] %vm1118_vm2, %v2814_v20 }
 0xa9d   :  { %v3227_v2 = vpop.f32.mrf.mxu3 }
 0xa9e   :  { %3279 = vrot.lane.b32.xlu1 %v3227_v2, %s7011_s15  ;;  %v3790_v2 = vld [vmem:[#allocation2 + $0x78] sm:$0xff] }
 0xaa1   :  { %v3714_v27 = vpop.permute.xlu1 %3713  ;;  %v3675_v45 = vpop.f32.mrf.mxu2 }
 0xaa3   :  { %v3712_v53 = vpop.permute.xlu2 %3711 }
 0xaa6   :  { %3727 = vrot.lane.b32.xlu1 %v3675_v45, %s7013_s7  ;;  %v3129_v56 = vpop.xlane.xlu0 %3128 }
 0xaa7   :  { %6813 = vrcp.f32 %v3129_v56 }
 0xaa8   :  { %6815 = vrcp.f32 %v7014_v25 }
 0xaa9   :  { %v3266_v31 = vpop.permute.xlu1 %3265  ;;  %v3677_v21 = vpop.f32.mrf.mxu2 }
 0xaab   :  { %v2818_v33 = vpop.permute.xlu2 %2817 }
 0xaac   :  { %2862 = vst.msk [vmem:[#allocation2 + $0x98] sm:$0xff] %vm1118_vm2, %v2818_v33 }
 0xaad   :  { %v6814_v16 = vpop.eup %6813  ;;  %v3903_v17 = vpop.f32.mrf.mxu1 }
 0xaae   :  { %v3904_v13 = vadd.f32 %v10147_v47, %v3903_v17  ;;  %v3162_v10 = vmul.f32 %v6814_v16, %v10085_v18 }
 0xab0   :  { %v10171_v12 = vadd.f32 %v3904_v13, %v12168_v38  ;;  %v3171_v39 = vpack.c.bf16 %v3163_v63, %v3162_v10  ;;  %v6816_v13 = vpop.eup %6815 }
 0xab1   :  { %v3718_v32 = vpop.permute.xlu1 %3717  ;;  %4011 = vadd.xlane.f32.xlu0 %v4010_v62  ;;  %v4107_v63 = vmul.f32 32.0, %v6816_v13  ;;  %vm4111_vm5 = vweird.f32 %v6816_v13 }
 0xab2   :  { %3239 = vmatmul.bf16.gmra.mxu3 %v3171_v39  ;;  %v4016_v54 = vsel %vm158_vm0, %v10171_v12, 0.0 }
 0xab3   :  { %v3716_v59 = vpop.permute.xlu2 %3715  ;;  %4017 = vadd.xlane.f32.xlu2 %v4016_v54  ;;  %v4108_v62 = vsub.f32 1.0, %v4107_v63 }
 0xab5   :  { %v3905_v14 = vpop.f32.mrf.mxu1 }
 0xab6   :  { %v3906_v23 = vadd.f32 %v10147_v47, %v3905_v14  ;;  %v4109_v14 = vmul.f32 %v6816_v13, %v4108_v62 }
 0xab8   :  { %v10192_v57 = vadd.f32 %v3906_v23, %v12169_v24 }
 0xab9   :  { %v3270_v22 = vpop.permute.xlu1 %3269  ;;  %v1995_v18 = vpop.permute.xlu0 %1994 }
 0xaba   :  { %2033 = vst.msk [vmem:[#allocation2 + $0x50] sm:$0xff] %vm2022_vm4, %v1995_v18  ;;  %v4019_v50 = vsel %vm158_vm0, %v10192_v57, 0.0 }
 0xabb   :  { %v2822_v36 = vpop.permute.xlu2 %2821 }
 0xabc   :  { %2864 = vst.msk [vmem:[#allocation2 + $0xa8] sm:$0xff] %vm1118_vm2, %v2822_v36 }
 0xabd   :  { %v10179_v34 = vpop.f32.mrf.mxu1 }
 0xabe   :  { %v3909_v36 = vadd.f32 %v10147_v47, %v10179_v34 }
 0xac1   :  { %v3722_v48 = vpop.permute.xlu1 %3721  ;;  %v2812_v1 = vpop.permute.xlu0 %2811  ;;  %v3785_v11 = vld [vmem:[#allocation2 + $0x50] sm:$0xff] }
 0xac2   :  { %2859 = vst.msk [vmem:[#allocation2 + $0x80] sm:$0xff] %vm1118_vm2, %v2812_v1  ;;  %v3812_v5 = vpack.c.bf16 %v3786_v37, %v3785_v11  ;;  %v12171_v37 = vld [vmem:[#allocation7_spill] sm:$0xff] }
 0xac3   :  { %3309 = vst.msk [vmem:[#allocation2 + $0x80] sm:$0xff] %vm1570_vm3, %v3262_v19  ;;  %v3720_v7 = vpop.permute.xlu2 %3719 }
 0xac4   :  { %3759 = vst.msk [vmem:[#allocation2 + $0x80] sm:$0xff] %vm2022_vm4, %v3712_v53  ;;  %6200 = vmatmul.msk.bf16.gmra.mxu1 %vm158_vm0, %v3812_v5  ;;  %v3680_v53 = vpop.f32.mrf.mxu2  ;;  %v10243_v5 = vadd.f32 %v3909_v36, %v12171_v37  ;;  %v12174_v37 = vld [vmem:[#allocation11_spill] sm:$0xff] }
 0xac5   :  { %3729 = vrot.lane.b32.xlu0 %v3677_v21, %s7013_s7  ;;  %v3910_v61 = vpop.f32.mrf.mxu1 }
 0xac6   :  { %v3911_v43 = vadd.f32 %v10147_v47, %v3910_v61  ;;  %v4022_v34 = vsel %vm158_vm0, %v10243_v5, 0.0 }
 0xac8   :  { %v10203_v0 = vadd.f32 %v3911_v43, %v12170_v28 }
 0xac9   :  { %v3274_v30 = vpop.permute.xlu1 %3273  ;;  %v3264_v55 = vpop.permute.xlu0 %3263 }
 0xaca   :  { %3310 = vst.msk [vmem:[#allocation2 + $0x88] sm:$0xff] %vm1570_vm3, %v3264_v55 }
 0xacb   :  { %3760 = vst.msk [vmem:[#allocation2 + $0x88] sm:$0xff] %vm2022_vm4, %v3714_v27  ;;  %v2826_v15 = vpop.permute.xlu2 %2825  ;;  %2831 = vrot.lane.b32.xlu2 %v10023_v6, %s7012_s16  ;;  %v3813_v6 = vpack.c.bf16 %v3788_v35, %v3787_v52  ;;  %v3814_v27 = vpack.c.bf16 %v3790_v2, %v3789_v4  ;;  %v3791_v33 = vld [vmem:[#allocation2 + $0x80] sm:$0xff]  ;;  %v12172_v52 = vld [vmem:[#allocation10_spill] sm:$0xff] }
 0xacc   :  { %2866 = vst.msk [vmem:[#allocation2 + $0xb8] sm:$0xff] %vm1118_vm2, %v2826_v15  ;;  %v3682_v49 = vpop.f32.mrf.mxu2 }
 0xacd   :  { %2833 = vrot.lane.b32.xlu0 %v10036_v58, %s7012_s16  ;;  %v4025_v58 = vsel %vm158_vm0, %v10203_v0, 0.0 }
 0xad0   :  { %4020 = vadd.xlane.f32.xlu1 %v4019_v50 }
 0xad1   :  { %v3726_v44 = vpop.permute.xlu1 %3725  ;;  %v2816_v8 = vpop.permute.xlu0 %2815 }
 0xad2   :  { %2861 = vst.msk [vmem:[#allocation2 + $0x90] sm:$0xff] %vm1118_vm2, %v2816_v8 }
 0xad3   :  { %3311 = vst.msk [vmem:[#allocation2 + $0x90] sm:$0xff] %vm1570_vm3, %v3266_v31  ;;  %v3792_v31 = vld [vmem:[#allocation2 + $0x88] sm:$0xff]  ;;  %v3724_v17 = vpop.permute.xlu2 %3723 }
 0xad4   :  { %3761 = vst.msk [vmem:[#allocation2 + $0x90] sm:$0xff] %vm2022_vm4, %v3716_v59  ;;  %6201 = vmatmul.msk.bf16.gmra.mxu1 %vm158_vm0, %v3813_v6  ;;  %v3815_v16 = vpack.c.bf16 %v3792_v31, %v3791_v33 }
 0xad8   :  { %4026 = vadd.xlane.f32.xlu1 %v4025_v58 }
 0xad9   :  { %v2828_v29 = vpop.permute.xlu1 %2827  ;;  %v3268_v51 = vpop.permute.xlu0 %3267 }
 0xada   :  { %2867 = vst.msk [vmem:[#allocation2 + $0xc0] sm:$0xff] %vm1118_vm2, %v2828_v29 }
 0xadb   :  { %3312 = vst.msk [vmem:[#allocation2 + $0x98] sm:$0xff] %vm1570_vm3, %v3268_v51  ;;  %v12173_v51 = vld [vmem:[#allocation9_spill] sm:$0xff] }
 0xadc   :  { %3762 = vst.msk [vmem:[#allocation2 + $0x98] sm:$0xff] %vm2022_vm4, %v3718_v32  ;;  %v3793_v32 = vld [vmem:[#allocation2 + $0x90] sm:$0xff] }
 0xadf   :  { %v3230_v26 = vpop.f32.mrf.mxu3 }
 0xae0   :  { %3281 = vrot.lane.b32.xlu0 %v3230_v26, %s7011_s15 }
 0xae1   :  { %v2830_v19 = vpop.permute.xlu1 %2829  ;;  %v2820_v20 = vpop.permute.xlu0 %2819 }
 0xae2   :  { %2868 = vst.msk [vmem:[#allocation2 + $0xc8] sm:$0xff] %vm1118_vm2, %v2830_v19 }
 0xae3   :  { %2863 = vst.msk [vmem:[#allocation2 + $0xa0] sm:$0xff] %vm1118_vm2, %v2820_v20  ;;  %v3794_v39 = vld [vmem:[#allocation2 + $0x98] sm:$0xff] }
 0xae4   :  { %3313 = vst.msk [vmem:[#allocation2 + $0xa0] sm:$0xff] %vm1570_vm3, %v3270_v22  ;;  %6202 = vmatmul.msk.bf16.gmra.mxu1 %vm158_vm0, %v3814_v27  ;;  %v3816_v59 = vpack.c.bf16 %v3794_v39, %v3793_v32 }
 0xae5   :  { %3763 = vst.msk [vmem:[#allocation2 + $0xa0] sm:$0xff] %vm2022_vm4, %v3720_v7 }
 0xae7   :  { %v3232_v45 = vpop.f32.mrf.mxu3 }
 0xae8   :  { %3731 = vrot.lane.b32.xlu0 %v3680_v53, %s7013_s7  ;;  %3283 = vrot.lane.b32.xlu2 %v3232_v45, %s7011_s15 }
 0xae9   :  { %v3272_v56 = vpop.permute.xlu0 %3271 }
 0xaea   :  { %3314 = vst.msk [vmem:[#allocation2 + $0xa8] sm:$0xff] %vm1570_vm3, %v3272_v56 }
 0xaeb   :  { %3764 = vst.msk [vmem:[#allocation2 + $0xa8] sm:$0xff] %vm2022_vm4, %v3722_v48 }
 0xaec   :  { %v3795_v55 = vld [vmem:[#allocation2 + $0xa0] sm:$0xff] }
 0xaef   :  { %v3235_v38 = vpop.f32.mrf.mxu3 }
 0xaf0   :  { %3733 = vrot.lane.b32.xlu2 %v3682_v49, %s7013_s7 }
 0xaf1   :  { %2837 = vrot.lane.b32.xlu1 %v10050_v46, %s7012_s16  ;;  %v2824_v9 = vpop.permute.xlu0 %2823 }
 0xaf2   :  { %2865 = vst.msk [vmem:[#allocation2 + $0xb0] sm:$0xff] %vm1118_vm2, %v2824_v9  ;;  %v3796_v21 = vld [vmem:[#allocation2 + $0xa8] sm:$0xff] }
 0xaf3   :  { %3315 = vst.msk [vmem:[#allocation2 + $0xb0] sm:$0xff] %vm1570_vm3, %v3274_v30  ;;  %v3817_v15 = vpack.c.bf16 %v3796_v21, %v3795_v55 }
 0xaf4   :  { %3765 = vst.msk [vmem:[#allocation2 + $0xb0] sm:$0xff] %vm2022_vm4, %v3724_v17  ;;  %6203 = vmatmul.msk.bf16.gmra.mxu1 %vm158_vm0, %v3815_v16 }
 0xaf7   :  { %v3237_v22 = vpop.f32.mrf.mxu3 }
 0xaf8   :  { %2835 = vrot.lane.b32.xlu2 %v10041_v40, %s7012_s16  ;;  %v4110_v40 = vadd.f32 %v6816_v13, %v4109_v14 }
 0xaf9   :  { %v3276_v10 = vpop.permute.xlu0 %3275 }
 0xafa   :  { %3316 = vst.msk [vmem:[#allocation2 + $0xb8] sm:$0xff] %vm1570_vm3, %v3276_v10  ;;  %v3685_v46 = vpop.f32.mrf.mxu2  ;;  %v10240_v48 = vsel %vm4111_vm5, %v6816_v13, %v4110_v40 }
 0xafb   :  { %3766 = vst.msk [vmem:[#allocation2 + $0xb8] sm:$0xff] %vm2022_vm4, %v3726_v44  ;;  %v3797_v6 = vld [vmem:[#allocation2 + $0xb0] sm:$0xff] }
 0xb00   :  { %3285 = vrot.lane.b32.xlu2 %v3235_v38, %s7011_s15 }
 0xb02   :  { %v3687_v54 = vpop.f32.mrf.mxu2  ;;  %v3798_v8 = vld [vmem:[#allocation2 + $0xb8] sm:$0xff] }
 0xb03   :  { %3737 = vrot.lane.b32.xlu1 %v3687_v54, %s7013_s7  ;;  %v3913_v1 = vpop.f32.mrf.mxu1  ;;  %v3818_v28 = vpack.c.bf16 %v3798_v8, %v3797_v6 }
 0xb04   :  { %6204 = vmatmul.msk.bf16.gmra.mxu1 %vm158_vm0, %v3816_v59  ;;  %v3914_v58 = vadd.f32 %v10147_v47, %v3913_v1 }
 0xb06   :  { %v10267_v26 = vadd.f32 %v3914_v58, %v12173_v51  ;;  %v12176_v58 = vld [vmem:[#allocation15_spill] sm:$0xff]  ;;  %v12177_v51 = vld [vmem:[#allocation12_spill] sm:$0xff] }
 0xb08   :  { %v3278_v18 = vpop.permute.xlu1 %3277  ;;  %3287 = vrot.lane.b32.xlu2 %v3237_v22, %s7011_s15  ;;  %v4028_v20 = vsel %vm158_vm0, %v10267_v26, 0.0 }
 0xb09   :  { %3317 = vst.msk [vmem:[#allocation2 + $0xc0] sm:$0xff] %vm1570_vm3, %v3278_v18 }
 0xb0b   :  { %v3915_v61 = vpop.f32.mrf.mxu1 }
 0xb0c   :  { %v4015_v11 = vpop.xlane.xlu2 %4014  ;;  %v3916_v50 = vadd.f32 %v10147_v47, %v3915_v61  ;;  %v12175_v61 = vld [vmem:[#allocation14_spill] sm:$0xff] }
 0xb0d   :  { %v4114_v7 = vmul.f32 %v10240_v48, %v4015_v11 }
 0xb0e   :  { %v10260_v44 = vadd.f32 %v3916_v50, %v12172_v52 }
 0xb0f   :  { %v10248_v30 = vsub.f32 %v10153_v42, %v4114_v7 }
 0xb10   :  { %v3280_v23 = vpop.permute.xlu1 %3279  ;;  %3735 = vrot.lane.b32.xlu2 %v3685_v46, %s7013_s7  ;;  %v4031_v35 = vsel %vm158_vm0, %v10260_v44, 0.0 }
 0xb11   :  { %3318 = vst.msk [vmem:[#allocation2 + $0xc8] sm:$0xff] %vm1570_vm3, %v3280_v23  ;;  %v4178_v24 = vmul.f32 %v10248_v30, %v10248_v30 }
 0xb12   :  { %4023 = vadd.xlane.f32.xlu0 %v4022_v34 }
 0xb13   :  { %v4212_v42 = vsel %vm158_vm0, %v4178_v24, 0.0  ;;  %v3918_v13 = vpop.f32.mrf.mxu1 }
 0xb14   :  { %6205 = vmatmul.msk.bf16.gmra.mxu1 %vm158_vm0, %v3817_v15  ;;  %v3919_v36 = vadd.f32 %v10147_v47, %v3918_v13 }
 0xb16   :  { %v10301_v7 = vadd.f32 %v3919_v36, %v12174_v37 }
 0xb18   :  { %v3728_v43 = vpop.permute.xlu1 %3727  ;;  %v4034_v15 = vsel %vm158_vm0, %v10301_v7, 0.0 }
 0xb19   :  { %3767 = vst.msk [vmem:[#allocation2 + $0xc0] sm:$0xff] %vm2022_vm4, %v3728_v43 }
 0xb1a   :  { %4213 = vadd.xlane.f32.xlu0 %v4212_v42 }
 0xb1b   :  { %v3920_v38 = vpop.f32.mrf.mxu1 }
 0xb1c   :  { %v3921_v6 = vadd.f32 %v10147_v47, %v3920_v38 }
 0xb20   :  { %v3799_v9 = vld [vmem:[#allocation2 + $0xc0] sm:$0xff] }
 0xb22   :  { %4032 = vadd.xlane.f32.xlu0 %v4031_v35 }
 0xb24   :  { %6206 = vmatmul.msk.bf16.gmra.mxu1 %vm158_vm0, %v3818_v28  ;;  %v4012_v4 = vpop.xlane.xlu0 %4011 }
 0xb25   :  { %v4113_v19 = vmul.f32 %v10240_v48, %v4012_v4  ;;  %v10333_v4 = vadd.f32 %v3921_v6, %v12177_v51 }
 0xb26   :  { %v4018_v29 = vpop.xlane.xlu2 %4017 }
 0xb27   :  { %v10274_v27 = vsub.f32 %v10164_v3, %v4113_v19  ;;  %v4115_v21 = vmul.f32 %v10240_v48, %v4018_v29 }
 0xb29   :  { %v4177_v53 = vmul.f32 %v10274_v27, %v10274_v27  ;;  %v10307_v34 = vsub.f32 %v10171_v12, %v4115_v21  ;;  %v12179_v21 = vld [vmem:[#allocation16_spill] sm:$0xff] }
 0xb2b   :  { %v4209_v56 = vsel %vm158_vm0, %v4177_v53, 0.0  ;;  %v4179_v50 = vmul.f32 %v10307_v34, %v10307_v34 }
 0xb2d   :  { %4029 = vadd.xlane.f32.xlu1 %v4028_v20  ;;  %v4215_v35 = vsel %vm158_vm0, %v4179_v50, 0.0 }
 0xb2e   :  { %v2832_v2 = vpop.permute.xlu2 %2831 }
 0xb2f   :  { %2869 = vst.msk [vmem:[#allocation2 + $0xd0] sm:$0xff] %vm1118_vm2, %v2832_v2 }
 0xb35   :  { %v3240_v49 = vpop.f32.mrf.mxu3 }
 0xb36   :  { %2839 = vrot.lane.b32.xlu0 %v10059_v41, %s7012_s16  ;;  %v3690_v41 = vpop.f32.mrf.mxu2 }
 0xb37   :  { %v3730_v45 = vpop.permute.xlu0 %3729 }
 0xb38   :  { %3768 = vst.msk [vmem:[#allocation2 + $0xc8] sm:$0xff] %vm2022_vm4, %v3730_v45 }
 0xb39   :  { %4210 = vadd.xlane.f32.xlu2 %v4209_v56 }
 0xb3d   :  { %v3242_v16 = vpop.f32.mrf.mxu3 }
 0xb3e   :  { %2841 = vrot.lane.b32.xlu0 %v10065_v60, %s7012_s16  ;;  %v3692_v60 = vpop.f32.mrf.mxu2 }
 0xb3f   :  { %v2834_v31 = vpop.permute.xlu0 %2833  ;;  %v3800_v3 = vld [vmem:[#allocation2 + $0xc8] sm:$0xff] }
 0xb40   :  { %2870 = vst.msk [vmem:[#allocation2 + $0xd8] sm:$0xff] %vm1118_vm2, %v2834_v31  ;;  %v3819_v33 = vpack.c.bf16 %v3800_v3, %v3799_v9 }
 0xb41   :  { %v3923_v54 = vpop.f32.mrf.mxu1 }
 0xb42   :  { %v3284_v25 = vpop.permute.xlu2 %3283  ;;  %6207 = vmatmul.msk.bf16.gmra.mxu1 %vm158_vm0, %v3819_v33 }
 0xb43   :  { %3320 = vst.msk [vmem:[#allocation2 + $0xd8] sm:$0xff] %vm1570_vm3, %v3284_v25  ;;  %v4021_v10 = vpop.xlane.xlu1 %4020 }
 0xb44   :  { %v4116_v23 = vmul.f32 %v10240_v48, %v4021_v10 }
 0xb46   :  { %3291 = vrot.lane.b32.xlu1 %v3242_v16, %s7011_s15  ;;  %3739 = vrot.lane.b32.xlu0 %v3690_v41, %s7013_s7  ;;  %v10313_v24 = vsub.f32 %v10192_v57, %v4116_v23  ;;  %v3924_v41 = vadd.f32 %v10147_v47, %v3923_v54 }
 0xb48   :  { %v4180_v12 = vmul.f32 %v10313_v24, %v10313_v24 }
 0xb49   :  { %v3925_v1 = vpop.f32.mrf.mxu1 }
 0xb4a   :  { %v3734_v17 = vpop.permute.xlu2 %3733  ;;  %v3926_v55 = vadd.f32 %v10147_v47, %v3925_v1  ;;  %v4218_v28 = vsel %vm158_vm0, %v4180_v12, 0.0 }
 0xb4b   :  { %3770 = vst.msk [vmem:[#allocation2 + $0xd8] sm:$0xff] %vm2022_vm4, %v3734_v17  ;;  %v4027_v32 = vpop.xlane.xlu1 %4026 }
 0xb4c   :  { %v10316_v43 = vadd.f32 %v3926_v55, %v12175_v61  ;;  %v4118_v19 = vmul.f32 %v10240_v48, %v4027_v32 }
 0xb4e   :  { %3741 = vrot.lane.b32.xlu0 %v3692_v60, %s7013_s7  ;;  %v4043_v57 = vsel %vm158_vm0, %v10316_v43, 0.0  ;;  %v10340_v56 = vsub.f32 %v10203_v0, %v4118_v19  ;;  %v12178_v60 = vld [vmem:[#allocation13_spill] sm:$0xff] }
 0xb4f   :  { %v10356_v13 = vadd.f32 %v3924_v41, %v12178_v60  ;;  %v10409_v60 = vld [vmem:[%s11932_s6 + $0x2] ss:$0 sm:$0xff] }
 0xb50   :  { %v4182_v9 = vmul.f32 %v10340_v56, %v10340_v56 }
 0xb51   :  { %3289 = vrot.lane.b32.xlu2 %v3240_v49, %s7011_s15  ;;  %v3928_v42 = vpop.f32.mrf.mxu1  ;;  %v4037_v49 = vsel %vm158_vm0, %v10333_v4, 0.0  ;;  %v4040_v10 = vsel %vm158_vm0, %v10356_v13, 0.0 }
 0xb52   :  { %v3282_v46 = vpop.permute.xlu0 %3281  ;;  %v2836_v63 = vpop.permute.xlu2 %2835  ;;  %v3802_v40 = vld [vmem:[#allocation2 + $0xd8] sm:$0xff]  ;;  %v3929_v8 = vadd.f32 %v10147_v47, %v3928_v42  ;;  %v4224_v25 = vsel %vm158_vm0, %v4182_v9, 0.0 }
 0xb53   :  { %3319 = vst.msk [vmem:[#allocation2 + $0xd0] sm:$0xff] %vm1570_vm3, %v3282_v46 }
 0xb54   :  { %2871 = vst.msk [vmem:[#allocation2 + $0xe0] sm:$0xff] %vm1118_vm2, %v2836_v63  ;;  %v10330_v29 = vadd.f32 %v3929_v8, %v12176_v58 }
 0xb56   :  { %v4046_v45 = vsel %vm158_vm0, %v10330_v29, 0.0 }
 0xb5a   :  { %v3732_v62 = vpop.permute.xlu0 %3731  ;;  %v3286_v39 = vpop.permute.xlu2 %3285 }
 0xb5b   :  { %3769 = vst.msk [vmem:[#allocation2 + $0xd0] sm:$0xff] %vm2022_vm4, %v3732_v62 }
 0xb5c   :  { %3321 = vst.msk [vmem:[#allocation2 + $0xe0] sm:$0xff] %vm1570_vm3, %v3286_v39 }
 0xb62   :  { %v3288_v59 = vpop.permute.xlu2 %3287  ;;  %v3801_v14 = vld [vmem:[#allocation2 + $0xd0] sm:$0xff] }
 0xb63   :  { %v2838_v22 = vpop.permute.xlu1 %2837  ;;  %v3820_v18 = vpack.c.bf16 %v3802_v40, %v3801_v14  ;;  %v3930_v14 = vpop.f32.mrf.mxu1 }
 0xb64   :  { %2872 = vst.msk [vmem:[#allocation2 + $0xe8] sm:$0xff] %vm1118_vm2, %v2838_v22  ;;  %v3931_v36 = vadd.f32 %v10147_v47, %v3930_v14 }
 0xb65   :  { %3322 = vst.msk [vmem:[#allocation2 + $0xe8] sm:$0xff] %vm1570_vm3, %v3288_v59  ;;  %6208 = vmatmul.msk.bf16.gmra.mxu1 %vm158_vm0, %v3820_v18 }
 0xb66   :  { %v10384_v23 = vadd.f32 %v3931_v36, %v12179_v21 }
 0xb68   :  { %v4049_v12 = vsel %vm158_vm0, %v10384_v23, 0.0 }
 0xb6a   :  { %v3736_v11 = vpop.permute.xlu2 %3735 }
 0xb6b   :  { %3771 = vst.msk [vmem:[#allocation2 + $0xe0] sm:$0xff] %vm2022_vm4, %v3736_v11  ;;  %v3933_v55 = vpop.f32.mrf.mxu1 }
 0xb6c   :  { %v3934_v42 = vadd.f32 %v10147_v47, %v3933_v55 }
 0xb70   :  { %4035 = vadd.xlane.f32.xlu1 %v4034_v15 }
 0xb72   :  { %v3803_v20 = vld [vmem:[#allocation2 + $0xe0] sm:$0xff] }
 0xb75   :  { %v3738_v52 = vpop.permute.xlu1 %3737 }
 0xb76   :  { %3772 = vst.msk [vmem:[#allocation2 + $0xe8] sm:$0xff] %vm2022_vm4, %v3738_v52 }
 0xb78   :  { %4216 = vadd.xlane.f32.xlu0 %v4215_v35  ;;  %4044 = vadd.xlane.f32.xlu1 %v4043_v57  ;;  %v12180_v57 = vld [vmem:[#allocation17_spill] sm:$0xff] }
 0xb79   :  { %v10392_v6 = vadd.f32 %v3934_v42, %v12180_v57 }
 0xb7a   :  { %4219 = vadd.xlane.f32.xlu2 %v4218_v28 }
 0xb7b   :  { %v4052_v19 = vsel %vm158_vm0, %v10392_v6, 0.0 }
 0xb7d   :  { %v3804_v2 = vld [vmem:[#allocation2 + $0xe8] sm:$0xff] }
 0xb7e   :  { %v3821_v53 = vpack.c.bf16 %v3804_v2, %v3803_v20 }
 0xb80   :  { %4047 = vadd.xlane.f32.xlu1 %v4046_v45  ;;  %6209 = vmatmul.msk.bf16.gmra.mxu1 %vm158_vm0, %v3821_v53 }
 0xb82   :  { %4038 = vadd.xlane.f32.xlu2 %v4037_v49 }
 0xb85   :  { %v4024_v31 = vpop.xlane.xlu0 %4023 }
 0xb86   :  { %v4117_v3 = vmul.f32 %v10240_v48, %v4024_v31 }
 0xb88   :  { %v10348_v33 = vsub.f32 %v10243_v5, %v4117_v3 }
 0xb8a   :  { %4225 = vadd.xlane.f32.xlu2 %v4224_v25  ;;  %v4181_v0 = vmul.f32 %v10348_v33, %v10348_v33  ;;  %v10402_v25 = vld [vmem:[%s11932_s6 + $0x1] ss:$0 sm:$0xff] }
 0xb8c   :  { %v4221_v16 = vsel %vm158_vm0, %v4181_v0, 0.0 }
 0xb8d   :  { %v4214_v17 = vpop.xlane.xlu0 %4213  ;;  %4222 = vadd.xlane.f32.xlu0 %v4221_v16 }
 0xb8e   :  { %v4306_v63 = vmul.f32 %v4214_v17, %v10240_v48 }
 0xb90   :  { %v4338_v39 = vadd.f32 1e-05, %v4306_v63 }
 0xb92   :  { %6817 = vrsqrt.f32 %v4338_v39  ;;  %vm4385_vm7 = vweird.f32 %v4338_v39 }
 0xb95   :  { %v4033_v5 = vpop.xlane.xlu0 %4032  ;;  %4041 = vadd.xlane.f32.xlu0 %v4040_v10 }
 0xb96   :  { %v4120_v46 = vmul.f32 %v10240_v48, %v4033_v5 }
 0xb98   :  { %v10363_v38 = vsub.f32 %v10260_v44, %v4120_v46  ;;  %v6272_v44 = vld [vmem:[%s11933_s4 + $0x8] sm:$0xff]  ;;  %v6818_v22 = vpop.eup %6817 }
 0xb99   :  { %4877 = vmatpush.bf16.msra.mxu3 %v6272_v44  ;;  %v4380_v11 = vmul.f32 %v6818_v22, %v4338_v39  ;;  %vm4386_vm6 = vweird.f32 %v6818_v22 }
 0xb9a   :  { %v4184_v62 = vmul.f32 %v10363_v38, %v10363_v38  ;;  %vm4387_vm8 = vmor %vm4385_vm7, %vm4386_vm6 }
 0xb9b   :  { %v4381_v15 = vmul.f32 %v6818_v22, %v4380_v11 }
 0xb9c   :  { %v4230_v32 = vsel %vm158_vm0, %v4184_v62, 0.0 }
 0xb9d   :  { %4231 = vadd.xlane.f32.xlu0 %v4230_v32  ;;  %v4382_v8 = vmul.f32 0.5, %v4381_v15 }
 0xb9f   :  { %v4383_v28 = vsub.f32 1.5, %v4382_v8 }
 0xba0   :  { %v4030_v54 = vpop.xlane.xlu1 %4029 }
 0xba1   :  { %v4119_v59 = vmul.f32 %v10240_v48, %v4030_v54  ;;  %v4384_v20 = vmul.f32 %v6818_v22, %v4383_v28 }
 0xba3   :  { %v10370_v40 = vsub.f32 %v10267_v26, %v4119_v59  ;;  %v6271_v26 = vld [vmem:[%s11933_s4] sm:$0xff]  ;;  %v4388_v31 = vsel %vm4387_vm8, %v6818_v22, %v4384_v20  ;;  %v3935_v59 = vpop.f32.mrf.mxu1 }
 0xba4   :  { %4878 = vmatpush.bf16.msra.mxu3 %v6271_v26  ;;  %v4690_v0 = vmul.f32 %v4388_v31, %v10248_v30 }
 0xba5   :  { %v4183_v18 = vmul.f32 %v10370_v40, %v10370_v40 }
 0xba6   :  { %v4724_v10 = vmul.f32 %v10402_v25, %v4690_v0 }
 0xba7   :  { %v4227_v1 = vsel %vm158_vm0, %v4183_v18, 0.0 }
 0xba8   :  { %v2840_v37 = vpop.permute.xlu0 %2839  ;;  %4228 = vadd.xlane.f32.xlu2 %v4227_v1  ;;  %v10415_v30 = vadd.f32 %v10409_v60, %v4724_v10  ;;  %v3936_v1 = vadd.f32 %v10147_v47, %v3935_v59 }
 0xba9   :  { %2873 = vst.msk [vmem:[#allocation2 + $0xf0] sm:$0xff] %vm1118_vm2, %v2840_v37 }
 0xbac   :  { %v4211_v61 = vpop.xlane.xlu2 %4210 }
 0xbad   :  { %v4305_v50 = vmul.f32 %v4211_v61, %v10240_v48 }
 0xbaf   :  { %v4337_v52 = vadd.f32 1e-05, %v4305_v50  ;;  %v12181_v50 = vld [vmem:[#allocation18_spill] sm:$0xff] }
 0xbb0   :  { %v2842_v35 = vpop.permute.xlu0 %2841  ;;  %4050 = vadd.xlane.f32.xlu2 %v4049_v12 }
 0xbb1   :  { %6819 = vrsqrt.f32 %v4337_v52  ;;  %2874 = vst.msk [vmem:[#allocation2 + $0xf8] sm:$0xff] %vm1118_vm2, %v2842_v35  ;;  %vm4375_vm10 = vweird.f32 %v4337_v52 }
 0xbb4   :  { %v3290_v58 = vpop.permute.xlu2 %3289 }
 0xbb5   :  { %3323 = vst.msk [vmem:[#allocation2 + $0xf0] sm:$0xff] %vm1570_vm3, %v3290_v58 }
 0xbb7   :  { %v6820_v51 = vpop.eup %6819 }
 0xbb8   :  { %v4370_v2 = vmul.f32 %v6820_v51, %v4337_v52  ;;  %v3740_v53 = vpop.permute.xlu0 %3739  ;;  %4053 = vadd.xlane.f32.xlu2 %v4052_v19  ;;  %v3292_v45 = vpop.permute.xlu1 %3291  ;;  %vm4376_vm9 = vweird.f32 %v6820_v51 }
 0xbb9   :  { %3773 = vst.msk [vmem:[#allocation2 + $0xf0] sm:$0xff] %vm2022_vm4, %v3740_v53  ;;  %vm4377_vm11 = vmor %vm4375_vm10, %vm4376_vm9  ;;  %v12182_v53 = vld [vmem:[#allocation19_spill] sm:$0xff] }
 0xbba   :  { %v4371_v49 = vmul.f32 %v6820_v51, %v4370_v2  ;;  %3324 = vst.msk [vmem:[#allocation2 + $0xf8] sm:$0xff] %vm1570_vm3, %v3292_v45 }
 0xbbc   :  { %v4372_v9 = vmul.f32 0.5, %v4371_v49 }
 0xbbe   :  { %v4373_v3 = vsub.f32 1.5, %v4372_v9 }
 0xbc0   :  { %v4374_v41 = vmul.f32 %v6820_v51, %v4373_v3  ;;  %v3742_v16 = vpop.permute.xlu0 %3741  ;;  %v3805_v62 = vld [vmem:[#allocation2 + $0xf0] sm:$0xff] }
 0xbc1   :  { %3774 = vst.msk [vmem:[#allocation2 + $0xf8] sm:$0xff] %vm2022_vm4, %v3742_v16 }
 0xbc2   :  { %v4378_v17 = vsel %vm4377_vm11, %v6820_v51, %v4374_v41 }
 0xbc3   :  { %v4689_v5 = vmul.f32 %v4378_v17, %v10274_v27  ;;  %v3938_v27 = vpop.f32.mrf.mxu1 }
 0xbc4   :  { %v3939_v57 = vadd.f32 %v10147_v47, %v3938_v27  ;;  %v12183_v27 = vld [vmem:[#allocation22_spill] sm:$0xff] }
 0xbc5   :  { %v4723_v46 = vmul.f32 %v10402_v25, %v4689_v5 }
 0xbc6   :  { %v10453_v45 = vadd.f32 %v3939_v57, %v12182_v53 }
 0xbc7   :  { %v10418_v63 = vadd.f32 %v10409_v60, %v4723_v46 }
 0xbc8   :  { %v3806_v39 = vld [vmem:[#allocation2 + $0xf8] sm:$0xff]  ;;  %v4058_v5 = vsel %vm158_vm0, %v10453_v45, 0.0 }
 0xbc9   :  { %v4789_v32 = vpack.c.bf16 %v10415_v30, %v10418_v63  ;;  %v3822_v54 = vpack.c.bf16 %v3806_v39, %v3805_v62 }
 0xbcb   :  { %6210 = vmatmul.msk.bf16.gmra.mxu1 %vm158_vm0, %v3822_v54  ;;  %6219 = vmatmul.msk.bf16.vlgmr.msra.gmra.mxu3 %vm158_vm0, %v4789_v32  ;;  %v10424_v14 = vpop.f32.mrf.mxu1 }
 0xbd3   :  { %v10433_v11 = vpop.f32.mrf.mxu1 }
 0xbdb   :  { %v3945_v19 = vpop.f32.mrf.mxu1 }
 0xbdc   :  { %v3946_v10 = vadd.f32 %v10147_v47, %v3945_v19 }
 0xbe3   :  { %v4036_v44 = vpop.xlane.xlu1 %4035 }
 0xbe4   :  { %v4121_v22 = vmul.f32 %v10240_v48, %v4036_v44  ;;  %v10472_v44 = vadd.f32 %v3946_v10, %v12183_v27  ;;  %v12185_v27 = vld [vmem:[#allocation20_spill] sm:$0xff] }
 0xbe6   :  { %v10428_v18 = vsub.f32 %v10301_v7, %v4121_v22  ;;  %v10439_v7 = vadd.f32 %v3936_v1, %v12181_v50 }
 0xbe8   :  { %v4185_v36 = vmul.f32 %v10428_v18, %v10428_v18  ;;  %v4055_v28 = vsel %vm158_vm0, %v10439_v7, 0.0 }
 0xbea   :  { %v4233_v37 = vsel %vm158_vm0, %v4185_v36, 0.0  ;;  %v3948_v36 = vpop.f32.mrf.mxu1 }
 0xbeb   :  { %v4217_v26 = vpop.xlane.xlu0 %4216  ;;  %4234 = vadd.xlane.f32.xlu0 %v4233_v37  ;;  %v4045_v21 = vpop.xlane.xlu1 %4044  ;;  %v3949_v50 = vadd.f32 %v10147_v47, %v3948_v36 }
 0xbec   :  { %v4307_v55 = vmul.f32 %v4217_v26, %v10240_v48  ;;  %v4124_v15 = vmul.f32 %v10240_v48, %v4045_v21 }
 0xbed   :  { %v4220_v61 = vpop.xlane.xlu2 %4219 }
 0xbee   :  { %v4339_v42 = vadd.f32 1e-05, %v4307_v55  ;;  %v10442_v52 = vsub.f32 %v10316_v43, %v4124_v15  ;;  %v4308_v12 = vmul.f32 %v4220_v61, %v10240_v48 }
 0xbf0   :  { %6821 = vrsqrt.f32 %v4339_v42  ;;  %v4340_v8 = vadd.f32 1e-05, %v4308_v12  ;;  %v4188_v35 = vmul.f32 %v10442_v52, %v10442_v52  ;;  %vm4395_vm13 = vweird.f32 %v4339_v42 }
 0xbf2   :  { %6823 = vrsqrt.f32 %v4340_v8  ;;  %v4242_v58 = vsel %vm158_vm0, %v4188_v35, 0.0  ;;  %vm4405_vm1 = vweird.f32 %v4340_v8  ;;  %v4067_v35 = vsel %vm158_vm0, %v10472_v44, 0.0 }
 0xbf3   :  { %4056 = vadd.xlane.f32.xlu0 %v4055_v28  ;;  %4243 = vadd.xlane.f32.xlu2 %v4242_v58  ;;  %v4048_v51 = vpop.xlane.xlu1 %4047 }
 0xbf4   :  { %v4125_v43 = vmul.f32 %v10240_v48, %v4048_v51 }
 0xbf5   :  { %v4039_v20 = vpop.xlane.xlu2 %4038 }
 0xbf6   :  { %v6822_v2 = vpop.eup %6821  ;;  %v10456_v49 = vsub.f32 %v10330_v29, %v4125_v43  ;;  %v4122_v31 = vmul.f32 %v10240_v48, %v4039_v20 }
 0xbf7   :  { %v4390_v9 = vmul.f32 %v6822_v2, %v4339_v42  ;;  %vm4396_vm12 = vweird.f32 %v6822_v2 }
 0xbf8   :  { %v6824_v3 = vpop.eup %6823  ;;  %v10460_v0 = vsub.f32 %v10333_v4, %v4122_v31  ;;  %v4189_v41 = vmul.f32 %v10456_v49, %v10456_v49  ;;  %vm4397_vm15 = vmor %vm4395_vm13, %vm4396_vm12 }
 0xbf9   :  { %v4391_v16 = vmul.f32 %v6822_v2, %v4390_v9  ;;  %v4400_v17 = vmul.f32 %v6824_v3, %v4340_v8  ;;  %vm4406_vm14 = vweird.f32 %v6824_v3  ;;  %v12184_v8 = vld [vmem:[#allocation23_spill] sm:$0xff] }
 0xbfa   :  { %v4245_v29 = vsel %vm158_vm0, %v4189_v41, 0.0  ;;  %v4186_v46 = vmul.f32 %v10460_v0, %v10460_v0  ;;  %vm4407_vm2 = vmor %vm4405_vm1, %vm4406_vm14  ;;  %v10483_v51 = vadd.f32 %v3949_v50, %v12184_v8  ;;  %v6279_v8 = vld [vmem:[%s11934_s5 + $0x30] sm:$0xff] }
 0xbfb   :  { %v4392_v62 = vmul.f32 0.5, %v4391_v16  ;;  %v4401_v39 = vmul.f32 %v6824_v3, %v4400_v17  ;;  %4059 = vadd.xlane.f32.xlu0 %v4058_v5  ;;  %4246 = vadd.xlane.f32.xlu2 %v4245_v29 }
 0xbfc   :  { %v4236_v4 = vsel %vm158_vm0, %v4186_v46, 0.0  ;;  %v3941_v46 = vadd.f32 %v10147_v47, %v10424_v14 }
 0xbfd   :  { %v4393_v32 = vsub.f32 1.5, %v4392_v62  ;;  %v4402_v54 = vmul.f32 0.5, %v4401_v39  ;;  %4237 = vadd.xlane.f32.xlu1 %v4236_v4  ;;  %v4226_v59 = vpop.xlane.xlu2 %4225 }
 0xbfe   :  { %v4310_v22 = vmul.f32 %v4226_v59, %v10240_v48 }
 0xbff   :  { %v4394_v1 = vmul.f32 %v6822_v2, %v4393_v32  ;;  %v4403_v37 = vsub.f32 1.5, %v4402_v54 }
 0xc00   :  { %v4342_v26 = vadd.f32 1e-05, %v4310_v22  ;;  %v4223_v21 = vpop.xlane.xlu0 %4222  ;;  %v10508_v22 = vadd.f32 %v3941_v46, %v12185_v27 }
 0xc01   :  { %v4398_v55 = vsel %vm4397_vm15, %v6822_v2, %v4394_v1  ;;  %v4404_v15 = vmul.f32 %v6824_v3, %v4403_v37  ;;  %v4309_v61 = vmul.f32 %v4223_v21, %v10240_v48 }
 0xc02   :  { %v4691_v12 = vmul.f32 %v4398_v55, %v10307_v34  ;;  %6825 = vrsqrt.f32 %v4342_v26  ;;  %vm4425_vm4 = vweird.f32 %v4342_v26 }
 0xc03   :  { %v4408_v42 = vsel %vm4407_vm2, %v6824_v3, %v4404_v15  ;;  %v4341_v57 = vadd.f32 1e-05, %v4309_v61  ;;  %4068 = vadd.xlane.f32.xlu2 %v4067_v35  ;;  %v4061_v15 = vsel %vm158_vm0, %v10508_v22, 0.0 }
 0xc04   :  { %v4692_v28 = vmul.f32 %v4408_v42, %v10313_v24  ;;  %v4725_v58 = vmul.f32 %v10402_v25, %v4691_v12  ;;  %v4070_v24 = vsel %vm158_vm0, %v10483_v51, 0.0 }
 0xc05   :  { %6827 = vrsqrt.f32 %v4341_v57  ;;  %vm4415_vm7 = vweird.f32 %v4341_v57 }
 0xc06   :  { %v4726_v43 = vmul.f32 %v10402_v25, %v4692_v28  ;;  %v10487_v20 = vadd.f32 %v10409_v60, %v4725_v58 }
 0xc08   :  { %v6826_v19 = vpop.eup %6825  ;;  %v4042_v34 = vpop.xlane.xlu0 %4041  ;;  %v10490_v2 = vadd.f32 %v10409_v60, %v4726_v43 }
 0xc09   :  { %v4420_v53 = vmul.f32 %v6826_v19, %v4342_v26  ;;  %v4123_v31 = vmul.f32 %v10240_v48, %v4042_v34  ;;  %vm4426_vm3 = vweird.f32 %v6826_v19  ;;  %v3944_v26 = vadd.f32 %v10147_v47, %v10433_v11 }
 0xc0a   :  { %v4790_v9 = vpack.c.bf16 %v10490_v2, %v10487_v20  ;;  %vm4427_vm5 = vmor %vm4425_vm4, %vm4426_vm3 }
 0xc0b   :  { %v6828_v3 = vpop.eup %6827  ;;  %v4421_v41 = vmul.f32 %v6826_v19, %v4420_v53  ;;  %v10498_v16 = vsub.f32 %v10356_v13, %v4123_v31  ;;  %4071 = vadd.xlane.f32.xlu2 %v4070_v24 }
 0xc0c   :  { %v4410_v17 = vmul.f32 %v6828_v3, %v4341_v57  ;;  %6220 = vmatmul.msk.bf16.gmra.mxu3 %vm158_vm0, %v4790_v9  ;;  %vm4416_vm6 = vweird.f32 %v6828_v3  ;;  %v6278_v9 = vld [vmem:[%s11934_s5 + $0x28] sm:$0xff] }
 0xc0d   :  { %v4422_v10 = vmul.f32 0.5, %v4421_v41  ;;  %v4187_v5 = vmul.f32 %v10498_v16, %v10498_v16  ;;  %vm4417_vm8 = vmor %vm4415_vm7, %vm4416_vm6 }
 0xc0e   :  { %v4411_v29 = vmul.f32 %v6828_v3, %v4410_v17 }
 0xc0f   :  { %v4423_v62 = vsub.f32 1.5, %v4422_v10  ;;  %v4239_v39 = vsel %vm158_vm0, %v4187_v5, 0.0 }
 0xc10   :  { %v4412_v4 = vmul.f32 0.5, %v4411_v29  ;;  %v4232_v32 = vpop.xlane.xlu0 %4231  ;;  %4240 = vadd.xlane.f32.xlu1 %v4239_v39  ;;  %v6277_v39 = vld [vmem:[%s11934_s5 + $0x20] sm:$0xff] }
 0xc11   :  { %v4424_v13 = vmul.f32 %v6826_v19, %v4423_v62  ;;  %v4312_v54 = vmul.f32 %v4232_v32, %v10240_v48 }
 0xc12   :  { %v4413_v59 = vsub.f32 1.5, %v4412_v4 }
 0xc13   :  { %v4428_v36 = vsel %vm4427_vm5, %v6826_v19, %v4424_v13  ;;  %v4344_v1 = vadd.f32 1e-05, %v4312_v54  ;;  %v3950_v54 = vpop.f32.mrf.mxu1 }
 0xc14   :  { %v4694_v14 = vmul.f32 %v4428_v36, %v10340_v56  ;;  %v4414_v37 = vmul.f32 %v6828_v3, %v4413_v59  ;;  %v12186_v56 = vld [vmem:[#allocation21_spill] sm:$0xff] }
 0xc15   :  { %6829 = vrsqrt.f32 %v4344_v1  ;;  %v10519_v35 = vadd.f32 %v3944_v26, %v12186_v56  ;;  %vm4445_vm10 = vweird.f32 %v4344_v1  ;;  %v10565_v26 = vld [vmem:[%s11932_s6] ss:$0 sm:$0xff] }
 0xc16   :  { %v4418_v21 = vsel %vm4417_vm8, %v6828_v3, %v4414_v37  ;;  %v4728_v61 = vmul.f32 %v10402_v25, %v4694_v14 }
 0xc17   :  { %v4693_v55 = vmul.f32 %v4418_v21, %v10348_v33  ;;  %v6280_v33 = vld [vmem:[%s11934_s5 + $0x38] sm:$0xff]  ;;  %v4064_v34 = vsel %vm158_vm0, %v10519_v35, 0.0 }
 0xc18   :  { %4062 = vadd.xlane.f32.xlu1 %v4061_v15  ;;  %v10525_v47 = vadd.f32 %v10409_v60, %v4728_v61  ;;  %5074 = vmatpush.bf16.msrb.mxu0 %v6280_v33  ;;  %v6275_v61 = vld [vmem:[%s11934_s5 + $0x10] sm:$0xff]  ;;  %v6274_v33 = vld [vmem:[%s11934_s5 + $0x8] sm:$0xff] }
 0xc19   :  { %v4727_v50 = vmul.f32 %v10402_v25, %v4693_v55 }
 0xc1b   :  { %v6830_v12 = vpop.eup %6829  ;;  %v4229_v42 = vpop.xlane.xlu2 %4228  ;;  %v10522_v57 = vadd.f32 %v10409_v60, %v4727_v50 }
 0xc1c   :  { %v4440_v11 = vmul.f32 %v6830_v12, %v4344_v1  ;;  %v4311_v28 = vmul.f32 %v4229_v42, %v10240_v48  ;;  %5075 = vmatpush.bf16.msrb.mxu0 %v6279_v8  ;;  %vm4446_vm9 = vweird.f32 %v6830_v12  ;;  %v6276_v1 = vld [vmem:[%s11934_s5 + $0x18] sm:$0xff] }
 0xc1d   :  { %v4791_v58 = vpack.c.bf16 %v10525_v47, %v10522_v57  ;;  %vm4447_vm11 = vmor %vm4445_vm10, %vm4446_vm9 }
 0xc1e   :  { %v4441_v43 = vmul.f32 %v6830_v12, %v4440_v11  ;;  %v4343_v19 = vadd.f32 1e-05, %v4311_v28  ;;  %v3953_v11 = vpop.f32.mrf.mxu1 }
 0xc1f   :  { %6221 = vmatmul.msk.bf16.gmra.mxu3 %vm158_vm0, %v4791_v58  ;;  %v3954_v58 = vadd.f32 %v10565_v26, %v3953_v11 }
 0xc20   :  { %v4442_v53 = vmul.f32 0.5, %v4441_v43  ;;  %6831 = vrsqrt.f32 %v4343_v19  ;;  %4065 = vadd.xlane.f32.xlu1 %v4064_v34  ;;  %5076 = vmatpush.bf16.msrb.mxu0 %v6278_v9  ;;  %vm4435_vm13 = vweird.f32 %v4343_v19  ;;  %v6273_v43 = vld [vmem:[%s11934_s5] sm:$0xff] }
 0xc22   :  { %v4443_v31 = vsub.f32 1.5, %v4442_v53 }
 0xc23   :  { %v4051_v24 = vpop.xlane.xlu2 %4050 }
 0xc24   :  { %v4126_v3 = vmul.f32 %v10240_v48, %v4051_v24  ;;  %v4444_v10 = vmul.f32 %v6830_v12, %v4443_v31  ;;  %5077 = vmatpush.bf16.msrb.mxu0 %v6277_v39  ;;  %v10604_v24 = vld [vmem:[%s11932_s6 + $0x5] ss:$0 sm:$0xff] }
 0xc26   :  { %v6832_v41 = vpop.eup %6831  ;;  %v10544_v17 = vsub.f32 %v10384_v23, %v4126_v3  ;;  %v4448_v4 = vsel %vm4447_vm11, %v6830_v12, %v4444_v10  ;;  %v12187_v12 = vld [vmem:[#allocation24_spill] sm:$0xff] }
 0xc27   :  { %v4430_v5 = vmul.f32 %v6832_v41, %v4343_v19  ;;  %vm4436_vm12 = vweird.f32 %v6832_v41  ;;  %v4696_v27 = vmul.f32 %v4448_v4, %v10363_v38  ;;  %v3951_v38 = vadd.f32 %v10565_v26, %v3950_v54  ;;  %v12188_v19 = vld [vmem:[#allocation25_spill] sm:$0xff] }
 0xc28   :  { %v4190_v29 = vmul.f32 %v10544_v17, %v10544_v17  ;;  %vm4437_vm14 = vmor %vm4435_vm13, %vm4436_vm12  ;;  %5078 = vmatpush.bf16.msrb.mxu0 %v6276_v1  ;;  %v10597_v34 = vadd.f32 %v3954_v58, %v12188_v19 }
 0xc29   :  { %v4431_v46 = vmul.f32 %v6832_v41, %v4430_v5  ;;  %v4730_v15 = vmul.f32 %v10402_v25, %v4696_v27  ;;  %v10576_v56 = vadd.f32 %v3951_v38, %v12187_v12 }
 0xc2a   :  { %v4248_v62 = vsel %vm158_vm0, %v4190_v29, 0.0  ;;  %v4076_v53 = vsel %vm158_vm0, %v10597_v34, 0.0 }
 0xc2b   :  { %v4432_v32 = vmul.f32 0.5, %v4431_v46  ;;  %v4054_v13 = vpop.xlane.xlu2 %4053  ;;  %4249 = vadd.xlane.f32.xlu0 %v4248_v62  ;;  %v4073_v8 = vsel %vm158_vm0, %v10576_v56, 0.0  ;;  %v3955_v46 = vpop.f32.mrf.mxu1 }
 0xc2c   :  { %v4127_v23 = vmul.f32 %v10240_v48, %v4054_v13  ;;  %5079 = vmatpush.bf16.msrb.mxu0 %v6275_v61 }
 0xc2d   :  { %v4433_v59 = vsub.f32 1.5, %v4432_v32 }
 0xc2e   :  { %v10555_v36 = vsub.f32 %v10392_v6, %v4127_v23 }
 0xc2f   :  { %v4434_v14 = vmul.f32 %v6832_v41, %v4433_v59 }
 0xc30   :  { %v4191_v37 = vmul.f32 %v10555_v36, %v10555_v36  ;;  %5080 = vmatpush.bf16.msrb.mxu0 %v6274_v33 }
 0xc31   :  { %v4438_v21 = vsel %vm4437_vm14, %v6832_v41, %v4434_v14 }
 0xc32   :  { %v4695_v6 = vmul.f32 %v4438_v21, %v10370_v40  ;;  %v4251_v55 = vsel %vm158_vm0, %v4191_v37, 0.0  ;;  %v10582_v40 = vadd.f32 %v10409_v60, %v4730_v15 }
 0xc33   :  { %4252 = vadd.xlane.f32.xlu0 %v4251_v55  ;;  %v3958_v32 = vpop.f32.mrf.mxu1 }
 0xc34   :  { %v4729_v50 = vmul.f32 %v10402_v25, %v4695_v6  ;;  %5081 = vmatpush.bf16.msrb.mxu0 %v6273_v43 }
 0xc36   :  { %v10579_v42 = vadd.f32 %v10409_v60, %v4729_v50 }
 0xc38   :  { %v4792_v28 = vpack.c.bf16 %v10582_v40, %v10579_v42 }
 0xc3a   :  { %6222 = vmatmul.msk.bf16.gmra.mxu3 %vm158_vm0, %v4792_v28 }
 0xc3b   :  { %4074 = vadd.xlane.f32.xlu0 %v4073_v8  ;;  %v10620_v15 = vpop.f32.mrf.mxu1  ;;  %v3956_v8 = vadd.f32 %v10565_v26, %v3955_v46 }
 0xc43   :  { %4077 = vadd.xlane.f32.xlu0 %v4076_v53 }
 0xc4e   :  { %v4880_v31 = vpop.f32.mrf.mxu3 }
 0xc4f   :  { %v4881_v9 = vadd.f32 %v10604_v24, %v4880_v31 }
 0xc51   :  { %v4960_v10 = vmax.f32 %v4881_v9, 0.0  ;;  %v12189_v9 = vld [vmem:[#allocation26_spill] sm:$0xff] }
 0xc56   :  { %v4882_v3 = vpop.f32.mrf.mxu3 }
 0xc57   :  { %v4883_v41 = vadd.f32 %v10604_v24, %v4882_v3  ;;  %v10637_v3 = vadd.f32 %v3956_v8, %v12189_v9 }
 0xc59   :  { %v4961_v5 = vmax.f32 %v4883_v41, 0.0 }
 0xc5b   :  { %v4992_v29 = vpack.c.bf16 %v4961_v5, %v4960_v10 }
 0xc5d   :  { %5082 = vmatmul.bf16.vlgmr.msrb.gmra.mxu0 %v4992_v29 }
 0xc5e   :  { %v4235_v62 = vpop.xlane.xlu0 %4234 }
 0xc5f   :  { %v4313_v39 = vmul.f32 %v4235_v62, %v10240_v48 }
 0xc61   :  { %v4345_v4 = vadd.f32 1e-05, %v4313_v39  ;;  %v3959_v39 = vadd.f32 %v10565_v26, %v3958_v32 }
 0xc63   :  { %6833 = vrsqrt.f32 %v4345_v4  ;;  %vm4455_vm1 = vweird.f32 %v4345_v4 }
 0xc66   :  { %v4057_v13 = vpop.xlane.xlu0 %4056  ;;  %v4244_v23 = vpop.xlane.xlu2 %4243 }
 0xc67   :  { %v4128_v54 = vmul.f32 %v10240_v48, %v4057_v13  ;;  %v4316_v37 = vmul.f32 %v4244_v23, %v10240_v48  ;;  %v4079_v13 = vsel %vm158_vm0, %v10637_v3, 0.0 }
 0xc69   :  { %v6834_v59 = vpop.eup %6833  ;;  %v10611_v27 = vsub.f32 %v10439_v7, %v4128_v54  ;;  %v10622_v50 = vadd.f32 1e-05, %v4316_v37 }
 0xc6a   :  { %v4450_v14 = vmul.f32 %v6834_v59, %v4345_v4  ;;  %vm4456_vm15 = vweird.f32 %v6834_v59 }
 0xc6b   :  { %v4192_v1 = vmul.f32 %v10611_v27, %v10611_v27  ;;  %6835 = vrsqrt.f32 %v10622_v50  ;;  %vm4457_vm2 = vmor %vm4455_vm1, %vm4456_vm15  ;;  %vm4485_vm7 = vweird.f32 %v10622_v50 }
 0xc6c   :  { %v4451_v61 = vmul.f32 %v6834_v59, %v4450_v14 }
 0xc6d   :  { %v4254_v21 = vsel %vm158_vm0, %v4192_v1, 0.0 }
 0xc6e   :  { %4255 = vadd.xlane.f32.xlu1 %v4254_v21  ;;  %v4060_v38 = vpop.xlane.xlu0 %4059  ;;  %v10617_v6 = vpop.xlane.xlu2 %4246  ;;  %v4452_v58 = vmul.f32 0.5, %v4451_v61 }
 0xc6f   :  { %v4129_v55 = vmul.f32 %v10240_v48, %v4060_v38  ;;  %v12190_v38 = vld [vmem:[#allocation27_spill] sm:$0xff] }
 0xc70   :  { %v4238_v7 = vpop.xlane.xlu1 %4237  ;;  %v4453_v31 = vsub.f32 1.5, %v4452_v58  ;;  %v10654_v32 = vadd.f32 %v3959_v39, %v12190_v38 }
 0xc71   :  { %v10625_v12 = vsub.f32 %v10453_v45, %v4129_v55  ;;  %v4314_v33 = vmul.f32 %v4238_v7, %v10240_v48  ;;  %v10634_v45 = vpop.f32.mrf.mxu1  ;;  %v10642_v10 = vpop.eup %6835 }
 0xc72   :  { %v4454_v46 = vmul.f32 %v6834_v59, %v4453_v31  ;;  %vm4486_vm6 = vweird.f32 %v10642_v10 }
 0xc73   :  { %v4346_v11 = vadd.f32 1e-05, %v4314_v33  ;;  %v4193_v28 = vmul.f32 %v10625_v12, %v10625_v12  ;;  %vm4487_vm8 = vmor %vm4485_vm7, %vm4486_vm6 }
 0xc74   :  { %v4458_v37 = vsel %vm4457_vm2, %v6834_v59, %v4454_v46  ;;  %v12191_v46 = vld [vmem:[#allocation30_spill] sm:$0xff] }
 0xc75   :  { %6837 = vrsqrt.f32 %v4346_v11  ;;  %v4257_v43 = vsel %vm158_vm0, %v4193_v28, 0.0  ;;  %v4697_v33 = vmul.f32 %v4458_v37, %v10428_v18  ;;  %vm4465_vm4 = vweird.f32 %v4346_v11 }
 0xc76   :  { %4258 = vadd.xlane.f32.xlu1 %v4257_v43  ;;  %v4069_v19 = vpop.xlane.xlu2 %4068 }
 0xc77   :  { %v4132_v53 = vmul.f32 %v10240_v48, %v4069_v19 }
 0xc79   :  { %v10640_v41 = vsub.f32 %v10472_v44, %v4132_v53  ;;  %v4480_v44 = vmul.f32 %v10642_v10, %v10622_v50  ;;  %v3965_v61 = vpop.f32.mrf.mxu1 }
 0xc7a   :  { %v3966_v43 = vadd.f32 %v10565_v26, %v3965_v61 }
 0xc7b   :  { %v6838_v5 = vpop.eup %6837  ;;  %v4196_v29 = vmul.f32 %v10640_v41, %v10640_v41  ;;  %v4481_v4 = vmul.f32 %v10642_v10, %v4480_v44 }
 0xc7c   :  { %v4460_v62 = vmul.f32 %v6838_v5, %v4346_v11  ;;  %vm4466_vm3 = vweird.f32 %v6838_v5  ;;  %v4317_v11 = vmul.f32 %v10617_v6, %v10240_v48 }
 0xc7d   :  { %v4266_v23 = vsel %vm158_vm0, %v4196_v29, 0.0  ;;  %vm4467_vm5 = vmor %vm4465_vm4, %vm4466_vm3  ;;  %v4482_v53 = vmul.f32 0.5, %v4481_v4  ;;  %v4731_v29 = vmul.f32 %v10402_v25, %v4697_v33 }
 0xc7e   :  { %v4461_v54 = vmul.f32 %v6838_v5, %v4460_v62  ;;  %4080 = vadd.xlane.f32.xlu1 %v4079_v13  ;;  %4267 = vadd.xlane.f32.xlu0 %v4266_v23  ;;  %v4072_v1 = vpop.xlane.xlu2 %4071  ;;  %v10673_v62 = vadd.f32 %v3966_v43, %v12191_v46 }
 0xc7f   :  { %v4133_v14 = vmul.f32 %v10240_v48, %v4072_v1  ;;  %v4483_v23 = vsub.f32 1.5, %v4482_v53 }
 0xc80   :  { %v4462_v21 = vmul.f32 0.5, %v4461_v54 }
 0xc81   :  { %v10657_v55 = vsub.f32 %v10483_v51, %v4133_v14  ;;  %v4082_v51 = vsel %vm158_vm0, %v10654_v32, 0.0  ;;  %v3968_v13 = vpop.f32.mrf.mxu1  ;;  %v4091_v14 = vsel %vm158_vm0, %v10673_v62, 0.0  ;;  %v4484_v38 = vmul.f32 %v10642_v10, %v4483_v23 }
 0xc82   :  { %v4463_v7 = vsub.f32 1.5, %v4462_v21  ;;  %v3969_v6 = vadd.f32 %v10565_v26, %v3968_v13  ;;  %v3961_v13 = vadd.f32 %v10565_v26, %v10620_v15 }
 0xc83   :  { %v4241_v28 = vpop.xlane.xlu1 %4240  ;;  %v4197_v58 = vmul.f32 %v10657_v55, %v10657_v55 }
 0xc84   :  { %v4464_v8 = vmul.f32 %v6838_v5, %v4463_v7  ;;  %v4315_v59 = vmul.f32 %v4241_v28, %v10240_v48  ;;  %v12192_v28 = vld [vmem:[#allocation31_spill] sm:$0xff] }
 0xc85   :  { %v4269_v19 = vsel %vm158_vm0, %v4197_v58, 0.0  ;;  %v10701_v58 = vadd.f32 %v3969_v6, %v12192_v28 }
 0xc86   :  { %v4468_v31 = vsel %vm4467_vm5, %v6838_v5, %v4464_v8  ;;  %v4347_v9 = vadd.f32 1e-05, %v4315_v59  ;;  %4083 = vadd.xlane.f32.xlu1 %v4082_v51  ;;  %4270 = vadd.xlane.f32.xlu0 %v4269_v19  ;;  %v10677_v5 = vadd.f32 %v10409_v60, %v4731_v29 }
 0xc87   :  { %v4698_v18 = vmul.f32 %v4468_v31, %v10460_v0  ;;  %v10682_v0 = vadd.f32 1e-05, %v4317_v11  ;;  %v4094_v31 = vsel %vm158_vm0, %v10701_v58, 0.0 }
 0xc88   :  { %6839 = vrsqrt.f32 %v4347_v9  ;;  %vm4475_vm10 = vweird.f32 %v4347_v9 }
 0xc89   :  { %v4732_v39 = vmul.f32 %v10402_v25, %v4698_v18  ;;  %6841 = vrsqrt.f32 %v10682_v0  ;;  %vm4495_vm13 = vweird.f32 %v10682_v0 }
 0xc8b   :  { %v4063_v44 = vpop.xlane.xlu1 %4062  ;;  %v10680_v54 = vadd.f32 %v10409_v60, %v4732_v39 }
 0xc8c   :  { %v4130_v1 = vmul.f32 %v10240_v48, %v4063_v44 }
 0xc8d   :  { %v4793_v37 = vpack.c.bf16 %v10680_v54, %v10677_v5 }
 0xc8e   :  { %v6840_v21 = vpop.eup %6839  ;;  %v10693_v61 = vsub.f32 %v10508_v22, %v4130_v1  ;;  %4092 = vadd.xlane.f32.xlu0 %v4091_v14  ;;  %v4488_v22 = vsel %vm4487_vm8, %v10642_v10, %v4484_v38 }
 0xc8f   :  { %v4470_v4 = vmul.f32 %v6840_v21, %v4347_v9  ;;  %v4885_v7 = vpop.f32.mrf.mxu3  ;;  %6223 = vmatmul.msk.bf16.gmra.mxu3 %vm158_vm0, %v4793_v37  ;;  %v4700_v50 = vmul.f32 %v4488_v22, %v10442_v52  ;;  %vm4476_vm9 = vweird.f32 %v6840_v21  ;;  %v6842_v18 = vpop.eup %6841 }
 0xc90   :  { %v4194_v33 = vmul.f32 %v10693_v61, %v10693_v61  ;;  %v4886_v29 = vadd.f32 %v10604_v24, %v4885_v7  ;;  %vm4477_vm11 = vmor %vm4475_vm10, %vm4476_vm9  ;;  %v4490_v23 = vmul.f32 %v6842_v18, %v10682_v0  ;;  %vm4496_vm12 = vweird.f32 %v6842_v18 }
 0xc91   :  { %v4471_v8 = vmul.f32 %v6840_v21, %v4470_v4  ;;  %v4734_v1 = vmul.f32 %v10402_v25, %v4700_v50  ;;  %v12193_v4 = vld [vmem:[#allocation28_spill] sm:$0xff]  ;;  %v12194_v50 = vld [vmem:[#allocation29_spill] sm:$0xff]  ;;  %vm4497_vm14 = vmor %vm4495_vm13, %vm4496_vm12 }
 0xc92   :  { %v4260_v59 = vsel %vm158_vm0, %v4194_v33, 0.0  ;;  %v4962_v6 = vmax.f32 %v4886_v29, 0.0  ;;  %v10724_v7 = vadd.f32 %v3961_v13, %v12193_v4  ;;  %v4491_v33 = vmul.f32 %v6842_v18, %v4490_v23 }
 0xc93   :  { %v4472_v43 = vmul.f32 0.5, %v4471_v8  ;;  %4261 = vadd.xlane.f32.xlu2 %v4260_v59  ;;  %v4066_v51 = vpop.xlane.xlu1 %4065  ;;  %v10730_v28 = vadd.f32 %v10409_v60, %v4734_v1  ;;  %v3964_v59 = vadd.f32 %v10565_v26, %v10634_v45 }
 0xc94   :  { %v4131_v19 = vmul.f32 %v10240_v48, %v4066_v51 }
 0xc95   :  { %v4473_v53 = vsub.f32 1.5, %v4472_v43  ;;  %v4492_v43 = vmul.f32 0.5, %v4491_v33 }
 0xc96   :  { %v10711_v11 = vsub.f32 %v10519_v35, %v4131_v19  ;;  %4095 = vadd.xlane.f32.xlu0 %v4094_v31  ;;  %v4085_v19 = vsel %vm158_vm0, %v10724_v7, 0.0 }
 0xc97   :  { %v4474_v10 = vmul.f32 %v6840_v21, %v4473_v53  ;;  %v4887_v46 = vpop.f32.mrf.mxu3  ;;  %v10741_v53 = vadd.f32 %v3964_v59, %v12194_v50  ;;  %v4493_v31 = vsub.f32 1.5, %v4492_v43 }
 0xc98   :  { %v4888_v39 = vadd.f32 %v10604_v24, %v4887_v46  ;;  %v4195_v52 = vmul.f32 %v10711_v11, %v10711_v11 }
 0xc99   :  { %v4478_v44 = vsel %vm4477_vm11, %v6840_v21, %v4474_v10  ;;  %v4088_v13 = vsel %vm158_vm0, %v10741_v53, 0.0 }
 0xc9a   :  { %v4699_v35 = vmul.f32 %v4478_v44, %v10498_v16  ;;  %v4963_v14 = vmax.f32 %v4888_v39, 0.0  ;;  %v4263_v9 = vsel %vm158_vm0, %v4195_v52, 0.0  ;;  %v4494_v39 = vmul.f32 %v6842_v18, %v4493_v31 }
 0xc9b   :  { %4264 = vadd.xlane.f32.xlu2 %v4263_v9 }
 0xc9c   :  { %v4993_v37 = vpack.c.bf16 %v4963_v14, %v4962_v6  ;;  %v4733_v38 = vmul.f32 %v10402_v25, %v4699_v35  ;;  %v4498_v6 = vsel %vm4497_vm14, %v6842_v18, %v4494_v39 }
 0xc9d   :  { %v4701_v33 = vmul.f32 %v4498_v6, %v10456_v49 }
 0xc9e   :  { %5087 = vmatmul.bf16.gmra.mxu0 %v4993_v37  ;;  %v4250_v15 = vpop.xlane.xlu0 %4249  ;;  %v10727_v21 = vadd.f32 %v10409_v60, %v4733_v38 }
 0xc9f   :  { %v4318_v16 = vmul.f32 %v4250_v15, %v10240_v48  ;;  %v4735_v43 = vmul.f32 %v10402_v25, %v4701_v33 }
 0xca0   :  { %v4794_v8 = vpack.c.bf16 %v10730_v28, %v10727_v21 }
 0xca1   :  { %v4350_v22 = vadd.f32 1e-05, %v4318_v16 }
 0xca2   :  { %v4890_v51 = vpop.f32.mrf.mxu3  ;;  %6224 = vmatmul.msk.bf16.gmra.mxu3 %vm158_vm0, %v4794_v8 }
 0xca3   :  { %6843 = vrsqrt.f32 %v4350_v22  ;;  %4086 = vadd.xlane.f32.xlu2 %v4085_v19  ;;  %v4891_v46 = vadd.f32 %v10604_v24, %v4890_v51  ;;  %vm4505_vm1 = vweird.f32 %v4350_v22 }
 0xca5   :  { %v4964_v1 = vmax.f32 %v4891_v46, 0.0 }
 0xca6   :  { %v4253_v29 = vpop.xlane.xlu0 %4252 }
 0xca7   :  { %v4319_v33 = vmul.f32 %v4253_v29, %v10240_v48 }
 0xca9   :  { %v6844_v10 = vpop.eup %6843 }
 0xcaa   :  { %v4500_v45 = vmul.f32 %v6844_v10, %v4350_v22  ;;  %v4892_v52 = vpop.f32.mrf.mxu3  ;;  %vm4506_vm15 = vweird.f32 %v6844_v10  ;;  %v10764_v22 = vadd.f32 %v10409_v60, %v4735_v43 }
 0xcab   :  { %v4893_v23 = vadd.f32 %v10604_v24, %v4892_v52  ;;  %4089 = vadd.xlane.f32.xlu2 %v4088_v13  ;;  %vm4507_vm2 = vmor %vm4505_vm1, %vm4506_vm15 }
 0xcac   :  { %v4501_v44 = vmul.f32 %v6844_v10, %v4500_v45  ;;  %v12195_v45 = vld [vmem:[#allocation32_spill] sm:$0xff] }
 0xcad   :  { %v4965_v35 = vmax.f32 %v4893_v23, 0.0 }
 0xcae   :  { %v4502_v14 = vmul.f32 0.5, %v4501_v44  ;;  %v4075_v9 = vpop.xlane.xlu0 %4074 }
 0xcaf   :  { %v4134_v37 = vmul.f32 %v10240_v48, %v4075_v9  ;;  %v4994_v38 = vpack.c.bf16 %v4965_v35, %v4964_v1 }
 0xcb0   :  { %v4503_v4 = vsub.f32 1.5, %v4502_v14 }
 0xcb1   :  { %v10751_v15 = vsub.f32 %v10576_v56, %v4134_v37  ;;  %5092 = vmatmul.bf16.gmra.mxu0 %v4994_v38  ;;  %v12196_v37 = vld [vmem:[#allocation35_spill] sm:$0xff] }
 0xcb2   :  { %v4504_v16 = vmul.f32 %v6844_v10, %v4503_v4 }
 0xcb3   :  { %v4198_v0 = vmul.f32 %v10751_v15, %v10751_v15 }
 0xcb4   :  { %v4508_v18 = vsel %vm4507_vm2, %v6844_v10, %v4504_v16 }
 0xcb5   :  { %v4702_v8 = vmul.f32 %v4508_v18, %v10544_v17  ;;  %v4272_v59 = vsel %vm158_vm0, %v4198_v0, 0.0  ;;  %v3970_v17 = vpop.f32.mrf.mxu1  ;;  %v4351_v0 = vadd.f32 1e-05, %v4319_v33 }
 0xcb6   :  { %4273 = vadd.xlane.f32.xlu1 %v4272_v59  ;;  %v4078_v51 = vpop.xlane.xlu0 %4077  ;;  %v3971_v46 = vadd.f32 %v10565_v26, %v3970_v17 }
 0xcb7   :  { %v4135_v49 = vmul.f32 %v10240_v48, %v4078_v51  ;;  %v4736_v56 = vmul.f32 %v10402_v25, %v4702_v8  ;;  %6845 = vrsqrt.f32 %v4351_v0  ;;  %vm4515_vm4 = vweird.f32 %v4351_v0 }
 0xcb8   :  { %v10777_v52 = vadd.f32 %v3971_v46, %v12195_v45 }
 0xcb9   :  { %v10761_v19 = vsub.f32 %v10597_v34, %v4135_v49  ;;  %v10767_v50 = vadd.f32 %v10409_v60, %v4736_v56 }
 0xcba   :  { %v4097_v35 = vsel %vm158_vm0, %v10777_v52, 0.0 }
 0xcbb   :  { %v4795_v31 = vpack.c.bf16 %v10767_v50, %v10764_v22  ;;  %v4199_v10 = vmul.f32 %v10761_v19, %v10761_v19 }
 0xcbd   :  { %v4895_v39 = vpop.f32.mrf.mxu3  ;;  %6225 = vmatmul.msk.bf16.gmra.mxu3 %vm158_vm0, %v4795_v31  ;;  %v4275_v34 = vsel %vm158_vm0, %v4199_v10, 0.0  ;;  %v3973_v13 = vpop.f32.mrf.mxu1 }
 0xcbe   :  { %4276 = vadd.xlane.f32.xlu1 %v4275_v34  ;;  %v4896_v23 = vadd.f32 %v10604_v24, %v4895_v39  ;;  %v3974_v44 = vadd.f32 %v10565_v26, %v3973_v13  ;;  %v6846_v18 = vpop.eup %6845 }
 0xcbf   :  { %v4510_v8 = vmul.f32 %v6846_v18, %v4351_v0  ;;  %vm4516_vm3 = vweird.f32 %v6846_v18 }
 0xcc0   :  { %v4966_v14 = vmax.f32 %v4896_v23, 0.0  ;;  %v10785_v38 = vadd.f32 %v3974_v44, %v12196_v37  ;;  %vm4517_vm5 = vmor %vm4515_vm4, %vm4516_vm3 }
 0xcc1   :  { %v4511_v59 = vmul.f32 %v6846_v18, %v4510_v8 }
 0xcc2   :  { %v4100_v16 = vsel %vm158_vm0, %v10785_v38, 0.0 }
 0xcc3   :  { %v4512_v56 = vmul.f32 0.5, %v4511_v59 }
 0xcc5   :  { %v4897_v1 = vpop.f32.mrf.mxu3  ;;  %v4513_v17 = vsub.f32 1.5, %v4512_v56 }
 0xcc6   :  { %v4898_v6 = vadd.f32 %v10604_v24, %v4897_v1  ;;  %4098 = vadd.xlane.f32.xlu1 %v4097_v35 }
 0xcc7   :  { %v4514_v29 = vmul.f32 %v6846_v18, %v4513_v17 }
 0xcc8   :  { %v4967_v9 = vmax.f32 %v4898_v6, 0.0 }
 0xcc9   :  { %v4518_v45 = vsel %vm4517_vm5, %v6846_v18, %v4514_v29 }
 0xcca   :  { %v4995_v4 = vpack.c.bf16 %v4967_v9, %v4966_v14  ;;  %v4703_v6 = vmul.f32 %v4518_v45, %v10555_v36 }
 0xccc   :  { %5097 = vmatmul.bf16.gmra.mxu0 %v4995_v4  ;;  %v4737_v36 = vmul.f32 %v10402_v25, %v4703_v6 }
 0xcce   :  { %4101 = vadd.xlane.f32.xlu1 %v4100_v16 }
 0xce1   :  { %v4256_v43 = vpop.xlane.xlu1 %4255 }
 0xce2   :  { %v4320_v51 = vmul.f32 %v4256_v43, %v10240_v48 }
 0xce4   :  { %v4352_v49 = vadd.f32 1e-05, %v4320_v51  ;;  %v10811_v51 = vadd.f32 %v10409_v60, %v4737_v36 }
 0xce6   :  { %6847 = vrsqrt.f32 %v4352_v49  ;;  %vm4525_vm7 = vweird.f32 %v4352_v49 }
 0xce9   :  { %v4259_v31 = vpop.xlane.xlu1 %4258 }
 0xcea   :  { %v4321_v34 = vmul.f32 %v4259_v31, %v10240_v48 }
 0xcec   :  { %v6848_v10 = vpop.eup %6847  ;;  %v10794_v14 = vadd.f32 1e-05, %v4321_v34 }
 0xced   :  { %v4520_v46 = vmul.f32 %v6848_v10, %v4352_v49  ;;  %vm4526_vm6 = vweird.f32 %v6848_v10  ;;  %v3975_v49 = vpop.f32.mrf.mxu1 }
 0xcee   :  { %vm4527_vm8 = vmor %vm4525_vm7, %vm4526_vm6  ;;  %6849 = vrsqrt.f32 %v10794_v14  ;;  %vm4535_vm10 = vweird.f32 %v10794_v14 }
 0xcef   :  { %v4521_v39 = vmul.f32 %v6848_v10, %v4520_v46 }
 0xcf1   :  { %v4522_v13 = vmul.f32 0.5, %v4521_v39  ;;  %v4268_v23 = vpop.xlane.xlu0 %4267  ;;  %v4081_v44 = vpop.xlane.xlu1 %4080  ;;  %v12197_v39 = vld [vmem:[#allocation36_spill] sm:$0xff] }
 0xcf2   :  { %v4136_v1 = vmul.f32 %v10240_v48, %v4081_v44  ;;  %v4324_v29 = vmul.f32 %v4268_v23, %v10240_v48 }
 0xcf3   :  { %v4523_v35 = vsub.f32 1.5, %v4522_v13 }
 0xcf4   :  { %v10797_v9 = vsub.f32 %v10637_v3, %v4136_v1  ;;  %v6850_v56 = vpop.eup %6849 }
 0xcf5   :  { %v4524_v37 = vmul.f32 %v6848_v10, %v4523_v35  ;;  %vm4536_vm9 = vweird.f32 %v6850_v56 }
 0xcf6   :  { %v4200_v4 = vmul.f32 %v10797_v9, %v10797_v9  ;;  %vm4537_vm11 = vmor %vm4535_vm10, %vm4536_vm9 }
 0xcf7   :  { %v4528_v33 = vsel %vm4527_vm8, %v6848_v10, %v4524_v37  ;;  %v3976_v10 = vadd.f32 %v10565_v26, %v3975_v49  ;;  %v10832_v26 = vadd.f32 1e-05, %v4324_v29 }
 0xcf8   :  { %v4704_v16 = vmul.f32 %v4528_v33, %v10611_v27  ;;  %v4278_v0 = vsel %vm158_vm0, %v4200_v4, 0.0 }
 0xcf9   :  { %v4271_v18 = vpop.xlane.xlu0 %4270  ;;  %4279 = vadd.xlane.f32.xlu2 %v4278_v0  ;;  %v4084_v8 = vpop.xlane.xlu1 %4083  ;;  %v10827_v34 = vadd.f32 %v3976_v10, %v12197_v39  ;;  %6851 = vrsqrt.f32 %v10832_v26  ;;  %vm4565_vm4 = vweird.f32 %v10832_v26 }
 0xcfa   :  { %v4137_v3 = vmul.f32 %v10240_v48, %v4084_v8  ;;  %v4738_v59 = vmul.f32 %v10402_v25, %v4704_v16  ;;  %v4325_v29 = vmul.f32 %v4271_v18, %v10240_v48 }
 0xcfb   :  { %v4103_v6 = vsel %vm158_vm0, %v10827_v34, 0.0 }
 0xcfc   :  { %v10808_v43 = vsub.f32 %v10654_v32, %v4137_v3  ;;  %v10814_v27 = vadd.f32 %v10409_v60, %v4738_v59  ;;  %v4530_v32 = vmul.f32 %v6850_v56, %v10794_v14 }
 0xcfe   :  { %v4796_v17 = vpack.c.bf16 %v10814_v27, %v10811_v51  ;;  %v4201_v31 = vmul.f32 %v10808_v43, %v10808_v43  ;;  %v4531_v13 = vmul.f32 %v6850_v56, %v4530_v32 }
 0xcff   :  { %v10847_v3 = vpop.eup %6851 }
 0xd00   :  { %6226 = vmatmul.msk.bf16.gmra.mxu3 %vm158_vm0, %v4796_v17  ;;  %v4281_v25 = vsel %vm158_vm0, %v4201_v31, 0.0  ;;  %v4532_v37 = vmul.f32 0.5, %v4531_v13  ;;  %vm4566_vm1 = vweird.f32 %v10847_v3 }
 0xd01   :  { %v4093_v60 = vpop.xlane.xlu0 %4092  ;;  %4282 = vadd.xlane.f32.xlu2 %v4281_v25  ;;  %vm4567_vm5 = vmor %vm4565_vm4, %vm4566_vm1 }
 0xd02   :  { %v4140_v46 = vmul.f32 %v10240_v48, %v4093_v60  ;;  %v4533_v0 = vsub.f32 1.5, %v4532_v37 }
 0xd04   :  { %v10830_v45 = vsub.f32 %v10673_v62, %v4140_v46  ;;  %v4534_v31 = vmul.f32 %v6850_v56, %v4533_v0  ;;  %v10855_v46 = vpop.f32.mrf.mxu0 }
 0xd06   :  { %v4262_v44 = vpop.xlane.xlu2 %4261  ;;  %v4204_v1 = vmul.f32 %v10830_v45, %v10830_v45  ;;  %v4538_v39 = vsel %vm4537_vm11, %v6850_v56, %v4534_v31 }
 0xd07   :  { %v4322_v35 = vmul.f32 %v4262_v44, %v10240_v48 }
 0xd08   :  { %v4290_v23 = vsel %vm158_vm0, %v4204_v1, 0.0 }
 0xd09   :  { %v4354_v4 = vadd.f32 1e-05, %v4322_v35  ;;  %4291 = vadd.xlane.f32.xlu1 %v4290_v23  ;;  %v4096_v62 = vpop.xlane.xlu0 %4095  ;;  %4104 = vadd.xlane.f32.xlu2 %v4103_v6  ;;  %v4705_v23 = vmul.f32 %v4538_v39, %v10625_v12  ;;  %v10860_v6 = vadd.f32 1e-05, %v4325_v29 }
 0xd0a   :  { %v4141_v33 = vmul.f32 %v10240_v48, %v4096_v62 }
 0xd0b   :  { %6853 = vrsqrt.f32 %v4354_v4  ;;  %vm4545_vm13 = vweird.f32 %v4354_v4  ;;  %vm4575_vm7 = vweird.f32 %v10860_v6 }
 0xd0c   :  { %v10843_v16 = vsub.f32 %v10701_v58, %v4141_v33  ;;  %v4560_v58 = vmul.f32 %v10847_v3, %v10832_v26 }
 0xd0e   :  { %v4265_v36 = vpop.xlane.xlu2 %4264  ;;  %v4205_v8 = vmul.f32 %v10843_v16, %v10843_v16  ;;  %v4561_v13 = vmul.f32 %v10847_v3, %v4560_v58 }
 0xd0f   :  { %v4323_v59 = vmul.f32 %v4265_v36, %v10240_v48 }
 0xd10   :  { %v4293_v49 = vsel %vm158_vm0, %v4205_v8, 0.0  ;;  %v4562_v33 = vmul.f32 0.5, %v4561_v13  ;;  %v10878_v13 = vpop.f32.mrf.mxu0 }
 0xd11   :  { %v6854_v17 = vpop.eup %6853  ;;  %v4355_v10 = vadd.f32 1e-05, %v4323_v59  ;;  %4294 = vadd.xlane.f32.xlu2 %v4293_v49 }
 0xd12   :  { %v4540_v25 = vmul.f32 %v6854_v17, %v4354_v4  ;;  %v4900_v32 = vpop.f32.mrf.mxu3  ;;  %vm4546_vm12 = vweird.f32 %v6854_v17  ;;  %v4563_v29 = vsub.f32 1.5, %v4562_v33 }
 0xd13   :  { %6855 = vrsqrt.f32 %v4355_v10  ;;  %v4901_v62 = vadd.f32 %v10604_v24, %v4900_v32  ;;  %vm4547_vm14 = vmor %vm4545_vm13, %vm4546_vm12  ;;  %vm4555_vm2 = vweird.f32 %v4355_v10 }
 0xd14   :  { %v4541_v60 = vmul.f32 %v6854_v17, %v4540_v25  ;;  %6857 = vrsqrt.f32 %v10860_v6 }
 0xd15   :  { %v4968_v58 = vmax.f32 %v4901_v62, 0.0 }
 0xd16   :  { %v4542_v44 = vmul.f32 0.5, %v4541_v60  ;;  %v4087_v1 = vpop.xlane.xlu2 %4086 }
 0xd17   :  { %v4138_v35 = vmul.f32 %v10240_v48, %v4087_v1 }
 0xd18   :  { %v4543_v37 = vsub.f32 1.5, %v4542_v44 }
 0xd19   :  { %v6856_v14 = vpop.eup %6855  ;;  %v10864_v18 = vsub.f32 %v10724_v7, %v4138_v35  ;;  %v10873_v7 = vld [vmem:[%s11932_s6 + $0x1] ss:$0 sm:$0xff] }
 0xd1a   :  { %v4544_v56 = vmul.f32 %v6854_v17, %v4543_v37  ;;  %v4550_v0 = vmul.f32 %v6856_v14, %v4355_v10  ;;  %v4902_v36 = vpop.f32.mrf.mxu3  ;;  %v4739_v31 = vmul.f32 %v10873_v7, %v4705_v23  ;;  %vm4556_vm15 = vweird.f32 %v6856_v14  ;;  %v6858_v33 = vpop.eup %6857 }
 0xd1b   :  { %v4903_v8 = vadd.f32 %v10604_v24, %v4902_v36  ;;  %v4202_v12 = vmul.f32 %v10864_v18, %v10864_v18  ;;  %vm4557_vm3 = vmor %vm4555_vm2, %vm4556_vm15  ;;  %vm4576_vm6 = vweird.f32 %v6858_v33 }
 0xd1c   :  { %v4548_v59 = vsel %vm4547_vm14, %v6854_v17, %v4544_v56  ;;  %v4551_v49 = vmul.f32 %v6856_v14, %v4550_v0  ;;  %v4564_v56 = vmul.f32 %v10847_v3, %v4563_v29  ;;  %vm4577_vm8 = vmor %vm4575_vm7, %vm4576_vm6 }
 0xd1d   :  { %v4706_v4 = vmul.f32 %v4548_v59, %v10693_v61  ;;  %v4969_v25 = vmax.f32 %v4903_v8, 0.0  ;;  %v4284_v32 = vsel %vm158_vm0, %v4202_v12, 0.0  ;;  %v10888_v61 = vld [vmem:[%s11932_s6 + $0x2] ss:$0 sm:$0xff]  ;;  %v4570_v12 = vmul.f32 %v6858_v33, %v10860_v6 }
 0xd1e   :  { %v4552_v60 = vmul.f32 0.5, %v4551_v49  ;;  %4285 = vadd.xlane.f32.xlu0 %v4284_v32  ;;  %v4090_v39 = vpop.xlane.xlu2 %4089  ;;  %v10891_v37 = vadd.f32 %v10888_v61, %v4739_v31  ;;  %v4568_v10 = vsel %vm4567_vm5, %v10847_v3, %v4564_v56 }
 0xd1f   :  { %v4996_v17 = vpack.c.bf16 %v4969_v25, %v4968_v58  ;;  %v4139_v44 = vmul.f32 %v10240_v48, %v4090_v39  ;;  %v4740_v1 = vmul.f32 %v10873_v7, %v4706_v4  ;;  %v10908_v4 = vpop.f32.mrf.mxu0  ;;  %v4708_v58 = vmul.f32 %v4568_v10, %v10640_v41 }
 0xd20   :  { %v4553_v35 = vsub.f32 1.5, %v4552_v60  ;;  %v4571_v25 = vmul.f32 %v6858_v33, %v4570_v12 }
 0xd21   :  { %v10883_v23 = vsub.f32 %v10741_v53, %v4139_v44  ;;  %5102 = vmatmul.bf16.gmra.mxu0 %v4996_v17  ;;  %v10894_v62 = vadd.f32 %v10888_v61, %v4740_v1  ;;  %v4742_v3 = vmul.f32 %v10873_v7, %v4708_v58 }
 0xd22   :  { %v4554_v0 = vmul.f32 %v6856_v14, %v4553_v35  ;;  %v4572_v39 = vmul.f32 0.5, %v4571_v25 }
 0xd23   :  { %v4797_v53 = vpack.c.bf16 %v10894_v62, %v10891_v37  ;;  %v4203_v36 = vmul.f32 %v10883_v23, %v10883_v23 }
 0xd24   :  { %v4558_v8 = vsel %vm4557_vm3, %v6856_v14, %v4554_v0  ;;  %v4573_v35 = vsub.f32 1.5, %v4572_v39 }
 0xd25   :  { %v4905_v59 = vpop.f32.mrf.mxu3  ;;  %6227 = vmatmul.msk.bf16.gmra.mxu3 %vm158_vm0, %v4797_v53  ;;  %v4287_v49 = vsel %vm158_vm0, %v4203_v36, 0.0  ;;  %v4707_v31 = vmul.f32 %v4558_v8, %v10711_v11  ;;  %v10922_v53 = vadd.f32 %v10888_v61, %v4742_v3 }
 0xd26   :  { %4288 = vadd.xlane.f32.xlu0 %v4287_v49  ;;  %v4906_v29 = vadd.f32 %v10604_v24, %v4905_v59  ;;  %v4574_v59 = vmul.f32 %v6858_v33, %v4573_v35 }
 0xd27   :  { %v4741_v32 = vmul.f32 %v10873_v7, %v4707_v31  ;;  %v5090_v56 = vpop.f32.mrf.mxu0 }
 0xd28   :  { %v4970_v41 = vmax.f32 %v4906_v29, 0.0  ;;  %v4578_v31 = vsel %vm4577_vm8, %v6858_v33, %v4574_v59  ;;  %v10932_v29 = vld [vmem:[%s11932_s6 + $0x6] ss:$0 sm:$0xff] }
 0xd29   :  { %v4274_v26 = vpop.xlane.xlu1 %4273  ;;  %v10917_v44 = vadd.f32 %v10888_v61, %v4741_v32  ;;  %v4709_v39 = vmul.f32 %v4578_v31, %v10657_v55 }
 0xd2a   :  { %v4326_v14 = vmul.f32 %v4274_v26, %v10240_v48 }
 0xd2b   :  { %v4798_v8 = vpack.c.bf16 %v10922_v53, %v10917_v44  ;;  %v4743_v55 = vmul.f32 %v10873_v7, %v4709_v39 }
 0xd2c   :  { %v4358_v60 = vadd.f32 1e-05, %v4326_v14 }
 0xd2d   :  { %v4907_v17 = vpop.f32.mrf.mxu3 }
 0xd2e   :  { %6859 = vrsqrt.f32 %v4358_v60  ;;  %v4908_v11 = vadd.f32 %v10604_v24, %v4907_v17  ;;  %vm4585_vm10 = vweird.f32 %v4358_v60 }
 0xd2f   :  { %v5093_v25 = vpop.f32.mrf.mxu0 }
 0xd30   :  { %v4971_v1 = vmax.f32 %v4908_v11, 0.0  ;;  %v5084_v11 = vadd.f32 %v10932_v29, %v10855_v46 }
 0xd31   :  { %v10919_v0 = vpop.xlane.xlu1 %4276 }
 0xd32   :  { %v4997_v36 = vpack.c.bf16 %v4971_v1, %v4970_v41 }
 0xd34   :  { %v6860_v12 = vpop.eup %6859  ;;  %5107 = vmatmul.bf16.gmra.mxu0 %v4997_v36 }
 0xd35   :  { %v4580_v49 = vmul.f32 %v6860_v12, %v4358_v60  ;;  %6228 = vmatmul.msk.bf16.gmra.mxu3 %vm158_vm0, %v4798_v8  ;;  %vm4586_vm9 = vweird.f32 %v6860_v12 }
 0xd36   :  { %vm4587_vm11 = vmor %vm4585_vm10, %vm4586_vm9 }
 0xd37   :  { %v4581_v10 = vmul.f32 %v6860_v12, %v4580_v49  ;;  %v10947_v8 = vpop.f32.mrf.mxu0 }
 0xd39   :  { %v4582_v58 = vmul.f32 0.5, %v4581_v10  ;;  %v4099_v26 = vpop.xlane.xlu1 %4098 }
 0xd3a   :  { %v4142_v14 = vmul.f32 %v10240_v48, %v4099_v26 }
 0xd3b   :  { %v4583_v32 = vsub.f32 1.5, %v4582_v58 }
 0xd3c   :  { %v10936_v17 = vsub.f32 %v10777_v52, %v4142_v14 }
 0xd3d   :  { %v4584_v6 = vmul.f32 %v6860_v12, %v4583_v32 }
 0xd3e   :  { %v4206_v33 = vmul.f32 %v10936_v17, %v10936_v17 }
 0xd3f   :  { %v4588_v3 = vsel %vm4587_vm11, %v6860_v12, %v4584_v6  ;;  %v10950_v12 = vadd.f32 %v5084_v11, %v10418_v63  ;;  %v5086_v63 = vadd.f32 %v10932_v29, %v10878_v13  ;;  %v5094_v11 = vadd.f32 %v10932_v29, %v5093_v25 }
 0xd40   :  { %v4710_v41 = vmul.f32 %v4588_v3, %v10751_v15  ;;  %v4910_v1 = vpop.f32.mrf.mxu3  ;;  %v4296_v35 = vsel %vm158_vm0, %v4206_v33, 0.0  ;;  %v10956_v15 = vadd.f32 %v10888_v61, %v4743_v55  ;;  %v4327_v25 = vmul.f32 %v10919_v0, %v10240_v48 }
 0xd41   :  { %4297 = vadd.xlane.f32.xlu0 %v4296_v35  ;;  %v4102_v52 = vpop.xlane.xlu1 %4101  ;;  %v4911_v31 = vadd.f32 %v10604_v24, %v4910_v1  ;;  %v5195_v26 = vsel %vm158_vm0, %v10950_v12, 0.0  ;;  %v10978_v13 = vadd.f32 %v5086_v63, %v10415_v30 }
 0xd42   :  { %v4143_v36 = vmul.f32 %v10240_v48, %v4102_v52  ;;  %v4744_v60 = vmul.f32 %v10873_v7, %v4710_v41 }
 0xd43   :  { %v4972_v39 = vmax.f32 %v4911_v31, 0.0  ;;  %v5198_v1 = vsel %vm158_vm0, %v10978_v13, 0.0 }
 0xd44   :  { %v10953_v46 = vsub.f32 %v10785_v38, %v4143_v36  ;;  %v10959_v59 = vadd.f32 %v10888_v61, %v4744_v60  ;;  %v5091_v38 = vadd.f32 %v10932_v29, %v5090_v56  ;;  %v4359_v60 = vadd.f32 1e-05, %v4327_v25 }
 0xd46   :  { %v4799_v49 = vpack.c.bf16 %v10959_v59, %v10956_v15  ;;  %v4207_v10 = vmul.f32 %v10953_v46, %v10953_v46  ;;  %v10975_v3 = vadd.f32 %v5091_v38, %v10490_v2  ;;  %v10987_v2 = vadd.f32 %v5094_v11, %v10522_v57 }
 0xd47   :  { %6861 = vrsqrt.f32 %v4359_v60  ;;  %vm4595_vm13 = vweird.f32 %v4359_v60 }
 0xd48   :  { %v4912_v58 = vpop.f32.mrf.mxu3  ;;  %6229 = vmatmul.msk.bf16.gmra.mxu3 %vm158_vm0, %v4799_v49  ;;  %v4299_v14 = vsel %vm158_vm0, %v4207_v10, 0.0  ;;  %v5207_v36 = vsel %vm158_vm0, %v10987_v2, 0.0 }
 0xd49   :  { %v4913_v32 = vadd.f32 %v10604_v24, %v4912_v58  ;;  %5196 = vadd.xlane.f32.xlu0 %v5195_v26  ;;  %4300 = vadd.xlane.f32.xlu1 %v4299_v14  ;;  %v5098_v33 = vpop.f32.mrf.mxu0  ;;  %v5204_v24 = vsel %vm158_vm0, %v10975_v3, 0.0 }
 0xd4a   :  { %v5099_v41 = vadd.f32 %v10932_v29, %v5098_v33 }
 0xd4b   :  { %v4973_v6 = vmax.f32 %v4913_v32, 0.0 }
 0xd4c   :  { %v10990_v30 = vadd.f32 %v5099_v41, %v10579_v42 }
 0xd4d   :  { %v4998_v56 = vpack.c.bf16 %v4973_v6, %v4972_v39  ;;  %v6862_v0 = vpop.eup %6861 }
 0xd4e   :  { %v5213_v52 = vsel %vm158_vm0, %v10990_v30, 0.0  ;;  %v4590_v49 = vmul.f32 %v6862_v0, %v4359_v60  ;;  %vm4596_vm12 = vweird.f32 %v6862_v0 }
 0xd4f   :  { %5112 = vmatmul.bf16.gmra.mxu0 %v4998_v56  ;;  %vm4597_vm14 = vmor %vm4595_vm13, %vm4596_vm12 }
 0xd50   :  { %v4591_v10 = vmul.f32 %v6862_v0, %v4590_v49 }
 0xd51   :  { %5205 = vadd.xlane.f32.xlu0 %v5204_v24  ;;  %5199 = vadd.xlane.f32.xlu1 %v5198_v1  ;;  %v5100_v35 = vpop.f32.mrf.mxu0 }
 0xd52   :  { %v5101_v55 = vadd.f32 %v10932_v29, %v5100_v35  ;;  %v4592_v58 = vmul.f32 0.5, %v4591_v10 }
 0xd54   :  { %v11000_v57 = vadd.f32 %v5101_v55, %v10582_v40  ;;  %v4593_v26 = vsub.f32 1.5, %v4592_v58 }
 0xd56   :  { %v5216_v42 = vsel %vm158_vm0, %v11000_v57, 0.0  ;;  %v4594_v39 = vmul.f32 %v6862_v0, %v4593_v26  ;;  %v11033_v26 = vld [vmem:[%s11932_s6 + $0x5] ss:$0 sm:$0xff] }
 0xd58   :  { %v4598_v33 = vsel %vm4597_vm14, %v6862_v0, %v4594_v39 }
 0xd59   :  { %5214 = vadd.xlane.f32.xlu0 %v5213_v52  ;;  %5208 = vadd.xlane.f32.xlu1 %v5207_v36  ;;  %v4711_v35 = vmul.f32 %v4598_v33, %v10761_v19 }
 0xd5b   :  { %v4745_v19 = vmul.f32 %v10873_v7, %v4711_v35 }
 0xd61   :  { %5217 = vadd.xlane.f32.xlu1 %v5216_v42  ;;  %v5089_v42 = vadd.f32 %v10932_v29, %v10908_v4 }
 0xd6c   :  { %v4280_v31 = vpop.xlane.xlu2 %4279 }
 0xd6d   :  { %v4328_v63 = vmul.f32 %v4280_v31, %v10240_v48  ;;  %v11020_v31 = vadd.f32 %v5089_v42, %v10487_v20  ;;  %v5096_v20 = vadd.f32 %v10932_v29, %v10947_v8 }
 0xd6f   :  { %v4360_v38 = vadd.f32 1e-05, %v4328_v63  ;;  %v11023_v63 = vadd.f32 %v10888_v61, %v4745_v19  ;;  %v5201_v39 = vsel %vm158_vm0, %v11020_v31, 0.0 }
 0xd71   :  { %6863 = vrsqrt.f32 %v4360_v38  ;;  %vm4605_vm1 = vweird.f32 %v4360_v38 }
 0xd74   :  { %v4283_v14 = vpop.xlane.xlu2 %4282 }
 0xd75   :  { %v4329_v11 = vmul.f32 %v4283_v14, %v10240_v48 }
 0xd77   :  { %v6864_v32 = vpop.eup %6863  ;;  %v4361_v52 = vadd.f32 1e-05, %v4329_v11 }
 0xd78   :  { %v4600_v40 = vmul.f32 %v6864_v32, %v4360_v38  ;;  %vm4606_vm15 = vweird.f32 %v6864_v32 }
 0xd79   :  { %vm4607_vm2 = vmor %vm4605_vm1, %vm4606_vm15  ;;  %6865 = vrsqrt.f32 %v4361_v52  ;;  %vm4615_vm4 = vweird.f32 %v4361_v52 }
 0xd7a   :  { %v4601_v6 = vmul.f32 %v6864_v32, %v4600_v40 }
 0xd7c   :  { %v4602_v56 = vmul.f32 0.5, %v4601_v6  ;;  %v4105_v41 = vpop.xlane.xlu2 %4104  ;;  %v4292_v4 = vpop.xlane.xlu1 %4291 }
 0xd7d   :  { %v4144_v24 = vmul.f32 %v10240_v48, %v4105_v41  ;;  %v4332_v40 = vmul.f32 %v4292_v4, %v10240_v48  ;;  %v11044_v41 = vadd.f32 %v5096_v20, %v10525_v47 }
 0xd7e   :  { %v4603_v1 = vsub.f32 1.5, %v4602_v56 }
 0xd7f   :  { %v11009_v25 = vsub.f32 %v10827_v34, %v4144_v24  ;;  %v6866_v58 = vpop.eup %6865  ;;  %v11046_v24 = vadd.f32 1e-05, %v4332_v40 }
 0xd80   :  { %v4604_v55 = vmul.f32 %v6864_v32, %v4603_v1  ;;  %v4610_v33 = vmul.f32 %v6866_v58, %v4361_v52  ;;  %vm4616_vm3 = vweird.f32 %v6866_v58 }
 0xd81   :  { %v4208_v36 = vmul.f32 %v11009_v25, %v11009_v25  ;;  %6867 = vrsqrt.f32 %v11046_v24  ;;  %vm4617_vm5 = vmor %vm4615_vm4, %vm4616_vm3  ;;  %vm4645_vm13 = vweird.f32 %v11046_v24 }
 0xd82   :  { %v4608_v60 = vsel %vm4607_vm2, %v6864_v32, %v4604_v55  ;;  %v4611_v1 = vmul.f32 %v6866_v58, %v4610_v33 }
 0xd83   :  { %v4712_v0 = vmul.f32 %v4608_v60, %v10797_v9  ;;  %v4915_v49 = vpop.f32.mrf.mxu3  ;;  %v4302_v10 = vsel %vm158_vm0, %v4208_v36, 0.0  ;;  %v5210_v36 = vsel %vm158_vm0, %v11044_v41, 0.0 }
 0xd84   :  { %4303 = vadd.xlane.f32.xlu2 %v4302_v10  ;;  %v4916_v14 = vadd.f32 %v11033_v26, %v4915_v49  ;;  %v4612_v42 = vmul.f32 0.5, %v4611_v1 }
 0xd85   :  { %v4746_v34 = vmul.f32 %v10873_v7, %v4712_v0 }
 0xd86   :  { %v4974_v56 = vmax.f32 %v4916_v14, 0.0  ;;  %v4613_v0 = vsub.f32 1.5, %v4612_v42 }
 0xd87   :  { %v11026_v38 = vadd.f32 %v10888_v61, %v4746_v34  ;;  %v11052_v49 = vpop.eup %6867  ;;  %v4295_v34 = vpop.xlane.xlu2 %4294 }
 0xd88   :  { %v4640_v14 = vmul.f32 %v11052_v49, %v11046_v24  ;;  %vm4646_vm10 = vweird.f32 %v11052_v49 }
 0xd89   :  { %v4800_v9 = vpack.c.bf16 %v11026_v38, %v11023_v63  ;;  %vm4647_vm14 = vmor %vm4645_vm13, %vm4646_vm10 }
 0xd8b   :  { %v4917_v32 = vpop.f32.mrf.mxu3  ;;  %6230 = vmatmul.msk.bf16.gmra.mxu3 %vm158_vm0, %v4800_v9  ;;  %v4614_v9 = vmul.f32 %v6866_v58, %v4613_v0 }
 0xd8c   :  { %v4918_v6 = vadd.f32 %v11033_v26, %v4917_v32  ;;  %5202 = vadd.xlane.f32.xlu2 %v5201_v39  ;;  %v4333_v39 = vmul.f32 %v4295_v34, %v10240_v48 }
 0xd8d   :  { %v4618_v33 = vsel %vm4617_vm5, %v6866_v58, %v4614_v9 }
 0xd8e   :  { %v4975_v11 = vmax.f32 %v4918_v6, 0.0  ;;  %v11063_v1 = vadd.f32 1e-05, %v4333_v39 }
 0xd90   :  { %v4999_v8 = vpack.c.bf16 %v4975_v11, %v4974_v56  ;;  %v4641_v56 = vmul.f32 %v11052_v49, %v4640_v14  ;;  %vm4655_vm1 = vweird.f32 %v11063_v1 }
 0xd91   :  { %v4286_v35 = vpop.xlane.xlu0 %4285 }
 0xd92   :  { %v4330_v55 = vmul.f32 %v4286_v35, %v10240_v48  ;;  %5117 = vmatmul.bf16.gmra.mxu0 %v4999_v8  ;;  %v4642_v42 = vmul.f32 0.5, %v4641_v56 }
 0xd94   :  { %v4362_v60 = vadd.f32 1e-05, %v4330_v55  ;;  %5211 = vadd.xlane.f32.xlu2 %v5210_v36  ;;  %v4713_v36 = vmul.f32 %v4618_v33, %v10808_v43 }
 0xd96   :  { %6869 = vrsqrt.f32 %v4362_v60  ;;  %vm4625_vm7 = vweird.f32 %v4362_v60 }
 0xd99   :  { %v4289_v47 = vpop.xlane.xlu0 %4288 }
 0xd9a   :  { %v4331_v10 = vmul.f32 %v4289_v47, %v10240_v48 }
 0xd9c   :  { %v6870_v19 = vpop.eup %6869  ;;  %v4363_v4 = vadd.f32 1e-05, %v4331_v10 }
 0xd9d   :  { %v4620_v20 = vmul.f32 %v6870_v19, %v4362_v60  ;;  %vm4626_vm6 = vweird.f32 %v6870_v19 }
 0xd9e   :  { %6871 = vrsqrt.f32 %v4363_v4  ;;  %v5103_v32 = vpop.f32.mrf.mxu0  ;;  %vm4627_vm8 = vmor %vm4625_vm7, %vm4626_vm6  ;;  %vm4635_vm11 = vweird.f32 %v4363_v4 }
 0xd9f   :  { %v4621_v40 = vmul.f32 %v6870_v19, %v4620_v20  ;;  %v5104_v6 = vadd.f32 %v10932_v29, %v5103_v32  ;;  %6873 = vrsqrt.f32 %v11063_v1  ;;  %v4747_v20 = vmul.f32 %v10873_v7, %v4713_v36 }
 0xda0   :  { %v4643_v32 = vsub.f32 1.5, %v4642_v42 }
 0xda1   :  { %v4622_v11 = vmul.f32 0.5, %v4621_v40  ;;  %v11061_v8 = vadd.f32 %v5104_v6, %v10677_v5  ;;  %v11079_v6 = vadd.f32 %v10888_v61, %v4747_v20 }
 0xda2   :  { %v4644_v56 = vmul.f32 %v11052_v49, %v4643_v32 }
 0xda3   :  { %v4623_v35 = vsub.f32 1.5, %v4622_v11  ;;  %v5219_v52 = vsel %vm158_vm0, %v11061_v8, 0.0 }
 0xda4   :  { %v6872_v55 = vpop.eup %6871  ;;  %5220 = vadd.xlane.f32.xlu2 %v5219_v52 }
 0xda5   :  { %v4624_v0 = vmul.f32 %v6870_v19, %v4623_v35  ;;  %v4630_v58 = vmul.f32 %v6872_v55, %v4363_v4  ;;  %vm4636_vm9 = vweird.f32 %v6872_v55  ;;  %v11084_v33 = vpop.eup %6873 }
 0xda6   :  { %v5105_v47 = vpop.f32.mrf.mxu0  ;;  %vm4637_vm12 = vmor %vm4635_vm11, %vm4636_vm9  ;;  %v4650_v36 = vmul.f32 %v11084_v33, %v11063_v1  ;;  %vm4656_vm15 = vweird.f32 %v11084_v33 }
 0xda7   :  { %v4628_v5 = vsel %vm4627_vm8, %v6870_v19, %v4624_v0  ;;  %v4631_v10 = vmul.f32 %v6872_v55, %v4630_v58  ;;  %v5106_v34 = vadd.f32 %v10932_v29, %v5105_v47  ;;  %v4648_v0 = vsel %vm4647_vm14, %v11052_v49, %v4644_v56  ;;  %vm4657_vm2 = vmor %vm4655_vm1, %vm4656_vm15 }
 0xda8   :  { %v4714_v9 = vmul.f32 %v4628_v5, %v10864_v18  ;;  %v4920_v14 = vpop.f32.mrf.mxu3 }
 0xda9   :  { %v4632_v43 = vmul.f32 0.5, %v4631_v10  ;;  %v11073_v39 = vadd.f32 %v5106_v34, %v10680_v54  ;;  %v4921_v52 = vadd.f32 %v11033_v26, %v4920_v14  ;;  %v4716_v10 = vmul.f32 %v4648_v0, %v10830_v45 }
 0xdaa   :  { %v4748_v60 = vmul.f32 %v10873_v7, %v4714_v9  ;;  %v4651_v34 = vmul.f32 %v11084_v33, %v4650_v36 }
 0xdab   :  { %v4633_v40 = vsub.f32 1.5, %v4632_v43  ;;  %v5222_v19 = vsel %vm158_vm0, %v11073_v39, 0.0  ;;  %v4976_v24 = vmax.f32 %v4921_v52, 0.0  ;;  %v4750_v45 = vmul.f32 %v10873_v7, %v4716_v10 }
 0xdac   :  { %5223 = vadd.xlane.f32.xlu0 %v5222_v19  ;;  %v11082_v18 = vadd.f32 %v10888_v61, %v4748_v60  ;;  %v4652_v60 = vmul.f32 0.5, %v4651_v34 }
 0xdad   :  { %v4634_v54 = vmul.f32 %v6872_v55, %v4633_v40 }
 0xdae   :  { %v4801_v11 = vpack.c.bf16 %v11082_v18, %v11079_v6 }
 0xdaf   :  { %v4638_v35 = vsel %vm4637_vm12, %v6872_v55, %v4634_v54  ;;  %v4653_v54 = vsub.f32 1.5, %v4652_v60 }
 0xdb0   :  { %v4922_v42 = vpop.f32.mrf.mxu3  ;;  %6231 = vmatmul.msk.bf16.gmra.mxu3 %vm158_vm0, %v4801_v11  ;;  %v4715_v47 = vmul.f32 %v4638_v35, %v10883_v23  ;;  %v11117_v35 = vadd.f32 %v10888_v61, %v4750_v45 }
 0xdb1   :  { %v4923_v4 = vadd.f32 %v11033_v26, %v4922_v42  ;;  %v5108_v58 = vpop.f32.mrf.mxu0 }
 0xdb2   :  { %v5109_v5 = vadd.f32 %v10932_v29, %v5108_v58  ;;  %v4749_v23 = vmul.f32 %v10873_v7, %v4715_v47 }
 0xdb3   :  { %v4977_v55 = vmax.f32 %v4923_v4, 0.0  ;;  %v4654_v4 = vmul.f32 %v11084_v33, %v4653_v54 }
 0xdb4   :  { %v11102_v9 = vadd.f32 %v5109_v5, %v10727_v21  ;;  %v4298_v14 = vpop.xlane.xlu0 %4297  ;;  %v11111_v56 = vadd.f32 %v10888_v61, %v4749_v23 }
 0xdb5   :  { %v5000_v20 = vpack.c.bf16 %v4977_v55, %v4976_v24  ;;  %v4334_v49 = vmul.f32 %v4298_v14, %v10240_v48  ;;  %v4658_v10 = vsel %vm4657_vm2, %v11084_v33, %v4654_v4 }
 0xdb6   :  { %v5225_v32 = vsel %vm158_vm0, %v11102_v9, 0.0  ;;  %v4802_v36 = vpack.c.bf16 %v11117_v35, %v11111_v56 }
 0xdb7   :  { %v4366_v43 = vadd.f32 1e-05, %v4334_v49  ;;  %5122 = vmatmul.bf16.gmra.mxu0 %v5000_v20  ;;  %5226 = vadd.xlane.f32.xlu1 %v5225_v32  ;;  %v4717_v49 = vmul.f32 %v4658_v10, %v10843_v16 }
 0xdb8   :  { %v4925_v40 = vpop.f32.mrf.mxu3 }
 0xdb9   :  { %6875 = vrsqrt.f32 %v4366_v43  ;;  %v5110_v19 = vpop.f32.mrf.mxu0  ;;  %v4926_v0 = vadd.f32 %v11033_v26, %v4925_v40  ;;  %vm4665_vm4 = vweird.f32 %v4366_v43  ;;  %v4751_v40 = vmul.f32 %v10873_v7, %v4717_v49 }
 0xdba   :  { %v5111_v21 = vadd.f32 %v10932_v29, %v5110_v19 }
 0xdbb   :  { %v4978_v24 = vmax.f32 %v4926_v0, 0.0  ;;  %v11139_v16 = vadd.f32 %v10888_v61, %v4751_v40 }
 0xdbc   :  { %v11114_v11 = vadd.f32 %v5111_v21, %v10730_v28 }
 0xdbe   :  { %v5228_v52 = vsel %vm158_vm0, %v11114_v11, 0.0 }
 0xdbf   :  { %v6876_v42 = vpop.eup %6875  ;;  %5229 = vadd.xlane.f32.xlu2 %v5228_v52 }
 0xdc0   :  { %v4660_v58 = vmul.f32 %v6876_v42, %v4366_v43  ;;  %v4927_v28 = vpop.f32.mrf.mxu3  ;;  %6232 = vmatmul.msk.bf16.gmra.mxu3 %vm158_vm0, %v4802_v36  ;;  %vm4666_vm3 = vweird.f32 %v6876_v42 }
 0xdc1   :  { %v4928_v47 = vadd.f32 %v11033_v26, %v4927_v28  ;;  %vm4667_vm5 = vmor %vm4665_vm4, %vm4666_vm3 }
 0xdc2   :  { %v4661_v5 = vmul.f32 %v6876_v42, %v4660_v58 }
 0xdc3   :  { %v4979_v55 = vmax.f32 %v4928_v47, 0.0 }
 0xdc4   :  { %v4662_v34 = vmul.f32 0.5, %v4661_v5 }
 0xdc5   :  { %v5001_v14 = vpack.c.bf16 %v4979_v55, %v4978_v24  ;;  %v4301_v24 = vpop.xlane.xlu1 %4300 }
 0xdc6   :  { %v4663_v20 = vsub.f32 1.5, %v4662_v34  ;;  %v4335_v55 = vmul.f32 %v4301_v24, %v10240_v48 }
 0xdc7   :  { %5127 = vmatmul.bf16.gmra.mxu0 %v5001_v14 }
 0xdc8   :  { %v4664_v32 = vmul.f32 %v6876_v42, %v4663_v20  ;;  %v4367_v10 = vadd.f32 1e-05, %v4335_v55 }
 0xdca   :  { %v4668_v23 = vsel %vm4667_vm5, %v6876_v42, %v4664_v32  ;;  %6877 = vrsqrt.f32 %v4367_v10  ;;  %vm4675_vm7 = vweird.f32 %v4367_v10 }
 0xdcb   :  { %v4718_v60 = vmul.f32 %v4668_v23, %v10936_v17  ;;  %v4930_v1 = vpop.f32.mrf.mxu3 }
 0xdcc   :  { %v5113_v45 = vpop.f32.mrf.mxu0  ;;  %v4931_v52 = vadd.f32 %v11033_v26, %v4930_v1 }
 0xdcd   :  { %v5114_v19 = vadd.f32 %v10932_v29, %v5113_v45  ;;  %v4752_v33 = vmul.f32 %v10873_v7, %v4718_v60 }
 0xdce   :  { %v4980_v4 = vmax.f32 %v4931_v52, 0.0 }
 0xdcf   :  { %v11136_v21 = vadd.f32 %v5114_v19, %v10764_v22  ;;  %v11142_v43 = vadd.f32 %v10888_v61, %v4752_v33 }
 0xdd0   :  { %v6878_v34 = vpop.eup %6877 }
 0xdd1   :  { %v5231_v17 = vsel %vm158_vm0, %v11136_v21, 0.0  ;;  %v4803_v54 = vpack.c.bf16 %v11142_v43, %v11139_v16  ;;  %v4670_v14 = vmul.f32 %v6878_v34, %v4367_v10  ;;  %vm4676_vm6 = vweird.f32 %v6878_v34 }
 0xdd2   :  { %5232 = vadd.xlane.f32.xlu0 %v5231_v17  ;;  %vm4677_vm8 = vmor %vm4675_vm7, %vm4676_vm6 }
 0xdd3   :  { %v4932_v36 = vpop.f32.mrf.mxu3  ;;  %6233 = vmatmul.msk.bf16.gmra.mxu3 %vm158_vm0, %v4803_v54  ;;  %v4671_v20 = vmul.f32 %v6878_v34, %v4670_v14 }
 0xdd4   :  { %v4933_v22 = vadd.f32 %v11033_v26, %v4932_v36  ;;  %v5115_v42 = vpop.f32.mrf.mxu0 }
 0xdd5   :  { %v5116_v0 = vadd.f32 %v10932_v29, %v5115_v42 }
 0xdd6   :  { %v4981_v58 = vmax.f32 %v4933_v22, 0.0 }
 0xdd7   :  { %v11153_v28 = vadd.f32 %v5116_v0, %v10767_v50  ;;  %v4672_v50 = vmul.f32 0.5, %v4671_v20 }
 0xdd8   :  { %v5002_v47 = vpack.c.bf16 %v4981_v58, %v4980_v4 }
 0xdd9   :  { %v5234_v5 = vsel %vm158_vm0, %v11153_v28, 0.0  ;;  %v4673_v60 = vsub.f32 1.5, %v4672_v50  ;;  %v5200_v50 = vpop.xlane.xlu1 %5199 }
 0xdda   :  { %5132 = vmatmul.bf16.gmra.mxu0 %v5002_v47  ;;  %5235 = vadd.xlane.f32.xlu1 %v5234_v5 }
 0xddb   :  { %v4674_v33 = vmul.f32 %v6878_v34, %v4673_v60 }
 0xddd   :  { %v4678_v22 = vsel %vm4677_vm8, %v6878_v34, %v4674_v33 }
 0xdde   :  { %v4719_v47 = vmul.f32 %v4678_v22, %v10953_v46 }
 0xdf7   :  { %v4304_v49 = vpop.xlane.xlu2 %4303 }
 0xdf8   :  { %v4336_v32 = vmul.f32 %v4304_v49, %v10240_v48  ;;  %v4753_v49 = vmul.f32 %v10873_v7, %v4719_v47 }
 0xdfa   :  { %v4368_v23 = vadd.f32 1e-05, %v4336_v32 }
 0xdfc   :  { %6879 = vrsqrt.f32 %v4368_v23  ;;  %vm4685_vm10 = vweird.f32 %v4368_v23 }
 0xdff   :  { %v5203_v1 = vpop.xlane.xlu2 %5202 }
 0xe00   :  { %v5293_v40 = vmul.f32 %v5203_v1, %v10240_v48  ;;  %v11183_v1 = vadd.f32 %v10888_v61, %v4753_v49 }
 0xe02   :  { %v6880_v45 = vpop.eup %6879  ;;  %v11161_v19 = vsub.f32 %v11020_v31, %v5293_v40  ;;  %v5197_v31 = vpop.xlane.xlu0 %5196 }
 0xe03   :  { %v4680_v17 = vmul.f32 %v6880_v45, %v4368_v23  ;;  %vm4686_vm9 = vweird.f32 %v6880_v45  ;;  %v5291_v23 = vmul.f32 %v5197_v31, %v10240_v48 }
 0xe04   :  { %v5357_v54 = vmul.f32 %v11161_v19, %v11161_v19  ;;  %vm4687_vm11 = vmor %vm4685_vm10, %vm4686_vm9 }
 0xe05   :  { %v4681_v52 = vmul.f32 %v6880_v45, %v4680_v17 }
 0xe06   :  { %v5393_v36 = vsel %vm158_vm0, %v5357_v54, 0.0 }
 0xe07   :  { %v4682_v42 = vmul.f32 0.5, %v4681_v52  ;;  %v5212_v0 = vpop.xlane.xlu2 %5211  ;;  %5394 = vadd.xlane.f32.xlu1 %v5393_v36  ;;  %v5292_v36 = vmul.f32 %v5200_v50, %v10240_v48 }
 0xe08   :  { %v5296_v4 = vmul.f32 %v5212_v0, %v10240_v48 }
 0xe09   :  { %v4683_v58 = vsub.f32 1.5, %v4682_v42 }
 0xe0a   :  { %v11169_v5 = vsub.f32 %v11044_v41, %v5296_v4  ;;  %v5206_v40 = vpop.xlane.xlu0 %5205 }
 0xe0b   :  { %v4684_v24 = vmul.f32 %v6880_v45, %v4683_v58  ;;  %v5294_v0 = vmul.f32 %v5206_v40, %v10240_v48 }
 0xe0c   :  { %v5360_v55 = vmul.f32 %v11169_v5, %v11169_v5 }
 0xe0d   :  { %v4688_v10 = vsel %vm4687_vm11, %v6880_v45, %v4684_v24  ;;  %v5209_v24 = vpop.xlane.xlu1 %5208 }
 0xe0e   :  { %v4720_v34 = vmul.f32 %v4688_v10, %v11009_v25  ;;  %v4935_v14 = vpop.f32.mrf.mxu3  ;;  %v5402_v20 = vsel %vm158_vm0, %v5360_v55, 0.0  ;;  %v11211_v10 = vsub.f32 %v10978_v13, %v5292_v36  ;;  %v5295_v13 = vmul.f32 %v5209_v24, %v10240_v48 }
 0xe0f   :  { %v5118_v32 = vpop.f32.mrf.mxu0  ;;  %5403 = vadd.xlane.f32.xlu1 %v5402_v20  ;;  %v4936_v17 = vadd.f32 %v11033_v26, %v4935_v14  ;;  %v11218_v20 = vsub.f32 %v10975_v3, %v5294_v0 }
 0xe10   :  { %v5119_v46 = vadd.f32 %v10932_v29, %v5118_v32  ;;  %v4754_v41 = vmul.f32 %v10873_v7, %v4720_v34  ;;  %v11193_v7 = vsub.f32 %v10950_v12, %v5291_v23  ;;  %v5356_v32 = vmul.f32 %v11211_v10, %v11211_v10 }
 0xe11   :  { %v4982_v12 = vmax.f32 %v4936_v17, 0.0  ;;  %v5358_v3 = vmul.f32 %v11218_v20, %v11218_v20 }
 0xe12   :  { %v11180_v60 = vadd.f32 %v5119_v46, %v10811_v51  ;;  %v11186_v25 = vadd.f32 %v10888_v61, %v4754_v41  ;;  %v5355_v58 = vmul.f32 %v11193_v7, %v11193_v7  ;;  %v11229_v41 = vsub.f32 %v10987_v2, %v5295_v13 }
 0xe13   :  { %v5390_v23 = vsel %vm158_vm0, %v5356_v32, 0.0 }
 0xe14   :  { %v5237_v45 = vsel %vm158_vm0, %v11180_v60, 0.0  ;;  %v4804_v33 = vpack.c.bf16 %v11186_v25, %v11183_v1 }
 0xe15   :  { %5238 = vadd.xlane.f32.xlu2 %v5237_v45  ;;  %v5218_v40 = vpop.xlane.xlu1 %5217  ;;  %v5396_v45 = vsel %vm158_vm0, %v5358_v3, 0.0 }
 0xe16   :  { %v4937_v51 = vpop.f32.mrf.mxu3  ;;  %6234 = vmatmul.msk.bf16.gmra.mxu3 %vm158_vm0, %v4804_v33  ;;  %v5298_v17 = vmul.f32 %v5218_v40, %v10240_v48 }
 0xe17   :  { %v4938_v54 = vadd.f32 %v11033_v26, %v4937_v51  ;;  %v5120_v61 = vpop.f32.mrf.mxu0  ;;  %v5221_v52 = vpop.xlane.xlu2 %5220  ;;  %v5359_v51 = vmul.f32 %v11229_v41, %v11229_v41 }
 0xe18   :  { %v5121_v22 = vadd.f32 %v10932_v29, %v5120_v61  ;;  %v5299_v42 = vmul.f32 %v5221_v52, %v10240_v48  ;;  %v11243_v61 = vsub.f32 %v11000_v57, %v5298_v17 }
 0xe19   :  { %v4983_v4 = vmax.f32 %v4938_v54, 0.0 }
 0xe1a   :  { %v11205_v31 = vadd.f32 %v5121_v22, %v10814_v27  ;;  %v11208_v47 = vsub.f32 %v11061_v8, %v5299_v42  ;;  %v5387_v27 = vsel %vm158_vm0, %v5355_v58, 0.0  ;;  %v5215_v8 = vpop.xlane.xlu0 %5214  ;;  %v5362_v0 = vmul.f32 %v11243_v61, %v11243_v61 }
 0xe1b   :  { %v5003_v55 = vpack.c.bf16 %v4983_v4, %v4982_v12  ;;  %v5297_v46 = vmul.f32 %v5215_v8, %v10240_v48 }
 0xe1c   :  { %v5240_v34 = vsel %vm158_vm0, %v11205_v31, 0.0  ;;  %v5363_v14 = vmul.f32 %v11208_v47, %v11208_v47 }
 0xe1d   :  { %5137 = vmatmul.bf16.gmra.mxu0 %v5003_v55  ;;  %5241 = vadd.xlane.f32.xlu0 %v5240_v34  ;;  %v11233_v50 = vsub.f32 %v10990_v30, %v5297_v46  ;;  %v5399_v30 = vsel %vm158_vm0, %v5359_v51, 0.0  ;;  %v5408_v55 = vsel %vm158_vm0, %v5362_v0, 0.0 }
 0xe1e   :  { %5388 = vadd.xlane.f32.xlu2 %v5387_v27  ;;  %v5411_v49 = vsel %vm158_vm0, %v5363_v14, 0.0 }
 0xe1f   :  { %5412 = vadd.xlane.f32.xlu1 %v5411_v49  ;;  %v5361_v2 = vmul.f32 %v11233_v50, %v11233_v50 }
 0xe21   :  { %v5405_v22 = vsel %vm158_vm0, %v5361_v2, 0.0 }
 0xe22   :  { %v5224_v33 = vpop.xlane.xlu0 %5223 }
 0xe23   :  { %v5300_v54 = vmul.f32 %v5224_v33, %v10240_v48 }
 0xe25   :  { %5391 = vadd.xlane.f32.xlu0 %v5390_v23  ;;  %v11247_v52 = vsub.f32 %v11073_v39, %v5300_v54 }
 0xe26   :  { %5397 = vadd.xlane.f32.xlu2 %v5396_v45 }
 0xe27   :  { %v5364_v12 = vmul.f32 %v11247_v52, %v11247_v52 }
 0xe29   :  { %v5414_v14 = vsel %vm158_vm0, %v5364_v12, 0.0 }
 0xe2a   :  { %v5227_v36 = vpop.xlane.xlu1 %5226 }
 0xe2b   :  { %v5301_v42 = vmul.f32 %v5227_v36, %v10240_v48 }
 0xe2d   :  { %5400 = vadd.xlane.f32.xlu0 %v5399_v30  ;;  %v11257_v39 = vsub.f32 %v11102_v9, %v5301_v42 }
 0xe2e   :  { %5406 = vadd.xlane.f32.xlu2 %v5405_v22 }
 0xe2f   :  { %v5365_v8 = vmul.f32 %v11257_v39, %v11257_v39 }
 0xe31   :  { %v5417_v3 = vsel %vm158_vm0, %v5365_v8, 0.0 }
 0xe32   :  { %v5230_v57 = vpop.xlane.xlu2 %5229 }
 0xe33   :  { %v5302_v4 = vmul.f32 %v5230_v57, %v10240_v48  ;;  %v4940_v58 = vpop.f32.mrf.mxu3 }
 0xe34   :  { %v5123_v24 = vpop.f32.mrf.mxu0  ;;  %v4941_v9 = vadd.f32 %v11033_v26, %v4940_v58 }
 0xe35   :  { %v11261_v34 = vsub.f32 %v11114_v11, %v5302_v4  ;;  %5409 = vadd.xlane.f32.xlu0 %v5408_v55  ;;  %v5124_v13 = vadd.f32 %v10932_v29, %v5123_v24 }
 0xe36   :  { %5415 = vadd.xlane.f32.xlu2 %v5414_v14  ;;  %v4984_v40 = vmax.f32 %v4941_v9, 0.0 }
 0xe37   :  { %v5366_v27 = vmul.f32 %v11261_v34, %v11261_v34  ;;  %v11275_v45 = vadd.f32 %v5124_v13, %v10891_v37 }
 0xe39   :  { %v5420_v49 = vsel %vm158_vm0, %v5366_v27, 0.0  ;;  %v5243_v2 = vsel %vm158_vm0, %v11275_v45, 0.0 }
 0xe3a   :  { %5421 = vadd.xlane.f32.xlu1 %v5420_v49 }
 0xe3b   :  { %v4942_v32 = vpop.f32.mrf.mxu3 }
 0xe3c   :  { %v4943_v11 = vadd.f32 %v11033_v26, %v4942_v32  ;;  %v5125_v46 = vpop.f32.mrf.mxu0 }
 0xe3d   :  { %v5126_v23 = vadd.f32 %v10932_v29, %v5125_v46  ;;  %5418 = vadd.xlane.f32.xlu0 %v5417_v3 }
 0xe3e   :  { %v4985_v33 = vmax.f32 %v4943_v11, 0.0 }
 0xe3f   :  { %v11278_v17 = vadd.f32 %v5126_v23, %v10894_v62 }
 0xe40   :  { %v5004_v51 = vpack.c.bf16 %v4985_v33, %v4984_v40 }
 0xe41   :  { %v5246_v54 = vsel %vm158_vm0, %v11278_v17, 0.0 }
 0xe42   :  { %5142 = vmatmul.bf16.gmra.mxu0 %v5004_v51  ;;  %5247 = vadd.xlane.f32.xlu2 %v5246_v54 }
 0xe43   :  { %5244 = vadd.xlane.f32.xlu1 %v5243_v2  ;;  %v4945_v30 = vpop.f32.mrf.mxu3 }
 0xe44   :  { %v5128_v36 = vpop.f32.mrf.mxu0  ;;  %v4946_v62 = vadd.f32 %v11033_v26, %v4945_v30 }
 0xe45   :  { %v5233_v22 = vpop.xlane.xlu0 %5232  ;;  %v5129_v11 = vadd.f32 %v10932_v29, %v5128_v36 }
 0xe46   :  { %v5303_v37 = vmul.f32 %v5233_v22, %v10240_v48  ;;  %v4986_v14 = vmax.f32 %v4946_v62, 0.0 }
 0xe47   :  { %v11308_v23 = vadd.f32 %v5129_v11, %v10917_v44 }
 0xe48   :  { %v11286_v42 = vsub.f32 %v11136_v21, %v5303_v37 }
 0xe49   :  { %v5249_v51 = vsel %vm158_vm0, %v11308_v23, 0.0 }
 0xe4a   :  { %v5367_v0 = vmul.f32 %v11286_v42, %v11286_v42 }
 0xe4b   :  { %v4947_v12 = vpop.f32.mrf.mxu3 }
 0xe4c   :  { %v4948_v57 = vadd.f32 %v11033_v26, %v4947_v12  ;;  %v5130_v4 = vpop.f32.mrf.mxu0  ;;  %v5423_v58 = vsel %vm158_vm0, %v5367_v0, 0.0 }
 0xe4d   :  { %v5131_v24 = vadd.f32 %v10932_v29, %v5130_v4  ;;  %5424 = vadd.xlane.f32.xlu2 %v5423_v58  ;;  %v5236_v55 = vpop.xlane.xlu1 %5235 }
 0xe4e   :  { %v4987_v27 = vmax.f32 %v4948_v57, 0.0  ;;  %v5304_v21 = vmul.f32 %v5236_v55, %v10240_v48 }
 0xe4f   :  { %v11296_v8 = vadd.f32 %v5131_v24, %v10922_v53 }
 0xe50   :  { %v5005_v49 = vpack.c.bf16 %v4987_v27, %v4986_v14  ;;  %v11299_v9 = vsub.f32 %v11153_v28, %v5304_v21 }
 0xe51   :  { %v5252_v13 = vsel %vm158_vm0, %v11296_v8, 0.0 }
 0xe52   :  { %5253 = vadd.xlane.f32.xlu1 %v5252_v13  ;;  %5147 = vmatmul.bf16.gmra.mxu0 %v5005_v49  ;;  %v5368_v32 = vmul.f32 %v11299_v9, %v11299_v9 }
 0xe54   :  { %v5426_v46 = vsel %vm158_vm0, %v5368_v32, 0.0 }
 0xe55   :  { %5427 = vadd.xlane.f32.xlu0 %v5426_v46  ;;  %v11333_v46 = vld [vmem:[%s11932_s6 + $0x3] ss:$0 sm:$0xff] }
 0xe56   :  { %v4950_v3 = vpop.f32.mrf.mxu3 }
 0xe57   :  { %v5133_v53 = vpop.f32.mrf.mxu0  ;;  %v4951_v54 = vadd.f32 %v11033_v26, %v4950_v3 }
 0xe58   :  { %v5134_v28 = vadd.f32 %v10932_v29, %v5133_v53 }
 0xe59   :  { %v4988_v22 = vmax.f32 %v4951_v54, 0.0 }
 0xe5a   :  { %v11312_v40 = vadd.f32 %v5134_v28, %v10956_v15 }
 0xe5c   :  { %v5255_v33 = vsel %vm158_vm0, %v11312_v40, 0.0 }
 0xe5d   :  { %5256 = vadd.xlane.f32.xlu2 %v5255_v33  ;;  %5250 = vadd.xlane.f32.xlu0 %v5249_v51  ;;  %v11340_v33 = vld [vmem:[%s11932_s6 + $0x4] ss:$0 sm:$0xff] }
 0xe5e   :  { %v4952_v2 = vpop.f32.mrf.mxu3 }
 0xe5f   :  { %v4953_v30 = vadd.f32 %v11033_v26, %v4952_v2  ;;  %v5135_v44 = vpop.f32.mrf.mxu0 }
 0xe60   :  { %v5136_v36 = vadd.f32 %v10932_v29, %v5135_v44 }
 0xe61   :  { %v4989_v37 = vmax.f32 %v4953_v30, 0.0 }
 0xe62   :  { %v11322_v15 = vadd.f32 %v5136_v36, %v10959_v59 }
 0xe63   :  { %v5006_v62 = vpack.c.bf16 %v4989_v37, %v4988_v22 }
 0xe64   :  { %v5258_v0 = vsel %vm158_vm0, %v11322_v15, 0.0 }
 0xe65   :  { %5152 = vmatmul.bf16.gmra.mxu0 %v5006_v62  ;;  %5259 = vadd.xlane.f32.xlu0 %v5258_v0 }
 0xe7a   :  { %v5395_v12 = vpop.xlane.xlu1 %5394 }
 0xe7b   :  { %v5485_v57 = vmul.f32 %v5395_v12, %v10240_v48 }
 0xe7d   :  { %v5517_v4 = vadd.f32 1e-05, %v5485_v57 }
 0xe7f   :  { %6881 = vrsqrt.f32 %v5517_v4  ;;  %vm5573_vm13 = vweird.f32 %v5517_v4 }
 0xe82   :  { %v5404_v58 = vpop.xlane.xlu1 %5403 }
 0xe83   :  { %v5488_v24 = vmul.f32 %v5404_v58, %v10240_v48 }
 0xe85   :  { %v6882_v29 = vpop.eup %6881  ;;  %v5520_v55 = vadd.f32 1e-05, %v5488_v24 }
 0xe86   :  { %v5568_v14 = vmul.f32 %v6882_v29, %v5517_v4  ;;  %vm5574_vm12 = vweird.f32 %v6882_v29 }
 0xe87   :  { %6883 = vrsqrt.f32 %v5520_v55  ;;  %vm5575_vm14 = vmor %vm5573_vm13, %vm5574_vm12  ;;  %vm5603_vm1 = vweird.f32 %v5520_v55 }
 0xe88   :  { %v5569_v59 = vmul.f32 %v6882_v29, %v5568_v14  ;;  %v11328_v27 = vpop.xlane.xlu2 %5238 }
 0xe8a   :  { %v5570_v21 = vmul.f32 0.5, %v5569_v59 }
 0xe8c   :  { %v5571_v49 = vsub.f32 1.5, %v5570_v21 }
 0xe8d   :  { %v6884_v13 = vpop.eup %6883 }
 0xe8e   :  { %v5572_v32 = vmul.f32 %v6882_v29, %v5571_v49  ;;  %v5598_v11 = vmul.f32 %v6884_v13, %v5520_v55  ;;  %vm5604_vm15 = vweird.f32 %v6884_v13 }
 0xe8f   :  { %vm5605_vm2 = vmor %vm5603_vm1, %vm5604_vm15 }
 0xe90   :  { %v5576_v3 = vsel %vm5575_vm14, %v6882_v29, %v5572_v32  ;;  %v5599_v53 = vmul.f32 %v6884_v13, %v5598_v11  ;;  %v11335_v28 = vpop.xlane.xlu0 %5241  ;;  %v11363_v32 = vld [vmem:[%s11932_s6 + $0x6] ss:$0 sm:$0xff] }
 0xe91   :  { %v5869_v51 = vmul.f32 %v5576_v3, %v11161_v19  ;;  %v5389_v54 = vpop.xlane.xlu2 %5388 }
 0xe92   :  { %v5600_v2 = vmul.f32 0.5, %v5599_v53  ;;  %v5483_v30 = vmul.f32 %v5389_v54, %v10240_v48  ;;  %v5413_v44 = vpop.xlane.xlu1 %5412 }
 0xe93   :  { %v5903_v36 = vmul.f32 %v11333_v46, %v5869_v51  ;;  %v5491_v22 = vmul.f32 %v5413_v44, %v10240_v48 }
 0xe94   :  { %v5601_v37 = vsub.f32 1.5, %v5600_v2  ;;  %v5515_v62 = vadd.f32 1e-05, %v5483_v30 }
 0xe95   :  { %v5937_v0 = vadd.f32 %v11340_v33, %v5903_v36  ;;  %v11347_v12 = vadd.f32 1e-05, %v5491_v22 }
 0xe96   :  { %v5602_v57 = vmul.f32 %v6884_v13, %v5601_v37  ;;  %6885 = vrsqrt.f32 %v5515_v62  ;;  %vm5553_vm3 = vweird.f32 %v5515_v62 }
 0xe97   :  { %5969 = vst.msk [vmem:[%s11935_s8 + $0x10] sm:$0xff] %vm158_vm0, %v5937_v0  ;;  %6887 = vrsqrt.f32 %v11347_v12  ;;  %vm5633_vm6 = vweird.f32 %v11347_v12 }
 0xe98   :  { %v5606_v19 = vsel %vm5605_vm2, %v6884_v13, %v5602_v57  ;;  %v5392_v4 = vpop.xlane.xlu0 %5391 }
 0xe99   :  { %v5872_v58 = vmul.f32 %v5606_v19, %v11169_v5  ;;  %v5398_v24 = vpop.xlane.xlu2 %5397  ;;  %v5484_v29 = vmul.f32 %v5392_v4, %v10240_v48  ;;  %v4955_v14 = vpop.f32.mrf.mxu3 }
 0xe9a   :  { %v5486_v59 = vmul.f32 %v5398_v24, %v10240_v48  ;;  %v5138_v55 = vpop.f32.mrf.mxu0 }
 0xe9b   :  { %v5906_v21 = vmul.f32 %v11333_v46, %v5872_v58  ;;  %v11358_v49 = vadd.f32 1e-05, %v5484_v29  ;;  %v5139_v13 = vadd.f32 %v11363_v32, %v5138_v55  ;;  %v4956_v58 = vadd.f32 %v11033_v26, %v4955_v14 }
 0xe9c   :  { %v6886_v11 = vpop.eup %6885  ;;  %v11366_v5 = vadd.f32 1e-05, %v5486_v59 }
 0xe9d   :  { %v6888_v3 = vpop.eup %6887  ;;  %v5940_v53 = vadd.f32 %v11340_v33, %v5906_v21  ;;  %v5548_v51 = vmul.f32 %v6886_v11, %v5515_v62  ;;  %6889 = vrsqrt.f32 %v11358_v49  ;;  %v11377_v30 = vadd.f32 %v5139_v13, %v11023_v63 }
 0xe9e   :  { %v5628_v54 = vmul.f32 %v6888_v3, %v11347_v12  ;;  %6891 = vrsqrt.f32 %v11366_v5  ;;  %vm5554_vm4 = vweird.f32 %v6886_v11  ;;  %vm5634_vm5 = vweird.f32 %v6888_v3 }
 0xe9f   :  { %5972 = vst.msk [vmem:[%s11935_s8 + $0x28] sm:$0xff] %vm158_vm0, %v5940_v53  ;;  %v5549_v2 = vmul.f32 %v6886_v11, %v5548_v51  ;;  %v5261_v0 = vsel %vm158_vm0, %v11377_v30, 0.0  ;;  %vm5555_vm7 = vmor %vm5553_vm3, %vm5554_vm4  ;;  %vm5563_vm11 = vweird.f32 %v11358_v49  ;;  %vm5583_vm12 = vweird.f32 %v11366_v5 }
 0xea0   :  { %v5629_v44 = vmul.f32 %v6888_v3, %v5628_v54  ;;  %v5401_v36 = vpop.xlane.xlu0 %5400  ;;  %5262 = vadd.xlane.f32.xlu1 %v5261_v0  ;;  %vm5635_vm8 = vmor %vm5633_vm6, %vm5634_vm5 }
 0xea1   :  { %v5550_v22 = vmul.f32 0.5, %v5549_v2  ;;  %v5407_v37 = vpop.xlane.xlu2 %5406  ;;  %v5487_v57 = vmul.f32 %v5401_v36, %v10240_v48  ;;  %v4957_v19 = vpop.f32.mrf.mxu3 }
 0xea2   :  { %v5630_v4 = vmul.f32 0.5, %v5629_v44  ;;  %v5489_v24 = vmul.f32 %v5407_v37, %v10240_v48  ;;  %v5140_v63 = vpop.f32.mrf.mxu0  ;;  %v4958_v21 = vadd.f32 %v11033_v26, %v4957_v19 }
 0xea3   :  { %v11384_v29 = vpop.eup %6889  ;;  %v5551_v59 = vsub.f32 1.5, %v5550_v22  ;;  %v11386_v55 = vadd.f32 1e-05, %v5487_v57  ;;  %v5141_v14 = vadd.f32 %v11363_v32, %v5140_v63  ;;  %v4990_v22 = vmax.f32 %v4956_v58, 0.0 }
 0xea4   :  { %v6892_v13 = vpop.eup %6891  ;;  %v5631_v53 = vsub.f32 1.5, %v5630_v4  ;;  %v5558_v51 = vmul.f32 %v11384_v29, %v11358_v49  ;;  %v11391_v54 = vadd.f32 1e-05, %v5489_v24  ;;  %vm5564_vm9 = vweird.f32 %v11384_v29 }
 0xea5   :  { %v5552_v2 = vmul.f32 %v6886_v11, %v5551_v59  ;;  %v5578_v44 = vmul.f32 %v6892_v13, %v11366_v5  ;;  %6893 = vrsqrt.f32 %v11386_v55  ;;  %v4991_v12 = vmax.f32 %v4958_v21, 0.0  ;;  %vm5565_vm13 = vmor %vm5563_vm11, %vm5564_vm9 }
 0xea6   :  { %v5632_v26 = vmul.f32 %v6888_v3, %v5631_v53  ;;  %v5559_v36 = vmul.f32 %v11384_v29, %v5558_v51  ;;  %6895 = vrsqrt.f32 %v11391_v54  ;;  %v11405_v62 = vadd.f32 %v5141_v14, %v11026_v38 }
 0xea7   :  { %v5556_v37 = vsel %vm5555_vm7, %v6886_v11, %v5552_v2  ;;  %v5579_v0 = vmul.f32 %v6892_v13, %v5578_v44  ;;  %v5007_v59 = vpack.c.bf16 %v4991_v12, %v4990_v22  ;;  %vm5584_vm10 = vweird.f32 %v6892_v13 }
 0xea8   :  { %v5867_v57 = vmul.f32 %v5556_v37, %v11193_v7  ;;  %v5636_v19 = vsel %vm5635_vm8, %v6888_v3, %v5632_v26  ;;  %v5560_v4 = vmul.f32 0.5, %v5559_v36  ;;  %v5410_v24 = vpop.xlane.xlu0 %5409  ;;  %v5264_v7 = vsel %vm158_vm0, %v11405_v62, 0.0  ;;  %vm5585_vm14 = vmor %vm5583_vm12, %vm5584_vm10 }
 0xea9   :  { %v5875_v63 = vmul.f32 %v5636_v19, %v11208_v47  ;;  %v5580_v58 = vmul.f32 0.5, %v5579_v0  ;;  %v5416_v53 = vpop.xlane.xlu2 %5415  ;;  %v5490_v11 = vmul.f32 %v5410_v24, %v10240_v48  ;;  %5265 = vadd.xlane.f32.xlu2 %v5264_v7  ;;  %5157 = vmatmul.bf16.gmra.mxu0 %v5007_v59  ;;  %vm5593_vm2 = vweird.f32 %v11386_v55 }
 0xeaa   :  { %v5901_v51 = vmul.f32 %v11333_v46, %v5867_v57  ;;  %v5561_v2 = vsub.f32 1.5, %v5560_v4  ;;  %v5492_v21 = vmul.f32 %v5416_v53, %v10240_v48  ;;  %vm5613_vm3 = vweird.f32 %v11391_v54 }
 0xeab   :  { %v6894_v3 = vpop.eup %6893  ;;  %v5909_v38 = vmul.f32 %v11333_v46, %v5875_v63  ;;  %v5581_v14 = vsub.f32 1.5, %v5580_v58  ;;  %v11414_v47 = vadd.f32 1e-05, %v5490_v11 }
 0xeac   :  { %v6896_v44 = vpop.eup %6895  ;;  %v5935_v26 = vadd.f32 %v11340_v33, %v5901_v51  ;;  %v5562_v36 = vmul.f32 %v11384_v29, %v5561_v2  ;;  %v5588_v22 = vmul.f32 %v6894_v3, %v11386_v55  ;;  %v11431_v19 = vadd.f32 1e-05, %v5492_v21 }
 0xead   :  { %v5943_v37 = vadd.f32 %v11340_v33, %v5909_v38  ;;  %v5582_v0 = vmul.f32 %v6892_v13, %v5581_v14  ;;  %v5608_v12 = vmul.f32 %v6896_v44, %v11391_v54  ;;  %6897 = vrsqrt.f32 %v11414_v47  ;;  %v5422_v5 = vpop.xlane.xlu1 %5421 }
 0xeae   :  { %5967 = vst.msk [vmem:[%s11935_s8] sm:$0xff] %vm158_vm0, %v5935_v26  ;;  %v5566_v49 = vsel %vm5565_vm13, %v11384_v29, %v5562_v36  ;;  %v5589_v57 = vmul.f32 %v6894_v3, %v5588_v22  ;;  %6899 = vrsqrt.f32 %v11431_v19  ;;  %v5494_v51 = vmul.f32 %v5422_v5, %v10240_v48 }
 0xeaf   :  { %5975 = vst.msk [vmem:[%s11935_s8 + $0x40] sm:$0xff] %vm158_vm0, %v5943_v37  ;;  %v5586_v4 = vsel %vm5585_vm14, %v6892_v13, %v5582_v0  ;;  %v5868_v24 = vmul.f32 %v5566_v49, %v11211_v10  ;;  %v5609_v63 = vmul.f32 %v6896_v44, %v5608_v12  ;;  %vm5614_vm15 = vweird.f32 %v6896_v44 }
 0xeb0   :  { %v5870_v58 = vmul.f32 %v5586_v4, %v11218_v20  ;;  %v5590_v59 = vmul.f32 0.5, %v5589_v57  ;;  %v5419_v29 = vpop.xlane.xlu0 %5418  ;;  %vm5594_vm1 = vweird.f32 %v6894_v3  ;;  %v11446_v20 = vadd.f32 1e-05, %v5494_v51  ;;  %vm5615_vm5 = vmor %vm5613_vm3, %vm5614_vm15 }
 0xeb1   :  { %v5902_v53 = vmul.f32 %v11333_v46, %v5868_v24  ;;  %v5610_v11 = vmul.f32 0.5, %v5609_v63  ;;  %v5493_v2 = vmul.f32 %v5419_v29, %v10240_v48  ;;  %vm5595_vm4 = vmor %vm5593_vm2, %vm5594_vm1  ;;  %vm5623_vm8 = vweird.f32 %v11414_v47 }
 0xeb2   :  { %v5904_v21 = vmul.f32 %v11333_v46, %v5870_v58  ;;  %v5591_v13 = vsub.f32 1.5, %v5590_v59  ;;  %6901 = vrsqrt.f32 %v11446_v20  ;;  %vm5643_vm9 = vweird.f32 %v11431_v19 }
 0xeb3   :  { %v5936_v10 = vadd.f32 %v11340_v33, %v5902_v53  ;;  %v5611_v7 = vsub.f32 1.5, %v5610_v11  ;;  %v11448_v38 = vadd.f32 1e-05, %v5493_v2  ;;  %v6898_v14 = vpop.eup %6897  ;;  %vm5663_vm14 = vweird.f32 %v11446_v20 }
 0xeb4   :  { %v5938_v26 = vadd.f32 %v11340_v33, %v5904_v21  ;;  %v5592_v36 = vmul.f32 %v6894_v3, %v5591_v13  ;;  %v5618_v37 = vmul.f32 %v6898_v14, %v11414_v47  ;;  %v6900_v0 = vpop.eup %6899  ;;  %vm5624_vm6 = vweird.f32 %v6898_v14 }
 0xeb5   :  { %5968 = vst.msk [vmem:[%s11935_s8 + $0x8] sm:$0xff] %vm158_vm0, %v5936_v10  ;;  %v5612_v22 = vmul.f32 %v6896_v44, %v5611_v7  ;;  %6903 = vrsqrt.f32 %v11448_v38  ;;  %v5638_v54 = vmul.f32 %v6900_v0, %v11431_v19  ;;  %v11468_v4 = vpop.xlane.xlu2 %5247  ;;  %vm5644_vm7 = vweird.f32 %v6900_v0  ;;  %vm5625_vm10 = vmor %vm5623_vm8, %vm5624_vm6 }
 0xeb6   :  { %5970 = vst.msk [vmem:[%s11935_s8 + $0x18] sm:$0xff] %vm158_vm0, %v5938_v26  ;;  %v5596_v55 = vsel %vm5595_vm4, %v6894_v3, %v5592_v36  ;;  %v5619_v5 = vmul.f32 %v6898_v14, %v5618_v37  ;;  %vm5645_vm11 = vmor %vm5643_vm9, %vm5644_vm7  ;;  %vm5653_vm1 = vweird.f32 %v11448_v38 }
 0xeb7   :  { %v5616_v12 = vsel %vm5615_vm5, %v6896_v44, %v5612_v22  ;;  %v5871_v49 = vmul.f32 %v5596_v55, %v11229_v41  ;;  %v5639_v63 = vmul.f32 %v6900_v0, %v5638_v54 }
 0xeb8   :  { %v5873_v57 = vmul.f32 %v5616_v12, %v11233_v50  ;;  %v5620_v59 = vmul.f32 0.5, %v5619_v5  ;;  %v6902_v29 = vpop.eup %6901 }
 0xeb9   :  { %v5905_v24 = vmul.f32 %v11333_v46, %v5871_v49  ;;  %v5640_v53 = vmul.f32 0.5, %v5639_v63  ;;  %v5658_v50 = vmul.f32 %v6902_v29, %v11446_v20  ;;  %vm5664_vm12 = vweird.f32 %v6902_v29 }
 0xeba   :  { %v5907_v58 = vmul.f32 %v11333_v46, %v5873_v57  ;;  %v5621_v11 = vsub.f32 1.5, %v5620_v59  ;;  %vm5665_vm15 = vmor %vm5663_vm14, %vm5664_vm12 }
 0xebb   :  { %v5939_v3 = vadd.f32 %v11340_v33, %v5905_v24  ;;  %v6904_v44 = vpop.eup %6903  ;;  %v5641_v51 = vsub.f32 1.5, %v5640_v53  ;;  %v5659_v13 = vmul.f32 %v6902_v29, %v5658_v50 }
 0xebc   :  { %v5941_v41 = vadd.f32 %v11340_v33, %v5907_v58  ;;  %v5648_v2 = vmul.f32 %v6904_v44, %v11448_v38  ;;  %v5622_v21 = vmul.f32 %v6898_v14, %v5621_v11  ;;  %vm5654_vm13 = vweird.f32 %v6904_v44 }
 0xebd   :  { %5971 = vst.msk [vmem:[%s11935_s8 + $0x20] sm:$0xff] %vm158_vm0, %v5939_v3  ;;  %v5642_v10 = vmul.f32 %v6900_v0, %v5641_v51  ;;  %v5660_v22 = vmul.f32 0.5, %v5659_v13  ;;  %vm5655_vm2 = vmor %vm5653_vm1, %vm5654_vm13 }
 0xebe   :  { %5973 = vst.msk [vmem:[%s11935_s8 + $0x30] sm:$0xff] %vm158_vm0, %v5941_v41  ;;  %v5649_v7 = vmul.f32 %v6904_v44, %v5648_v2  ;;  %v5626_v36 = vsel %vm5625_vm10, %v6898_v14, %v5622_v21 }
 0xebf   :  { %v5143_v26 = vpop.f32.mrf.mxu0  ;;  %v5646_v12 = vsel %vm5645_vm11, %v6900_v0, %v5642_v10  ;;  %v5874_v49 = vmul.f32 %v5626_v36, %v11243_v61  ;;  %v5661_v5 = vsub.f32 1.5, %v5660_v22 }
 0xec0   :  { %v5144_v37 = vadd.f32 %v11363_v32, %v5143_v26  ;;  %v5425_v55 = vpop.xlane.xlu2 %5424  ;;  %v5650_v54 = vmul.f32 0.5, %v5649_v7  ;;  %v5876_v47 = vmul.f32 %v5646_v12, %v11247_v52 }
 0xec1   :  { %v5495_v57 = vmul.f32 %v5425_v55, %v10240_v48  ;;  %v5908_v24 = vmul.f32 %v11333_v46, %v5874_v49  ;;  %v5662_v0 = vmul.f32 %v6902_v29, %v5661_v5 }
 0xec2   :  { %v11491_v19 = vadd.f32 %v5144_v37, %v11079_v6  ;;  %v5651_v14 = vsub.f32 1.5, %v5650_v54  ;;  %v5910_v58 = vmul.f32 %v11333_v46, %v5876_v47 }
 0xec3   :  { %v5527_v63 = vadd.f32 1e-05, %v5495_v57  ;;  %v5942_v52 = vadd.f32 %v11340_v33, %v5908_v24  ;;  %v5666_v3 = vsel %vm5665_vm15, %v6902_v29, %v5662_v0 }
 0xec4   :  { %v5267_v61 = vsel %vm158_vm0, %v11491_v19, 0.0  ;;  %v5652_v59 = vmul.f32 %v6904_v44, %v5651_v14  ;;  %v5944_v6 = vadd.f32 %v11340_v33, %v5910_v58  ;;  %v5878_v20 = vmul.f32 %v5666_v3, %v11261_v34 }
 0xec5   :  { %6905 = vrsqrt.f32 %v5527_v63  ;;  %5268 = vadd.xlane.f32.xlu0 %v5267_v61  ;;  %5974 = vst.msk [vmem:[%s11935_s8 + $0x38] sm:$0xff] %vm158_vm0, %v5942_v52  ;;  %vm5673_vm4 = vweird.f32 %v5527_v63 }
 0xec6   :  { %v5656_v53 = vsel %vm5655_vm2, %v6904_v44, %v5652_v59  ;;  %5976 = vst.msk [vmem:[%s11935_s8 + $0x48] sm:$0xff] %vm158_vm0, %v5944_v6  ;;  %v5912_v50 = vmul.f32 %v11333_v46, %v5878_v20 }
 0xec7   :  { %v5145_v41 = vpop.f32.mrf.mxu0  ;;  %v5877_v38 = vmul.f32 %v5656_v53, %v11257_v39 }
 0xec8   :  { %v5146_v11 = vadd.f32 %v11363_v32, %v5145_v41  ;;  %v5428_v29 = vpop.xlane.xlu0 %5427  ;;  %v5946_v21 = vadd.f32 %v11340_v33, %v5912_v50 }
 0xec9   :  { %v5496_v51 = vmul.f32 %v5428_v29, %v10240_v48  ;;  %v5911_v2 = vmul.f32 %v11333_v46, %v5877_v38  ;;  %v5306_v29 = vmul.f32 %v11335_v28, %v10240_v48 }
 0xeca   :  { %v11516_v34 = vadd.f32 %v5146_v11, %v11082_v18  ;;  %5978 = vst.msk [vmem:[%s11935_s8 + $0x58] sm:$0xff] %vm158_vm0, %v5946_v21 }
 0xecb   :  { %v6906_v44 = vpop.eup %6905  ;;  %v5528_v13 = vadd.f32 1e-05, %v5496_v51  ;;  %v5945_v10 = vadd.f32 %v11340_v33, %v5911_v2 }
 0xecc   :  { %v5668_v7 = vmul.f32 %v6906_v44, %v5527_v63  ;;  %v5270_v39 = vsel %vm158_vm0, %v11516_v34, 0.0  ;;  %vm5674_vm3 = vweird.f32 %v6906_v44 }
 0xecd   :  { %6907 = vrsqrt.f32 %v5528_v13  ;;  %5271 = vadd.xlane.f32.xlu1 %v5270_v39  ;;  %5977 = vst.msk [vmem:[%s11935_s8 + $0x50] sm:$0xff] %vm158_vm0, %v5945_v10  ;;  %vm5675_vm5 = vmor %vm5673_vm4, %vm5674_vm3  ;;  %vm5683_vm7 = vweird.f32 %v5528_v13 }
 0xece   :  { %v5669_v18 = vmul.f32 %v6906_v44, %v5668_v7 }
 0xecf   :  { %v5148_v26 = vpop.f32.mrf.mxu0 }
 0xed0   :  { %v5670_v36 = vmul.f32 0.5, %v5669_v18  ;;  %v5149_v22 = vadd.f32 %v11363_v32, %v5148_v26  ;;  %v5251_v2 = vpop.xlane.xlu0 %5250 }
 0xed1   :  { %v5309_v21 = vmul.f32 %v5251_v2, %v10240_v48 }
 0xed2   :  { %v5671_v37 = vsub.f32 1.5, %v5670_v36  ;;  %v11532_v55 = vadd.f32 %v5149_v22, %v11111_v56  ;;  %v5245_v36 = vpop.xlane.xlu1 %5244 }
 0xed3   :  { %v6908_v12 = vpop.eup %6907  ;;  %v11577_v28 = vsub.f32 %v11308_v23, %v5309_v21 }
 0xed4   :  { %v5672_v49 = vmul.f32 %v6906_v44, %v5671_v37  ;;  %v5678_v54 = vmul.f32 %v6908_v12, %v5528_v13  ;;  %v5273_v57 = vsel %vm158_vm0, %v11532_v55, 0.0  ;;  %vm5684_vm6 = vweird.f32 %v6908_v12 }
 0xed5   :  { %5274 = vadd.xlane.f32.xlu2 %v5273_v57  ;;  %vm5685_vm8 = vmor %vm5683_vm7, %vm5684_vm6  ;;  %v5307_v37 = vmul.f32 %v5245_v36, %v10240_v48 }
 0xed6   :  { %v5676_v47 = vsel %vm5675_vm5, %v6906_v44, %v5672_v49  ;;  %v5679_v5 = vmul.f32 %v6908_v12, %v5678_v54  ;;  %v11569_v44 = vsub.f32 %v11205_v31, %v5306_v29  ;;  %v5373_v31 = vmul.f32 %v11577_v28, %v11577_v28 }
 0xed7   :  { %v5879_v24 = vmul.f32 %v5676_v47, %v11286_v42  ;;  %v5150_v14 = vpop.f32.mrf.mxu0  ;;  %v5305_v47 = vmul.f32 %v11328_v27, %v10240_v48 }
 0xed8   :  { %v5680_v58 = vmul.f32 0.5, %v5679_v5  ;;  %v5151_v0 = vadd.f32 %v11363_v32, %v5150_v14  ;;  %v5370_v13 = vmul.f32 %v11569_v44, %v11569_v44  ;;  %v5441_v18 = vsel %vm158_vm0, %v5373_v31, 0.0 }
 0xed9   :  { %v5913_v56 = vmul.f32 %v11333_v46, %v5879_v24 }
 0xeda   :  { %v5681_v61 = vsub.f32 1.5, %v5680_v58  ;;  %v11540_v63 = vadd.f32 %v5151_v0, %v11117_v35  ;;  %v5432_v10 = vsel %vm158_vm0, %v5370_v13, 0.0  ;;  %v5254_v57 = vpop.xlane.xlu1 %5253 }
 0xedb   :  { %v5947_v52 = vadd.f32 %v11340_v33, %v5913_v56  ;;  %v5310_v24 = vmul.f32 %v5254_v57, %v10240_v48 }
 0xedc   :  { %v5682_v59 = vmul.f32 %v6908_v12, %v5681_v61  ;;  %v5276_v6 = vsel %vm158_vm0, %v11540_v63, 0.0 }
 0xedd   :  { %5979 = vst.msk [vmem:[%s11935_s8 + $0x60] sm:$0xff] %vm158_vm0, %v5947_v52  ;;  %5277 = vadd.xlane.f32.xlu0 %v5276_v6  ;;  %v11613_v0 = vsub.f32 %v11296_v8, %v5310_v24 }
 0xede   :  { %v5686_v42 = vsel %vm5685_vm8, %v6908_v12, %v5682_v59 }
 0xedf   :  { %v5880_v3 = vmul.f32 %v5686_v42, %v11299_v9  ;;  %v5374_v59 = vmul.f32 %v11613_v0, %v11613_v0 }
 0xee1   :  { %v5914_v35 = vmul.f32 %v11333_v46, %v5880_v3 }
 0xee2   :  { %v5153_v20 = vpop.f32.mrf.mxu0 }
 0xee3   :  { %v5948_v53 = vadd.f32 %v11340_v33, %v5914_v35  ;;  %v5154_v41 = vadd.f32 %v11363_v32, %v5153_v20 }
 0xee5   :  { %5980 = vst.msk [vmem:[%s11935_s8 + $0x68] sm:$0xff] %vm158_vm0, %v5948_v53  ;;  %v11558_v38 = vadd.f32 %v5154_v41, %v11139_v16  ;;  %v5257_v53 = vpop.xlane.xlu2 %5256 }
 0xee7   :  { %v5279_v11 = vsel %vm158_vm0, %v11558_v38, 0.0 }
 0xee8   :  { %5280 = vadd.xlane.f32.xlu1 %v5279_v11  ;;  %v5311_v11 = vmul.f32 %v5257_v53, %v10240_v48 }
 0xeea   :  { %v5155_v9 = vpop.f32.mrf.mxu0  ;;  %v11647_v29 = vsub.f32 %v11312_v40, %v5311_v11 }
 0xeeb   :  { %v5156_v50 = vadd.f32 %v11363_v32, %v5155_v9 }
 0xeed   :  { %v11566_v51 = vadd.f32 %v5156_v50, %v11142_v43  ;;  %v5260_v43 = vpop.xlane.xlu0 %5259 }
 0xeee   :  { %v5312_v7 = vmul.f32 %v5260_v43, %v10240_v48 }
 0xeef   :  { %v5282_v16 = vsel %vm158_vm0, %v11566_v51, 0.0 }
 0xef0   :  { %5283 = vadd.xlane.f32.xlu2 %v5282_v16  ;;  %v11584_v39 = vsub.f32 %v11322_v15, %v5312_v7  ;;  %v11596_v15 = vsub.f32 %v11275_v45, %v5307_v37  ;;  %v11610_v45 = vsub.f32 %v11180_v60, %v5305_v47 }
 0xef2   :  { %v5376_v26 = vmul.f32 %v11584_v39, %v11584_v39  ;;  %v5369_v52 = vmul.f32 %v11610_v45, %v11610_v45 }
 0xef4   :  { %v5450_v23 = vsel %vm158_vm0, %v5376_v26, 0.0  ;;  %v5429_v42 = vsel %vm158_vm0, %v5369_v52, 0.0 }
 0xef8   :  { %5433 = vadd.xlane.f32.xlu2 %v5432_v10  ;;  %v5375_v10 = vmul.f32 %v11647_v29, %v11647_v29 }
 0xf00   :  { %5442 = vadd.xlane.f32.xlu2 %v5441_v18 }
 0xf08   :  { %5451 = vadd.xlane.f32.xlu2 %v5450_v23 }
 0xf13   :  { %v5263_v61 = vpop.xlane.xlu1 %5262 }
 0xf14   :  { %v5313_v60 = vmul.f32 %v5263_v61, %v10240_v48 }
 0xf16   :  { %v11634_v35 = vsub.f32 %v11377_v30, %v5313_v60 }
 0xf18   :  { %v5377_v9 = vmul.f32 %v11634_v35, %v11634_v35 }
 0xf1a   :  { %v5453_v16 = vsel %vm158_vm0, %v5377_v9, 0.0 }
 0xf1c   :  { %v5266_v21 = vpop.xlane.xlu2 %5265 }
 0xf1d   :  { %v5314_v13 = vmul.f32 %v5266_v21, %v10240_v48 }
 0xf1f   :  { %v11660_v40 = vsub.f32 %v11405_v62, %v5314_v13 }
 0xf21   :  { %v5378_v36 = vmul.f32 %v11660_v40, %v11660_v40 }
 0xf23   :  { %v5456_v37 = vsel %vm158_vm0, %v5378_v36, 0.0 }
 0xf26   :  { %v5158_v22 = vpop.f32.mrf.mxu0 }
 0xf27   :  { %v5159_v12 = vadd.f32 %v11363_v32, %v5158_v22 }
 0xf29   :  { %v11593_v49 = vadd.f32 %v5159_v12, %v11183_v1  ;;  %v5371_v1 = vmul.f32 %v11596_v15, %v11596_v15 }
 0xf2b   :  { %v5285_v54 = vsel %vm158_vm0, %v11593_v49, 0.0  ;;  %v5435_v56 = vsel %vm158_vm0, %v5371_v1, 0.0 }
 0xf2c   :  { %5286 = vadd.xlane.f32.xlu0 %v5285_v54 }
 0xf2e   :  { %v5160_v5 = vpop.f32.mrf.mxu0 }
 0xf2f   :  { %v5161_v14 = vadd.f32 %v11363_v32, %v5160_v5 }
 0xf31   :  { %v11607_v58 = vadd.f32 %v5161_v14, %v11186_v25  ;;  %v5308_v25 = vmul.f32 %v11468_v4, %v10240_v48  ;;  %v5444_v4 = vsel %vm158_vm0, %v5374_v59, 0.0 }
 0xf33   :  { %v5288_v27 = vsel %vm158_vm0, %v11607_v58, 0.0  ;;  %v11631_v3 = vsub.f32 %v11278_v17, %v5308_v25 }
 0xf34   :  { %5289 = vadd.xlane.f32.xlu1 %v5288_v27  ;;  %5436 = vadd.xlane.f32.xlu0 %v5435_v56 }
 0xf35   :  { %v5372_v30 = vmul.f32 %v11631_v3, %v11631_v3 }
 0xf37   :  { %v5438_v2 = vsel %vm158_vm0, %v5372_v30, 0.0 }
 0xf38   :  { %v5269_v32 = vpop.xlane.xlu0 %5268 }
 0xf39   :  { %v5315_v8 = vmul.f32 %v5269_v32, %v10240_v48 }
 0xf3b   :  { %v11627_v6 = vsub.f32 %v11491_v19, %v5315_v8 }
 0xf3c   :  { %5430 = vadd.xlane.f32.xlu1 %v5429_v42  ;;  %5445 = vadd.xlane.f32.xlu0 %v5444_v4 }
 0xf3d   :  { %v5379_v20 = vmul.f32 %v11627_v6, %v11627_v6 }
 0xf3f   :  { %v5459_v41 = vsel %vm158_vm0, %v5379_v20, 0.0 }
 0xf40   :  { %5460 = vadd.xlane.f32.xlu2 %v5459_v41  ;;  %v5272_v19 = vpop.xlane.xlu1 %5271 }
 0xf41   :  { %v5316_v17 = vmul.f32 %v5272_v19, %v10240_v48 }
 0xf43   :  { %v11650_v50 = vsub.f32 %v11516_v34, %v5316_v17  ;;  %v5447_v34 = vsel %vm158_vm0, %v5375_v10, 0.0 }
 0xf44   :  { %5439 = vadd.xlane.f32.xlu1 %v5438_v2  ;;  %5454 = vadd.xlane.f32.xlu0 %v5453_v16 }
 0xf45   :  { %v5380_v43 = vmul.f32 %v11650_v50, %v11650_v50 }
 0xf47   :  { %v5462_v7 = vsel %vm158_vm0, %v5380_v43, 0.0 }
 0xf48   :  { %v5275_v31 = vpop.xlane.xlu2 %5274 }
 0xf49   :  { %v5317_v26 = vmul.f32 %v5275_v31, %v10240_v48 }
 0xf4b   :  { %v11672_v62 = vsub.f32 %v11532_v55, %v5317_v26 }
 0xf4c   :  { %5448 = vadd.xlane.f32.xlu1 %v5447_v34  ;;  %5463 = vadd.xlane.f32.xlu0 %v5462_v7 }
 0xf4d   :  { %v5381_v57 = vmul.f32 %v11672_v62, %v11672_v62 }
 0xf50   :  { %v5278_v18 = vpop.xlane.xlu0 %5277 }
 0xf51   :  { %v5318_v23 = vmul.f32 %v5278_v18, %v10240_v48 }
 0xf53   :  { %v11669_v22 = vsub.f32 %v11540_v63, %v5318_v23  ;;  %v5465_v63 = vsel %vm158_vm0, %v5381_v57, 0.0 }
 0xf54   :  { %5457 = vadd.xlane.f32.xlu1 %v5456_v37 }
 0xf55   :  { %v5382_v12 = vmul.f32 %v11669_v22, %v11669_v22 }
 0xf57   :  { %v5468_v54 = vsel %vm158_vm0, %v5382_v12, 0.0 }
 0xf58   :  { %5469 = vadd.xlane.f32.xlu2 %v5468_v54 }
 0xf5b   :  { %v5281_v47 = vpop.xlane.xlu1 %5280 }
 0xf5c   :  { %v5319_v5 = vmul.f32 %v5281_v47, %v10240_v48  ;;  %5466 = vadd.xlane.f32.xlu1 %v5465_v63 }
 0xf5e   :  { %v11683_v55 = vsub.f32 %v11558_v38, %v5319_v5 }
 0xf60   :  { %v5383_v24 = vmul.f32 %v11683_v55, %v11683_v55 }
 0xf62   :  { %v5471_v14 = vsel %vm158_vm0, %v5383_v24, 0.0 }
 0xf63   :  { %v5284_v1 = vpop.xlane.xlu2 %5283  ;;  %5472 = vadd.xlane.f32.xlu0 %v5471_v14 }
 0xf64   :  { %v5320_v27 = vmul.f32 %v5284_v1, %v10240_v48 }
 0xf66   :  { %v11690_v56 = vsub.f32 %v11566_v51, %v5320_v27 }
 0xf68   :  { %v5384_v61 = vmul.f32 %v11690_v56, %v11690_v56 }
 0xf6a   :  { %v5474_v32 = vsel %vm158_vm0, %v5384_v61, 0.0 }
 0xf6b   :  { %v5434_v52 = vpop.xlane.xlu2 %5433  ;;  %5475 = vadd.xlane.f32.xlu1 %v5474_v32 }
 0xf6c   :  { %v5498_v38 = vmul.f32 %v5434_v52, %v10240_v48 }
 0xf6e   :  { %v5530_v25 = vadd.f32 1e-05, %v5498_v38 }
 0xf70   :  { %6909 = vrsqrt.f32 %v5530_v25  ;;  %vm5703_vm10 = vweird.f32 %v5530_v25 }
 0xf73   :  { %v5443_v60 = vpop.xlane.xlu2 %5442 }
 0xf74   :  { %v5501_v8 = vmul.f32 %v5443_v60, %v10240_v48 }
 0xf76   :  { %v6910_v59 = vpop.eup %6909  ;;  %v5533_v42 = vadd.f32 1e-05, %v5501_v8 }
 0xf77   :  { %v5698_v4 = vmul.f32 %v6910_v59, %v5530_v25  ;;  %vm5704_vm9 = vweird.f32 %v6910_v59 }
 0xf78   :  { %6911 = vrsqrt.f32 %v5533_v42  ;;  %vm5705_vm11 = vmor %vm5703_vm10, %vm5704_vm9  ;;  %vm5733_vm13 = vweird.f32 %v5533_v42 }
 0xf79   :  { %v5699_v51 = vmul.f32 %v6910_v59, %v5698_v4 }
 0xf7b   :  { %v5700_v20 = vmul.f32 0.5, %v5699_v51  ;;  %v5452_v53 = vpop.xlane.xlu2 %5451 }
 0xf7c   :  { %v5504_v41 = vmul.f32 %v5452_v53, %v10240_v48 }
 0xf7d   :  { %v5701_v19 = vsub.f32 1.5, %v5700_v20 }
 0xf7e   :  { %v6912_v11 = vpop.eup %6911  ;;  %v5536_v17 = vadd.f32 1e-05, %v5504_v41 }
 0xf7f   :  { %v5702_v30 = vmul.f32 %v6910_v59, %v5701_v19  ;;  %v5728_v9 = vmul.f32 %v6912_v11, %v5533_v42  ;;  %vm5734_vm12 = vweird.f32 %v6912_v11 }
 0xf80   :  { %6913 = vrsqrt.f32 %v5536_v17  ;;  %vm5735_vm14 = vmor %vm5733_vm13, %vm5734_vm12  ;;  %vm5763_vm1 = vweird.f32 %v5536_v17 }
 0xf81   :  { %v5706_v2 = vsel %vm5705_vm11, %v6910_v59, %v5702_v30  ;;  %v5729_v16 = vmul.f32 %v6912_v11, %v5728_v9 }
 0xf82   :  { %v5882_v21 = vmul.f32 %v5706_v2, %v11569_v44 }
 0xf83   :  { %v5730_v13 = vmul.f32 0.5, %v5729_v16 }
 0xf84   :  { %v5916_v10 = vmul.f32 %v11333_v46, %v5882_v21 }
 0xf85   :  { %v5731_v43 = vsub.f32 1.5, %v5730_v13 }
 0xf86   :  { %v6914_v34 = vpop.eup %6913  ;;  %v5950_v7 = vadd.f32 %v11340_v33, %v5916_v10 }
 0xf87   :  { %v5732_v31 = vmul.f32 %v6912_v11, %v5731_v43  ;;  %v5758_v18 = vmul.f32 %v6914_v34, %v5536_v17  ;;  %vm5764_vm15 = vweird.f32 %v6914_v34 }
 0xf88   :  { %5982 = vst.msk [vmem:[%s11935_s8 + $0x78] sm:$0xff] %vm158_vm0, %v5950_v7  ;;  %vm5765_vm2 = vmor %vm5763_vm1, %vm5764_vm15 }
 0xf89   :  { %v5736_v26 = vsel %vm5735_vm14, %v6912_v11, %v5732_v31  ;;  %v5759_v23 = vmul.f32 %v6914_v34, %v5758_v18 }
 0xf8a   :  { %v5885_v44 = vmul.f32 %v5736_v26, %v11577_v28 }
 0xf8b   :  { %v5760_v36 = vmul.f32 0.5, %v5759_v23 }
 0xf8c   :  { %v5919_v37 = vmul.f32 %v11333_v46, %v5885_v44 }
 0xf8d   :  { %v5761_v12 = vsub.f32 1.5, %v5760_v36 }
 0xf8e   :  { %v5953_v54 = vadd.f32 %v11340_v33, %v5919_v37 }
 0xf8f   :  { %v5762_v57 = vmul.f32 %v6914_v34, %v5761_v12 }
 0xf90   :  { %5985 = vst.msk [vmem:[%s11935_s8 + $0x90] sm:$0xff] %vm158_vm0, %v5953_v54 }
 0xf91   :  { %v5766_v47 = vsel %vm5765_vm2, %v6914_v34, %v5762_v57 }
 0xf92   :  { %v5888_v5 = vmul.f32 %v5766_v47, %v11584_v39 }
 0xf94   :  { %v5922_v28 = vmul.f32 %v11333_v46, %v5888_v5 }
 0xf96   :  { %v5956_v63 = vadd.f32 %v11340_v33, %v5922_v28 }
 0xf98   :  { %5988 = vst.msk [vmem:[%s11935_s8 + $0xa8] sm:$0xff] %vm158_vm0, %v5956_v63 }
 0xf9f   :  { %v5287_v24 = vpop.xlane.xlu0 %5286 }
 0xfa0   :  { %v5321_v14 = vmul.f32 %v5287_v24, %v10240_v48 }
 0xfa2   :  { %v11721_v1 = vsub.f32 %v11593_v49, %v5321_v14 }
 0xfa4   :  { %v5385_v27 = vmul.f32 %v11721_v1, %v11721_v1 }
 0xfa6   :  { %v5477_v39 = vsel %vm158_vm0, %v5385_v27, 0.0 }
 0xfa7   :  { %5478 = vadd.xlane.f32.xlu2 %v5477_v39  ;;  %v5437_v61 = vpop.xlane.xlu0 %5436  ;;  %v5290_v32 = vpop.xlane.xlu1 %5289 }
 0xfa8   :  { %v5499_v52 = vmul.f32 %v5437_v61, %v10240_v48  ;;  %v5322_v38 = vmul.f32 %v5290_v32, %v10240_v48 }
 0xfaa   :  { %v5531_v25 = vadd.f32 1e-05, %v5499_v52  ;;  %v11729_v60 = vsub.f32 %v11607_v58, %v5322_v38 }
 0xfac   :  { %6915 = vrsqrt.f32 %v5531_v25  ;;  %v5386_v49 = vmul.f32 %v11729_v60, %v11729_v60  ;;  %vm5713_vm4 = vweird.f32 %v5531_v25 }
 0xfae   :  { %v5480_v8 = vsel %vm158_vm0, %v5386_v49, 0.0 }
 0xfaf   :  { %v5446_v59 = vpop.xlane.xlu0 %5445  ;;  %5481 = vadd.xlane.f32.xlu0 %v5480_v8  ;;  %v5431_v42 = vpop.xlane.xlu1 %5430 }
 0xfb0   :  { %v5502_v4 = vmul.f32 %v5446_v59, %v10240_v48  ;;  %v5497_v51 = vmul.f32 %v5431_v42, %v10240_v48 }
 0xfb2   :  { %v6916_v53 = vpop.eup %6915  ;;  %v5534_v41 = vadd.f32 1e-05, %v5502_v4  ;;  %v11736_v19 = vadd.f32 1e-05, %v5497_v51 }
 0xfb3   :  { %v5461_v20 = vpop.xlane.xlu2 %5460  ;;  %v5708_v11 = vmul.f32 %v6916_v53, %v5531_v25  ;;  %vm5714_vm3 = vweird.f32 %v6916_v53 }
 0xfb4   :  { %v5507_v58 = vmul.f32 %v5461_v20, %v10240_v48  ;;  %6917 = vrsqrt.f32 %v5534_v41  ;;  %vm5715_vm5 = vmor %vm5713_vm4, %vm5714_vm3  ;;  %vm5743_vm6 = vweird.f32 %v5534_v41  ;;  %vm5693_vm11 = vweird.f32 %v11736_v19 }
 0xfb5   :  { %v5709_v30 = vmul.f32 %v6916_v53, %v5708_v11  ;;  %6919 = vrsqrt.f32 %v11736_v19 }
 0xfb6   :  { %v11739_v17 = vadd.f32 1e-05, %v5507_v58 }
 0xfb7   :  { %v5710_v9 = vmul.f32 0.5, %v5709_v30  ;;  %v5455_v2 = vpop.xlane.xlu0 %5454  ;;  %v5440_v16 = vpop.xlane.xlu1 %5439 }
 0xfb8   :  { %6921 = vrsqrt.f32 %v11739_v17  ;;  %v5505_v21 = vmul.f32 %v5455_v2, %v10240_v48  ;;  %v5500_v13 = vmul.f32 %v5440_v16, %v10240_v48  ;;  %vm5793_vm12 = vweird.f32 %v11739_v17  ;;  %v11789_v2 = vld [vmem:[%s11932_s6 + $0x3] ss:$0 sm:$0xff] }
 0xfb9   :  { %v5711_v10 = vsub.f32 1.5, %v5710_v9 }
 0xfba   :  { %v6918_v43 = vpop.eup %6917  ;;  %v11745_v34 = vadd.f32 1e-05, %v5505_v21  ;;  %v11747_v7 = vadd.f32 1e-05, %v5500_v13 }
 0xfbb   :  { %v6920_v31 = vpop.eup %6919  ;;  %v5712_v18 = vmul.f32 %v6916_v53, %v5711_v10  ;;  %v5738_v26 = vmul.f32 %v6918_v43, %v5534_v41  ;;  %vm5744_vm7 = vweird.f32 %v6918_v43 }
 0xfbc   :  { %v5688_v44 = vmul.f32 %v6920_v31, %v11736_v19  ;;  %6923 = vrsqrt.f32 %v11745_v34  ;;  %vm5694_vm8 = vweird.f32 %v6920_v31  ;;  %vm5745_vm10 = vmor %vm5743_vm6, %vm5744_vm7  ;;  %vm5773_vm15 = vweird.f32 %v11745_v34 }
 0xfbd   :  { %v5716_v36 = vsel %vm5715_vm5, %v6916_v53, %v5712_v18  ;;  %v5739_v37 = vmul.f32 %v6918_v43, %v5738_v26  ;;  %6925 = vrsqrt.f32 %v11747_v7  ;;  %vm5695_vm13 = vmor %vm5693_vm11, %vm5694_vm8  ;;  %v11800_v18 = vld [vmem:[%s11932_s6 + $0x4] ss:$0 sm:$0xff]  ;;  %vm5723_vm4 = vweird.f32 %v11747_v7 }
 0xfbe   :  { %v6922_v23 = vpop.eup %6921  ;;  %v5883_v54 = vmul.f32 %v5716_v36, %v11596_v15  ;;  %v5689_v57 = vmul.f32 %v6920_v31, %v5688_v44 }
 0xfbf   :  { %v5788_v12 = vmul.f32 %v6922_v23, %v11739_v17  ;;  %v5740_v47 = vmul.f32 0.5, %v5739_v37  ;;  %v5464_v28 = vpop.xlane.xlu0 %5463  ;;  %v5449_v63 = vpop.xlane.xlu1 %5448  ;;  %vm5794_vm9 = vweird.f32 %v6922_v23 }
 0xfc0   :  { %v5917_v24 = vmul.f32 %v11333_v46, %v5883_v54  ;;  %v5690_v14 = vmul.f32 0.5, %v5689_v57  ;;  %v5508_v27 = vmul.f32 %v5464_v28, %v10240_v48  ;;  %v5503_v39 = vmul.f32 %v5449_v63, %v10240_v48  ;;  %vm5795_vm14 = vmor %vm5793_vm12, %vm5794_vm9 }
 0xfc1   :  { %v5789_v5 = vmul.f32 %v6922_v23, %v5788_v12  ;;  %v5741_v61 = vsub.f32 1.5, %v5740_v47 }
 0xfc2   :  { %v11757_v15 = vpop.eup %6923  ;;  %v5951_v52 = vadd.f32 %v11340_v33, %v5917_v24  ;;  %v5691_v38 = vsub.f32 1.5, %v5690_v14  ;;  %v11760_v25 = vadd.f32 1e-05, %v5508_v27  ;;  %v11762_v49 = vadd.f32 1e-05, %v5503_v39 }
 0xfc3   :  { %v5790_v32 = vmul.f32 0.5, %v5789_v5  ;;  %v5742_v8 = vmul.f32 %v6918_v43, %v5741_v61  ;;  %v5768_v59 = vmul.f32 %v11757_v15, %v11745_v34  ;;  %v11766_v42 = vpop.eup %6925  ;;  %vm5774_vm1 = vweird.f32 %v11757_v15 }
 0xfc4   :  { %5983 = vst.msk [vmem:[%s11935_s8 + $0x80] sm:$0xff] %vm158_vm0, %v5951_v52  ;;  %v5692_v33 = vmul.f32 %v6920_v31, %v5691_v38  ;;  %6927 = vrsqrt.f32 %v11760_v25  ;;  %v5718_v53 = vmul.f32 %v11766_v42, %v11747_v7  ;;  %vm5724_vm2 = vweird.f32 %v11766_v42  ;;  %vm5775_vm3 = vmor %vm5773_vm15, %vm5774_vm1 }
 0xfc5   :  { %v5791_v46 = vsub.f32 1.5, %v5790_v32  ;;  %v5746_v4 = vsel %vm5745_vm10, %v6918_v43, %v5742_v8  ;;  %v5769_v20 = vmul.f32 %v11757_v15, %v5768_v59  ;;  %6929 = vrsqrt.f32 %v11762_v49  ;;  %vm5725_vm5 = vmor %vm5723_vm4, %vm5724_vm2 }
 0xfc6   :  { %v5886_v58 = vmul.f32 %v5746_v4, %v11613_v0  ;;  %v5696_v41 = vsel %vm5695_vm13, %v6920_v31, %v5692_v33  ;;  %v5719_v30 = vmul.f32 %v11766_v42, %v5718_v53  ;;  %vm5803_vm7 = vweird.f32 %v11760_v25 }
 0xfc7   :  { %v5792_v51 = vmul.f32 %v6922_v23, %v5791_v46  ;;  %v5881_v19 = vmul.f32 %v5696_v41, %v11610_v45  ;;  %v5770_v17 = vmul.f32 0.5, %v5769_v20  ;;  %v5458_v9 = vpop.xlane.xlu1 %5457  ;;  %vm5753_vm10 = vweird.f32 %v11762_v49 }
 0xfc8   :  { %v5920_v0 = vmul.f32 %v11789_v2, %v5886_v58  ;;  %v5506_v21 = vmul.f32 %v5458_v9, %v10240_v48  ;;  %v5720_v10 = vmul.f32 0.5, %v5719_v30 }
 0xfc9   :  { %v5796_v11 = vsel %vm5795_vm14, %v6922_v23, %v5792_v51  ;;  %v5915_v45 = vmul.f32 %v11789_v2, %v5881_v19  ;;  %v5771_v13 = vsub.f32 1.5, %v5770_v17 }
 0xfca   :  { %v5891_v16 = vmul.f32 %v5796_v11, %v11627_v6  ;;  %v6928_v31 = vpop.eup %6927  ;;  %v5954_v26 = vadd.f32 %v11800_v18, %v5920_v0  ;;  %v11804_v23 = vadd.f32 1e-05, %v5506_v21  ;;  %v5721_v12 = vsub.f32 1.5, %v5720_v10 }
 0xfcb   :  { %v5470_v43 = vpop.xlane.xlu2 %5469  ;;  %v5949_v36 = vadd.f32 %v11800_v18, %v5915_v45  ;;  %v5772_v37 = vmul.f32 %v11757_v15, %v5771_v13  ;;  %v5798_v54 = vmul.f32 %v6928_v31, %v11760_v25  ;;  %v6930_v57 = vpop.eup %6929  ;;  %vm5804_vm6 = vweird.f32 %v6928_v31 }
 0xfcc   :  { %v5925_v6 = vmul.f32 %v11789_v2, %v5891_v16  ;;  %v5510_v44 = vmul.f32 %v5470_v43, %v10240_v48  ;;  %5986 = vst.msk [vmem:[%s11935_s8 + $0x98] sm:$0xff] %vm158_vm0, %v5954_v26  ;;  %6931 = vrsqrt.f32 %v11804_v23  ;;  %v5722_v28 = vmul.f32 %v11766_v42, %v5721_v12  ;;  %vm5805_vm9 = vmor %vm5803_vm7, %vm5804_vm6 }
 0xfcd   :  { %5981 = vst.msk [vmem:[%s11935_s8 + $0x70] sm:$0xff] %vm158_vm0, %v5949_v36  ;;  %v5776_v5 = vsel %vm5775_vm3, %v11757_v15, %v5772_v37  ;;  %v5799_v63 = vmul.f32 %v6928_v31, %v5798_v54  ;;  %v5748_v24 = vmul.f32 %v6930_v57, %v11762_v49  ;;  %vm5754_vm8 = vweird.f32 %v6930_v57 }
 0xfce   :  { %v5959_v47 = vadd.f32 %v11800_v18, %v5925_v6  ;;  %v5889_v34 = vmul.f32 %v5776_v5, %v11634_v35  ;;  %v11835_v7 = vadd.f32 1e-05, %v5510_v44  ;;  %v5726_v14 = vsel %vm5725_vm5, %v11766_v42, %v5722_v28  ;;  %vm5755_vm11 = vmor %vm5753_vm10, %vm5754_vm8 }
 0xfcf   :  { %v5800_v27 = vmul.f32 0.5, %v5799_v63  ;;  %v5749_v39 = vmul.f32 %v6930_v57, %v5748_v24  ;;  %v5467_v61 = vpop.xlane.xlu1 %5466  ;;  %v5884_v15 = vmul.f32 %v5726_v14, %v11631_v3  ;;  %vm5783_vm13 = vweird.f32 %v11804_v23 }
 0xfd0   :  { %5991 = vst.msk [vmem:[%s11935_s8 + $0xc0] sm:$0xff] %vm158_vm0, %v5959_v47  ;;  %v5923_v32 = vmul.f32 %v11789_v2, %v5889_v34  ;;  %6933 = vrsqrt.f32 %v11835_v7  ;;  %v5509_v35 = vmul.f32 %v5467_v61, %v10240_v48  ;;  %vm5823_vm1 = vweird.f32 %v11835_v7 }
 0xfd1   :  { %v5801_v52 = vsub.f32 1.5, %v5800_v27  ;;  %v5750_v38 = vmul.f32 0.5, %v5749_v39  ;;  %v5918_v59 = vmul.f32 %v11789_v2, %v5884_v15 }
 0xfd2   :  { %v6932_v8 = vpop.eup %6931  ;;  %v5957_v46 = vadd.f32 %v11800_v18, %v5923_v32  ;;  %v5541_v51 = vadd.f32 1e-05, %v5509_v35 }
 0xfd3   :  { %v5802_v42 = vmul.f32 %v6928_v31, %v5801_v52  ;;  %v5751_v33 = vsub.f32 1.5, %v5750_v38  ;;  %v5778_v4 = vmul.f32 %v6932_v8, %v11804_v23  ;;  %v5952_v3 = vadd.f32 %v11800_v18, %v5918_v59 }
 0xfd4   :  { %5989 = vst.msk [vmem:[%s11935_s8 + $0xb0] sm:$0xff] %vm158_vm0, %v5957_v46  ;;  %6935 = vrsqrt.f32 %v5541_v51  ;;  %vm5784_vm12 = vweird.f32 %v6932_v8  ;;  %vm5813_vm4 = vweird.f32 %v5541_v51 }
 0xfd5   :  { %v5806_v53 = vsel %vm5805_vm9, %v6928_v31, %v5802_v42  ;;  %v5752_v58 = vmul.f32 %v6930_v57, %v5751_v33  ;;  %v5779_v25 = vmul.f32 %v6932_v8, %v5778_v4  ;;  %5984 = vst.msk [vmem:[%s11935_s8 + $0x88] sm:$0xff] %vm158_vm0, %v5952_v3  ;;  %vm5785_vm14 = vmor %vm5783_vm13, %vm5784_vm12 }
 0xfd6   :  { %v5473_v20 = vpop.xlane.xlu0 %5472  ;;  %v6934_v19 = vpop.eup %6933  ;;  %v5892_v11 = vmul.f32 %v5806_v53, %v11650_v50 }
 0xfd7   :  { %v5511_v41 = vmul.f32 %v5473_v20, %v10240_v48  ;;  %v5756_v17 = vsel %vm5755_vm11, %v6930_v57, %v5752_v58  ;;  %v5780_v49 = vmul.f32 0.5, %v5779_v25  ;;  %v5818_v30 = vmul.f32 %v6934_v19, %v11835_v7 }
 0xfd8   :  { %v5926_v9 = vmul.f32 %v11789_v2, %v5892_v11  ;;  %v5887_v0 = vmul.f32 %v5756_v17, %v11647_v29  ;;  %vm5824_vm15 = vweird.f32 %v6934_v19 }
 0xfd9   :  { %v5543_v16 = vadd.f32 1e-05, %v5511_v41  ;;  %v5781_v21 = vsub.f32 1.5, %v5780_v49  ;;  %v5819_v45 = vmul.f32 %v6934_v19, %v5818_v30  ;;  %vm5825_vm2 = vmor %vm5823_vm1, %vm5824_vm15 }
 0xfda   :  { %v5960_v13 = vadd.f32 %v11800_v18, %v5926_v9  ;;  %v5921_v10 = vmul.f32 %v11789_v2, %v5887_v0  ;;  %v6936_v31 = vpop.eup %6935 }
 0xfdb   :  { %6937 = vrsqrt.f32 %v5543_v16  ;;  %v5782_v50 = vmul.f32 %v6932_v8, %v5781_v21  ;;  %v5820_v43 = vmul.f32 0.5, %v5819_v45  ;;  %v5808_v36 = vmul.f32 %v6936_v31, %v5541_v51 }
 0xfdc   :  { %5992 = vst.msk [vmem:[%s11935_s8 + $0xc8] sm:$0xff] %vm158_vm0, %v5960_v13  ;;  %v5955_v29 = vadd.f32 %v11800_v18, %v5921_v10  ;;  %vm5814_vm3 = vweird.f32 %v6936_v31  ;;  %vm5833_vm7 = vweird.f32 %v5543_v16 }
 0xfdd   :  { %v5786_v6 = vsel %vm5785_vm14, %v6932_v8, %v5782_v50  ;;  %v5821_v44 = vsub.f32 1.5, %v5820_v43  ;;  %v5809_v54 = vmul.f32 %v6936_v31, %v5808_v36  ;;  %vm5815_vm5 = vmor %vm5813_vm4, %vm5814_vm3 }
 0xfde   :  { %v5476_v26 = vpop.xlane.xlu1 %5475  ;;  %5987 = vst.msk [vmem:[%s11935_s8 + $0xa0] sm:$0xff] %vm158_vm0, %v5955_v29  ;;  %v5890_v23 = vmul.f32 %v5786_v6, %v11660_v40 }
 0xfdf   :  { %v5512_v37 = vmul.f32 %v5476_v26, %v10240_v48  ;;  %v5822_v12 = vmul.f32 %v6934_v19, %v5821_v44  ;;  %v5810_v63 = vmul.f32 0.5, %v5809_v54 }
 0xfe0   :  { %v5924_v47 = vmul.f32 %v11789_v2, %v5890_v23 }
 0xfe1   :  { %v6938_v57 = vpop.eup %6937  ;;  %v5544_v5 = vadd.f32 1e-05, %v5512_v37  ;;  %v5826_v28 = vsel %vm5825_vm2, %v6934_v19, %v5822_v12  ;;  %v5811_v40 = vsub.f32 1.5, %v5810_v63 }
 0xfe2   :  { %v5828_v24 = vmul.f32 %v6938_v57, %v5543_v16  ;;  %v5958_v34 = vadd.f32 %v11800_v18, %v5924_v47  ;;  %v5894_v14 = vmul.f32 %v5826_v28, %v11669_v22  ;;  %vm5834_vm6 = vweird.f32 %v6938_v57 }
 0xfe3   :  { %6939 = vrsqrt.f32 %v5544_v5  ;;  %v5812_v39 = vmul.f32 %v6936_v31, %v5811_v40  ;;  %vm5835_vm8 = vmor %vm5833_vm7, %vm5834_vm6  ;;  %vm5843_vm10 = vweird.f32 %v5544_v5 }
 0xfe4   :  { %v5829_v27 = vmul.f32 %v6938_v57, %v5828_v24  ;;  %5990 = vst.msk [vmem:[%s11935_s8 + $0xb8] sm:$0xff] %vm158_vm0, %v5958_v34  ;;  %v5928_v7 = vmul.f32 %v11789_v2, %v5894_v14 }
 0xfe5   :  { %v5816_v15 = vsel %vm5815_vm5, %v6936_v31, %v5812_v39 }
 0xfe6   :  { %v5830_v61 = vmul.f32 0.5, %v5829_v27  ;;  %v5962_v32 = vadd.f32 %v11800_v18, %v5928_v7  ;;  %v5893_v38 = vmul.f32 %v5816_v15, %v11672_v62 }
 0xfe8   :  { %v5831_v52 = vsub.f32 1.5, %v5830_v61  ;;  %5994 = vst.msk [vmem:[%s11935_s8 + $0xd8] sm:$0xff] %vm158_vm0, %v5962_v32  ;;  %v5927_v46 = vmul.f32 %v11789_v2, %v5893_v38 }
 0xfe9   :  { %v6940_v22 = vpop.eup %6939 }
 0xfea   :  { %v5832_v35 = vmul.f32 %v6938_v57, %v5831_v52  ;;  %v5838_v8 = vmul.f32 %v6940_v22, %v5544_v5  ;;  %v5961_v33 = vadd.f32 %v11800_v18, %v5927_v46  ;;  %vm5844_vm9 = vweird.f32 %v6940_v22 }
 0xfeb   :  { %vm5845_vm11 = vmor %vm5843_vm10, %vm5844_vm9 }
 0xfec   :  { %v5836_v59 = vsel %vm5835_vm8, %v6938_v57, %v5832_v35  ;;  %v5839_v42 = vmul.f32 %v6940_v22, %v5838_v8  ;;  %5993 = vst.msk [vmem:[%s11935_s8 + $0xd0] sm:$0xff] %vm158_vm0, %v5961_v33 }
 0xfed   :  { %v5895_v4 = vmul.f32 %v5836_v59, %v11683_v55 }
 0xfee   :  { %v5840_v3 = vmul.f32 0.5, %v5839_v42 }
 0xfef   :  { %v5929_v62 = vmul.f32 %v11789_v2, %v5895_v4 }
 0xff0   :  { %v5841_v51 = vsub.f32 1.5, %v5840_v3 }
 0xff1   :  { %v5963_v20 = vadd.f32 %v11800_v18, %v5929_v62 }
 0xff2   :  { %v5842_v53 = vmul.f32 %v6940_v22, %v5841_v51 }
 0xff3   :  { %5995 = vst.msk [vmem:[%s11935_s8 + $0xe0] sm:$0xff] %vm158_vm0, %v5963_v20 }
 0xff4   :  { %v5846_v55 = vsel %vm5845_vm11, %v6940_v22, %v5842_v53 }
 0xff5   :  { %v5896_v58 = vmul.f32 %v5846_v55, %v11690_v56 }
 0xff7   :  { %v5930_v25 = vmul.f32 %v11789_v2, %v5896_v58 }
 0xff9   :  { %v5964_v41 = vadd.f32 %v11800_v18, %v5930_v25 }
 0xffb   :  { %5996 = vst.msk [vmem:[%s11935_s8 + $0xe8] sm:$0xff] %vm158_vm0, %v5964_v41 }
0x101a   :  { %v5479_v19 = vpop.xlane.xlu2 %5478 }
0x101b   :  { %v5513_v11 = vmul.f32 %v5479_v19, %v10240_v48 }
0x101d   :  { %v5545_v17 = vadd.f32 1e-05, %v5513_v11 }
0x101f   :  { %6941 = vrsqrt.f32 %v5545_v17  ;;  %vm5853_vm13 = vweird.f32 %v5545_v17 }
0x1022   :  { %v5482_v49 = vpop.xlane.xlu0 %5481 }
0x1023   :  { %v5514_v30 = vmul.f32 %v5482_v49, %v10240_v48 }
0x1025   :  { %v6942_v9 = vpop.eup %6941  ;;  %v5546_v0 = vadd.f32 1e-05, %v5514_v30 }
0x1026   :  { %v5848_v56 = vmul.f32 %v6942_v9, %v5545_v17  ;;  %vm5854_vm12 = vweird.f32 %v6942_v9 }
0x1027   :  { %6943 = vrsqrt.f32 %v5546_v0  ;;  %vm5855_vm14 = vmor %vm5853_vm13, %vm5854_vm12  ;;  %vm5863_vm1 = vweird.f32 %v5546_v0 }
0x1028   :  { %v5849_v16 = vmul.f32 %v6942_v9, %v5848_v56 }
0x102a   :  { %v5850_v21 = vmul.f32 0.5, %v5849_v16 }
0x102c   :  { %v5851_v45 = vsub.f32 1.5, %v5850_v21 }
0x102d   :  { %v6944_v13 = vpop.eup %6943 }
0x102e   :  { %v5852_v10 = vmul.f32 %v6942_v9, %v5851_v45  ;;  %v5858_v50 = vmul.f32 %v6944_v13, %v5546_v0  ;;  %vm5864_vm15 = vweird.f32 %v6944_v13 }
0x102f   :  { %vm5865_vm2 = vmor %vm5863_vm1, %vm5864_vm15 }
0x1030   :  { %v5856_v43 = vsel %vm5855_vm14, %v6942_v9, %v5852_v10  ;;  %v5859_v31 = vmul.f32 %v6944_v13, %v5858_v50 }
0x1031   :  { %v5897_v29 = vmul.f32 %v5856_v43, %v11721_v1 }
0x1032   :  { %v5860_v26 = vmul.f32 0.5, %v5859_v31 }
0x1033   :  { %v5931_v48 = vmul.f32 %v11789_v2, %v5897_v29 }
0x1034   :  { %v5861_v6 = vsub.f32 1.5, %v5860_v26 }
0x1035   :  { %v5965_v44 = vadd.f32 %v11800_v18, %v5931_v48 }
0x1036   :  { %v5862_v36 = vmul.f32 %v6944_v13, %v5861_v6 }
0x1037   :  { %5997 = vst.msk [vmem:[%s11935_s8 + $0xf0] sm:$0xff] %vm158_vm0, %v5965_v44 }
0x1038   :  { %v5866_v23 = vsel %vm5865_vm2, %v6944_v13, %v5862_v36 }
0x1039   :  { %v5898_v37 = vmul.f32 %v5866_v23, %v11729_v60 }
0x103b   :  { %v5932_v1 = vmul.f32 %v11789_v2, %v5898_v37 }
0x103d   :  { %v5966_v12 = vadd.f32 %v11800_v18, %v5932_v1 }
0x103f   :  { %5998 = vst.msk [vmem:[%s11935_s8 + $0xf8] sm:$0xff] %vm158_vm0, %v5966_v12 }

</bundles_post_ra>
